<compile_context>
chip_gen: v6e
topology: v6e:2x2x1
jax: 0.10.0
libtpu: 0.0.40
codegen_flags: <defaults>
</compile_context>

<pallas_src>
import jax
import jax.numpy as jnp
from jax.experimental import pallas as pl
from jax.experimental.pallas import tpu as pltpu

# --- model hyperparameters (from the reference module) ---
VOCAB_SIZE = 65          # synthetic deterministic vocab (len(chars) stand-in)
VOCAB_PAD = 128          # lane-dense padded lm_head width
N_EMBEDDING_DIM = 48
NUM_HEADS = 3
HEAD_SIZE = N_EMBEDDING_DIM // NUM_HEADS   # 16
NUM_LAYER = 3
FF_DIM = 4 * N_EMBEDDING_DIM               # 192
BLOCK_SIZE = 256
LN_EPS = 1e-5
_NEG_INF = -1e30


def _layernorm(x, gamma, beta):
    mu = jnp.mean(x, axis=-1, keepdims=True)
    var = jnp.mean((x - mu) ** 2, axis=-1, keepdims=True)
    return (x - mu) * jax.lax.rsqrt(var + LN_EPS) * gamma + beta


def gpt_kernel(x_ref, wq_ref, wk_ref, wv_ref, wo_ref, bo_ref,
               ln1g_ref, ln1b_ref, ln2g_ref, ln2b_ref,
               w1_ref, b1_ref, w2_ref, b2_ref,
               wlm_ref, blm_ref, out_ref):
    x = x_ref[...]                       # (TB, T, D) activation tile
    TB, T, D = x.shape
    R = TB * T
    x2 = x.reshape(R, D)                 # fold batch into rows for dense matmuls

    # Additive causal mask, built once and reused across all layers/heads.
    row = jax.lax.broadcasted_iota(jnp.int32, (T, T), 0)
    col = jax.lax.broadcasted_iota(jnp.int32, (T, T), 1)
    bias = jnp.where(col <= row, 0.0, _NEG_INF).astype(jnp.float32)
    scale = float(N_EMBEDDING_DIM) ** -0.5   # reference scales by C, not head_size

    for l in range(NUM_LAYER):
        # --- self-attention sublayer ---
        n2 = _layernorm(x2, ln1g_ref[l], ln1b_ref[l])
        sa = jnp.zeros((R, D), jnp.float32)
        for h in range(NUM_HEADS):
            i = l * NUM_HEADS + h
            # per-head weights loaded right before use (bounded live ranges)
            qh = jnp.dot(n2, wq_ref[i], preferred_element_type=jnp.float32)
            kh = jnp.dot(n2, wk_ref[i], preferred_element_type=jnp.float32)
            vh = jnp.dot(n2, wv_ref[i], preferred_element_type=jnp.float32)
            qh = qh.reshape(TB, T, HEAD_SIZE)
            kh = kh.reshape(TB, T, HEAD_SIZE)
            vh = vh.reshape(TB, T, HEAD_SIZE)
            wei = jnp.einsum('bqh,bkh->bqk', qh, kh,
                             preferred_element_type=jnp.float32) * scale + bias
            wei = wei - jnp.max(wei, axis=-1, keepdims=True)
            wei = jnp.exp(wei)
            wei = wei / jnp.sum(wei, axis=-1, keepdims=True)
            oh = jnp.einsum('bqk,bkh->bqh', wei, vh,
                            preferred_element_type=jnp.float32)
            # summed per-head output projection == concat-then-project
            sa = sa + jnp.dot(oh.reshape(R, HEAD_SIZE), wo_ref[i],
                              preferred_element_type=jnp.float32)
        x2 = x2 + sa + bo_ref[l]

        # --- feed-forward sublayer ---
        n2 = _layernorm(x2, ln2g_ref[l], ln2b_ref[l])
        h1 = jnp.dot(n2, w1_ref[l], preferred_element_type=jnp.float32) + b1_ref[l]
        h1 = jnp.maximum(h1, 0.0)
        x2 = x2 + jnp.dot(h1, w2_ref[l], preferred_element_type=jnp.float32) + b2_ref[l]

    # lm_head on a lane-dense (128-wide, zero-padded) output
    logits = jnp.dot(x2, wlm_ref[...], preferred_element_type=jnp.float32) + blm_ref[...]
    out_ref[...] = logits.reshape(TB, T, VOCAB_PAD)


def bigram_forward(idx, params, tile_b=8):
    """idx: (B, T) int32 token ids.  Returns logits (B, T, VOCAB_SIZE) f32."""
    B, T = idx.shape
    D, V = N_EMBEDDING_DIM, VOCAB_SIZE

    # Batch tile: big enough to amortize per-grid-step overhead, but keep at
    # least 2 grid steps when possible so v7x's two TensorCores are both used.
    tb = max(1, min(tile_b, B))
    if B >= 2 and B // tb < 2:
        tb = max(1, B // 2)
    grid_b = -(-B // tb)
    Bp = grid_b * tb

    # Embedding lookups (glue, plain JAX gather).
    tok = jnp.take(params["tok_emb"], idx, axis=0)            # (B, T, D)
    pos = params["pos_emb"][:T]                               # (T, D)
    x = (tok + pos[None, :, :]).astype(jnp.float32)           # (B, T, D)
    if Bp != B:
        x = jnp.concatenate([x, jnp.zeros((Bp - B, T, D), jnp.float32)], axis=0)

    # Zero-pad lm_head to 128 lanes (wrapper slices the logits back).
    wlm = jnp.zeros((D, VOCAB_PAD), jnp.float32).at[:, :V].set(params["wlm"])
    blm = jnp.zeros((1, VOCAB_PAD), jnp.float32).at[:, :V].set(params["blm"])

    weight_args = (params["wq"], params["wk"], params["wv"], params["wo"],
                   params["bo"],
                   params["ln1_g"], params["ln1_b"],
                   params["ln2_g"], params["ln2_b"],
                   params["w1"], params["b1"], params["w2"], params["b2"],
                   wlm, blm)

    def full_spec(arr):
        zeros = (0,) * arr.ndim
        return pl.BlockSpec(arr.shape, lambda b, _z=zeros: _z)

    in_specs = [pl.BlockSpec((tb, T, D), lambda b: (b, 0, 0))]
    in_specs += [full_spec(a) for a in weight_args]

    out = pl.pallas_call(
        gpt_kernel,
        out_shape=jax.ShapeDtypeStruct((Bp, T, VOCAB_PAD), jnp.float32),
        grid_spec=pltpu.PrefetchScalarGridSpec(
            num_scalar_prefetch=0,
            grid=(grid_b,),
            in_specs=in_specs,
            out_specs=pl.BlockSpec((tb, T, VOCAB_PAD), lambda b: (b, 0, 0)),
        ),
        compiler_params=pltpu.CompilerParams(
            dimension_semantics=("parallel",)),
    )(x, *weight_args)
    return out[:B, :, :V]


def bigram_forward_ref(idx, params):
    """Pure-JAX reference for correctness checking (matches PyTorch forward)."""
    B, T = idx.shape
    tok = jnp.take(params["tok_emb"], idx, axis=0)
    x = tok + params["pos_emb"][:T][None]
    causal = jnp.arange(T)[None, :] <= jnp.arange(T)[:, None]
    scale = float(N_EMBEDDING_DIM) ** -0.5

    def ln(x, g, b):
        mu = x.mean(-1, keepdims=True)
        var = ((x - mu) ** 2).mean(-1, keepdims=True)
        return (x - mu) / jnp.sqrt(var + LN_EPS) * g + b

    for l in range(NUM_LAYER):
        n = ln(x, params["ln1_g"][l, 0], params["ln1_b"][l, 0])
        sa = jnp.zeros_like(x)
        for h in range(NUM_HEADS):
            i = l * NUM_HEADS + h
            q = n @ params["wq"][i]
            k = n @ params["wk"][i]
            v = n @ params["wv"][i]
            wei = (q @ jnp.swapaxes(k, -1, -2)) * scale
            wei = jnp.where(causal, wei, -jnp.inf)
            wei = jax.nn.softmax(wei, axis=-1)
            sa = sa + (wei @ v) @ params["wo"][i]
        x = x + sa + params["bo"][l, 0]
        n = ln(x, params["ln2_g"][l, 0], params["ln2_b"][l, 0])
        x = x + jax.nn.relu(n @ params["w1"][l] + params["b1"][l, 0]) @ params["w2"][l] + params["b2"][l, 0]
    # ln_f exists in the module but is never used in forward()
    return x @ params["wlm"] + params["blm"][0]


def init_params(key):
    ks = jax.random.split(key, 16)
    D, V, L, H, HS, F = (N_EMBEDDING_DIM, VOCAB_SIZE, NUM_LAYER,
                         NUM_HEADS, HEAD_SIZE, FF_DIM)
    s = 0.02
    ones = jnp.ones((L, 1, D), jnp.float32)
    zeros = jnp.zeros((L, 1, D), jnp.float32)
    return {
        "tok_emb": jax.random.normal(ks[0], (V, D), jnp.float32) * s,
        "pos_emb": jax.random.normal(ks[1], (BLOCK_SIZE, D), jnp.float32) * s,
        # per-head projection weights, flattened over (layer, head)
        "wq": jax.random.normal(ks[2], (L * H, D, HS), jnp.float32) * s,
        "wk": jax.random.normal(ks[3], (L * H, D, HS), jnp.float32) * s,
        "wv": jax.random.normal(ks[4], (L * H, D, HS), jnp.float32) * s,
        "wo": jax.random.normal(ks[5], (L * H, HS, D), jnp.float32) * s,
        "bo": jax.random.normal(ks[6], (L, 1, D), jnp.float32) * s,
        "ln1_g": ones, "ln1_b": zeros,
        "ln2_g": ones, "ln2_b": zeros,
        "w1": jax.random.normal(ks[7], (L, D, F), jnp.float32) * s,
        "b1": jax.random.normal(ks[8], (L, 1, F), jnp.float32) * s,
        "w2": jax.random.normal(ks[9], (L, F, D), jnp.float32) * s,
        "b2": jax.random.normal(ks[10], (L, 1, D), jnp.float32) * s,
        # ln_f is defined in the reference module but unused in forward()
        "lnf_g": jnp.ones((1, D), jnp.float32),
        "lnf_b": jnp.zeros((1, D), jnp.float32),
        "wlm": jax.random.normal(ks[11], (D, V), jnp.float32) * s,
        "blm": jax.random.normal(ks[12], (1, V), jnp.float32) * s,
    }


if __name__ == "__main__":
    key = jax.random.PRNGKey(0)
    pkey, ikey = jax.random.split(key)
    params = init_params(pkey)

    B, T = 8, 16   # small shapes; T multiple of 8 keeps in-kernel reshapes tile-aligned
    idx = jax.random.randint(ikey, (B, T), 0, VOCAB_SIZE, dtype=jnp.int32)

    logits = bigram_forward(idx, params)
    logits = jax.block_until_ready(logits)

    assert logits.shape == (B, T, VOCAB_SIZE), logits.shape
    assert bool(jnp.all(jnp.isfinite(logits)))

    ref = bigram_forward_ref(idx, params)
    assert bool(jnp.allclose(logits, ref, rtol=1e-4, atol=1e-5)), \
        float(jnp.max(jnp.abs(logits - ref)))

    print("KERNEL_OK")
</pallas_src>

<mosaic_0001>
module attributes {stable_mosaic.version = 11 : i64} {
  func.func @gpt_kernel(%arg0: i32, %arg1: memref<4x16x48xf32, #tpu.memory_space<vmem>>, %arg2: memref<9x48x16xf32, #tpu.memory_space<vmem>>, %arg3: memref<9x48x16xf32, #tpu.memory_space<vmem>>, %arg4: memref<9x48x16xf32, #tpu.memory_space<vmem>>, %arg5: memref<9x16x48xf32, #tpu.memory_space<vmem>>, %arg6: memref<3x1x48xf32, #tpu.memory_space<vmem>>, %arg7: memref<3x1x48xf32, #tpu.memory_space<vmem>>, %arg8: memref<3x1x48xf32, #tpu.memory_space<vmem>>, %arg9: memref<3x1x48xf32, #tpu.memory_space<vmem>>, %arg10: memref<3x1x48xf32, #tpu.memory_space<vmem>>, %arg11: memref<3x48x192xf32, #tpu.memory_space<vmem>>, %arg12: memref<3x1x192xf32, #tpu.memory_space<vmem>>, %arg13: memref<3x192x48xf32, #tpu.memory_space<vmem>>, %arg14: memref<3x1x48xf32, #tpu.memory_space<vmem>>, %arg15: memref<48x128xf32, #tpu.memory_space<vmem>>, %arg16: memref<1x128xf32, #tpu.memory_space<vmem>>, %arg17: memref<4x16x128xf32, #tpu.memory_space<vmem>>) attributes {dimension_semantics = [#tpu.dimension_semantics<parallel>], iteration_bounds = array<i64: 2>, scalar_prefetch = 0 : i64, scratch_operands = 0 : i64, tpu.core_type = #tpu.core_type<tc>, window_params = [{transform_indices = @transform_0, window_bounds = array<i64: 4, 16, 48>}, {pipeline_mode = #tpu.pipeline_mode<synchronous>, transform_indices = @transform_1, window_bounds = array<i64: 9, 48, 16>}, {pipeline_mode = #tpu.pipeline_mode<synchronous>, transform_indices = @transform_2, window_bounds = array<i64: 9, 48, 16>}, {pipeline_mode = #tpu.pipeline_mode<synchronous>, transform_indices = @transform_3, window_bounds = array<i64: 9, 48, 16>}, {pipeline_mode = #tpu.pipeline_mode<synchronous>, transform_indices = @transform_4, window_bounds = array<i64: 9, 16, 48>}, {pipeline_mode = #tpu.pipeline_mode<synchronous>, transform_indices = @transform_5, window_bounds = array<i64: 3, 1, 48>}, {pipeline_mode = #tpu.pipeline_mode<synchronous>, transform_indices = @transform_6, window_bounds = array<i64: 3, 1, 48>}, {pipeline_mode = #tpu.pipeline_mode<synchronous>, transform_indices = @transform_7, window_bounds = array<i64: 3, 1, 48>}, {pipeline_mode = #tpu.pipeline_mode<synchronous>, transform_indices = @transform_8, window_bounds = array<i64: 3, 1, 48>}, {pipeline_mode = #tpu.pipeline_mode<synchronous>, transform_indices = @transform_9, window_bounds = array<i64: 3, 1, 48>}, {pipeline_mode = #tpu.pipeline_mode<synchronous>, transform_indices = @transform_10, window_bounds = array<i64: 3, 48, 192>}, {pipeline_mode = #tpu.pipeline_mode<synchronous>, transform_indices = @transform_11, window_bounds = array<i64: 3, 1, 192>}, {pipeline_mode = #tpu.pipeline_mode<synchronous>, transform_indices = @transform_12, window_bounds = array<i64: 3, 192, 48>}, {pipeline_mode = #tpu.pipeline_mode<synchronous>, transform_indices = @transform_13, window_bounds = array<i64: 3, 1, 48>}, {pipeline_mode = #tpu.pipeline_mode<synchronous>, transform_indices = @transform_14, window_bounds = array<i64: 48, 128>}, {pipeline_mode = #tpu.pipeline_mode<synchronous>, transform_indices = @transform_15, window_bounds = array<i64: 1, 128>}, {transform_indices = @transform_16, window_bounds = array<i64: 4, 16, 128>}]} {
    %c0 = arith.constant 0 : index
    %c0_0 = arith.constant 0 : index
    %c0_1 = arith.constant 0 : index
    %0 = vector.load %arg1[%c0, %c0_0, %c0_1] : memref<4x16x48xf32, #tpu.memory_space<vmem>>, vector<4x16x48xf32>
    %1 = vector.shape_cast %0 : vector<4x16x48xf32> to vector<64x48xf32>
    %2 = tpu.iota {dimensions = array<i32: 0>} : vector<16x16xi32>
    %3 = tpu.iota {dimensions = array<i32: 1>} : vector<16x16xi32>
    %4 = arith.cmpi sle, %3, %2 : vector<16x16xi32>
    %cst = arith.constant 0.000000e+00 : f32
    %cst_2 = arith.constant -1.000000e+30 : f32
    %5 = vector.broadcast %cst : f32 to vector<16x16xf32>
    %6 = vector.broadcast %cst_2 : f32 to vector<16x16xf32>
    %7 = arith.select %4, %5, %6 : vector<16x16xi1>, vector<16x16xf32>
    %c0_3 = arith.constant 0 : index
    %c0_4 = arith.constant 0 : index
    %c0_5 = arith.constant 0 : index
    %8 = vector.load %arg7[%c0_3, %c0_4, %c0_5] : memref<3x1x48xf32, #tpu.memory_space<vmem>>, vector<1x1x48xf32>
    %9 = vector.shape_cast %8 : vector<1x1x48xf32> to vector<1x48xf32>
    %c0_6 = arith.constant 0 : index
    %c0_7 = arith.constant 0 : index
    %c0_8 = arith.constant 0 : index
    %10 = vector.load %arg8[%c0_6, %c0_7, %c0_8] : memref<3x1x48xf32, #tpu.memory_space<vmem>>, vector<1x1x48xf32>
    %11 = vector.shape_cast %10 : vector<1x1x48xf32> to vector<1x48xf32>
    %cst_9 = arith.constant dense<0.000000e+00> : vector<64xf32>
    %12 = vector.multi_reduction <add>, %1, %cst_9 [1] : vector<64x48xf32> to vector<64xf32>
    %13 = vector.shape_cast %12 : vector<64xf32> to vector<64x1xf32>
    %cst_10 = arith.constant 4.800000e+01 : f32
    %14 = vector.broadcast %cst_10 : f32 to vector<64x1xf32>
    %15 = arith.divf %13, %14 : vector<64x1xf32>
    %16 = vector.broadcast %15 : vector<64x1xf32> to vector<64x48xf32>
    %17 = arith.subf %1, %16 : vector<64x48xf32>
    %18 = arith.mulf %17, %17 : vector<64x48xf32>
    %cst_11 = arith.constant dense<0.000000e+00> : vector<64xf32>
    %19 = vector.multi_reduction <add>, %18, %cst_11 [1] : vector<64x48xf32> to vector<64xf32>
    %20 = vector.shape_cast %19 : vector<64xf32> to vector<64x1xf32>
    %cst_12 = arith.constant 4.800000e+01 : f32
    %21 = vector.broadcast %cst_12 : f32 to vector<64x1xf32>
    %22 = arith.divf %20, %21 : vector<64x1xf32>
    %23 = vector.broadcast %15 : vector<64x1xf32> to vector<64x48xf32>
    %24 = arith.subf %1, %23 : vector<64x48xf32>
    %cst_13 = arith.constant 9.99999974E-6 : f32
    %25 = vector.broadcast %cst_13 : f32 to vector<64x1xf32>
    %26 = arith.addf %22, %25 : vector<64x1xf32>
    %27 = math.rsqrt %26 : vector<64x1xf32>
    %28 = vector.broadcast %27 : vector<64x1xf32> to vector<64x48xf32>
    %29 = arith.mulf %24, %28 : vector<64x48xf32>
    %30 = vector.broadcast %9 : vector<1x48xf32> to vector<64x48xf32>
    %31 = arith.mulf %29, %30 : vector<64x48xf32>
    %32 = vector.broadcast %11 : vector<1x48xf32> to vector<64x48xf32>
    %33 = arith.addf %31, %32 : vector<64x48xf32>
    %cst_14 = arith.constant 0.000000e+00 : f32
    %34 = vector.broadcast %cst_14 : f32 to vector<64x48xf32>
    %c0_15 = arith.constant 0 : index
    %c0_16 = arith.constant 0 : index
    %c0_17 = arith.constant 0 : index
    %35 = vector.load %arg2[%c0_15, %c0_16, %c0_17] : memref<9x48x16xf32, #tpu.memory_space<vmem>>, vector<1x48x16xf32>
    %36 = vector.shape_cast %35 : vector<1x48x16xf32> to vector<48x16xf32>
    %cst_18 = arith.constant dense<0.000000e+00> : vector<64x16xf32>
    %37 = tpu.matmul %33, %36, %cst_18 {dimension_numbers = #tpu.dot_dimension_numbers<[1], [0], [0], [1], [0, 0, 1, 1], [], []>} : vector<64x48xf32>, vector<48x16xf32>, vector<64x16xf32> -> vector<64x16xf32>
    %c0_19 = arith.constant 0 : index
    %c0_20 = arith.constant 0 : index
    %c0_21 = arith.constant 0 : index
    %38 = vector.load %arg3[%c0_19, %c0_20, %c0_21] : memref<9x48x16xf32, #tpu.memory_space<vmem>>, vector<1x48x16xf32>
    %39 = vector.shape_cast %38 : vector<1x48x16xf32> to vector<48x16xf32>
    %cst_22 = arith.constant dense<0.000000e+00> : vector<64x16xf32>
    %40 = tpu.matmul %33, %39, %cst_22 {dimension_numbers = #tpu.dot_dimension_numbers<[1], [0], [0], [1], [0, 0, 1, 1], [], []>} : vector<64x48xf32>, vector<48x16xf32>, vector<64x16xf32> -> vector<64x16xf32>
    %c0_23 = arith.constant 0 : index
    %c0_24 = arith.constant 0 : index
    %c0_25 = arith.constant 0 : index
    %41 = vector.load %arg4[%c0_23, %c0_24, %c0_25] : memref<9x48x16xf32, #tpu.memory_space<vmem>>, vector<1x48x16xf32>
    %42 = vector.shape_cast %41 : vector<1x48x16xf32> to vector<48x16xf32>
    %cst_26 = arith.constant dense<0.000000e+00> : vector<64x16xf32>
    %43 = tpu.matmul %33, %42, %cst_26 {dimension_numbers = #tpu.dot_dimension_numbers<[1], [0], [0], [1], [0, 0, 1, 1], [], []>} : vector<64x48xf32>, vector<48x16xf32>, vector<64x16xf32> -> vector<64x16xf32>
    %44 = vector.shape_cast %37 : vector<64x16xf32> to vector<4x16x16xf32>
    %45 = vector.shape_cast %40 : vector<64x16xf32> to vector<4x16x16xf32>
    %46 = vector.shape_cast %43 : vector<64x16xf32> to vector<4x16x16xf32>
    "tpu.trace_start"() <{level = 10 : i32, message = "bqh,bkh->bqk"}> : () -> ()
    %cst_27 = arith.constant dense<0.000000e+00> : vector<4x16x16xf32>
    %47 = tpu.matmul %44, %45, %cst_27 {dimension_numbers = #tpu.dot_dimension_numbers<[2], [2], [1], [1], [0, 0, 0, 1, 1, 1], [0], [0]>} : vector<4x16x16xf32>, vector<4x16x16xf32>, vector<4x16x16xf32> -> vector<4x16x16xf32>
    "tpu.trace_stop"() : () -> ()
    %cst_28 = arith.constant 0.144337565 : f32
    %48 = vector.broadcast %cst_28 : f32 to vector<4x16x16xf32>
    %49 = arith.mulf %47, %48 : vector<4x16x16xf32>
    %50 = vector.shape_cast %7 : vector<16x16xf32> to vector<1x16x16xf32>
    %51 = vector.broadcast %50 : vector<1x16x16xf32> to vector<4x16x16xf32>
    %52 = arith.addf %49, %51 : vector<4x16x16xf32>
    %cst_29 = arith.constant dense<0xFF800000> : vector<4x16xf32>
    %53 = vector.multi_reduction <maximumf>, %52, %cst_29 [2] : vector<4x16x16xf32> to vector<4x16xf32>
    %54 = vector.shape_cast %53 : vector<4x16xf32> to vector<4x16x1xf32>
    %55 = vector.broadcast %54 : vector<4x16x1xf32> to vector<4x16x16xf32>
    %56 = arith.subf %52, %55 : vector<4x16x16xf32>
    %57 = math.exp %56 : vector<4x16x16xf32>
    %cst_30 = arith.constant dense<0.000000e+00> : vector<4x16xf32>
    %58 = vector.multi_reduction <add>, %57, %cst_30 [2] : vector<4x16x16xf32> to vector<4x16xf32>
    %59 = vector.shape_cast %58 : vector<4x16xf32> to vector<4x16x1xf32>
    %60 = vector.broadcast %59 : vector<4x16x1xf32> to vector<4x16x16xf32>
    %61 = arith.divf %57, %60 : vector<4x16x16xf32>
    "tpu.trace_start"() <{level = 10 : i32, message = "bqk,bkh->bqh"}> : () -> ()
    %cst_31 = arith.constant dense<0.000000e+00> : vector<4x16x16xf32>
    %62 = tpu.matmul %61, %46, %cst_31 {dimension_numbers = #tpu.dot_dimension_numbers<[2], [1], [1], [2], [0, 0, 0, 1, 1, 2], [0], [0]>} : vector<4x16x16xf32>, vector<4x16x16xf32>, vector<4x16x16xf32> -> vector<4x16x16xf32>
    "tpu.trace_stop"() : () -> ()
    %63 = vector.shape_cast %62 : vector<4x16x16xf32> to vector<64x16xf32>
    %c0_32 = arith.constant 0 : index
    %c0_33 = arith.constant 0 : index
    %c0_34 = arith.constant 0 : index
    %64 = vector.load %arg5[%c0_32, %c0_33, %c0_34] : memref<9x16x48xf32, #tpu.memory_space<vmem>>, vector<1x16x48xf32>
    %65 = vector.shape_cast %64 : vector<1x16x48xf32> to vector<16x48xf32>
    %cst_35 = arith.constant dense<0.000000e+00> : vector<64x48xf32>
    %66 = tpu.matmul %63, %65, %cst_35 {dimension_numbers = #tpu.dot_dimension_numbers<[1], [0], [0], [1], [0, 0, 1, 1], [], []>} : vector<64x16xf32>, vector<16x48xf32>, vector<64x48xf32> -> vector<64x48xf32>
    %67 = arith.addf %34, %66 : vector<64x48xf32>
    %c1 = arith.constant 1 : index
    %c0_36 = arith.constant 0 : index
    %c0_37 = arith.constant 0 : index
    %68 = vector.load %arg2[%c1, %c0_36, %c0_37] : memref<9x48x16xf32, #tpu.memory_space<vmem>>, vector<1x48x16xf32>
    %69 = vector.shape_cast %68 : vector<1x48x16xf32> to vector<48x16xf32>
    %cst_38 = arith.constant dense<0.000000e+00> : vector<64x16xf32>
    %70 = tpu.matmul %33, %69, %cst_38 {dimension_numbers = #tpu.dot_dimension_numbers<[1], [0], [0], [1], [0, 0, 1, 1], [], []>} : vector<64x48xf32>, vector<48x16xf32>, vector<64x16xf32> -> vector<64x16xf32>
    %c1_39 = arith.constant 1 : index
    %c0_40 = arith.constant 0 : index
    %c0_41 = arith.constant 0 : index
    %71 = vector.load %arg3[%c1_39, %c0_40, %c0_41] : memref<9x48x16xf32, #tpu.memory_space<vmem>>, vector<1x48x16xf32>
    %72 = vector.shape_cast %71 : vector<1x48x16xf32> to vector<48x16xf32>
    %cst_42 = arith.constant dense<0.000000e+00> : vector<64x16xf32>
    %73 = tpu.matmul %33, %72, %cst_42 {dimension_numbers = #tpu.dot_dimension_numbers<[1], [0], [0], [1], [0, 0, 1, 1], [], []>} : vector<64x48xf32>, vector<48x16xf32>, vector<64x16xf32> -> vector<64x16xf32>
    %c1_43 = arith.constant 1 : index
    %c0_44 = arith.constant 0 : index
    %c0_45 = arith.constant 0 : index
    %74 = vector.load %arg4[%c1_43, %c0_44, %c0_45] : memref<9x48x16xf32, #tpu.memory_space<vmem>>, vector<1x48x16xf32>
    %75 = vector.shape_cast %74 : vector<1x48x16xf32> to vector<48x16xf32>
    %cst_46 = arith.constant dense<0.000000e+00> : vector<64x16xf32>
    %76 = tpu.matmul %33, %75, %cst_46 {dimension_numbers = #tpu.dot_dimension_numbers<[1], [0], [0], [1], [0, 0, 1, 1], [], []>} : vector<64x48xf32>, vector<48x16xf32>, vector<64x16xf32> -> vector<64x16xf32>
    %77 = vector.shape_cast %70 : vector<64x16xf32> to vector<4x16x16xf32>
    %78 = vector.shape_cast %73 : vector<64x16xf32> to vector<4x16x16xf32>
    %79 = vector.shape_cast %76 : vector<64x16xf32> to vector<4x16x16xf32>
    "tpu.trace_start"() <{level = 10 : i32, message = "bqh,bkh->bqk"}> : () -> ()
    %cst_47 = arith.constant dense<0.000000e+00> : vector<4x16x16xf32>
    %80 = tpu.matmul %77, %78, %cst_47 {dimension_numbers = #tpu.dot_dimension_numbers<[2], [2], [1], [1], [0, 0, 0, 1, 1, 1], [0], [0]>} : vector<4x16x16xf32>, vector<4x16x16xf32>, vector<4x16x16xf32> -> vector<4x16x16xf32>
    "tpu.trace_stop"() : () -> ()
    %cst_48 = arith.constant 0.144337565 : f32
    %81 = vector.broadcast %cst_48 : f32 to vector<4x16x16xf32>
    %82 = arith.mulf %80, %81 : vector<4x16x16xf32>
    %83 = vector.shape_cast %7 : vector<16x16xf32> to vector<1x16x16xf32>
    %84 = vector.broadcast %83 : vector<1x16x16xf32> to vector<4x16x16xf32>
    %85 = arith.addf %82, %84 : vector<4x16x16xf32>
    %cst_49 = arith.constant dense<0xFF800000> : vector<4x16xf32>
    %86 = vector.multi_reduction <maximumf>, %85, %cst_49 [2] : vector<4x16x16xf32> to vector<4x16xf32>
    %87 = vector.shape_cast %86 : vector<4x16xf32> to vector<4x16x1xf32>
    %88 = vector.broadcast %87 : vector<4x16x1xf32> to vector<4x16x16xf32>
    %89 = arith.subf %85, %88 : vector<4x16x16xf32>
    %90 = math.exp %89 : vector<4x16x16xf32>
    %cst_50 = arith.constant dense<0.000000e+00> : vector<4x16xf32>
    %91 = vector.multi_reduction <add>, %90, %cst_50 [2] : vector<4x16x16xf32> to vector<4x16xf32>
    %92 = vector.shape_cast %91 : vector<4x16xf32> to vector<4x16x1xf32>
    %93 = vector.broadcast %92 : vector<4x16x1xf32> to vector<4x16x16xf32>
    %94 = arith.divf %90, %93 : vector<4x16x16xf32>
    "tpu.trace_start"() <{level = 10 : i32, message = "bqk,bkh->bqh"}> : () -> ()
    %cst_51 = arith.constant dense<0.000000e+00> : vector<4x16x16xf32>
    %95 = tpu.matmul %94, %79, %cst_51 {dimension_numbers = #tpu.dot_dimension_numbers<[2], [1], [1], [2], [0, 0, 0, 1, 1, 2], [0], [0]>} : vector<4x16x16xf32>, vector<4x16x16xf32>, vector<4x16x16xf32> -> vector<4x16x16xf32>
    "tpu.trace_stop"() : () -> ()
    %96 = vector.shape_cast %95 : vector<4x16x16xf32> to vector<64x16xf32>
    %c1_52 = arith.constant 1 : index
    %c0_53 = arith.constant 0 : index
    %c0_54 = arith.constant 0 : index
    %97 = vector.load %arg5[%c1_52, %c0_53, %c0_54] : memref<9x16x48xf32, #tpu.memory_space<vmem>>, vector<1x16x48xf32>
    %98 = vector.shape_cast %97 : vector<1x16x48xf32> to vector<16x48xf32>
    %cst_55 = arith.constant dense<0.000000e+00> : vector<64x48xf32>
    %99 = tpu.matmul %96, %98, %cst_55 {dimension_numbers = #tpu.dot_dimension_numbers<[1], [0], [0], [1], [0, 0, 1, 1], [], []>} : vector<64x16xf32>, vector<16x48xf32>, vector<64x48xf32> -> vector<64x48xf32>
    %100 = arith.addf %67, %99 : vector<64x48xf32>
    %c2 = arith.constant 2 : index
    %c0_56 = arith.constant 0 : index
    %c0_57 = arith.constant 0 : index
    %101 = vector.load %arg2[%c2, %c0_56, %c0_57] : memref<9x48x16xf32, #tpu.memory_space<vmem>>, vector<1x48x16xf32>
    %102 = vector.shape_cast %101 : vector<1x48x16xf32> to vector<48x16xf32>
    %cst_58 = arith.constant dense<0.000000e+00> : vector<64x16xf32>
    %103 = tpu.matmul %33, %102, %cst_58 {dimension_numbers = #tpu.dot_dimension_numbers<[1], [0], [0], [1], [0, 0, 1, 1], [], []>} : vector<64x48xf32>, vector<48x16xf32>, vector<64x16xf32> -> vector<64x16xf32>
    %c2_59 = arith.constant 2 : index
    %c0_60 = arith.constant 0 : index
    %c0_61 = arith.constant 0 : index
    %104 = vector.load %arg3[%c2_59, %c0_60, %c0_61] : memref<9x48x16xf32, #tpu.memory_space<vmem>>, vector<1x48x16xf32>
    %105 = vector.shape_cast %104 : vector<1x48x16xf32> to vector<48x16xf32>
    %cst_62 = arith.constant dense<0.000000e+00> : vector<64x16xf32>
    %106 = tpu.matmul %33, %105, %cst_62 {dimension_numbers = #tpu.dot_dimension_numbers<[1], [0], [0], [1], [0, 0, 1, 1], [], []>} : vector<64x48xf32>, vector<48x16xf32>, vector<64x16xf32> -> vector<64x16xf32>
    %c2_63 = arith.constant 2 : index
    %c0_64 = arith.constant 0 : index
    %c0_65 = arith.constant 0 : index
    %107 = vector.load %arg4[%c2_63, %c0_64, %c0_65] : memref<9x48x16xf32, #tpu.memory_space<vmem>>, vector<1x48x16xf32>
    %108 = vector.shape_cast %107 : vector<1x48x16xf32> to vector<48x16xf32>
    %cst_66 = arith.constant dense<0.000000e+00> : vector<64x16xf32>
    %109 = tpu.matmul %33, %108, %cst_66 {dimension_numbers = #tpu.dot_dimension_numbers<[1], [0], [0], [1], [0, 0, 1, 1], [], []>} : vector<64x48xf32>, vector<48x16xf32>, vector<64x16xf32> -> vector<64x16xf32>
    %110 = vector.shape_cast %103 : vector<64x16xf32> to vector<4x16x16xf32>
    %111 = vector.shape_cast %106 : vector<64x16xf32> to vector<4x16x16xf32>
    %112 = vector.shape_cast %109 : vector<64x16xf32> to vector<4x16x16xf32>
    "tpu.trace_start"() <{level = 10 : i32, message = "bqh,bkh->bqk"}> : () -> ()
    %cst_67 = arith.constant dense<0.000000e+00> : vector<4x16x16xf32>
    %113 = tpu.matmul %110, %111, %cst_67 {dimension_numbers = #tpu.dot_dimension_numbers<[2], [2], [1], [1], [0, 0, 0, 1, 1, 1], [0], [0]>} : vector<4x16x16xf32>, vector<4x16x16xf32>, vector<4x16x16xf32> -> vector<4x16x16xf32>
    "tpu.trace_stop"() : () -> ()
    %cst_68 = arith.constant 0.144337565 : f32
    %114 = vector.broadcast %cst_68 : f32 to vector<4x16x16xf32>
    %115 = arith.mulf %113, %114 : vector<4x16x16xf32>
    %116 = vector.shape_cast %7 : vector<16x16xf32> to vector<1x16x16xf32>
    %117 = vector.broadcast %116 : vector<1x16x16xf32> to vector<4x16x16xf32>
    %118 = arith.addf %115, %117 : vector<4x16x16xf32>
    %cst_69 = arith.constant dense<0xFF800000> : vector<4x16xf32>
    %119 = vector.multi_reduction <maximumf>, %118, %cst_69 [2] : vector<4x16x16xf32> to vector<4x16xf32>
    %120 = vector.shape_cast %119 : vector<4x16xf32> to vector<4x16x1xf32>
    %121 = vector.broadcast %120 : vector<4x16x1xf32> to vector<4x16x16xf32>
    %122 = arith.subf %118, %121 : vector<4x16x16xf32>
    %123 = math.exp %122 : vector<4x16x16xf32>
    %cst_70 = arith.constant dense<0.000000e+00> : vector<4x16xf32>
    %124 = vector.multi_reduction <add>, %123, %cst_70 [2] : vector<4x16x16xf32> to vector<4x16xf32>
    %125 = vector.shape_cast %124 : vector<4x16xf32> to vector<4x16x1xf32>
    %126 = vector.broadcast %125 : vector<4x16x1xf32> to vector<4x16x16xf32>
    %127 = arith.divf %123, %126 : vector<4x16x16xf32>
    "tpu.trace_start"() <{level = 10 : i32, message = "bqk,bkh->bqh"}> : () -> ()
    %cst_71 = arith.constant dense<0.000000e+00> : vector<4x16x16xf32>
    %128 = tpu.matmul %127, %112, %cst_71 {dimension_numbers = #tpu.dot_dimension_numbers<[2], [1], [1], [2], [0, 0, 0, 1, 1, 2], [0], [0]>} : vector<4x16x16xf32>, vector<4x16x16xf32>, vector<4x16x16xf32> -> vector<4x16x16xf32>
    "tpu.trace_stop"() : () -> ()
    %129 = vector.shape_cast %128 : vector<4x16x16xf32> to vector<64x16xf32>
    %c2_72 = arith.constant 2 : index
    %c0_73 = arith.constant 0 : index
    %c0_74 = arith.constant 0 : index
    %130 = vector.load %arg5[%c2_72, %c0_73, %c0_74] : memref<9x16x48xf32, #tpu.memory_space<vmem>>, vector<1x16x48xf32>
    %131 = vector.shape_cast %130 : vector<1x16x48xf32> to vector<16x48xf32>
    %cst_75 = arith.constant dense<0.000000e+00> : vector<64x48xf32>
    %132 = tpu.matmul %129, %131, %cst_75 {dimension_numbers = #tpu.dot_dimension_numbers<[1], [0], [0], [1], [0, 0, 1, 1], [], []>} : vector<64x16xf32>, vector<16x48xf32>, vector<64x48xf32> -> vector<64x48xf32>
    %133 = arith.addf %100, %132 : vector<64x48xf32>
    %134 = arith.addf %1, %133 : vector<64x48xf32>
    %c0_76 = arith.constant 0 : index
    %c0_77 = arith.constant 0 : index
    %c0_78 = arith.constant 0 : index
    %135 = vector.load %arg6[%c0_76, %c0_77, %c0_78] : memref<3x1x48xf32, #tpu.memory_space<vmem>>, vector<1x1x48xf32>
    %136 = vector.shape_cast %135 : vector<1x1x48xf32> to vector<1x48xf32>
    %137 = vector.broadcast %136 : vector<1x48xf32> to vector<64x48xf32>
    %138 = arith.addf %134, %137 : vector<64x48xf32>
    %c0_79 = arith.constant 0 : index
    %c0_80 = arith.constant 0 : index
    %c0_81 = arith.constant 0 : index
    %139 = vector.load %arg9[%c0_79, %c0_80, %c0_81] : memref<3x1x48xf32, #tpu.memory_space<vmem>>, vector<1x1x48xf32>
    %140 = vector.shape_cast %139 : vector<1x1x48xf32> to vector<1x48xf32>
    %c0_82 = arith.constant 0 : index
    %c0_83 = arith.constant 0 : index
    %c0_84 = arith.constant 0 : index
    %141 = vector.load %arg10[%c0_82, %c0_83, %c0_84] : memref<3x1x48xf32, #tpu.memory_space<vmem>>, vector<1x1x48xf32>
    %142 = vector.shape_cast %141 : vector<1x1x48xf32> to vector<1x48xf32>
    %cst_85 = arith.constant dense<0.000000e+00> : vector<64xf32>
    %143 = vector.multi_reduction <add>, %138, %cst_85 [1] : vector<64x48xf32> to vector<64xf32>
    %144 = vector.shape_cast %143 : vector<64xf32> to vector<64x1xf32>
    %cst_86 = arith.constant 4.800000e+01 : f32
    %145 = vector.broadcast %cst_86 : f32 to vector<64x1xf32>
    %146 = arith.divf %144, %145 : vector<64x1xf32>
    %147 = vector.broadcast %146 : vector<64x1xf32> to vector<64x48xf32>
    %148 = arith.subf %138, %147 : vector<64x48xf32>
    %149 = arith.mulf %148, %148 : vector<64x48xf32>
    %cst_87 = arith.constant dense<0.000000e+00> : vector<64xf32>
    %150 = vector.multi_reduction <add>, %149, %cst_87 [1] : vector<64x48xf32> to vector<64xf32>
    %151 = vector.shape_cast %150 : vector<64xf32> to vector<64x1xf32>
    %cst_88 = arith.constant 4.800000e+01 : f32
    %152 = vector.broadcast %cst_88 : f32 to vector<64x1xf32>
    %153 = arith.divf %151, %152 : vector<64x1xf32>
    %154 = vector.broadcast %146 : vector<64x1xf32> to vector<64x48xf32>
    %155 = arith.subf %138, %154 : vector<64x48xf32>
    %cst_89 = arith.constant 9.99999974E-6 : f32
    %156 = vector.broadcast %cst_89 : f32 to vector<64x1xf32>
    %157 = arith.addf %153, %156 : vector<64x1xf32>
    %158 = math.rsqrt %157 : vector<64x1xf32>
    %159 = vector.broadcast %158 : vector<64x1xf32> to vector<64x48xf32>
    %160 = arith.mulf %155, %159 : vector<64x48xf32>
    %161 = vector.broadcast %140 : vector<1x48xf32> to vector<64x48xf32>
    %162 = arith.mulf %160, %161 : vector<64x48xf32>
    %163 = vector.broadcast %142 : vector<1x48xf32> to vector<64x48xf32>
    %164 = arith.addf %162, %163 : vector<64x48xf32>
    %c0_90 = arith.constant 0 : index
    %c0_91 = arith.constant 0 : index
    %c0_92 = arith.constant 0 : index
    %165 = vector.load %arg11[%c0_90, %c0_91, %c0_92] : memref<3x48x192xf32, #tpu.memory_space<vmem>>, vector<1x48x192xf32>
    %166 = vector.shape_cast %165 : vector<1x48x192xf32> to vector<48x192xf32>
    %cst_93 = arith.constant dense<0.000000e+00> : vector<64x192xf32>
    %167 = tpu.matmul %164, %166, %cst_93 {dimension_numbers = #tpu.dot_dimension_numbers<[1], [0], [0], [1], [0, 0, 1, 1], [], []>} : vector<64x48xf32>, vector<48x192xf32>, vector<64x192xf32> -> vector<64x192xf32>
    %c0_94 = arith.constant 0 : index
    %c0_95 = arith.constant 0 : index
    %c0_96 = arith.constant 0 : index
    %168 = vector.load %arg12[%c0_94, %c0_95, %c0_96] : memref<3x1x192xf32, #tpu.memory_space<vmem>>, vector<1x1x192xf32>
    %169 = vector.shape_cast %168 : vector<1x1x192xf32> to vector<1x192xf32>
    %170 = vector.broadcast %169 : vector<1x192xf32> to vector<64x192xf32>
    %171 = arith.addf %167, %170 : vector<64x192xf32>
    %cst_97 = arith.constant 0.000000e+00 : f32
    %172 = vector.broadcast %cst_97 : f32 to vector<64x192xf32>
    %173 = arith.maximumf %171, %172 : vector<64x192xf32>
    %c0_98 = arith.constant 0 : index
    %c0_99 = arith.constant 0 : index
    %c0_100 = arith.constant 0 : index
    %174 = vector.load %arg13[%c0_98, %c0_99, %c0_100] : memref<3x192x48xf32, #tpu.memory_space<vmem>>, vector<1x192x48xf32>
    %175 = vector.shape_cast %174 : vector<1x192x48xf32> to vector<192x48xf32>
    %cst_101 = arith.constant dense<0.000000e+00> : vector<64x48xf32>
    %176 = tpu.matmul %173, %175, %cst_101 {dimension_numbers = #tpu.dot_dimension_numbers<[1], [0], [0], [1], [0, 0, 1, 1], [], []>} : vector<64x192xf32>, vector<192x48xf32>, vector<64x48xf32> -> vector<64x48xf32>
    %177 = arith.addf %138, %176 : vector<64x48xf32>
    %c0_102 = arith.constant 0 : index
    %c0_103 = arith.constant 0 : index
    %c0_104 = arith.constant 0 : index
    %178 = vector.load %arg14[%c0_102, %c0_103, %c0_104] : memref<3x1x48xf32, #tpu.memory_space<vmem>>, vector<1x1x48xf32>
    %179 = vector.shape_cast %178 : vector<1x1x48xf32> to vector<1x48xf32>
    %180 = vector.broadcast %179 : vector<1x48xf32> to vector<64x48xf32>
    %181 = arith.addf %177, %180 : vector<64x48xf32>
    %c1_105 = arith.constant 1 : index
    %c0_106 = arith.constant 0 : index
    %c0_107 = arith.constant 0 : index
    %182 = vector.load %arg7[%c1_105, %c0_106, %c0_107] : memref<3x1x48xf32, #tpu.memory_space<vmem>>, vector<1x1x48xf32>
    %183 = vector.shape_cast %182 : vector<1x1x48xf32> to vector<1x48xf32>
    %c1_108 = arith.constant 1 : index
    %c0_109 = arith.constant 0 : index
    %c0_110 = arith.constant 0 : index
    %184 = vector.load %arg8[%c1_108, %c0_109, %c0_110] : memref<3x1x48xf32, #tpu.memory_space<vmem>>, vector<1x1x48xf32>
    %185 = vector.shape_cast %184 : vector<1x1x48xf32> to vector<1x48xf32>
    %cst_111 = arith.constant dense<0.000000e+00> : vector<64xf32>
    %186 = vector.multi_reduction <add>, %181, %cst_111 [1] : vector<64x48xf32> to vector<64xf32>
    %187 = vector.shape_cast %186 : vector<64xf32> to vector<64x1xf32>
    %cst_112 = arith.constant 4.800000e+01 : f32
    %188 = vector.broadcast %cst_112 : f32 to vector<64x1xf32>
    %189 = arith.divf %187, %188 : vector<64x1xf32>
    %190 = vector.broadcast %189 : vector<64x1xf32> to vector<64x48xf32>
    %191 = arith.subf %181, %190 : vector<64x48xf32>
    %192 = arith.mulf %191, %191 : vector<64x48xf32>
    %cst_113 = arith.constant dense<0.000000e+00> : vector<64xf32>
    %193 = vector.multi_reduction <add>, %192, %cst_113 [1] : vector<64x48xf32> to vector<64xf32>
    %194 = vector.shape_cast %193 : vector<64xf32> to vector<64x1xf32>
    %cst_114 = arith.constant 4.800000e+01 : f32
    %195 = vector.broadcast %cst_114 : f32 to vector<64x1xf32>
    %196 = arith.divf %194, %195 : vector<64x1xf32>
    %197 = vector.broadcast %189 : vector<64x1xf32> to vector<64x48xf32>
    %198 = arith.subf %181, %197 : vector<64x48xf32>
    %cst_115 = arith.constant 9.99999974E-6 : f32
    %199 = vector.broadcast %cst_115 : f32 to vector<64x1xf32>
    %200 = arith.addf %196, %199 : vector<64x1xf32>
    %201 = math.rsqrt %200 : vector<64x1xf32>
    %202 = vector.broadcast %201 : vector<64x1xf32> to vector<64x48xf32>
    %203 = arith.mulf %198, %202 : vector<64x48xf32>
    %204 = vector.broadcast %183 : vector<1x48xf32> to vector<64x48xf32>
    %205 = arith.mulf %203, %204 : vector<64x48xf32>
    %206 = vector.broadcast %185 : vector<1x48xf32> to vector<64x48xf32>
    %207 = arith.addf %205, %206 : vector<64x48xf32>
    %cst_116 = arith.constant 0.000000e+00 : f32
    %208 = vector.broadcast %cst_116 : f32 to vector<64x48xf32>
    %c3 = arith.constant 3 : index
    %c0_117 = arith.constant 0 : index
    %c0_118 = arith.constant 0 : index
    %209 = vector.load %arg2[%c3, %c0_117, %c0_118] : memref<9x48x16xf32, #tpu.memory_space<vmem>>, vector<1x48x16xf32>
    %210 = vector.shape_cast %209 : vector<1x48x16xf32> to vector<48x16xf32>
    %cst_119 = arith.constant dense<0.000000e+00> : vector<64x16xf32>
    %211 = tpu.matmul %207, %210, %cst_119 {dimension_numbers = #tpu.dot_dimension_numbers<[1], [0], [0], [1], [0, 0, 1, 1], [], []>} : vector<64x48xf32>, vector<48x16xf32>, vector<64x16xf32> -> vector<64x16xf32>
    %c3_120 = arith.constant 3 : index
    %c0_121 = arith.constant 0 : index
    %c0_122 = arith.constant 0 : index
    %212 = vector.load %arg3[%c3_120, %c0_121, %c0_122] : memref<9x48x16xf32, #tpu.memory_space<vmem>>, vector<1x48x16xf32>
    %213 = vector.shape_cast %212 : vector<1x48x16xf32> to vector<48x16xf32>
    %cst_123 = arith.constant dense<0.000000e+00> : vector<64x16xf32>
    %214 = tpu.matmul %207, %213, %cst_123 {dimension_numbers = #tpu.dot_dimension_numbers<[1], [0], [0], [1], [0, 0, 1, 1], [], []>} : vector<64x48xf32>, vector<48x16xf32>, vector<64x16xf32> -> vector<64x16xf32>
    %c3_124 = arith.constant 3 : index
    %c0_125 = arith.constant 0 : index
    %c0_126 = arith.constant 0 : index
    %215 = vector.load %arg4[%c3_124, %c0_125, %c0_126] : memref<9x48x16xf32, #tpu.memory_space<vmem>>, vector<1x48x16xf32>
    %216 = vector.shape_cast %215 : vector<1x48x16xf32> to vector<48x16xf32>
    %cst_127 = arith.constant dense<0.000000e+00> : vector<64x16xf32>
    %217 = tpu.matmul %207, %216, %cst_127 {dimension_numbers = #tpu.dot_dimension_numbers<[1], [0], [0], [1], [0, 0, 1, 1], [], []>} : vector<64x48xf32>, vector<48x16xf32>, vector<64x16xf32> -> vector<64x16xf32>
    %218 = vector.shape_cast %211 : vector<64x16xf32> to vector<4x16x16xf32>
    %219 = vector.shape_cast %214 : vector<64x16xf32> to vector<4x16x16xf32>
    %220 = vector.shape_cast %217 : vector<64x16xf32> to vector<4x16x16xf32>
    "tpu.trace_start"() <{level = 10 : i32, message = "bqh,bkh->bqk"}> : () -> ()
    %cst_128 = arith.constant dense<0.000000e+00> : vector<4x16x16xf32>
    %221 = tpu.matmul %218, %219, %cst_128 {dimension_numbers = #tpu.dot_dimension_numbers<[2], [2], [1], [1], [0, 0, 0, 1, 1, 1], [0], [0]>} : vector<4x16x16xf32>, vector<4x16x16xf32>, vector<4x16x16xf32> -> vector<4x16x16xf32>
    "tpu.trace_stop"() : () -> ()
    %cst_129 = arith.constant 0.144337565 : f32
    %222 = vector.broadcast %cst_129 : f32 to vector<4x16x16xf32>
    %223 = arith.mulf %221, %222 : vector<4x16x16xf32>
    %224 = vector.shape_cast %7 : vector<16x16xf32> to vector<1x16x16xf32>
    %225 = vector.broadcast %224 : vector<1x16x16xf32> to vector<4x16x16xf32>
    %226 = arith.addf %223, %225 : vector<4x16x16xf32>
    %cst_130 = arith.constant dense<0xFF800000> : vector<4x16xf32>
    %227 = vector.multi_reduction <maximumf>, %226, %cst_130 [2] : vector<4x16x16xf32> to vector<4x16xf32>
    %228 = vector.shape_cast %227 : vector<4x16xf32> to vector<4x16x1xf32>
    %229 = vector.broadcast %228 : vector<4x16x1xf32> to vector<4x16x16xf32>
    %230 = arith.subf %226, %229 : vector<4x16x16xf32>
    %231 = math.exp %230 : vector<4x16x16xf32>
    %cst_131 = arith.constant dense<0.000000e+00> : vector<4x16xf32>
    %232 = vector.multi_reduction <add>, %231, %cst_131 [2] : vector<4x16x16xf32> to vector<4x16xf32>
    %233 = vector.shape_cast %232 : vector<4x16xf32> to vector<4x16x1xf32>
    %234 = vector.broadcast %233 : vector<4x16x1xf32> to vector<4x16x16xf32>
    %235 = arith.divf %231, %234 : vector<4x16x16xf32>
    "tpu.trace_start"() <{level = 10 : i32, message = "bqk,bkh->bqh"}> : () -> ()
    %cst_132 = arith.constant dense<0.000000e+00> : vector<4x16x16xf32>
    %236 = tpu.matmul %235, %220, %cst_132 {dimension_numbers = #tpu.dot_dimension_numbers<[2], [1], [1], [2], [0, 0, 0, 1, 1, 2], [0], [0]>} : vector<4x16x16xf32>, vector<4x16x16xf32>, vector<4x16x16xf32> -> vector<4x16x16xf32>
    "tpu.trace_stop"() : () -> ()
    %237 = vector.shape_cast %236 : vector<4x16x16xf32> to vector<64x16xf32>
    %c3_133 = arith.constant 3 : index
    %c0_134 = arith.constant 0 : index
    %c0_135 = arith.constant 0 : index
    %238 = vector.load %arg5[%c3_133, %c0_134, %c0_135] : memref<9x16x48xf32, #tpu.memory_space<vmem>>, vector<1x16x48xf32>
    %239 = vector.shape_cast %238 : vector<1x16x48xf32> to vector<16x48xf32>
    %cst_136 = arith.constant dense<0.000000e+00> : vector<64x48xf32>
    %240 = tpu.matmul %237, %239, %cst_136 {dimension_numbers = #tpu.dot_dimension_numbers<[1], [0], [0], [1], [0, 0, 1, 1], [], []>} : vector<64x16xf32>, vector<16x48xf32>, vector<64x48xf32> -> vector<64x48xf32>
    %241 = arith.addf %208, %240 : vector<64x48xf32>
    %c4 = arith.constant 4 : index
    %c0_137 = arith.constant 0 : index
    %c0_138 = arith.constant 0 : index
    %242 = vector.load %arg2[%c4, %c0_137, %c0_138] : memref<9x48x16xf32, #tpu.memory_space<vmem>>, vector<1x48x16xf32>
    %243 = vector.shape_cast %242 : vector<1x48x16xf32> to vector<48x16xf32>
    %cst_139 = arith.constant dense<0.000000e+00> : vector<64x16xf32>
    %244 = tpu.matmul %207, %243, %cst_139 {dimension_numbers = #tpu.dot_dimension_numbers<[1], [0], [0], [1], [0, 0, 1, 1], [], []>} : vector<64x48xf32>, vector<48x16xf32>, vector<64x16xf32> -> vector<64x16xf32>
    %c4_140 = arith.constant 4 : index
    %c0_141 = arith.constant 0 : index
    %c0_142 = arith.constant 0 : index
    %245 = vector.load %arg3[%c4_140, %c0_141, %c0_142] : memref<9x48x16xf32, #tpu.memory_space<vmem>>, vector<1x48x16xf32>
    %246 = vector.shape_cast %245 : vector<1x48x16xf32> to vector<48x16xf32>
    %cst_143 = arith.constant dense<0.000000e+00> : vector<64x16xf32>
    %247 = tpu.matmul %207, %246, %cst_143 {dimension_numbers = #tpu.dot_dimension_numbers<[1], [0], [0], [1], [0, 0, 1, 1], [], []>} : vector<64x48xf32>, vector<48x16xf32>, vector<64x16xf32> -> vector<64x16xf32>
    %c4_144 = arith.constant 4 : index
    %c0_145 = arith.constant 0 : index
    %c0_146 = arith.constant 0 : index
    %248 = vector.load %arg4[%c4_144, %c0_145, %c0_146] : memref<9x48x16xf32, #tpu.memory_space<vmem>>, vector<1x48x16xf32>
    %249 = vector.shape_cast %248 : vector<1x48x16xf32> to vector<48x16xf32>
    %cst_147 = arith.constant dense<0.000000e+00> : vector<64x16xf32>
    %250 = tpu.matmul %207, %249, %cst_147 {dimension_numbers = #tpu.dot_dimension_numbers<[1], [0], [0], [1], [0, 0, 1, 1], [], []>} : vector<64x48xf32>, vector<48x16xf32>, vector<64x16xf32> -> vector<64x16xf32>
    %251 = vector.shape_cast %244 : vector<64x16xf32> to vector<4x16x16xf32>
    %252 = vector.shape_cast %247 : vector<64x16xf32> to vector<4x16x16xf32>
    %253 = vector.shape_cast %250 : vector<64x16xf32> to vector<4x16x16xf32>
    "tpu.trace_start"() <{level = 10 : i32, message = "bqh,bkh->bqk"}> : () -> ()
    %cst_148 = arith.constant dense<0.000000e+00> : vector<4x16x16xf32>
    %254 = tpu.matmul %251, %252, %cst_148 {dimension_numbers = #tpu.dot_dimension_numbers<[2], [2], [1], [1], [0, 0, 0, 1, 1, 1], [0], [0]>} : vector<4x16x16xf32>, vector<4x16x16xf32>, vector<4x16x16xf32> -> vector<4x16x16xf32>
    "tpu.trace_stop"() : () -> ()
    %cst_149 = arith.constant 0.144337565 : f32
    %255 = vector.broadcast %cst_149 : f32 to vector<4x16x16xf32>
    %256 = arith.mulf %254, %255 : vector<4x16x16xf32>
    %257 = vector.shape_cast %7 : vector<16x16xf32> to vector<1x16x16xf32>
    %258 = vector.broadcast %257 : vector<1x16x16xf32> to vector<4x16x16xf32>
    %259 = arith.addf %256, %258 : vector<4x16x16xf32>
    %cst_150 = arith.constant dense<0xFF800000> : vector<4x16xf32>
    %260 = vector.multi_reduction <maximumf>, %259, %cst_150 [2] : vector<4x16x16xf32> to vector<4x16xf32>
    %261 = vector.shape_cast %260 : vector<4x16xf32> to vector<4x16x1xf32>
    %262 = vector.broadcast %261 : vector<4x16x1xf32> to vector<4x16x16xf32>
    %263 = arith.subf %259, %262 : vector<4x16x16xf32>
    %264 = math.exp %263 : vector<4x16x16xf32>
    %cst_151 = arith.constant dense<0.000000e+00> : vector<4x16xf32>
    %265 = vector.multi_reduction <add>, %264, %cst_151 [2] : vector<4x16x16xf32> to vector<4x16xf32>
    %266 = vector.shape_cast %265 : vector<4x16xf32> to vector<4x16x1xf32>
    %267 = vector.broadcast %266 : vector<4x16x1xf32> to vector<4x16x16xf32>
    %268 = arith.divf %264, %267 : vector<4x16x16xf32>
    "tpu.trace_start"() <{level = 10 : i32, message = "bqk,bkh->bqh"}> : () -> ()
    %cst_152 = arith.constant dense<0.000000e+00> : vector<4x16x16xf32>
    %269 = tpu.matmul %268, %253, %cst_152 {dimension_numbers = #tpu.dot_dimension_numbers<[2], [1], [1], [2], [0, 0, 0, 1, 1, 2], [0], [0]>} : vector<4x16x16xf32>, vector<4x16x16xf32>, vector<4x16x16xf32> -> vector<4x16x16xf32>
    "tpu.trace_stop"() : () -> ()
    %270 = vector.shape_cast %269 : vector<4x16x16xf32> to vector<64x16xf32>
    %c4_153 = arith.constant 4 : index
    %c0_154 = arith.constant 0 : index
    %c0_155 = arith.constant 0 : index
    %271 = vector.load %arg5[%c4_153, %c0_154, %c0_155] : memref<9x16x48xf32, #tpu.memory_space<vmem>>, vector<1x16x48xf32>
    %272 = vector.shape_cast %271 : vector<1x16x48xf32> to vector<16x48xf32>
    %cst_156 = arith.constant dense<0.000000e+00> : vector<64x48xf32>
    %273 = tpu.matmul %270, %272, %cst_156 {dimension_numbers = #tpu.dot_dimension_numbers<[1], [0], [0], [1], [0, 0, 1, 1], [], []>} : vector<64x16xf32>, vector<16x48xf32>, vector<64x48xf32> -> vector<64x48xf32>
    %274 = arith.addf %241, %273 : vector<64x48xf32>
    %c5 = arith.constant 5 : index
    %c0_157 = arith.constant 0 : index
    %c0_158 = arith.constant 0 : index
    %275 = vector.load %arg2[%c5, %c0_157, %c0_158] : memref<9x48x16xf32, #tpu.memory_space<vmem>>, vector<1x48x16xf32>
    %276 = vector.shape_cast %275 : vector<1x48x16xf32> to vector<48x16xf32>
    %cst_159 = arith.constant dense<0.000000e+00> : vector<64x16xf32>
    %277 = tpu.matmul %207, %276, %cst_159 {dimension_numbers = #tpu.dot_dimension_numbers<[1], [0], [0], [1], [0, 0, 1, 1], [], []>} : vector<64x48xf32>, vector<48x16xf32>, vector<64x16xf32> -> vector<64x16xf32>
    %c5_160 = arith.constant 5 : index
    %c0_161 = arith.constant 0 : index
    %c0_162 = arith.constant 0 : index
    %278 = vector.load %arg3[%c5_160, %c0_161, %c0_162] : memref<9x48x16xf32, #tpu.memory_space<vmem>>, vector<1x48x16xf32>
    %279 = vector.shape_cast %278 : vector<1x48x16xf32> to vector<48x16xf32>
    %cst_163 = arith.constant dense<0.000000e+00> : vector<64x16xf32>
    %280 = tpu.matmul %207, %279, %cst_163 {dimension_numbers = #tpu.dot_dimension_numbers<[1], [0], [0], [1], [0, 0, 1, 1], [], []>} : vector<64x48xf32>, vector<48x16xf32>, vector<64x16xf32> -> vector<64x16xf32>
    %c5_164 = arith.constant 5 : index
    %c0_165 = arith.constant 0 : index
    %c0_166 = arith.constant 0 : index
    %281 = vector.load %arg4[%c5_164, %c0_165, %c0_166] : memref<9x48x16xf32, #tpu.memory_space<vmem>>, vector<1x48x16xf32>
    %282 = vector.shape_cast %281 : vector<1x48x16xf32> to vector<48x16xf32>
    %cst_167 = arith.constant dense<0.000000e+00> : vector<64x16xf32>
    %283 = tpu.matmul %207, %282, %cst_167 {dimension_numbers = #tpu.dot_dimension_numbers<[1], [0], [0], [1], [0, 0, 1, 1], [], []>} : vector<64x48xf32>, vector<48x16xf32>, vector<64x16xf32> -> vector<64x16xf32>
    %284 = vector.shape_cast %277 : vector<64x16xf32> to vector<4x16x16xf32>
    %285 = vector.shape_cast %280 : vector<64x16xf32> to vector<4x16x16xf32>
    %286 = vector.shape_cast %283 : vector<64x16xf32> to vector<4x16x16xf32>
    "tpu.trace_start"() <{level = 10 : i32, message = "bqh,bkh->bqk"}> : () -> ()
    %cst_168 = arith.constant dense<0.000000e+00> : vector<4x16x16xf32>
    %287 = tpu.matmul %284, %285, %cst_168 {dimension_numbers = #tpu.dot_dimension_numbers<[2], [2], [1], [1], [0, 0, 0, 1, 1, 1], [0], [0]>} : vector<4x16x16xf32>, vector<4x16x16xf32>, vector<4x16x16xf32> -> vector<4x16x16xf32>
    "tpu.trace_stop"() : () -> ()
    %cst_169 = arith.constant 0.144337565 : f32
    %288 = vector.broadcast %cst_169 : f32 to vector<4x16x16xf32>
    %289 = arith.mulf %287, %288 : vector<4x16x16xf32>
    %290 = vector.shape_cast %7 : vector<16x16xf32> to vector<1x16x16xf32>
    %291 = vector.broadcast %290 : vector<1x16x16xf32> to vector<4x16x16xf32>
    %292 = arith.addf %289, %291 : vector<4x16x16xf32>
    %cst_170 = arith.constant dense<0xFF800000> : vector<4x16xf32>
    %293 = vector.multi_reduction <maximumf>, %292, %cst_170 [2] : vector<4x16x16xf32> to vector<4x16xf32>
    %294 = vector.shape_cast %293 : vector<4x16xf32> to vector<4x16x1xf32>
    %295 = vector.broadcast %294 : vector<4x16x1xf32> to vector<4x16x16xf32>
    %296 = arith.subf %292, %295 : vector<4x16x16xf32>
    %297 = math.exp %296 : vector<4x16x16xf32>
    %cst_171 = arith.constant dense<0.000000e+00> : vector<4x16xf32>
    %298 = vector.multi_reduction <add>, %297, %cst_171 [2] : vector<4x16x16xf32> to vector<4x16xf32>
    %299 = vector.shape_cast %298 : vector<4x16xf32> to vector<4x16x1xf32>
    %300 = vector.broadcast %299 : vector<4x16x1xf32> to vector<4x16x16xf32>
    %301 = arith.divf %297, %300 : vector<4x16x16xf32>
    "tpu.trace_start"() <{level = 10 : i32, message = "bqk,bkh->bqh"}> : () -> ()
    %cst_172 = arith.constant dense<0.000000e+00> : vector<4x16x16xf32>
    %302 = tpu.matmul %301, %286, %cst_172 {dimension_numbers = #tpu.dot_dimension_numbers<[2], [1], [1], [2], [0, 0, 0, 1, 1, 2], [0], [0]>} : vector<4x16x16xf32>, vector<4x16x16xf32>, vector<4x16x16xf32> -> vector<4x16x16xf32>
    "tpu.trace_stop"() : () -> ()
    %303 = vector.shape_cast %302 : vector<4x16x16xf32> to vector<64x16xf32>
    %c5_173 = arith.constant 5 : index
    %c0_174 = arith.constant 0 : index
    %c0_175 = arith.constant 0 : index
    %304 = vector.load %arg5[%c5_173, %c0_174, %c0_175] : memref<9x16x48xf32, #tpu.memory_space<vmem>>, vector<1x16x48xf32>
    %305 = vector.shape_cast %304 : vector<1x16x48xf32> to vector<16x48xf32>
    %cst_176 = arith.constant dense<0.000000e+00> : vector<64x48xf32>
    %306 = tpu.matmul %303, %305, %cst_176 {dimension_numbers = #tpu.dot_dimension_numbers<[1], [0], [0], [1], [0, 0, 1, 1], [], []>} : vector<64x16xf32>, vector<16x48xf32>, vector<64x48xf32> -> vector<64x48xf32>
    %307 = arith.addf %274, %306 : vector<64x48xf32>
    %308 = arith.addf %181, %307 : vector<64x48xf32>
    %c1_177 = arith.constant 1 : index
    %c0_178 = arith.constant 0 : index
    %c0_179 = arith.constant 0 : index
    %309 = vector.load %arg6[%c1_177, %c0_178, %c0_179] : memref<3x1x48xf32, #tpu.memory_space<vmem>>, vector<1x1x48xf32>
    %310 = vector.shape_cast %309 : vector<1x1x48xf32> to vector<1x48xf32>
    %311 = vector.broadcast %310 : vector<1x48xf32> to vector<64x48xf32>
    %312 = arith.addf %308, %311 : vector<64x48xf32>
    %c1_180 = arith.constant 1 : index
    %c0_181 = arith.constant 0 : index
    %c0_182 = arith.constant 0 : index
    %313 = vector.load %arg9[%c1_180, %c0_181, %c0_182] : memref<3x1x48xf32, #tpu.memory_space<vmem>>, vector<1x1x48xf32>
    %314 = vector.shape_cast %313 : vector<1x1x48xf32> to vector<1x48xf32>
    %c1_183 = arith.constant 1 : index
    %c0_184 = arith.constant 0 : index
    %c0_185 = arith.constant 0 : index
    %315 = vector.load %arg10[%c1_183, %c0_184, %c0_185] : memref<3x1x48xf32, #tpu.memory_space<vmem>>, vector<1x1x48xf32>
    %316 = vector.shape_cast %315 : vector<1x1x48xf32> to vector<1x48xf32>
    %cst_186 = arith.constant dense<0.000000e+00> : vector<64xf32>
    %317 = vector.multi_reduction <add>, %312, %cst_186 [1] : vector<64x48xf32> to vector<64xf32>
    %318 = vector.shape_cast %317 : vector<64xf32> to vector<64x1xf32>
    %cst_187 = arith.constant 4.800000e+01 : f32
    %319 = vector.broadcast %cst_187 : f32 to vector<64x1xf32>
    %320 = arith.divf %318, %319 : vector<64x1xf32>
    %321 = vector.broadcast %320 : vector<64x1xf32> to vector<64x48xf32>
    %322 = arith.subf %312, %321 : vector<64x48xf32>
    %323 = arith.mulf %322, %322 : vector<64x48xf32>
    %cst_188 = arith.constant dense<0.000000e+00> : vector<64xf32>
    %324 = vector.multi_reduction <add>, %323, %cst_188 [1] : vector<64x48xf32> to vector<64xf32>
    %325 = vector.shape_cast %324 : vector<64xf32> to vector<64x1xf32>
    %cst_189 = arith.constant 4.800000e+01 : f32
    %326 = vector.broadcast %cst_189 : f32 to vector<64x1xf32>
    %327 = arith.divf %325, %326 : vector<64x1xf32>
    %328 = vector.broadcast %320 : vector<64x1xf32> to vector<64x48xf32>
    %329 = arith.subf %312, %328 : vector<64x48xf32>
    %cst_190 = arith.constant 9.99999974E-6 : f32
    %330 = vector.broadcast %cst_190 : f32 to vector<64x1xf32>
    %331 = arith.addf %327, %330 : vector<64x1xf32>
    %332 = math.rsqrt %331 : vector<64x1xf32>
    %333 = vector.broadcast %332 : vector<64x1xf32> to vector<64x48xf32>
    %334 = arith.mulf %329, %333 : vector<64x48xf32>
    %335 = vector.broadcast %314 : vector<1x48xf32> to vector<64x48xf32>
    %336 = arith.mulf %334, %335 : vector<64x48xf32>
    %337 = vector.broadcast %316 : vector<1x48xf32> to vector<64x48xf32>
    %338 = arith.addf %336, %337 : vector<64x48xf32>
    %c1_191 = arith.constant 1 : index
    %c0_192 = arith.constant 0 : index
    %c0_193 = arith.constant 0 : index
    %339 = vector.load %arg11[%c1_191, %c0_192, %c0_193] : memref<3x48x192xf32, #tpu.memory_space<vmem>>, vector<1x48x192xf32>
    %340 = vector.shape_cast %339 : vector<1x48x192xf32> to vector<48x192xf32>
    %cst_194 = arith.constant dense<0.000000e+00> : vector<64x192xf32>
    %341 = tpu.matmul %338, %340, %cst_194 {dimension_numbers = #tpu.dot_dimension_numbers<[1], [0], [0], [1], [0, 0, 1, 1], [], []>} : vector<64x48xf32>, vector<48x192xf32>, vector<64x192xf32> -> vector<64x192xf32>
    %c1_195 = arith.constant 1 : index
    %c0_196 = arith.constant 0 : index
    %c0_197 = arith.constant 0 : index
    %342 = vector.load %arg12[%c1_195, %c0_196, %c0_197] : memref<3x1x192xf32, #tpu.memory_space<vmem>>, vector<1x1x192xf32>
    %343 = vector.shape_cast %342 : vector<1x1x192xf32> to vector<1x192xf32>
    %344 = vector.broadcast %343 : vector<1x192xf32> to vector<64x192xf32>
    %345 = arith.addf %341, %344 : vector<64x192xf32>
    %cst_198 = arith.constant 0.000000e+00 : f32
    %346 = vector.broadcast %cst_198 : f32 to vector<64x192xf32>
    %347 = arith.maximumf %345, %346 : vector<64x192xf32>
    %c1_199 = arith.constant 1 : index
    %c0_200 = arith.constant 0 : index
    %c0_201 = arith.constant 0 : index
    %348 = vector.load %arg13[%c1_199, %c0_200, %c0_201] : memref<3x192x48xf32, #tpu.memory_space<vmem>>, vector<1x192x48xf32>
    %349 = vector.shape_cast %348 : vector<1x192x48xf32> to vector<192x48xf32>
    %cst_202 = arith.constant dense<0.000000e+00> : vector<64x48xf32>
    %350 = tpu.matmul %347, %349, %cst_202 {dimension_numbers = #tpu.dot_dimension_numbers<[1], [0], [0], [1], [0, 0, 1, 1], [], []>} : vector<64x192xf32>, vector<192x48xf32>, vector<64x48xf32> -> vector<64x48xf32>
    %351 = arith.addf %312, %350 : vector<64x48xf32>
    %c1_203 = arith.constant 1 : index
    %c0_204 = arith.constant 0 : index
    %c0_205 = arith.constant 0 : index
    %352 = vector.load %arg14[%c1_203, %c0_204, %c0_205] : memref<3x1x48xf32, #tpu.memory_space<vmem>>, vector<1x1x48xf32>
    %353 = vector.shape_cast %352 : vector<1x1x48xf32> to vector<1x48xf32>
    %354 = vector.broadcast %353 : vector<1x48xf32> to vector<64x48xf32>
    %355 = arith.addf %351, %354 : vector<64x48xf32>
    %c2_206 = arith.constant 2 : index
    %c0_207 = arith.constant 0 : index
    %c0_208 = arith.constant 0 : index
    %356 = vector.load %arg7[%c2_206, %c0_207, %c0_208] : memref<3x1x48xf32, #tpu.memory_space<vmem>>, vector<1x1x48xf32>
    %357 = vector.shape_cast %356 : vector<1x1x48xf32> to vector<1x48xf32>
    %c2_209 = arith.constant 2 : index
    %c0_210 = arith.constant 0 : index
    %c0_211 = arith.constant 0 : index
    %358 = vector.load %arg8[%c2_209, %c0_210, %c0_211] : memref<3x1x48xf32, #tpu.memory_space<vmem>>, vector<1x1x48xf32>
    %359 = vector.shape_cast %358 : vector<1x1x48xf32> to vector<1x48xf32>
    %cst_212 = arith.constant dense<0.000000e+00> : vector<64xf32>
    %360 = vector.multi_reduction <add>, %355, %cst_212 [1] : vector<64x48xf32> to vector<64xf32>
    %361 = vector.shape_cast %360 : vector<64xf32> to vector<64x1xf32>
    %cst_213 = arith.constant 4.800000e+01 : f32
    %362 = vector.broadcast %cst_213 : f32 to vector<64x1xf32>
    %363 = arith.divf %361, %362 : vector<64x1xf32>
    %364 = vector.broadcast %363 : vector<64x1xf32> to vector<64x48xf32>
    %365 = arith.subf %355, %364 : vector<64x48xf32>
    %366 = arith.mulf %365, %365 : vector<64x48xf32>
    %cst_214 = arith.constant dense<0.000000e+00> : vector<64xf32>
    %367 = vector.multi_reduction <add>, %366, %cst_214 [1] : vector<64x48xf32> to vector<64xf32>
    %368 = vector.shape_cast %367 : vector<64xf32> to vector<64x1xf32>
    %cst_215 = arith.constant 4.800000e+01 : f32
    %369 = vector.broadcast %cst_215 : f32 to vector<64x1xf32>
    %370 = arith.divf %368, %369 : vector<64x1xf32>
    %371 = vector.broadcast %363 : vector<64x1xf32> to vector<64x48xf32>
    %372 = arith.subf %355, %371 : vector<64x48xf32>
    %cst_216 = arith.constant 9.99999974E-6 : f32
    %373 = vector.broadcast %cst_216 : f32 to vector<64x1xf32>
    %374 = arith.addf %370, %373 : vector<64x1xf32>
    %375 = math.rsqrt %374 : vector<64x1xf32>
    %376 = vector.broadcast %375 : vector<64x1xf32> to vector<64x48xf32>
    %377 = arith.mulf %372, %376 : vector<64x48xf32>
    %378 = vector.broadcast %357 : vector<1x48xf32> to vector<64x48xf32>
    %379 = arith.mulf %377, %378 : vector<64x48xf32>
    %380 = vector.broadcast %359 : vector<1x48xf32> to vector<64x48xf32>
    %381 = arith.addf %379, %380 : vector<64x48xf32>
    %cst_217 = arith.constant 0.000000e+00 : f32
    %382 = vector.broadcast %cst_217 : f32 to vector<64x48xf32>
    %c6 = arith.constant 6 : index
    %c0_218 = arith.constant 0 : index
    %c0_219 = arith.constant 0 : index
    %383 = vector.load %arg2[%c6, %c0_218, %c0_219] : memref<9x48x16xf32, #tpu.memory_space<vmem>>, vector<1x48x16xf32>
    %384 = vector.shape_cast %383 : vector<1x48x16xf32> to vector<48x16xf32>
    %cst_220 = arith.constant dense<0.000000e+00> : vector<64x16xf32>
    %385 = tpu.matmul %381, %384, %cst_220 {dimension_numbers = #tpu.dot_dimension_numbers<[1], [0], [0], [1], [0, 0, 1, 1], [], []>} : vector<64x48xf32>, vector<48x16xf32>, vector<64x16xf32> -> vector<64x16xf32>
    %c6_221 = arith.constant 6 : index
    %c0_222 = arith.constant 0 : index
    %c0_223 = arith.constant 0 : index
    %386 = vector.load %arg3[%c6_221, %c0_222, %c0_223] : memref<9x48x16xf32, #tpu.memory_space<vmem>>, vector<1x48x16xf32>
    %387 = vector.shape_cast %386 : vector<1x48x16xf32> to vector<48x16xf32>
    %cst_224 = arith.constant dense<0.000000e+00> : vector<64x16xf32>
    %388 = tpu.matmul %381, %387, %cst_224 {dimension_numbers = #tpu.dot_dimension_numbers<[1], [0], [0], [1], [0, 0, 1, 1], [], []>} : vector<64x48xf32>, vector<48x16xf32>, vector<64x16xf32> -> vector<64x16xf32>
    %c6_225 = arith.constant 6 : index
    %c0_226 = arith.constant 0 : index
    %c0_227 = arith.constant 0 : index
    %389 = vector.load %arg4[%c6_225, %c0_226, %c0_227] : memref<9x48x16xf32, #tpu.memory_space<vmem>>, vector<1x48x16xf32>
    %390 = vector.shape_cast %389 : vector<1x48x16xf32> to vector<48x16xf32>
    %cst_228 = arith.constant dense<0.000000e+00> : vector<64x16xf32>
    %391 = tpu.matmul %381, %390, %cst_228 {dimension_numbers = #tpu.dot_dimension_numbers<[1], [0], [0], [1], [0, 0, 1, 1], [], []>} : vector<64x48xf32>, vector<48x16xf32>, vector<64x16xf32> -> vector<64x16xf32>
    %392 = vector.shape_cast %385 : vector<64x16xf32> to vector<4x16x16xf32>
    %393 = vector.shape_cast %388 : vector<64x16xf32> to vector<4x16x16xf32>
    %394 = vector.shape_cast %391 : vector<64x16xf32> to vector<4x16x16xf32>
    "tpu.trace_start"() <{level = 10 : i32, message = "bqh,bkh->bqk"}> : () -> ()
    %cst_229 = arith.constant dense<0.000000e+00> : vector<4x16x16xf32>
    %395 = tpu.matmul %392, %393, %cst_229 {dimension_numbers = #tpu.dot_dimension_numbers<[2], [2], [1], [1], [0, 0, 0, 1, 1, 1], [0], [0]>} : vector<4x16x16xf32>, vector<4x16x16xf32>, vector<4x16x16xf32> -> vector<4x16x16xf32>
    "tpu.trace_stop"() : () -> ()
    %cst_230 = arith.constant 0.144337565 : f32
    %396 = vector.broadcast %cst_230 : f32 to vector<4x16x16xf32>
    %397 = arith.mulf %395, %396 : vector<4x16x16xf32>
    %398 = vector.shape_cast %7 : vector<16x16xf32> to vector<1x16x16xf32>
    %399 = vector.broadcast %398 : vector<1x16x16xf32> to vector<4x16x16xf32>
    %400 = arith.addf %397, %399 : vector<4x16x16xf32>
    %cst_231 = arith.constant dense<0xFF800000> : vector<4x16xf32>
    %401 = vector.multi_reduction <maximumf>, %400, %cst_231 [2] : vector<4x16x16xf32> to vector<4x16xf32>
    %402 = vector.shape_cast %401 : vector<4x16xf32> to vector<4x16x1xf32>
    %403 = vector.broadcast %402 : vector<4x16x1xf32> to vector<4x16x16xf32>
    %404 = arith.subf %400, %403 : vector<4x16x16xf32>
    %405 = math.exp %404 : vector<4x16x16xf32>
    %cst_232 = arith.constant dense<0.000000e+00> : vector<4x16xf32>
    %406 = vector.multi_reduction <add>, %405, %cst_232 [2] : vector<4x16x16xf32> to vector<4x16xf32>
    %407 = vector.shape_cast %406 : vector<4x16xf32> to vector<4x16x1xf32>
    %408 = vector.broadcast %407 : vector<4x16x1xf32> to vector<4x16x16xf32>
    %409 = arith.divf %405, %408 : vector<4x16x16xf32>
    "tpu.trace_start"() <{level = 10 : i32, message = "bqk,bkh->bqh"}> : () -> ()
    %cst_233 = arith.constant dense<0.000000e+00> : vector<4x16x16xf32>
    %410 = tpu.matmul %409, %394, %cst_233 {dimension_numbers = #tpu.dot_dimension_numbers<[2], [1], [1], [2], [0, 0, 0, 1, 1, 2], [0], [0]>} : vector<4x16x16xf32>, vector<4x16x16xf32>, vector<4x16x16xf32> -> vector<4x16x16xf32>
    "tpu.trace_stop"() : () -> ()
    %411 = vector.shape_cast %410 : vector<4x16x16xf32> to vector<64x16xf32>
    %c6_234 = arith.constant 6 : index
    %c0_235 = arith.constant 0 : index
    %c0_236 = arith.constant 0 : index
    %412 = vector.load %arg5[%c6_234, %c0_235, %c0_236] : memref<9x16x48xf32, #tpu.memory_space<vmem>>, vector<1x16x48xf32>
    %413 = vector.shape_cast %412 : vector<1x16x48xf32> to vector<16x48xf32>
    %cst_237 = arith.constant dense<0.000000e+00> : vector<64x48xf32>
    %414 = tpu.matmul %411, %413, %cst_237 {dimension_numbers = #tpu.dot_dimension_numbers<[1], [0], [0], [1], [0, 0, 1, 1], [], []>} : vector<64x16xf32>, vector<16x48xf32>, vector<64x48xf32> -> vector<64x48xf32>
    %415 = arith.addf %382, %414 : vector<64x48xf32>
    %c7 = arith.constant 7 : index
    %c0_238 = arith.constant 0 : index
    %c0_239 = arith.constant 0 : index
    %416 = vector.load %arg2[%c7, %c0_238, %c0_239] : memref<9x48x16xf32, #tpu.memory_space<vmem>>, vector<1x48x16xf32>
    %417 = vector.shape_cast %416 : vector<1x48x16xf32> to vector<48x16xf32>
    %cst_240 = arith.constant dense<0.000000e+00> : vector<64x16xf32>
    %418 = tpu.matmul %381, %417, %cst_240 {dimension_numbers = #tpu.dot_dimension_numbers<[1], [0], [0], [1], [0, 0, 1, 1], [], []>} : vector<64x48xf32>, vector<48x16xf32>, vector<64x16xf32> -> vector<64x16xf32>
    %c7_241 = arith.constant 7 : index
    %c0_242 = arith.constant 0 : index
    %c0_243 = arith.constant 0 : index
    %419 = vector.load %arg3[%c7_241, %c0_242, %c0_243] : memref<9x48x16xf32, #tpu.memory_space<vmem>>, vector<1x48x16xf32>
    %420 = vector.shape_cast %419 : vector<1x48x16xf32> to vector<48x16xf32>
    %cst_244 = arith.constant dense<0.000000e+00> : vector<64x16xf32>
    %421 = tpu.matmul %381, %420, %cst_244 {dimension_numbers = #tpu.dot_dimension_numbers<[1], [0], [0], [1], [0, 0, 1, 1], [], []>} : vector<64x48xf32>, vector<48x16xf32>, vector<64x16xf32> -> vector<64x16xf32>
    %c7_245 = arith.constant 7 : index
    %c0_246 = arith.constant 0 : index
    %c0_247 = arith.constant 0 : index
    %422 = vector.load %arg4[%c7_245, %c0_246, %c0_247] : memref<9x48x16xf32, #tpu.memory_space<vmem>>, vector<1x48x16xf32>
    %423 = vector.shape_cast %422 : vector<1x48x16xf32> to vector<48x16xf32>
    %cst_248 = arith.constant dense<0.000000e+00> : vector<64x16xf32>
    %424 = tpu.matmul %381, %423, %cst_248 {dimension_numbers = #tpu.dot_dimension_numbers<[1], [0], [0], [1], [0, 0, 1, 1], [], []>} : vector<64x48xf32>, vector<48x16xf32>, vector<64x16xf32> -> vector<64x16xf32>
    %425 = vector.shape_cast %418 : vector<64x16xf32> to vector<4x16x16xf32>
    %426 = vector.shape_cast %421 : vector<64x16xf32> to vector<4x16x16xf32>
    %427 = vector.shape_cast %424 : vector<64x16xf32> to vector<4x16x16xf32>
    "tpu.trace_start"() <{level = 10 : i32, message = "bqh,bkh->bqk"}> : () -> ()
    %cst_249 = arith.constant dense<0.000000e+00> : vector<4x16x16xf32>
    %428 = tpu.matmul %425, %426, %cst_249 {dimension_numbers = #tpu.dot_dimension_numbers<[2], [2], [1], [1], [0, 0, 0, 1, 1, 1], [0], [0]>} : vector<4x16x16xf32>, vector<4x16x16xf32>, vector<4x16x16xf32> -> vector<4x16x16xf32>
    "tpu.trace_stop"() : () -> ()
    %cst_250 = arith.constant 0.144337565 : f32
    %429 = vector.broadcast %cst_250 : f32 to vector<4x16x16xf32>
    %430 = arith.mulf %428, %429 : vector<4x16x16xf32>
    %431 = vector.shape_cast %7 : vector<16x16xf32> to vector<1x16x16xf32>
    %432 = vector.broadcast %431 : vector<1x16x16xf32> to vector<4x16x16xf32>
    %433 = arith.addf %430, %432 : vector<4x16x16xf32>
    %cst_251 = arith.constant dense<0xFF800000> : vector<4x16xf32>
    %434 = vector.multi_reduction <maximumf>, %433, %cst_251 [2] : vector<4x16x16xf32> to vector<4x16xf32>
    %435 = vector.shape_cast %434 : vector<4x16xf32> to vector<4x16x1xf32>
    %436 = vector.broadcast %435 : vector<4x16x1xf32> to vector<4x16x16xf32>
    %437 = arith.subf %433, %436 : vector<4x16x16xf32>
    %438 = math.exp %437 : vector<4x16x16xf32>
    %cst_252 = arith.constant dense<0.000000e+00> : vector<4x16xf32>
    %439 = vector.multi_reduction <add>, %438, %cst_252 [2] : vector<4x16x16xf32> to vector<4x16xf32>
    %440 = vector.shape_cast %439 : vector<4x16xf32> to vector<4x16x1xf32>
    %441 = vector.broadcast %440 : vector<4x16x1xf32> to vector<4x16x16xf32>
    %442 = arith.divf %438, %441 : vector<4x16x16xf32>
    "tpu.trace_start"() <{level = 10 : i32, message = "bqk,bkh->bqh"}> : () -> ()
    %cst_253 = arith.constant dense<0.000000e+00> : vector<4x16x16xf32>
    %443 = tpu.matmul %442, %427, %cst_253 {dimension_numbers = #tpu.dot_dimension_numbers<[2], [1], [1], [2], [0, 0, 0, 1, 1, 2], [0], [0]>} : vector<4x16x16xf32>, vector<4x16x16xf32>, vector<4x16x16xf32> -> vector<4x16x16xf32>
    "tpu.trace_stop"() : () -> ()
    %444 = vector.shape_cast %443 : vector<4x16x16xf32> to vector<64x16xf32>
    %c7_254 = arith.constant 7 : index
    %c0_255 = arith.constant 0 : index
    %c0_256 = arith.constant 0 : index
    %445 = vector.load %arg5[%c7_254, %c0_255, %c0_256] : memref<9x16x48xf32, #tpu.memory_space<vmem>>, vector<1x16x48xf32>
    %446 = vector.shape_cast %445 : vector<1x16x48xf32> to vector<16x48xf32>
    %cst_257 = arith.constant dense<0.000000e+00> : vector<64x48xf32>
    %447 = tpu.matmul %444, %446, %cst_257 {dimension_numbers = #tpu.dot_dimension_numbers<[1], [0], [0], [1], [0, 0, 1, 1], [], []>} : vector<64x16xf32>, vector<16x48xf32>, vector<64x48xf32> -> vector<64x48xf32>
    %448 = arith.addf %415, %447 : vector<64x48xf32>
    %c8 = arith.constant 8 : index
    %c0_258 = arith.constant 0 : index
    %c0_259 = arith.constant 0 : index
    %449 = vector.load %arg2[%c8, %c0_258, %c0_259] : memref<9x48x16xf32, #tpu.memory_space<vmem>>, vector<1x48x16xf32>
    %450 = vector.shape_cast %449 : vector<1x48x16xf32> to vector<48x16xf32>
    %cst_260 = arith.constant dense<0.000000e+00> : vector<64x16xf32>
    %451 = tpu.matmul %381, %450, %cst_260 {dimension_numbers = #tpu.dot_dimension_numbers<[1], [0], [0], [1], [0, 0, 1, 1], [], []>} : vector<64x48xf32>, vector<48x16xf32>, vector<64x16xf32> -> vector<64x16xf32>
    %c8_261 = arith.constant 8 : index
    %c0_262 = arith.constant 0 : index
    %c0_263 = arith.constant 0 : index
    %452 = vector.load %arg3[%c8_261, %c0_262, %c0_263] : memref<9x48x16xf32, #tpu.memory_space<vmem>>, vector<1x48x16xf32>
    %453 = vector.shape_cast %452 : vector<1x48x16xf32> to vector<48x16xf32>
    %cst_264 = arith.constant dense<0.000000e+00> : vector<64x16xf32>
    %454 = tpu.matmul %381, %453, %cst_264 {dimension_numbers = #tpu.dot_dimension_numbers<[1], [0], [0], [1], [0, 0, 1, 1], [], []>} : vector<64x48xf32>, vector<48x16xf32>, vector<64x16xf32> -> vector<64x16xf32>
    %c8_265 = arith.constant 8 : index
    %c0_266 = arith.constant 0 : index
    %c0_267 = arith.constant 0 : index
    %455 = vector.load %arg4[%c8_265, %c0_266, %c0_267] : memref<9x48x16xf32, #tpu.memory_space<vmem>>, vector<1x48x16xf32>
    %456 = vector.shape_cast %455 : vector<1x48x16xf32> to vector<48x16xf32>
    %cst_268 = arith.constant dense<0.000000e+00> : vector<64x16xf32>
    %457 = tpu.matmul %381, %456, %cst_268 {dimension_numbers = #tpu.dot_dimension_numbers<[1], [0], [0], [1], [0, 0, 1, 1], [], []>} : vector<64x48xf32>, vector<48x16xf32>, vector<64x16xf32> -> vector<64x16xf32>
    %458 = vector.shape_cast %451 : vector<64x16xf32> to vector<4x16x16xf32>
    %459 = vector.shape_cast %454 : vector<64x16xf32> to vector<4x16x16xf32>
    %460 = vector.shape_cast %457 : vector<64x16xf32> to vector<4x16x16xf32>
    "tpu.trace_start"() <{level = 10 : i32, message = "bqh,bkh->bqk"}> : () -> ()
    %cst_269 = arith.constant dense<0.000000e+00> : vector<4x16x16xf32>
    %461 = tpu.matmul %458, %459, %cst_269 {dimension_numbers = #tpu.dot_dimension_numbers<[2], [2], [1], [1], [0, 0, 0, 1, 1, 1], [0], [0]>} : vector<4x16x16xf32>, vector<4x16x16xf32>, vector<4x16x16xf32> -> vector<4x16x16xf32>
    "tpu.trace_stop"() : () -> ()
    %cst_270 = arith.constant 0.144337565 : f32
    %462 = vector.broadcast %cst_270 : f32 to vector<4x16x16xf32>
    %463 = arith.mulf %461, %462 : vector<4x16x16xf32>
    %464 = vector.shape_cast %7 : vector<16x16xf32> to vector<1x16x16xf32>
    %465 = vector.broadcast %464 : vector<1x16x16xf32> to vector<4x16x16xf32>
    %466 = arith.addf %463, %465 : vector<4x16x16xf32>
    %cst_271 = arith.constant dense<0xFF800000> : vector<4x16xf32>
    %467 = vector.multi_reduction <maximumf>, %466, %cst_271 [2] : vector<4x16x16xf32> to vector<4x16xf32>
    %468 = vector.shape_cast %467 : vector<4x16xf32> to vector<4x16x1xf32>
    %469 = vector.broadcast %468 : vector<4x16x1xf32> to vector<4x16x16xf32>
    %470 = arith.subf %466, %469 : vector<4x16x16xf32>
    %471 = math.exp %470 : vector<4x16x16xf32>
    %cst_272 = arith.constant dense<0.000000e+00> : vector<4x16xf32>
    %472 = vector.multi_reduction <add>, %471, %cst_272 [2] : vector<4x16x16xf32> to vector<4x16xf32>
    %473 = vector.shape_cast %472 : vector<4x16xf32> to vector<4x16x1xf32>
    %474 = vector.broadcast %473 : vector<4x16x1xf32> to vector<4x16x16xf32>
    %475 = arith.divf %471, %474 : vector<4x16x16xf32>
    "tpu.trace_start"() <{level = 10 : i32, message = "bqk,bkh->bqh"}> : () -> ()
    %cst_273 = arith.constant dense<0.000000e+00> : vector<4x16x16xf32>
    %476 = tpu.matmul %475, %460, %cst_273 {dimension_numbers = #tpu.dot_dimension_numbers<[2], [1], [1], [2], [0, 0, 0, 1, 1, 2], [0], [0]>} : vector<4x16x16xf32>, vector<4x16x16xf32>, vector<4x16x16xf32> -> vector<4x16x16xf32>
    "tpu.trace_stop"() : () -> ()
    %477 = vector.shape_cast %476 : vector<4x16x16xf32> to vector<64x16xf32>
    %c8_274 = arith.constant 8 : index
    %c0_275 = arith.constant 0 : index
    %c0_276 = arith.constant 0 : index
    %478 = vector.load %arg5[%c8_274, %c0_275, %c0_276] : memref<9x16x48xf32, #tpu.memory_space<vmem>>, vector<1x16x48xf32>
    %479 = vector.shape_cast %478 : vector<1x16x48xf32> to vector<16x48xf32>
    %cst_277 = arith.constant dense<0.000000e+00> : vector<64x48xf32>
    %480 = tpu.matmul %477, %479, %cst_277 {dimension_numbers = #tpu.dot_dimension_numbers<[1], [0], [0], [1], [0, 0, 1, 1], [], []>} : vector<64x16xf32>, vector<16x48xf32>, vector<64x48xf32> -> vector<64x48xf32>
    %481 = arith.addf %448, %480 : vector<64x48xf32>
    %482 = arith.addf %355, %481 : vector<64x48xf32>
    %c2_278 = arith.constant 2 : index
    %c0_279 = arith.constant 0 : index
    %c0_280 = arith.constant 0 : index
    %483 = vector.load %arg6[%c2_278, %c0_279, %c0_280] : memref<3x1x48xf32, #tpu.memory_space<vmem>>, vector<1x1x48xf32>
    %484 = vector.shape_cast %483 : vector<1x1x48xf32> to vector<1x48xf32>
    %485 = vector.broadcast %484 : vector<1x48xf32> to vector<64x48xf32>
    %486 = arith.addf %482, %485 : vector<64x48xf32>
    %c2_281 = arith.constant 2 : index
    %c0_282 = arith.constant 0 : index
    %c0_283 = arith.constant 0 : index
    %487 = vector.load %arg9[%c2_281, %c0_282, %c0_283] : memref<3x1x48xf32, #tpu.memory_space<vmem>>, vector<1x1x48xf32>
    %488 = vector.shape_cast %487 : vector<1x1x48xf32> to vector<1x48xf32>
    %c2_284 = arith.constant 2 : index
    %c0_285 = arith.constant 0 : index
    %c0_286 = arith.constant 0 : index
    %489 = vector.load %arg10[%c2_284, %c0_285, %c0_286] : memref<3x1x48xf32, #tpu.memory_space<vmem>>, vector<1x1x48xf32>
    %490 = vector.shape_cast %489 : vector<1x1x48xf32> to vector<1x48xf32>
    %cst_287 = arith.constant dense<0.000000e+00> : vector<64xf32>
    %491 = vector.multi_reduction <add>, %486, %cst_287 [1] : vector<64x48xf32> to vector<64xf32>
    %492 = vector.shape_cast %491 : vector<64xf32> to vector<64x1xf32>
    %cst_288 = arith.constant 4.800000e+01 : f32
    %493 = vector.broadcast %cst_288 : f32 to vector<64x1xf32>
    %494 = arith.divf %492, %493 : vector<64x1xf32>
    %495 = vector.broadcast %494 : vector<64x1xf32> to vector<64x48xf32>
    %496 = arith.subf %486, %495 : vector<64x48xf32>
    %497 = arith.mulf %496, %496 : vector<64x48xf32>
    %cst_289 = arith.constant dense<0.000000e+00> : vector<64xf32>
    %498 = vector.multi_reduction <add>, %497, %cst_289 [1] : vector<64x48xf32> to vector<64xf32>
    %499 = vector.shape_cast %498 : vector<64xf32> to vector<64x1xf32>
    %cst_290 = arith.constant 4.800000e+01 : f32
    %500 = vector.broadcast %cst_290 : f32 to vector<64x1xf32>
    %501 = arith.divf %499, %500 : vector<64x1xf32>
    %502 = vector.broadcast %494 : vector<64x1xf32> to vector<64x48xf32>
    %503 = arith.subf %486, %502 : vector<64x48xf32>
    %cst_291 = arith.constant 9.99999974E-6 : f32
    %504 = vector.broadcast %cst_291 : f32 to vector<64x1xf32>
    %505 = arith.addf %501, %504 : vector<64x1xf32>
    %506 = math.rsqrt %505 : vector<64x1xf32>
    %507 = vector.broadcast %506 : vector<64x1xf32> to vector<64x48xf32>
    %508 = arith.mulf %503, %507 : vector<64x48xf32>
    %509 = vector.broadcast %488 : vector<1x48xf32> to vector<64x48xf32>
    %510 = arith.mulf %508, %509 : vector<64x48xf32>
    %511 = vector.broadcast %490 : vector<1x48xf32> to vector<64x48xf32>
    %512 = arith.addf %510, %511 : vector<64x48xf32>
    %c2_292 = arith.constant 2 : index
    %c0_293 = arith.constant 0 : index
    %c0_294 = arith.constant 0 : index
    %513 = vector.load %arg11[%c2_292, %c0_293, %c0_294] : memref<3x48x192xf32, #tpu.memory_space<vmem>>, vector<1x48x192xf32>
    %514 = vector.shape_cast %513 : vector<1x48x192xf32> to vector<48x192xf32>
    %cst_295 = arith.constant dense<0.000000e+00> : vector<64x192xf32>
    %515 = tpu.matmul %512, %514, %cst_295 {dimension_numbers = #tpu.dot_dimension_numbers<[1], [0], [0], [1], [0, 0, 1, 1], [], []>} : vector<64x48xf32>, vector<48x192xf32>, vector<64x192xf32> -> vector<64x192xf32>
    %c2_296 = arith.constant 2 : index
    %c0_297 = arith.constant 0 : index
    %c0_298 = arith.constant 0 : index
    %516 = vector.load %arg12[%c2_296, %c0_297, %c0_298] : memref<3x1x192xf32, #tpu.memory_space<vmem>>, vector<1x1x192xf32>
    %517 = vector.shape_cast %516 : vector<1x1x192xf32> to vector<1x192xf32>
    %518 = vector.broadcast %517 : vector<1x192xf32> to vector<64x192xf32>
    %519 = arith.addf %515, %518 : vector<64x192xf32>
    %cst_299 = arith.constant 0.000000e+00 : f32
    %520 = vector.broadcast %cst_299 : f32 to vector<64x192xf32>
    %521 = arith.maximumf %519, %520 : vector<64x192xf32>
    %c2_300 = arith.constant 2 : index
    %c0_301 = arith.constant 0 : index
    %c0_302 = arith.constant 0 : index
    %522 = vector.load %arg13[%c2_300, %c0_301, %c0_302] : memref<3x192x48xf32, #tpu.memory_space<vmem>>, vector<1x192x48xf32>
    %523 = vector.shape_cast %522 : vector<1x192x48xf32> to vector<192x48xf32>
    %cst_303 = arith.constant dense<0.000000e+00> : vector<64x48xf32>
    %524 = tpu.matmul %521, %523, %cst_303 {dimension_numbers = #tpu.dot_dimension_numbers<[1], [0], [0], [1], [0, 0, 1, 1], [], []>} : vector<64x192xf32>, vector<192x48xf32>, vector<64x48xf32> -> vector<64x48xf32>
    %525 = arith.addf %486, %524 : vector<64x48xf32>
    %c2_304 = arith.constant 2 : index
    %c0_305 = arith.constant 0 : index
    %c0_306 = arith.constant 0 : index
    %526 = vector.load %arg14[%c2_304, %c0_305, %c0_306] : memref<3x1x48xf32, #tpu.memory_space<vmem>>, vector<1x1x48xf32>
    %527 = vector.shape_cast %526 : vector<1x1x48xf32> to vector<1x48xf32>
    %528 = vector.broadcast %527 : vector<1x48xf32> to vector<64x48xf32>
    %529 = arith.addf %525, %528 : vector<64x48xf32>
    %c0_307 = arith.constant 0 : index
    %c0_308 = arith.constant 0 : index
    %530 = vector.load %arg15[%c0_307, %c0_308] : memref<48x128xf32, #tpu.memory_space<vmem>>, vector<48x128xf32>
    %cst_309 = arith.constant dense<0.000000e+00> : vector<64x128xf32>
    %531 = tpu.matmul %529, %530, %cst_309 {dimension_numbers = #tpu.dot_dimension_numbers<[1], [0], [0], [1], [0, 0, 1, 1], [], []>} : vector<64x48xf32>, vector<48x128xf32>, vector<64x128xf32> -> vector<64x128xf32>
    %c0_310 = arith.constant 0 : index
    %c0_311 = arith.constant 0 : index
    %532 = vector.load %arg16[%c0_310, %c0_311] : memref<1x128xf32, #tpu.memory_space<vmem>>, vector<1x128xf32>
    %533 = vector.broadcast %532 : vector<1x128xf32> to vector<64x128xf32>
    %534 = arith.addf %531, %533 : vector<64x128xf32>
    %535 = vector.shape_cast %534 : vector<64x128xf32> to vector<4x16x128xf32>
    %c0_312 = arith.constant 0 : index
    %c0_313 = arith.constant 0 : index
    %c0_314 = arith.constant 0 : index
    %536 = vector.load %arg17[%c0_312, %c0_313, %c0_314] : memref<4x16x128xf32, #tpu.memory_space<vmem>>, vector<4x16x128xf32>
    tpu.vector_store %arg17[%c0_312, %c0_313, %c0_314], %535 {strides = array<i32>} : memref<4x16x128xf32, #tpu.memory_space<vmem>>, vector<4x16x128xf32>,
    return
  }
  func.func @transform_0(%arg0: i32) -> (i32, i32, i32) {
    %c0_i32 = arith.constant 0 : i32
    %c0_i32_0 = arith.constant 0 : i32
    %c0_i32_1 = arith.constant 0 : i32
    return %arg0, %c0_i32, %c0_i32_0 : i32, i32, i32
  }
  func.func @transform_1(%arg0: i32) -> (i32, i32, i32) {
    %c0_i32 = arith.constant 0 : i32
    %c0_i32_0 = arith.constant 0 : i32
    %c0_i32_1 = arith.constant 0 : i32
    %c0_i32_2 = arith.constant 0 : i32
    return %c0_i32, %c0_i32_0, %c0_i32_1 : i32, i32, i32
  }
  func.func @transform_2(%arg0: i32) -> (i32, i32, i32) {
    %c0_i32 = arith.constant 0 : i32
    %c0_i32_0 = arith.constant 0 : i32
    %c0_i32_1 = arith.constant 0 : i32
    %c0_i32_2 = arith.constant 0 : i32
    return %c0_i32, %c0_i32_0, %c0_i32_1 : i32, i32, i32
  }
  func.func @transform_3(%arg0: i32) -> (i32, i32, i32) {
    %c0_i32 = arith.constant 0 : i32
    %c0_i32_0 = arith.constant 0 : i32
    %c0_i32_1 = arith.constant 0 : i32
    %c0_i32_2 = arith.constant 0 : i32
    return %c0_i32, %c0_i32_0, %c0_i32_1 : i32, i32, i32
  }
  func.func @transform_4(%arg0: i32) -> (i32, i32, i32) {
    %c0_i32 = arith.constant 0 : i32
    %c0_i32_0 = arith.constant 0 : i32
    %c0_i32_1 = arith.constant 0 : i32
    %c0_i32_2 = arith.constant 0 : i32
    return %c0_i32, %c0_i32_0, %c0_i32_1 : i32, i32, i32
  }
  func.func @transform_5(%arg0: i32) -> (i32, i32, i32) {
    %c0_i32 = arith.constant 0 : i32
    %c0_i32_0 = arith.constant 0 : i32
    %c0_i32_1 = arith.constant 0 : i32
    %c0_i32_2 = arith.constant 0 : i32
    return %c0_i32, %c0_i32_0, %c0_i32_1 : i32, i32, i32
  }
  func.func @transform_6(%arg0: i32) -> (i32, i32, i32) {
    %c0_i32 = arith.constant 0 : i32
    %c0_i32_0 = arith.constant 0 : i32
    %c0_i32_1 = arith.constant 0 : i32
    %c0_i32_2 = arith.constant 0 : i32
    return %c0_i32, %c0_i32_0, %c0_i32_1 : i32, i32, i32
  }
  func.func @transform_7(%arg0: i32) -> (i32, i32, i32) {
    %c0_i32 = arith.constant 0 : i32
    %c0_i32_0 = arith.constant 0 : i32
    %c0_i32_1 = arith.constant 0 : i32
    %c0_i32_2 = arith.constant 0 : i32
    return %c0_i32, %c0_i32_0, %c0_i32_1 : i32, i32, i32
  }
  func.func @transform_8(%arg0: i32) -> (i32, i32, i32) {
    %c0_i32 = arith.constant 0 : i32
    %c0_i32_0 = arith.constant 0 : i32
    %c0_i32_1 = arith.constant 0 : i32
    %c0_i32_2 = arith.constant 0 : i32
    return %c0_i32, %c0_i32_0, %c0_i32_1 : i32, i32, i32
  }
  func.func @transform_9(%arg0: i32) -> (i32, i32, i32) {
    %c0_i32 = arith.constant 0 : i32
    %c0_i32_0 = arith.constant 0 : i32
    %c0_i32_1 = arith.constant 0 : i32
    %c0_i32_2 = arith.constant 0 : i32
    return %c0_i32, %c0_i32_0, %c0_i32_1 : i32, i32, i32
  }
  func.func @transform_10(%arg0: i32) -> (i32, i32, i32) {
    %c0_i32 = arith.constant 0 : i32
    %c0_i32_0 = arith.constant 0 : i32
    %c0_i32_1 = arith.constant 0 : i32
    %c0_i32_2 = arith.constant 0 : i32
    return %c0_i32, %c0_i32_0, %c0_i32_1 : i32, i32, i32
  }
  func.func @transform_11(%arg0: i32) -> (i32, i32, i32) {
    %c0_i32 = arith.constant 0 : i32
    %c0_i32_0 = arith.constant 0 : i32
    %c0_i32_1 = arith.constant 0 : i32
    %c0_i32_2 = arith.constant 0 : i32
    return %c0_i32, %c0_i32_0, %c0_i32_1 : i32, i32, i32
  }
  func.func @transform_12(%arg0: i32) -> (i32, i32, i32) {
    %c0_i32 = arith.constant 0 : i32
    %c0_i32_0 = arith.constant 0 : i32
    %c0_i32_1 = arith.constant 0 : i32
    %c0_i32_2 = arith.constant 0 : i32
    return %c0_i32, %c0_i32_0, %c0_i32_1 : i32, i32, i32
  }
  func.func @transform_13(%arg0: i32) -> (i32, i32, i32) {
    %c0_i32 = arith.constant 0 : i32
    %c0_i32_0 = arith.constant 0 : i32
    %c0_i32_1 = arith.constant 0 : i32
    %c0_i32_2 = arith.constant 0 : i32
    return %c0_i32, %c0_i32_0, %c0_i32_1 : i32, i32, i32
  }
  func.func @transform_14(%arg0: i32) -> (i32, i32) {
    %c0_i32 = arith.constant 0 : i32
    %c0_i32_0 = arith.constant 0 : i32
    %c0_i32_1 = arith.constant 0 : i32
    return %c0_i32, %c0_i32_0 : i32, i32
  }
  func.func @transform_15(%arg0: i32) -> (i32, i32) {
    %c0_i32 = arith.constant 0 : i32
    %c0_i32_0 = arith.constant 0 : i32
    %c0_i32_1 = arith.constant 0 : i32
    return %c0_i32, %c0_i32_0 : i32, i32
  }
  func.func @transform_16(%arg0: i32) -> (i32, i32, i32) {
    %c0_i32 = arith.constant 0 : i32
    %c0_i32_0 = arith.constant 0 : i32
    %c0_i32_1 = arith.constant 0 : i32
    return %arg0, %c0_i32, %c0_i32_0 : i32, i32, i32
  }
}

</mosaic_0001>

<bundles_post_ra>
// kernel: tpu_custom_call.1
= control target key start
LH: loop header
LB: loop body
LE: loop exit
PB: predicated region body
PF: predicated region fallthrough
CT: control target
= control target key end

     0   :  { %s20774_s0 = inlined_call_operand.vmem [shape: f32[8,16,48], index: 0, kind: input, shape index: {}]   ;;  %s20775_s1 = inlined_call_operand.vmem [shape: f32[9,48,16], index: 1, kind: input, shape index: {}]   ;;  %s20776_s2 = inlined_call_operand.vmem [shape: f32[9,48,16], index: 2, kind: input, shape index: {}]   ;;  %s20777_s3 = inlined_call_operand.vmem [shape: f32[9,48,16], index: 3, kind: input, shape index: {}]   ;;  %s20778_s4 = inlined_call_operand.vmem [shape: f32[9,16,48], index: 4, kind: input, shape index: {}]   ;;  %s20779_s5 = inlined_call_operand.vmem [shape: f32[3,1,48], index: 5, kind: input, shape index: {}]   ;;  %s20780_s6 = inlined_call_operand.vmem [shape: f32[3,1,48], index: 6, kind: input, shape index: {}]   ;;  %s20781_s7 = inlined_call_operand.vmem [shape: f32[3,1,48], index: 7, kind: input, shape index: {}]   ;;  %s20782_s8 = inlined_call_operand.vmem [shape: f32[3,1,48], index: 8, kind: input, shape index: {}]   ;;  %s20783_s9 = inlined_call_operand.vmem [shape: f32[3,1,48], index: 9, kind: input, shape index: {}]   ;;  %s20784_s10 = inlined_call_operand.vmem [shape: f32[3,48,192], index: 10, kind: input, shape index: {}]   ;;  %s20785_s11 = inlined_call_operand.vmem [shape: f32[3,1,192], index: 11, kind: input, shape index: {}]   ;;  %s20786_s12 = inlined_call_operand.vmem [shape: f32[3,192,48], index: 12, kind: input, shape index: {}]   ;;  %s20787_s13 = inlined_call_operand.vmem [shape: f32[3,1,48], index: 13, kind: input, shape index: {}]   ;;  %s20788_s14 = inlined_call_operand.vmem [shape: f32[48,128], index: 14, kind: input, shape index: {}]   ;;  %s20789_s15 = inlined_call_operand.vmem [shape: f32[1,128], index: 15, kind: input, shape index: {}]   ;;  %s20790_s16 = inlined_call_operand.hbm [shape: f32[8,16,128], index: 16, kind: output, shape index: {}]  }
   0x1   :  { %20795 = sst [smem:[#allocation9_spill]] %s20774_s0 }
   0x2   :  { %20796 = sst [smem:[#allocation10_spill]] %s20775_s1 }
   0x3   :  { %21 = vsyncpa [#allocation3], 0 }
   0x4   :  { %23 = vsyncpa [#allocation3 + $0x1], 0  ;;  %s17531_s21 = smov 0   ;;  %s17533_s22 = smov 0  }
   0x5   :  { %s17535_s23 = smov 0   ;;  %s17537_s24 = smov 0  }
   0x6 LB: > { %20797 = sst [smem:[#allocation5_spill]] %s17435_s23  ;;  %s17552_s25 = sadd.s32 4294967295, %s17439_s24   ;;  %s17439_s24 = sphi %s17537_s24, %s20806_s24   ;;  %s17435_s23 = sphi %s17535_s23, %s20808_s23   ;;  %s17431_s22 = sphi %s17533_s22, %s20810_s22   ;;  %s17427_s21 = sphi %s17531_s21, %s20809_s21  }
   0x7   : > { %s14012_s26 = sadd.s32 4294967294, %s17439_s24   ;;  %s17556_s27 = sadd.s32 1, %s17439_s24  }
   0x8   : > { %20798 = sst [smem:[#allocation6_spill]] %s17556_s27  ;;  %s377_s28 = sadd.s32 1, %s17435_s23 }
   0x9   : > { %s374_s29 = ssub.s32 %s17439_s24, %s17556_s27  ;;  %p387_p0 = scmp.ne.s32.totalorder %s17435_s23, %s17431_s22 }
   0xa   : > { %p375_p1 = scmp.eq.s32.totalorder %s374_s29, 0  ;;  %p388_p2 = scmp.eq.s32.totalorder %s17552_s25, 1 }
   0xb   : > { %p393_p3 = scmp.ne.s32.totalorder %s17431_s22, %s17427_s21  ;;  %p394_p4 = scmp.eq.s32.totalorder %s14012_s26, 1 }
   0xc   : > { %s17567_s30 = scalar_select %p375_p1, %s17435_s23, %s377_s28  }
   0xd   : > { %p17569_p5 = por %p388_p2, %p387_p0  ;;  %p17573_p6 = por %p394_p4, %p393_p3 }
   0xe   : > { %20799 = sst [smem:[#allocation7_spill]] %s17567_s30  ;;  %p14015_p7 = scmp.ge.s32.totalorder %s17439_s24, 1 }
   0xf   : > { %s20801_s17 = scalar_select %p17573_p6, 1, 0 }
  0x10   : > { %p467_p8 = scmp.lt.s32.totalorder %s17439_s24, 3 }
  0x11   : > { %20802 = sst [smem:[#allocation8_spill]] %s20801_s17 }
  0x12   : > { %p468_p9 = pnand %p14015_p7, %p467_p8 }
  0x13   : > { %s14017_s18 = sshll.u32 (!%p468_p9), %s17552_s25, 2  ;;  %s20803_s28 = sld [smem:[#allocation9_spill]] (!%p468_p9) }
  0x14   : > { %471 = sbr.rel (%p468_p9) target bundleno = 11722 (0x2dca), region = 84  ;;  %p519_p10 = scmp.lt.s32.totalorder (!%p468_p9), %s14017_s18, 7 }
  0x15   : > { %s20804_s1 = sld [smem:[#allocation10_spill]] (!%p468_p9)  ;;  %s17443_s26 = smov (!%p468_p9), [#allocation2]  }
  0x16   : > { %s17383_s30 = sshll.u32 (!%p468_p9), %s17443_s26, 4  ;;  %s17384_s30 = int_to_ptr.vmem [resolvable:$false] %s17383_s30 }
  0x19   : > { %s20812_s18 = smov (!%p519_p10, %s14017_s18), 7  ;;  %vm545_vm0 = vcmask 392192   ;;  %v930_v57 = vld [vmem:[%s20777_s3 + $0x28] sm:$0xff]  ;;  %v929_v59 = vld [vmem:[%s20777_s3 + $0x20] sm:$0xff]  ;;  %v928_v61 = vld [vmem:[%s20777_s3 + $0x18] sm:$0xff]  ;;  %vm1036_vm1 = vcmask 130048  }
  0x1a   : > { %s14851_s19 = sshll.u32 %s20812_s18, 4  ;;  %15672 = vmatprep.subr.mxu0 %v930_v57  ;;  %v927_v63 = vld [vmem:[%s20777_s3 + $0x10] sm:$0xff]  ;;  %vm4798_vm4 = vcmask 523264  }
  0x1b   : > { %s17583_s29 = scalar_lea.vmem %s20803_s28, %s14851_s19  ;;  %v684_v56 = vld [vmem:[%s20804_s1 + $0x28] sm:$0xff]  ;;  %15673 = vmatpush3.msra.mxu0 %v930_v57  ;;  %v683_v58 = vld [vmem:[%s20804_s1 + $0x20] sm:$0xff]  ;;  %v682_v60 = vld [vmem:[%s20804_s1 + $0x18] sm:$0xff]  ;;  %s515_s19 = sand.u32 1, %s17431_s22  }
  0x1c   : > { %v526_v0 = vld [vmem:[%s17583_s29] sm:$0xff]  ;;  %v528_v1 = vld [vmem:[%s17583_s29 + $0x10] sm:$0xff]  ;;  %v527_v2 = vld [vmem:[%s17583_s29 + $0x8] sm:$0xff]  ;;  %15624 = vmatprep.subr.mxu1 %v684_v56  ;;  %15674 = vmatprep.subr.mxu0 %v929_v59  ;;  %s14016_s20 = sshll.u32 %s515_s19, 6  ;;  %s14853_s28 = sshll.u32 %s17552_s25, 10 }
  0x1d   : > { %v546_v3 = vsel %vm545_vm0, %v526_v0, 0.0  ;;  %v552_v4 = vsel %vm545_vm0, %v528_v1, 0.0  ;;  %v529_v5 = vld [vmem:[%s17583_s29 + $0x18] sm:$0xff]  ;;  %v549_v6 = vsel %vm545_vm0, %v527_v2, 0.0  ;;  %v530_v8 = vld [vmem:[%s17583_s29 + $0x20] sm:$0xff]  ;;  %v531_v9 = vld [vmem:[%s17583_s29 + $0x28] sm:$0xff]  ;;  %15625 = vmatpush3.msra.mxu1 %v684_v56  ;;  %15675 = vmatpush3.msra.mxu0 %v929_v59  ;;  %s20728_s18 = scalar_lea.hbm %s20790_s16, %s14853_s28 }
  0x1e   : > { %547 = vadd.xlane.f32.xlu0 %v546_v3  ;;  %553 = vadd.xlane.f32.xlu1 %v552_v4  ;;  %v555_v7 = vsel %vm545_vm0, %v529_v5, 0.0  ;;  %v558_v10 = vsel %vm545_vm0, %v530_v8, 0.0  ;;  %v561_v11 = vsel %vm545_vm0, %v531_v9, 0.0  ;;  %v532_v12 = vld [vmem:[%s17583_s29 + $0x30] sm:$0xff]  ;;  %v533_v13 = vld [vmem:[%s17583_s29 + $0x38] sm:$0xff]  ;;  %v925_v3 = vld [vmem:[%s20777_s3] sm:$0xff] }
  0x1f   : > { %v564_v14 = vsel %vm545_vm0, %v532_v12, 0.0  ;;  %v567_v15 = vsel %vm545_vm0, %v533_v13, 0.0  ;;  %15626 = vmatprep.subr.mxu1 %v683_v58  ;;  %15676 = vmatprep.subr.mxu0 %v928_v61  ;;  %v681_v62 = vld [vmem:[%s20804_s1 + $0x10] sm:$0xff]  ;;  %v17680_v4 = vld [vmem:[%s20776_s2 + $0x28] sm:$0xff]  ;;  %s517_s17 = scalar_lea.vmem [#allocation2], %s14016_s20  ;;  %s20734_s20 = scalar_lea.sflag [#allocation3], %s515_s19 }
  0x20   : > { %15627 = vmatpush3.msra.mxu1 %v683_v58  ;;  %15677 = vmatpush3.msra.mxu0 %v928_v61  ;;  %s17385_s28 = scalar_lea.vmem %s17384_s30, 2048 }
  0x21   : > { %15628 = vmatprep.subr.mxu1 %v682_v60  ;;  %15678 = vmatprep.subr.mxu0 %v927_v63 }
  0x22   : > { %550 = vadd.xlane.f32.xlu0 %v549_v6  ;;  %556 = vadd.xlane.f32.xlu1 %v555_v7 }
  0x23   : > { %15629 = vmatpush3.msra.mxu1 %v682_v60  ;;  %15679 = vmatpush3.msra.mxu0 %v927_v63  ;;  %v817_v60 = vld [vmem:[%s20776_s2 + $0x18] sm:$0xff] }
  0x24   : > { %15630 = vmatprep.subr.mxu1 %v681_v62 }
  0x25   : > { %15631 = vmatpush3.msra.mxu1 %v681_v62 }
  0x26   : > { %559 = vadd.xlane.f32.xlu0 %v558_v10  ;;  %562 = vadd.xlane.f32.xlu1 %v561_v11 }
  0x2a   : > { %565 = vadd.xlane.f32.xlu0 %v564_v14  ;;  %568 = vadd.xlane.f32.xlu1 %v567_v15 }
  0xa7   : > { %v548_v16 = vpop.xlane.xlu0 %547  ;;  %v554_v17 = vpop.xlane.xlu1 %553 }
  0xa8   : > { %v571_v18 = vmul.f32 0.020833334, %v548_v16  ;;  %v573_v19 = vmul.f32 0.020833334, %v554_v17 }
  0xaa   : > { %v17601_v20 = vsub.f32 %v526_v0, %v571_v18  ;;  %v17603_v21 = vsub.f32 %v528_v1, %v573_v19  ;;  %v680_v0 = vld [vmem:[%s20804_s1 + $0x8] sm:$0xff] }
  0xab   : > { %v551_v22 = vpop.xlane.xlu0 %550  ;;  %v557_v23 = vpop.xlane.xlu1 %556  ;;  %v926_v1 = vld [vmem:[%s20777_s3 + $0x8] sm:$0xff]  ;;  %15632 = vmatprep.subr.mxu1 %v680_v0 }
  0xac   : > { %v572_v24 = vmul.f32 0.020833334, %v551_v22  ;;  %v574_v25 = vmul.f32 0.020833334, %v557_v23  ;;  %v587_v26 = vmul.f32 %v17601_v20, %v17601_v20  ;;  %v589_v27 = vmul.f32 %v17603_v21, %v17603_v21  ;;  %15680 = vmatprep.subr.mxu0 %v926_v1  ;;  %15633 = vmatpush3.msra.mxu1 %v680_v0  ;;  %v816_v0 = vld [vmem:[%s20776_s2 + $0x10] sm:$0xff] }
  0xad   : > { %15681 = vmatpush3.msra.mxu0 %v926_v1 }
  0xae   : > { %v17609_v28 = vsub.f32 %v527_v2, %v572_v24  ;;  %v17611_v29 = vsub.f32 %v529_v5, %v574_v25  ;;  %v595_v30 = vsel %vm545_vm0, %v587_v26, 0.0  ;;  %v601_v33 = vsel %vm545_vm0, %v589_v27, 0.0  ;;  %v679_v2 = vld [vmem:[%s20804_s1] sm:$0xff]  ;;  %15682 = vmatprep.subr.mxu0 %v925_v3 }
  0xaf   : > { %596 = vadd.xlane.f32.xlu0 %v595_v30  ;;  %v560_v31 = vpop.xlane.xlu0 %559  ;;  %v563_v32 = vpop.xlane.xlu1 %562  ;;  %15634 = vmatprep.subr.mxu1 %v679_v2 }
  0xb0   : > { %v575_v34 = vmul.f32 0.020833334, %v560_v31  ;;  %v576_v35 = vmul.f32 0.020833334, %v563_v32  ;;  %v588_v36 = vmul.f32 %v17609_v28, %v17609_v28  ;;  %v590_v37 = vmul.f32 %v17611_v29, %v17611_v29  ;;  %15635 = vmatpush3.msra.mxu1 %v679_v2  ;;  %15683 = vmatpush3.msra.mxu0 %v925_v3  ;;  %v814_v3 = vld [vmem:[%s20776_s2] sm:$0xff] }
  0xb1   : > { %15648 = vmatprep.subr.mxu1 %v17680_v4 }
  0xb2   : > { %v17619_v38 = vsub.f32 %v530_v8, %v575_v34  ;;  %v17621_v39 = vsub.f32 %v531_v9, %v576_v35  ;;  %v598_v40 = vsel %vm545_vm0, %v588_v36, 0.0  ;;  %v604_v43 = vsel %vm545_vm0, %v590_v37, 0.0  ;;  %v14021_v36 = vld [vmem:[%s20781_s7] ss:$0 sm:$0xff] }
  0xb3   : > { %602 = vadd.xlane.f32.xlu0 %v601_v33  ;;  %599 = vadd.xlane.f32.xlu1 %v598_v40  ;;  %v566_v41 = vpop.xlane.xlu0 %565  ;;  %v569_v42 = vpop.xlane.xlu1 %568  ;;  %v14020_v33 = vld [vmem:[%s20780_s6] ss:$0 sm:$0xff] }
  0xb4   : > { %v577_v44 = vmul.f32 0.020833334, %v566_v41  ;;  %v578_v45 = vmul.f32 0.020833334, %v569_v42  ;;  %v591_v46 = vmul.f32 %v17619_v38, %v17619_v38  ;;  %v592_v47 = vmul.f32 %v17621_v39, %v17621_v39 }
  0xb6   : > { %v17629_v48 = vsub.f32 %v532_v12, %v577_v44  ;;  %v17631_v49 = vsub.f32 %v533_v13, %v578_v45  ;;  %v607_v50 = vsel %vm545_vm0, %v591_v46, 0.0  ;;  %v610_v51 = vsel %vm545_vm0, %v592_v47, 0.0 }
  0xb7   : > { %605 = vadd.xlane.f32.xlu1 %v604_v43  ;;  %608 = vadd.xlane.f32.xlu0 %v607_v50 }
  0xb8   : > { %v593_v52 = vmul.f32 %v17629_v48, %v17629_v48  ;;  %v594_v53 = vmul.f32 %v17631_v49, %v17631_v49 }
  0xba   : > { %v613_v54 = vsel %vm545_vm0, %v593_v52, 0.0  ;;  %v616_v55 = vsel %vm545_vm0, %v594_v53, 0.0 }
  0xbb   : > { %611 = vadd.xlane.f32.xlu1 %v610_v51  ;;  %614 = vadd.xlane.f32.xlu0 %v613_v54 }
  0xbf   : > { %617 = vadd.xlane.f32.xlu1 %v616_v55 }
 0x138   : > { %v597_v5 = vpop.xlane.xlu0 %596 }
 0x139   : > { %v619_v6 = vmul.f32 0.020833334, %v597_v5 }
 0x13b   : > { %v627_v7 = vadd.f32 1e-05, %v619_v6 }
 0x13c   : > { %v600_v8 = vpop.xlane.xlu1 %599  ;;  %v603_v9 = vpop.xlane.xlu0 %602 }
 0x13d   : > { %16987 = vrsqrt.f32 %v627_v7  ;;  %v620_v10 = vmul.f32 0.020833334, %v600_v8  ;;  %v621_v11 = vmul.f32 0.020833334, %v603_v9 }
 0x13f   : > { %v628_v12 = vadd.f32 1e-05, %v620_v10  ;;  %v629_v13 = vadd.f32 1e-05, %v621_v11 }
 0x140   : > { %v606_v14 = vpop.xlane.xlu1 %605  ;;  %v609_v15 = vpop.xlane.xlu0 %608 }
 0x141   : > { %16989 = vrsqrt.f32 %v628_v12  ;;  %v622_v16 = vmul.f32 0.020833334, %v606_v14  ;;  %v623_v17 = vmul.f32 0.020833334, %v609_v15 }
 0x142   : > { %16991 = vrsqrt.f32 %v629_v13 }
 0x143   : > { %v630_v18 = vadd.f32 1e-05, %v622_v16  ;;  %v631_v19 = vadd.f32 1e-05, %v623_v17 }
 0x144   : > { %v612_v22 = vpop.xlane.xlu1 %611  ;;  %v615_v23 = vpop.xlane.xlu0 %614 }
 0x145   : > { %16993 = vrsqrt.f32 %v630_v18  ;;  %v624_v24 = vmul.f32 0.020833334, %v612_v22  ;;  %v625_v25 = vmul.f32 0.020833334, %v615_v23 }
 0x146   : > { %16995 = vrsqrt.f32 %v631_v19 }
 0x147   : > { %v632_v26 = vadd.f32 1e-05, %v624_v24  ;;  %v633_v27 = vadd.f32 1e-05, %v625_v25 }
 0x148   : > { %v618_v30 = vpop.xlane.xlu1 %617 }
 0x149   : > { %16997 = vrsqrt.f32 %v632_v26  ;;  %v626_v31 = vmul.f32 0.020833334, %v618_v30 }
 0x14a   : > { %v16988_v32 = vpop.eup %16987  ;;  %16999 = vrsqrt.f32 %v633_v27 }
 0x14b   : > { %v643_v34 = vmul.f32 %v16988_v32, %v17601_v20  ;;  %v634_v35 = vadd.f32 1e-05, %v626_v31  ;;  %v534_v32 = vlaneseq }
 0x14d   : > { %v657_v37 = vmul.f32 %v14020_v33, %v643_v34  ;;  %17001 = vrsqrt.f32 %v634_v35  ;;  %v538_v35 = vand.u32 127, %v534_v32 }
 0x14e   : > { %v16990_v40 = vpop.eup %16989 }
 0x14f   : > { %v16992_v41 = vpop.eup %16991  ;;  %v17690_v42 = vadd.f32 %v14021_v36, %v657_v37  ;;  %v644_v43 = vmul.f32 %v16990_v40, %v17609_v28  ;;  %v17441_v37 = vmov -1e+30  }
 0x150   : > { %v645_v44 = vmul.f32 %v16992_v41, %v17603_v21  ;;  %v818_v21 = vld [vmem:[%s20776_s2 + $0x20] sm:$0xff] }
 0x151   : > { %v658_v45 = vmul.f32 %v14020_v33, %v644_v43  ;;  %15636 = vmatprep.mubr.msk.f32.mxu1 %vm545_vm0, %v17690_v42  ;;  %15684 = vmatprep.mubr.msk.f32.mxu0 %vm545_vm0, %v17690_v42 }
 0x152   : > { %v16994_v20 = vpop.eup %16993  ;;  %v659_v46 = vmul.f32 %v14020_v33, %v645_v44 }
 0x153   : > { %v16996_v47 = vpop.eup %16995  ;;  %v17698_v50 = vadd.f32 %v14021_v36, %v658_v45  ;;  %v646_v51 = vmul.f32 %v16994_v20, %v17611_v29 }
 0x154   : > { %v17701_v52 = vadd.f32 %v14021_v36, %v659_v46  ;;  %v647_v28 = vmul.f32 %v16996_v47, %v17619_v38 }
 0x155   : > { %v660_v53 = vmul.f32 %v14020_v33, %v646_v51  ;;  %15637 = vmatmul.mubr.msk.f32.vlgmr.msra.gmra.mxu1 %vm545_vm0, %v17698_v50  ;;  %15685 = vmatmul.mubr.msk.f32.vlgmr.msra.gmra.mxu0 %vm545_vm0, %v17698_v50 }
 0x156   : > { %v16998_v54 = vpop.eup %16997  ;;  %v661_v55 = vmul.f32 %v14020_v33, %v647_v28  ;;  %15639 = vmatprep.mubr.msk.f32.mxu1 %vm545_vm0, %v17701_v52  ;;  %15687 = vmatprep.mubr.msk.f32.mxu0 %vm545_vm0, %v17701_v52 }
 0x157   : > { %v17000_v29 = vpop.eup %16999  ;;  %v17715_v38 = vadd.f32 %v14021_v36, %v660_v53  ;;  %v648_v56 = vmul.f32 %v16998_v54, %v17621_v39  ;;  %15649 = vmatpush3.msra.mxu1 %v17680_v4 }
 0x158   : > { %v17719_v57 = vadd.f32 %v14021_v36, %v661_v55  ;;  %v649_v58 = vmul.f32 %v17000_v29, %v17629_v48  ;;  %15650 = vmatprep.subr.mxu1 %v818_v21 }
 0x159   : > { %v662_v59 = vmul.f32 %v14020_v33, %v648_v56  ;;  %15640 = vmatmul.mubr.msk.f32.gmra.mxu1 %vm545_vm0, %v17715_v38  ;;  %15688 = vmatmul.mubr.msk.f32.gmra.mxu0 %vm545_vm0, %v17715_v38 }
 0x15a   : > { %v17002_v61 = vpop.eup %17001  ;;  %v663_v39 = vmul.f32 %v14020_v33, %v649_v58  ;;  %15642 = vmatprep.mubr.msk.f32.mxu1 %vm545_vm0, %v17719_v57  ;;  %15690 = vmatprep.mubr.msk.f32.mxu0 %vm545_vm0, %v17719_v57 }
 0x15b   : > { %v17733_v48 = vadd.f32 %v14021_v36, %v662_v59  ;;  %v650_v62 = vmul.f32 %v17002_v61, %v17631_v49  ;;  %15651 = vmatpush3.msra.mxu1 %v818_v21  ;;  %v815_v49 = vld [vmem:[%s20776_s2 + $0x8] sm:$0xff] }
 0x15c   : > { %v17736_v63 = vadd.f32 %v14021_v36, %v663_v39  ;;  %15652 = vmatprep.subr.mxu1 %v817_v60 }
 0x15d   : > { %v664_v1 = vmul.f32 %v14020_v33, %v650_v62  ;;  %15643 = vmatmul.mubr.msk.f32.gmra.mxu1 %vm545_vm0, %v17733_v48  ;;  %15691 = vmatmul.mubr.msk.f32.gmra.mxu0 %vm545_vm0, %v17733_v48  ;;  %v17810_v33 = vshrl.u32 %v534_v32, 7 }
 0x15e   : > { %15645 = vmatprep.mubr.msk.f32.mxu1 %vm545_vm0, %v17736_v63  ;;  %15653 = vmatpush3.msra.mxu1 %v817_v60 }
 0x15f   : > { %v17750_v2 = vadd.f32 %v14021_v36, %v664_v1  ;;  %15693 = vmatprep.mubr.msk.f32.mxu0 %vm545_vm0, %v17736_v63  ;;  %15654 = vmatprep.subr.mxu1 %v816_v0  ;;  %v536_v34 = vadd.s32 8, %v17810_v33  ;;  %vm539_vm3 = vcmp.le.s32.totalorder %v538_v35, %v17810_v33 }
 0x160   : > { %15655 = vmatpush3.msra.mxu1 %v816_v0  ;;  %v17816_v44 = vsel %vm539_vm3, 0.0, %v17441_v37 }
 0x161   : > { %15646 = vmatmul.mubr.msk.f32.gmra.mxu1 %vm545_vm0, %v17750_v2  ;;  %15656 = vmatprep.subr.mxu1 %v815_v49  ;;  %vm540_vm2 = vcmp.le.s32.totalorder %v538_v35, %v536_v34 }
 0x162   : > { %15694 = vmatmul.mubr.msk.f32.gmra.mxu0 %vm545_vm0, %v17750_v2  ;;  %15657 = vmatpush3.msra.mxu1 %v815_v49  ;;  %v17814_v40 = vsel %vm540_vm2, 0.0, %v17441_v37 }
 0x163   : > { %15660 = vmatprep.mubr.msk.f32.mxu1 %vm545_vm0, %v17690_v42  ;;  %15658 = vmatprep.subr.mxu1 %v814_v3 }
 0x164   : > { %15659 = vmatpush3.msra.mxu1 %v814_v3 }
 0x165   : > { %15661 = vmatmul.mubr.msk.f32.vlgmr.msra.gmra.mxu1 %vm545_vm0, %v17698_v50 }
 0x166   : > { %15663 = vmatprep.mubr.msk.f32.mxu1 %vm545_vm0, %v17701_v52 }
 0x169   : > { %15664 = vmatmul.mubr.msk.f32.gmra.mxu1 %vm545_vm0, %v17715_v38 }
 0x16a   : > { %15666 = vmatprep.mubr.msk.f32.mxu1 %vm545_vm0, %v17719_v57 }
 0x16d   : > { %15667 = vmatmul.mubr.msk.f32.gmra.mxu1 %vm545_vm0, %v17733_v48 }
 0x16e   : > { %15669 = vmatprep.mubr.msk.f32.mxu1 %vm545_vm0, %v17736_v63 }
 0x171   : > { %15670 = vmatmul.mubr.msk.f32.gmra.mxu1 %vm545_vm0, %v17750_v2 }
 0x215   : > { %v15638_v4 = vpop.f32.mrf.mxu1  ;;  %v15686_v11 = vpop.f32.mrf.mxu0 }
 0x217   : > { %v775_v5 = vpop.f32.mrf.mxu1  ;;  %v997_v14 = vpop.f32.mrf.mxu0 }
 0x218   : > { %15700 = vmatprep.mubr.msk.f32.mxu1 %vm1036_vm1, %v775_v5 }
 0x219   : > { %v15641_v6 = vpop.f32.mrf.mxu1  ;;  %v17782_v17 = vpop.f32.mrf.mxu0 }
 0x21b   : > { %v785_v7 = vpop.f32.mrf.mxu1  ;;  %v17788_v22 = vpop.f32.mrf.mxu0 }
 0x21d   : > { %v15644_v8 = vpop.f32.mrf.mxu1  ;;  %v17795_v24 = vpop.f32.mrf.mxu0 }
 0x21f   : > { %v795_v9 = vpop.f32.mrf.mxu1  ;;  %v17801_v26 = vpop.f32.mrf.mxu0 }
 0x220   : > { %15714 = vmatprep.mubr.msk.f32.mxu0 %vm1036_vm1, %v795_v9 }
 0x221   : > { %v15647_v10 = vpop.f32.mrf.mxu1 }
 0x222   : > { %v15695_v30 = vpop.f32.mrf.mxu0 }
 0x223   : > { %v805_v12 = vpop.f32.mrf.mxu1 }
 0x224   : > { %v1027_v31 = vpop.f32.mrf.mxu0 }
 0x225   : > { %v15662_v13 = vpop.f32.mrf.mxu1 }
 0x226   : > { %15696 = vmatprep.subr.msk.mxu1 %vm1036_vm1, %v15662_v13 }
 0x227   : > { %v886_v15 = vpop.f32.mrf.mxu1  ;;  %15697 = vmatpush3.xpose.msk.msra.mxu1 %vm1036_vm1, %v15662_v13 }
 0x228   : > { %15698 = vmatprep.subr.msk.mxu1 %vm1036_vm1, %v886_v15 }
 0x229   : > { %v15665_v16 = vpop.f32.mrf.mxu1 }
 0x22b   : > { %v896_v18 = vpop.f32.mrf.mxu1  ;;  %15699 = vmatpush3.xpose.msk.msra.mxu1 %vm1036_vm1, %v886_v15 }
 0x22c   : > { %15703 = vmatprep.subr.msk.mxu1 %vm1036_vm1, %v15665_v16 }
 0x22d   : > { %v15668_v19 = vpop.f32.mrf.mxu1 }
 0x22e   : > { %15701 = vmatmul.mubr.msk.f32.vlgmr.msra.gmra.mxu1 %vm1036_vm1, %v15638_v4  ;;  %15710 = vmatprep.subr.msk.mxu0 %vm1036_vm1, %v15668_v19 }
 0x22f   : > { %v906_v23 = vpop.f32.mrf.mxu1  ;;  %15704 = vmatpush3.xpose.msk.msra.mxu1 %vm1036_vm1, %v15665_v16  ;;  %15707 = vmatprep.mubr.msk.f32.mxu1 %vm1036_vm1, %v785_v7 }
 0x230   : > { %15711 = vmatpush3.xpose.msk.msra.mxu0 %vm1036_vm1, %v15668_v19  ;;  %15705 = vmatprep.subr.msk.mxu1 %vm1036_vm1, %v896_v18 }
 0x231   : > { %15712 = vmatprep.subr.msk.mxu0 %vm1036_vm1, %v906_v23  ;;  %v15671_v25 = vpop.f32.mrf.mxu1 }
 0x233   : > { %15706 = vmatpush3.xpose.msk.msra.mxu1 %vm1036_vm1, %v896_v18  ;;  %v916_v27 = vpop.f32.mrf.mxu1 }
 0x234   : > { %15713 = vmatpush3.xpose.msk.msra.mxu0 %vm1036_vm1, %v906_v23  ;;  %15717 = vmatprep.subr.msk.mxu1 %vm1036_vm1, %v15671_v25 }
 0x235   : > { %15724 = vmatprep.subr.mxu0 %v15686_v11 }
 0x236   : > { %15708 = vmatmul.mubr.msk.f32.vlgmr.msra.gmra.mxu1 %vm1036_vm1, %v15641_v6 }
 0x237   : > { %15715 = vmatmul.mubr.msk.f32.vlgmr.msra.gmra.mxu0 %vm1036_vm1, %v15644_v8  ;;  %15718 = vmatpush3.xpose.msk.msra.mxu1 %vm1036_vm1, %v15671_v25 }
 0x238   : > { %15721 = vmatprep.mubr.msk.f32.mxu1 %vm1036_vm1, %v805_v12  ;;  %15725 = vmatpush3.msra.mxu0 %v15686_v11 }
 0x239   : > { %15719 = vmatprep.subr.msk.mxu1 %vm1036_vm1, %v916_v27  ;;  %15726 = vmatprep.subr.mxu0 %v997_v14 }
 0x23a   : > { %15727 = vmatpush3.msra.mxu0 %v997_v14 }
 0x23b   : > { %15731 = vmatprep.subr.mxu0 %v17782_v17  ;;  %15720 = vmatpush3.xpose.msk.msra.mxu1 %vm1036_vm1, %v916_v27 }
 0x23c   : > { %15745 = vmatprep.subr.mxu1 %v15695_v30 }
 0x23e   : > { %15722 = vmatmul.mubr.msk.f32.vlgmr.msra.gmra.mxu1 %vm1036_vm1, %v15647_v10 }
 0x23f   : > { %15746 = vmatpush3.msra.mxu1 %v15695_v30 }
 0x240   : > { %15747 = vmatprep.subr.mxu1 %v1027_v31 }
 0x241   : > { %15748 = vmatpush3.msra.mxu1 %v1027_v31 }
 0x2ee   : > { %v15702_v36 = vpop.f32.mrf.mxu1 }
 0x2ef   : > { %v1386_v41 = vmul.f32 0.14433756, %v15702_v36 }
 0x2f0   : > { %v1115_v43 = vpop.f32.mrf.mxu1 }
 0x2f1   : > { %v1385_v45 = vmul.f32 0.14433756, %v1115_v43  ;;  %v1394_v20 = vadd.f32 %v1386_v41, %v17814_v40 }
 0x2f3   : > { %v1404_v46 = vsel %vm1036_vm1, %v1394_v20, -inf  ;;  %v1393_v47 = vadd.f32 %v1385_v45, %v17816_v44 }
 0x2f4   : > { %1405 = vmax.xlane.f32.xlu1 %v1404_v46 }
 0x2f5   : > { %v1401_v51 = vsel %vm1036_vm1, %v1393_v47, -inf }
 0x2f6   : > { %1402 = vmax.xlane.f32.xlu0 %v1401_v51  ;;  %v15709_v28 = vpop.f32.mrf.mxu1 }
 0x2f7   : > { %v15716_v21 = vpop.f32.mrf.mxu0  ;;  %v1388_v55 = vmul.f32 0.14433756, %v15709_v28 }
 0x2f8   : > { %v1202_v53 = vpop.f32.mrf.mxu1  ;;  %v1390_v39 = vmul.f32 0.14433756, %v15716_v21 }
 0x2f9   : > { %v1387_v58 = vmul.f32 0.14433756, %v1202_v53  ;;  %v1289_v61 = vpop.f32.mrf.mxu0  ;;  %v1396_v1 = vadd.f32 %v1388_v55, %v17814_v40 }
 0x2fa   : > { %v1389_v49 = vmul.f32 0.14433756, %v1289_v61  ;;  %v1398_v6 = vadd.f32 %v1390_v39, %v17814_v40 }
 0x2fb   : > { %v1395_v4 = vadd.f32 %v1387_v58, %v17816_v44  ;;  %v1410_v5 = vsel %vm1036_vm1, %v1396_v1, -inf }
 0x2fc   : > { %v1397_v8 = vadd.f32 %v1389_v49, %v17816_v44  ;;  %v1416_v9 = vsel %vm1036_vm1, %v1398_v6, -inf  ;;  %v14089_v49 = vld [vmem:[%s20776_s2 + $0x58] sm:$0xff] }
 0x2fd   : > { %v1407_v7 = vsel %vm1036_vm1, %v1395_v4, -inf  ;;  %15776 = vmatprep.subr.mxu1 %v14089_v49 }
 0x2fe   : > { %v15723_v54 = vpop.f32.mrf.mxu1  ;;  %v1413_v10 = vsel %vm1036_vm1, %v1397_v8, -inf }
 0x2ff   : > { %v1392_v29 = vmul.f32 0.14433756, %v15723_v54 }
 0x300   : > { %v1376_v56 = vpop.f32.mrf.mxu1 }
 0x301   : > { %v1391_v59 = vmul.f32 0.14433756, %v1376_v56  ;;  %v1400_v60 = vadd.f32 %v1392_v29, %v17814_v40 }
 0x303   : > { %v1422_v62 = vsel %vm1036_vm1, %v1400_v60, -inf  ;;  %v1399_v0 = vadd.f32 %v1391_v59, %v17816_v44 }
 0x304   : > { %1423 = vmax.xlane.f32.xlu1 %v1422_v62 }
 0x305   : > { %v1419_v3 = vsel %vm1036_vm1, %v1399_v0, -inf }
 0x306   : > { %1420 = vmax.xlane.f32.xlu0 %v1419_v3 }
 0x308   : > { %1411 = vmax.xlane.f32.xlu1 %v1410_v5 }
 0x30a   : > { %1408 = vmax.xlane.f32.xlu0 %v1407_v7 }
 0x30c   : > { %1417 = vmax.xlane.f32.xlu1 %v1416_v9 }
 0x30e   : > { %1414 = vmax.xlane.f32.xlu0 %v1413_v10 }
 0x37d   : > { %v1406_v11 = vpop.xlane.xlu1 %1405 }
 0x37e   : > { %v1426_v12 = vsub.f32 %v1394_v20, %v1406_v11 }
 0x37f   : > { %v1403_v13 = vpop.xlane.xlu0 %1402 }
 0x380   : > { %v1435_v14 = vmul.f32 1.442695, %v1426_v12  ;;  %v1425_v15 = vsub.f32 %v1393_v47, %v1403_v13 }
 0x382   : > { %17003 = vpow2.f32 %v1435_v14  ;;  %v1433_v16 = vmul.f32 1.442695, %v1425_v15 }
 0x384   : > { %17005 = vpow2.f32 %v1433_v16 }
 0x38d   : > { %v1424_v18 = vpop.xlane.xlu1 %1423 }
 0x38e   : > { %v1432_v19 = vsub.f32 %v1400_v60, %v1424_v18 }
 0x38f   : > { %v17004_v23 = vpop.eup %17003  ;;  %v1421_v25 = vpop.xlane.xlu0 %1420 }
 0x390   : > { %v1447_v27 = vmul.f32 1.442695, %v1432_v19  ;;  %v1431_v30 = vsub.f32 %v1399_v0, %v1421_v25  ;;  %v1452_v31 = vsel %vm1036_vm1, %v17004_v23, 0.0 }
 0x391   : > { %v17006_v32 = vpop.eup %17005  ;;  %1453 = vadd.xlane.f32.xlu1 %v1452_v31  ;;  %v1412_v34 = vpop.xlane.xlu1 %1411 }
 0x392   : > { %17007 = vpow2.f32 %v1447_v27  ;;  %v1445_v35 = vmul.f32 1.442695, %v1431_v30  ;;  %v1428_v36 = vsub.f32 %v1396_v1, %v1412_v34  ;;  %v1449_v37 = vsel %vm1036_vm1, %v17006_v32, 0.0  ;;  %v14087_v27 = vld [vmem:[%s20776_s2 + $0x48] sm:$0xff] }
 0x393   : > { %1450 = vadd.xlane.f32.xlu0 %v1449_v37  ;;  %v1409_v41 = vpop.xlane.xlu0 %1408  ;;  %v14085_v37 = vld [vmem:[%s20776_s2 + $0x38] sm:$0xff] }
 0x394   : > { %17009 = vpow2.f32 %v1445_v35  ;;  %v1439_v43 = vmul.f32 1.442695, %v1428_v36  ;;  %v1427_v45 = vsub.f32 %v1395_v4, %v1409_v41  ;;  %v14075_v36 = vld [vmem:[%s20804_s1 + $0x58] sm:$0xff] }
 0x395   : > { %v1418_v20 = vpop.xlane.xlu1 %1417 }
 0x396   : > { %17011 = vpow2.f32 %v1439_v43  ;;  %v1437_v46 = vmul.f32 1.442695, %v1427_v45  ;;  %v1430_v47 = vsub.f32 %v1398_v6, %v1418_v20  ;;  %v14084_v43 = vld [vmem:[%s20776_s2 + $0x30] sm:$0xff]  ;;  %v14072_v45 = vld [vmem:[%s20804_s1 + $0x40] sm:$0xff]  ;;  %v14071_v20 = vld [vmem:[%s20804_s1 + $0x38] sm:$0xff] }
 0x397   : > { %v1415_v51 = vpop.xlane.xlu0 %1414 }
 0x398   : > { %17013 = vpow2.f32 %v1437_v46  ;;  %v1443_v28 = vmul.f32 1.442695, %v1430_v47  ;;  %v1429_v53 = vsub.f32 %v1397_v8, %v1415_v51  ;;  %v14070_v46 = vld [vmem:[%s20804_s1 + $0x30] sm:$0xff]  ;;  %v14103_v47 = vld [vmem:[%s20777_s3 + $0x58] sm:$0xff] }
 0x399   : > { %v14102_v51 = vld [vmem:[%s20777_s3 + $0x50] sm:$0xff] }
 0x39a   : > { %17015 = vpow2.f32 %v1443_v28  ;;  %v1441_v21 = vmul.f32 1.442695, %v1429_v53  ;;  %v14101_v28 = vld [vmem:[%s20777_s3 + $0x48] sm:$0xff]  ;;  %v14100_v53 = vld [vmem:[%s20777_s3 + $0x40] sm:$0xff] }
 0x39c   : > { %17017 = vpow2.f32 %v1441_v21  ;;  %v14099_v21 = vld [vmem:[%s20777_s3 + $0x38] sm:$0xff] }
 0x39f   : > { %v17008_v54 = vpop.eup %17007 }
 0x3a0   : > { %v1470_v55 = vsel %vm1036_vm1, %v17008_v54, 0.0 }
 0x3a1   : > { %v17010_v29 = vpop.eup %17009  ;;  %1471 = vadd.xlane.f32.xlu1 %v1470_v55 }
 0x3a2   : > { %v1467_v56 = vsel %vm1036_vm1, %v17010_v29, 0.0 }
 0x3a3   : > { %v17012_v58 = vpop.eup %17011  ;;  %1468 = vadd.xlane.f32.xlu0 %v1467_v56 }
 0x3a4   : > { %v1458_v59 = vsel %vm1036_vm1, %v17012_v58, 0.0 }
 0x3a5   : > { %v17014_v60 = vpop.eup %17013  ;;  %1459 = vadd.xlane.f32.xlu1 %v1458_v59 }
 0x3a6   : > { %v1455_v61 = vsel %vm1036_vm1, %v17014_v60, 0.0 }
 0x3a7   : > { %v17840_v39 = vpop.eup %17015  ;;  %1456 = vadd.xlane.f32.xlu0 %v1455_v61 }
 0x3a8   : > { %v1464_v62 = vsel %vm1036_vm1, %v17840_v39, 0.0 }
 0x3a9   : > { %v17018_v0 = vpop.eup %17017  ;;  %1465 = vadd.xlane.f32.xlu1 %v1464_v62 }
 0x3aa   : > { %v1461_v1 = vsel %vm1036_vm1, %v17018_v0, 0.0 }
 0x3ab   : > { %1462 = vadd.xlane.f32.xlu0 %v1461_v1 }
 0x41a   : > { %v1454_v3 = vpop.xlane.xlu1 %1453 }
 0x41b   : > { %17019 = vrcp.f32 %v1454_v3 }
 0x41c   : > { %v1451_v4 = vpop.xlane.xlu0 %1450 }
 0x41d   : > { %17021 = vrcp.f32 %v1451_v4 }
 0x428   : > { %v17020_v5 = vpop.eup %17019 }
 0x429   : > { %v1476_v10 = vmul.f32 %v17020_v5, %v17004_v23 }
 0x42a   : > { %v17022_v6 = vpop.eup %17021  ;;  %v1472_v7 = vpop.xlane.xlu1 %1471 }
 0x42b   : > { %v1474_v8 = vmul.f32 %v17022_v6, %v17006_v32  ;;  %17023 = vrcp.f32 %v1472_v7  ;;  %v14086_v32 = vld [vmem:[%s20776_s2 + $0x40] sm:$0xff] }
 0x42c   : > { %v1469_v9 = vpop.xlane.xlu0 %1468 }
 0x42d   : > { %17025 = vrcp.f32 %v1469_v9  ;;  %15728 = vmatprep.mubr.msk.f32.mxu0 %vm1036_vm1, %v1474_v8 }
 0x42e   : > { %v1460_v11 = vpop.xlane.xlu1 %1459  ;;  %15729 = vmatmul.mubr.msk.f32.vlgmr.msra.gmra.mxu0 %vm1036_vm1, %v1476_v10 }
 0x42f   : > { %15732 = vmatpush3.msra.mxu0 %v17782_v17  ;;  %17027 = vrcp.f32 %v1460_v11  ;;  %v14088_v17 = vld [vmem:[%s20776_s2 + $0x50] sm:$0xff] }
 0x430   : > { %15733 = vmatprep.subr.mxu0 %v17788_v22  ;;  %v1457_v12 = vpop.xlane.xlu0 %1456 }
 0x431   : > { %15734 = vmatpush3.msra.mxu0 %v17788_v22  ;;  %17029 = vrcp.f32 %v1457_v12 }
 0x432   : > { %15738 = vmatprep.subr.mxu0 %v17795_v24  ;;  %v1466_v13 = vpop.xlane.xlu1 %1465 }
 0x433   : > { %17031 = vrcp.f32 %v1466_v13 }
 0x434   : > { %v1463_v14 = vpop.xlane.xlu0 %1462 }
 0x435   : > { %17033 = vrcp.f32 %v1463_v14 }
 0x438   : > { %v17024_v15 = vpop.eup %17023 }
 0x439   : > { %v1488_v19 = vmul.f32 %v17024_v15, %v17008_v54  ;;  %v14098_v54 = vld [vmem:[%s20777_s3 + $0x30] sm:$0xff] }
 0x43a   : > { %v17026_v16 = vpop.eup %17025 }
 0x43b   : > { %v1486_v18 = vmul.f32 %v17026_v16, %v17010_v29 }
 0x43c   : > { %v17028_v23 = vpop.eup %17027 }
 0x43d   : > { %15749 = vmatprep.mubr.msk.f32.mxu1 %vm1036_vm1, %v1486_v18  ;;  %v1480_v30 = vmul.f32 %v17028_v23, %v17012_v58 }
 0x43e   : > { %v17030_v25 = vpop.eup %17029  ;;  %15750 = vmatmul.mubr.msk.f32.vlgmr.msra.gmra.mxu1 %vm1036_vm1, %v1488_v19 }
 0x43f   : > { %15777 = vmatpush3.msra.mxu1 %v14089_v49  ;;  %15788 = vmatprep.mubr.msk.f32.mxu1 %vm545_vm0, %v17690_v42  ;;  %v1478_v22 = vmul.f32 %v17030_v25, %v17014_v60 }
 0x440   : > { %15778 = vmatprep.subr.mxu1 %v14088_v17  ;;  %v17032_v31 = vpop.eup %17031 }
 0x441   : > { %15779 = vmatpush3.msra.mxu1 %v14088_v17  ;;  %15735 = vmatprep.mubr.msk.f32.mxu0 %vm1036_vm1, %v1478_v22  ;;  %v1484_v41 = vmul.f32 %v17032_v31, %v17840_v39 }
 0x442   : > { %v17034_v34 = vpop.eup %17033  ;;  %15780 = vmatprep.subr.mxu1 %v14087_v27  ;;  %15736 = vmatmul.mubr.msk.f32.vlgmr.msra.gmra.mxu0 %vm1036_vm1, %v1480_v30 }
 0x443   : > { %15739 = vmatpush3.msra.mxu0 %v17795_v24  ;;  %15781 = vmatpush3.msra.mxu1 %v14087_v27  ;;  %v1482_v35 = vmul.f32 %v17034_v34, %v17018_v0  ;;  %v14074_v24 = vld [vmem:[%s20804_s1 + $0x50] sm:$0xff] }
 0x444   : > { %15740 = vmatprep.subr.mxu0 %v17801_v26  ;;  %15782 = vmatprep.subr.mxu1 %v14086_v32 }
 0x445   : > { %15741 = vmatpush3.msra.mxu0 %v17801_v26  ;;  %15783 = vmatpush3.msra.mxu1 %v14086_v32  ;;  %v14073_v26 = vld [vmem:[%s20804_s1 + $0x48] sm:$0xff] }
 0x446   : > { %15742 = vmatprep.mubr.msk.f32.mxu0 %vm1036_vm1, %v1482_v35  ;;  %15752 = vmatprep.subr.mxu0 %v14075_v36 }
 0x447   : > { %15784 = vmatprep.subr.mxu1 %v14085_v37  ;;  %15743 = vmatmul.mubr.msk.f32.vlgmr.msra.gmra.mxu0 %vm1036_vm1, %v1484_v41 }
 0x448   : > { %15753 = vmatpush3.msra.mxu0 %v14075_v36  ;;  %15785 = vmatpush3.msra.mxu1 %v14085_v37 }
 0x449   : > { %15754 = vmatprep.subr.mxu0 %v14074_v24  ;;  %15764 = vmatprep.mubr.msk.f32.mxu0 %vm545_vm0, %v17690_v42 }
 0x44a   : > { %15786 = vmatprep.subr.mxu1 %v14084_v43  ;;  %15755 = vmatpush3.msra.mxu0 %v14074_v24 }
 0x44b   : > { %15787 = vmatpush3.msra.mxu1 %v14084_v43  ;;  %15756 = vmatprep.subr.mxu0 %v14073_v26 }
 0x44c   : > { %15789 = vmatmul.mubr.msk.f32.vlgmr.msra.gmra.mxu1 %vm545_vm0, %v17698_v50  ;;  %15757 = vmatpush3.msra.mxu0 %v14073_v26 }
 0x44d   : > { %15791 = vmatprep.mubr.msk.f32.mxu1 %vm545_vm0, %v17701_v52  ;;  %15758 = vmatprep.subr.mxu0 %v14072_v45 }
 0x44e   : > { %15759 = vmatpush3.msra.mxu0 %v14072_v45 }
 0x44f   : > { %15760 = vmatprep.subr.mxu0 %v14071_v20 }
 0x450   : > { %15792 = vmatmul.mubr.msk.f32.gmra.mxu1 %vm545_vm0, %v17715_v38  ;;  %15761 = vmatpush3.msra.mxu0 %v14071_v20 }
 0x451   : > { %15794 = vmatprep.mubr.msk.f32.mxu1 %vm545_vm0, %v17719_v57  ;;  %15762 = vmatprep.subr.mxu0 %v14070_v46 }
 0x452   : > { %15763 = vmatpush3.msra.mxu0 %v14070_v46 }
 0x453   : > { %15765 = vmatmul.mubr.msk.f32.vlgmr.msra.gmra.mxu0 %vm545_vm0, %v17698_v50  ;;  %15800 = vmatprep.subr.mxu0 %v14103_v47 }
 0x454   : > { %15795 = vmatmul.mubr.msk.f32.gmra.mxu1 %vm545_vm0, %v17733_v48  ;;  %15767 = vmatprep.mubr.msk.f32.mxu0 %vm545_vm0, %v17701_v52 }
 0x455   : > { %15797 = vmatprep.mubr.msk.f32.mxu1 %vm545_vm0, %v17736_v63  ;;  %15801 = vmatpush3.msra.mxu0 %v14103_v47 }
 0x456   : > { %15802 = vmatprep.subr.mxu0 %v14102_v51 }
 0x457   : > { %15768 = vmatmul.mubr.msk.f32.gmra.mxu0 %vm545_vm0, %v17715_v38 }
 0x458   : > { %15798 = vmatmul.mubr.msk.f32.gmra.mxu1 %vm545_vm0, %v17750_v2  ;;  %15770 = vmatprep.mubr.msk.f32.mxu0 %vm545_vm0, %v17719_v57 }
 0x459   : > { %15803 = vmatpush3.msra.mxu0 %v14102_v51 }
 0x45a   : > { %15804 = vmatprep.subr.mxu0 %v14101_v28 }
 0x45b   : > { %15771 = vmatmul.mubr.msk.f32.gmra.mxu0 %vm545_vm0, %v17733_v48 }
 0x45c   : > { %15773 = vmatprep.mubr.msk.f32.mxu0 %vm545_vm0, %v17736_v63  ;;  %15805 = vmatpush3.msra.mxu0 %v14101_v28 }
 0x45d   : > { %15806 = vmatprep.subr.mxu0 %v14100_v53 }
 0x45e   : > { %15807 = vmatpush3.msra.mxu0 %v14100_v53 }
 0x45f   : > { %15774 = vmatmul.mubr.msk.f32.gmra.mxu0 %vm545_vm0, %v17750_v2  ;;  %15808 = vmatprep.subr.mxu0 %v14099_v21 }
 0x460   : > { %15809 = vmatpush3.msra.mxu0 %v14099_v21  ;;  %15812 = vmatprep.mubr.msk.f32.mxu0 %vm545_vm0, %v17690_v42 }
 0x461   : > { %15810 = vmatprep.subr.mxu0 %v14098_v54 }
 0x462   : > { %15811 = vmatpush3.msra.mxu0 %v14098_v54 }
 0x463   : > { %15813 = vmatmul.mubr.msk.f32.vlgmr.msra.gmra.mxu0 %vm545_vm0, %v17698_v50 }
 0x464   : > { %15815 = vmatprep.mubr.msk.f32.mxu0 %vm545_vm0, %v17701_v52 }
 0x467   : > { %15816 = vmatmul.mubr.msk.f32.gmra.mxu0 %vm545_vm0, %v17715_v38 }
 0x468   : > { %15818 = vmatprep.mubr.msk.f32.mxu0 %vm545_vm0, %v17719_v57 }
 0x46b   : > { %15819 = vmatmul.mubr.msk.f32.gmra.mxu0 %vm545_vm0, %v17733_v48 }
 0x46c   : > { %15821 = vmatprep.mubr.msk.f32.mxu0 %vm545_vm0, %v17736_v63 }
 0x46f   : > { %15822 = vmatmul.mubr.msk.f32.gmra.mxu0 %vm545_vm0, %v17750_v2 }
 0x4ee   : > { %v17963_v55 = vpop.f32.mrf.mxu0 }
 0x4f0   : > { %v17965_v29 = vpop.f32.mrf.mxu0 }
 0x4fe   : > { %v17969_v58 = vpop.f32.mrf.mxu1 }
 0x500   : > { %v17973_v60 = vpop.f32.mrf.mxu1 }
 0x502   : > { %v17967_v56 = vpop.f32.mrf.mxu0 }
 0x504   : > { %v17971_v59 = vpop.f32.mrf.mxu0 }
 0x507   : > { %v17975_v39 = vpop.f32.mrf.mxu0 }
 0x509   : > { %v17980_v1 = vpop.f32.mrf.mxu0 }
 0x50c   : > { %v15790_v61 = vpop.f32.mrf.mxu1 }
 0x50d   : > { %15824 = vmatprep.subr.msk.mxu1 %vm1036_vm1, %v15790_v61 }
 0x50e   : > { %v2000_v62 = vpop.f32.mrf.mxu1  ;;  %15825 = vmatpush3.xpose.msk.msra.mxu1 %vm1036_vm1, %v15790_v61 }
 0x50f   : > { %15826 = vmatprep.subr.msk.mxu1 %vm1036_vm1, %v2000_v62 }
 0x510   : > { %v15793_v0 = vpop.f32.mrf.mxu1 }
 0x512   : > { %v2010_v49 = vpop.f32.mrf.mxu1  ;;  %15827 = vmatpush3.xpose.msk.msra.mxu1 %vm1036_vm1, %v2000_v62 }
 0x513   : > { %15831 = vmatprep.subr.msk.mxu1 %vm1036_vm1, %v15793_v0  ;;  %v15766_v3 = vpop.f32.mrf.mxu0 }
 0x514   : > { %v15796_v4 = vpop.f32.mrf.mxu1 }
 0x515   : > { %15838 = vmatprep.subr.msk.mxu0 %vm1036_vm1, %v15796_v4  ;;  %v1888_v5 = vpop.f32.mrf.mxu0 }
 0x516   : > { %v2020_v6 = vpop.f32.mrf.mxu1  ;;  %15839 = vmatpush3.xpose.msk.msra.mxu0 %vm1036_vm1, %v15796_v4  ;;  %15828 = vmatprep.mubr.msk.f32.mxu1 %vm1036_vm1, %v1888_v5 }
 0x517   : > { %15840 = vmatprep.subr.msk.mxu0 %vm1036_vm1, %v2020_v6  ;;  %v15769_v7 = vpop.f32.mrf.mxu0  ;;  %15829 = vmatmul.mubr.msk.f32.vlgmr.msra.gmra.mxu1 %vm1036_vm1, %v15766_v3 }
 0x518   : > { %15832 = vmatpush3.xpose.msk.msra.mxu1 %vm1036_vm1, %v15793_v0  ;;  %v15799_v10 = vpop.f32.mrf.mxu1 }
 0x519   : > { %15833 = vmatprep.subr.msk.mxu1 %vm1036_vm1, %v2010_v49  ;;  %v1898_v8 = vpop.f32.mrf.mxu0 }
 0x51a   : > { %15841 = vmatpush3.xpose.msk.msra.mxu0 %vm1036_vm1, %v2020_v6  ;;  %15835 = vmatprep.mubr.msk.f32.mxu1 %vm1036_vm1, %v1898_v8  ;;  %v2030_v13 = vpop.f32.mrf.mxu1 }
 0x51b   : > { %v15772_v9 = vpop.f32.mrf.mxu0 }
 0x51c   : > { %15834 = vmatpush3.xpose.msk.msra.mxu1 %vm1036_vm1, %v2010_v49 }
 0x51d   : > { %15845 = vmatprep.subr.msk.mxu1 %vm1036_vm1, %v15799_v10  ;;  %v1908_v11 = vpop.f32.mrf.mxu0 }
 0x51e   : > { %15842 = vmatprep.mubr.msk.f32.mxu0 %vm1036_vm1, %v1908_v11 }
 0x51f   : > { %15836 = vmatmul.mubr.msk.f32.vlgmr.msra.gmra.mxu1 %vm1036_vm1, %v15769_v7  ;;  %v15775_v12 = vpop.f32.mrf.mxu0  ;;  %15843 = vmatmul.mubr.msk.f32.vlgmr.msra.gmra.mxu0 %vm1036_vm1, %v15772_v9 }
 0x520   : > { %15846 = vmatpush3.xpose.msk.msra.mxu1 %vm1036_vm1, %v15799_v10 }
 0x521   : > { %15847 = vmatprep.subr.msk.mxu1 %vm1036_vm1, %v2030_v13  ;;  %v1918_v14 = vpop.f32.mrf.mxu0 }
 0x522   : > { %15849 = vmatprep.mubr.msk.f32.mxu1 %vm1036_vm1, %v1918_v14 }
 0x523   : > { %v15814_v15 = vpop.f32.mrf.mxu0 }
 0x524   : > { %15848 = vmatpush3.xpose.msk.msra.mxu1 %vm1036_vm1, %v2030_v13  ;;  %15852 = vmatprep.subr.mxu0 %v15814_v15 }
 0x525   : > { %v2112_v16 = vpop.f32.mrf.mxu0  ;;  %15853 = vmatpush3.msra.mxu0 %v15814_v15 }
 0x526   : > { %15854 = vmatprep.subr.mxu0 %v2112_v16 }
 0x527   : > { %15850 = vmatmul.mubr.msk.f32.vlgmr.msra.gmra.mxu1 %vm1036_vm1, %v15775_v12  ;;  %v15817_v18 = vpop.f32.mrf.mxu0  ;;  %15855 = vmatpush3.msra.mxu0 %v2112_v16 }
 0x528   : > { %15859 = vmatprep.subr.mxu1 %v15817_v18 }
 0x529   : > { %v2122_v19 = vpop.f32.mrf.mxu0  ;;  %15860 = vmatpush3.msra.mxu1 %v15817_v18 }
 0x52a   : > { %15861 = vmatprep.subr.mxu1 %v2122_v19 }
 0x52b   : > { %v18003_v23 = vpop.f32.mrf.mxu0  ;;  %15862 = vmatpush3.msra.mxu1 %v2122_v19 }
 0x52c   : > { %15866 = vmatprep.subr.mxu0 %v18003_v23 }
 0x52d   : > { %v18006_v17 = vpop.f32.mrf.mxu0 }
 0x52f   : > { %v18008_v25 = vpop.f32.mrf.mxu0 }
 0x530   : > { %15873 = vmatprep.subr.mxu1 %v18008_v25 }
 0x531   : > { %v18014_v36 = vpop.f32.mrf.mxu0 }
 0x5d7   : > { %v15830_v22 = vpop.f32.mrf.mxu1 }
 0x5d8   : > { %v2500_v27 = vmul.f32 0.14433756, %v15830_v22 }
 0x5d9   : > { %v2229_v30 = vpop.f32.mrf.mxu1 }
 0x5da   : > { %v2499_v31 = vmul.f32 0.14433756, %v2229_v30  ;;  %v2508_v32 = vadd.f32 %v2500_v27, %v17814_v40 }
 0x5dc   : > { %v2518_v34 = vsel %vm1036_vm1, %v2508_v32, -inf  ;;  %v2507_v35 = vadd.f32 %v2499_v31, %v17816_v44 }
 0x5dd   : > { %2519 = vmax.xlane.f32.xlu1 %v2518_v34 }
 0x5de   : > { %v2515_v37 = vsel %vm1036_vm1, %v2507_v35, -inf }
 0x5df   : > { %v15837_v41 = vpop.f32.mrf.mxu1  ;;  %2516 = vmax.xlane.f32.xlu0 %v2515_v37  ;;  %v15844_v24 = vpop.f32.mrf.mxu0 }
 0x5e0   : > { %v2502_v43 = vmul.f32 0.14433756, %v15837_v41  ;;  %v2504_v26 = vmul.f32 0.14433756, %v15844_v24 }
 0x5e1   : > { %v2316_v45 = vpop.f32.mrf.mxu1  ;;  %v2403_v20 = vpop.f32.mrf.mxu0 }
 0x5e2   : > { %v2501_v46 = vmul.f32 0.14433756, %v2316_v45  ;;  %v2503_v47 = vmul.f32 0.14433756, %v2403_v20  ;;  %v2510_v51 = vadd.f32 %v2502_v43, %v17814_v40  ;;  %v2512_v21 = vadd.f32 %v2504_v26, %v17814_v40 }
 0x5e4   : > { %v2524_v28 = vsel %vm1036_vm1, %v2510_v51, -inf  ;;  %v2509_v53 = vadd.f32 %v2501_v46, %v17816_v44  ;;  %v2511_v61 = vadd.f32 %v2503_v47, %v17816_v44  ;;  %v2530_v49 = vsel %vm1036_vm1, %v2512_v21, -inf }
 0x5e5   : > { %2525 = vmax.xlane.f32.xlu1 %v2524_v28 }
 0x5e6   : > { %v2521_v54 = vsel %vm1036_vm1, %v2509_v53, -inf  ;;  %v2527_v5 = vsel %vm1036_vm1, %v2511_v61, -inf }
 0x5e7   : > { %2522 = vmax.xlane.f32.xlu0 %v2521_v54  ;;  %v15851_v62 = vpop.f32.mrf.mxu1 }
 0x5e8   : > { %v2506_v0 = vmul.f32 0.14433756, %v15851_v62 }
 0x5e9   : > { %v2490_v3 = vpop.f32.mrf.mxu1  ;;  %2531 = vmax.xlane.f32.xlu1 %v2530_v49 }
 0x5ea   : > { %v2505_v4 = vmul.f32 0.14433756, %v2490_v3  ;;  %v2514_v6 = vadd.f32 %v2506_v0, %v17814_v40 }
 0x5eb   : > { %2528 = vmax.xlane.f32.xlu0 %v2527_v5 }
 0x5ec   : > { %v2536_v7 = vsel %vm1036_vm1, %v2514_v6, -inf  ;;  %v2513_v8 = vadd.f32 %v2505_v4, %v17816_v44 }
 0x5ed   : > { %2537 = vmax.xlane.f32.xlu1 %v2536_v7 }
 0x5ee   : > { %v2533_v9 = vsel %vm1036_vm1, %v2513_v8, -inf }
 0x5ef   : > { %2534 = vmax.xlane.f32.xlu0 %v2533_v9 }
 0x666   : > { %v2520_v10 = vpop.xlane.xlu1 %2519 }
 0x667   : > { %v2540_v11 = vsub.f32 %v2508_v32, %v2520_v10 }
 0x668   : > { %v2517_v12 = vpop.xlane.xlu0 %2516 }
 0x669   : > { %v2549_v13 = vmul.f32 1.442695, %v2540_v11  ;;  %v2539_v14 = vsub.f32 %v2507_v35, %v2517_v12 }
 0x66b   : > { %17035 = vpow2.f32 %v2549_v13  ;;  %v2547_v15 = vmul.f32 1.442695, %v2539_v14 }
 0x66d   : > { %17037 = vpow2.f32 %v2547_v15 }
 0x66e   : > { %v2526_v16 = vpop.xlane.xlu1 %2525 }
 0x66f   : > { %v2542_v18 = vsub.f32 %v2510_v51, %v2526_v16 }
 0x670   : > { %v2523_v19 = vpop.xlane.xlu0 %2522 }
 0x671   : > { %v2553_v22 = vmul.f32 1.442695, %v2542_v18  ;;  %v2541_v27 = vsub.f32 %v2509_v53, %v2523_v19 }
 0x672   : > { %v2532_v30 = vpop.xlane.xlu1 %2531 }
 0x673   : > { %17039 = vpow2.f32 %v2553_v22  ;;  %v2551_v31 = vmul.f32 1.442695, %v2541_v27  ;;  %v2544_v34 = vsub.f32 %v2512_v21, %v2532_v30 }
 0x674   : > { %v2529_v37 = vpop.xlane.xlu0 %2528 }
 0x675   : > { %17041 = vpow2.f32 %v2551_v31  ;;  %v2557_v41 = vmul.f32 1.442695, %v2544_v34  ;;  %v2543_v24 = vsub.f32 %v2511_v61, %v2529_v37 }
 0x676   : > { %v2538_v32 = vpop.xlane.xlu1 %2537 }
 0x677   : > { %17043 = vpow2.f32 %v2557_v41  ;;  %v2555_v43 = vmul.f32 1.442695, %v2543_v24  ;;  %v2546_v35 = vsub.f32 %v2514_v6, %v2538_v32 }
 0x678   : > { %v17036_v26 = vpop.eup %17035  ;;  %v2535_v45 = vpop.xlane.xlu0 %2534 }
 0x679   : > { %17045 = vpow2.f32 %v2555_v43  ;;  %v2561_v20 = vmul.f32 1.442695, %v2546_v35  ;;  %v2545_v46 = vsub.f32 %v2513_v8, %v2535_v45  ;;  %v2566_v47 = vsel %vm1036_vm1, %v17036_v26, 0.0 }
 0x67a   : > { %v17038_v51 = vpop.eup %17037  ;;  %2567 = vadd.xlane.f32.xlu1 %v2566_v47  ;;  %v14158_v47 = vld [vmem:[%s20804_s1 + $0x80] sm:$0xff] }
 0x67b   : > { %17047 = vpow2.f32 %v2561_v20  ;;  %v2559_v28 = vmul.f32 1.442695, %v2545_v46  ;;  %v2563_v53 = vsel %vm1036_vm1, %v17038_v51, 0.0  ;;  %v14172_v20 = vld [vmem:[%s20776_s2 + $0x80] sm:$0xff]  ;;  %v14170_v46 = vld [vmem:[%s20776_s2 + $0x70] sm:$0xff] }
 0x67c   : > { %2564 = vadd.xlane.f32.xlu0 %v2563_v53 }
 0x67d   : > { %17049 = vpow2.f32 %v2559_v28  ;;  %v14156_v28 = vld [vmem:[%s20804_s1 + $0x70] sm:$0xff] }
 0x680   : > { %v17040_v21 = vpop.eup %17039 }
 0x681   : > { %v2572_v54 = vsel %vm1036_vm1, %v17040_v21, 0.0 }
 0x682   : > { %v17042_v61 = vpop.eup %17041  ;;  %2573 = vadd.xlane.f32.xlu1 %v2572_v54 }
 0x683   : > { %v2569_v62 = vsel %vm1036_vm1, %v17042_v61, 0.0 }
 0x684   : > { %v17044_v0 = vpop.eup %17043  ;;  %2570 = vadd.xlane.f32.xlu0 %v2569_v62 }
 0x685   : > { %v2578_v49 = vsel %vm1036_vm1, %v17044_v0, 0.0 }
 0x686   : > { %v17046_v3 = vpop.eup %17045  ;;  %2579 = vadd.xlane.f32.xlu1 %v2578_v49 }
 0x687   : > { %v2575_v4 = vsel %vm1036_vm1, %v17046_v3, 0.0 }
 0x688   : > { %v17048_v5 = vpop.eup %17047  ;;  %2576 = vadd.xlane.f32.xlu0 %v2575_v4 }
 0x689   : > { %v2584_v6 = vsel %vm1036_vm1, %v17048_v5, 0.0 }
 0x68a   : > { %v17050_v7 = vpop.eup %17049  ;;  %2585 = vadd.xlane.f32.xlu1 %v2584_v6 }
 0x68b   : > { %v2581_v8 = vsel %vm1036_vm1, %v17050_v7, 0.0 }
 0x68c   : > { %2582 = vadd.xlane.f32.xlu0 %v2581_v8 }
 0x703   : > { %v2568_v9 = vpop.xlane.xlu1 %2567 }
 0x704   : > { %17051 = vrcp.f32 %v2568_v9  ;;  %v14185_v9 = vld [vmem:[%s20777_s3 + $0x78] sm:$0xff] }
 0x705   : > { %v2565_v10 = vpop.xlane.xlu0 %2564 }
 0x706   : > { %17053 = vrcp.f32 %v2565_v10 }
 0x70b   : > { %v2574_v11 = vpop.xlane.xlu1 %2573 }
 0x70c   : > { %17055 = vrcp.f32 %v2574_v11  ;;  %v14184_v11 = vld [vmem:[%s20777_s3 + $0x70] sm:$0xff] }
 0x70d   : > { %v2571_v12 = vpop.xlane.xlu0 %2570 }
 0x70e   : > { %17057 = vrcp.f32 %v2571_v12 }
 0x70f   : > { %v2580_v13 = vpop.xlane.xlu1 %2579 }
 0x710   : > { %17059 = vrcp.f32 %v2580_v13  ;;  %v14183_v13 = vld [vmem:[%s20777_s3 + $0x68] sm:$0xff] }
 0x711   : > { %v2577_v14 = vpop.xlane.xlu0 %2576  ;;  %v17052_v15 = vpop.eup %17051 }
 0x712   : > { %17061 = vrcp.f32 %v2577_v14  ;;  %v2590_v27 = vmul.f32 %v17052_v15, %v17036_v26  ;;  %v14182_v15 = vld [vmem:[%s20777_s3 + $0x60] sm:$0xff] }
 0x713   : > { %v17054_v16 = vpop.eup %17053  ;;  %v2586_v18 = vpop.xlane.xlu1 %2585 }
 0x714   : > { %v2588_v19 = vmul.f32 %v17054_v16, %v17038_v51  ;;  %17063 = vrcp.f32 %v2586_v18  ;;  %v14157_v51 = vld [vmem:[%s20804_s1 + $0x78] sm:$0xff] }
 0x715   : > { %v2583_v22 = vpop.xlane.xlu0 %2582 }
 0x716   : > { %17065 = vrcp.f32 %v2583_v22  ;;  %15856 = vmatprep.mubr.msk.f32.mxu0 %vm1036_vm1, %v2588_v19 }
 0x717   : > { %15857 = vmatmul.mubr.msk.f32.vlgmr.msra.gmra.mxu0 %vm1036_vm1, %v2590_v27 }
 0x718   : > { %15867 = vmatpush3.msra.mxu0 %v18003_v23  ;;  %v1814_v23 = vld [vmem:[%s20778_s4 + $0x8] sm:$0xff] }
 0x719   : > { %15868 = vmatprep.subr.mxu0 %v18006_v17  ;;  %v17056_v30 = vpop.eup %17055 }
 0x71a   : > { %15869 = vmatpush3.msra.mxu0 %v18006_v17  ;;  %v2594_v37 = vmul.f32 %v17056_v30, %v17040_v21  ;;  %v14155_v21 = vld [vmem:[%s20804_s1 + $0x68] sm:$0xff] }
 0x71b   : > { %v17058_v31 = vpop.eup %17057 }
 0x71c   : > { %v2592_v34 = vmul.f32 %v17058_v31, %v17042_v61  ;;  %v14154_v61 = vld [vmem:[%s20804_s1 + $0x60] sm:$0xff] }
 0x71d   : > { %v17060_v41 = vpop.eup %17059 }
 0x71e   : > { %15863 = vmatprep.mubr.msk.f32.mxu1 %vm1036_vm1, %v2592_v34  ;;  %v2598_v43 = vmul.f32 %v17060_v41, %v17044_v0  ;;  %v14187_v0 = vld [vmem:[%s20777_s3 + $0x88] sm:$0xff] }
 0x71f   : > { %v17062_v24 = vpop.eup %17061  ;;  %15864 = vmatmul.mubr.msk.f32.vlgmr.msra.gmra.mxu1 %vm1036_vm1, %v2594_v37 }
 0x720   : > { %15874 = vmatpush3.msra.mxu1 %v18008_v25  ;;  %v2596_v32 = vmul.f32 %v17062_v24, %v17046_v3  ;;  %v1813_v25 = vld [vmem:[%s20778_s4] sm:$0xff] }
 0x721   : > { %15875 = vmatprep.subr.mxu1 %v18014_v36  ;;  %v17064_v17 = vpop.eup %17063 }
 0x722   : > { %15876 = vmatpush3.msra.mxu1 %v18014_v36  ;;  %15870 = vmatprep.mubr.msk.f32.mxu0 %vm1036_vm1, %v2596_v32  ;;  %v2602_v45 = vmul.f32 %v17064_v17, %v17048_v5  ;;  %v14173_v36 = vld [vmem:[%s20776_s2 + $0x88] sm:$0xff] }
 0x723   : > { %v17066_v35 = vpop.eup %17065  ;;  %15871 = vmatmul.mubr.msk.f32.vlgmr.msra.gmra.mxu0 %vm1036_vm1, %v2598_v43  ;;  %15896 = vmatprep.subr.mxu1 %v1814_v23 }
 0x724   : > { %v2600_v26 = vmul.f32 %v17066_v35, %v17050_v7  ;;  %v14186_v7 = vld [vmem:[%s20777_s3 + $0x80] sm:$0xff] }
 0x726   : > { %15877 = vmatprep.mubr.msk.f32.mxu1 %vm1036_vm1, %v2600_v26 }
 0x727   : > { %15878 = vmatmul.mubr.msk.f32.vlgmr.msra.gmra.mxu1 %vm1036_vm1, %v2602_v45 }
 0x728   : > { %15897 = vmatpush3.msra.mxu1 %v1814_v23  ;;  %15900 = vmatprep.mubr.msk.f32.mxu1 %vm1036_vm1, %v17965_v29  ;;  %v14171_v29 = vld [vmem:[%s20776_s2 + $0x78] sm:$0xff] }
 0x729   : > { %15898 = vmatprep.subr.mxu1 %v1813_v25 }
 0x72a   : > { %15899 = vmatpush3.msra.mxu1 %v1813_v25 }
 0x72b   : > { %15901 = vmatmul.mubr.msk.f32.vlgmr.msra.gmra.mxu1 %vm1036_vm1, %v17963_v55  ;;  %15936 = vmatprep.subr.mxu1 %v14173_v36  ;;  %v14169_v55 = vld [vmem:[%s20776_s2 + $0x68] sm:$0xff] }
 0x72c   : > { %15903 = vmatprep.mubr.msk.f32.mxu1 %vm1036_vm1, %v17971_v59  ;;  %15937 = vmatpush3.msra.mxu1 %v14173_v36  ;;  %v14168_v59 = vld [vmem:[%s20776_s2 + $0x60] sm:$0xff] }
 0x72d   : > { %15938 = vmatprep.subr.mxu1 %v14172_v20 }
 0x72e   : > { %15939 = vmatpush3.msra.mxu1 %v14172_v20 }
 0x72f   : > { %15904 = vmatmul.mubr.msk.f32.gmra.mxu1 %vm1036_vm1, %v17967_v56  ;;  %15940 = vmatprep.subr.mxu1 %v14171_v29  ;;  %v14137_v56 = vld [vmem:[%s20778_s4 + $0x18] sm:$0xff] }
 0x730   : > { %15906 = vmatprep.mubr.msk.f32.mxu1 %vm1036_vm1, %v17980_v1  ;;  %15941 = vmatpush3.msra.mxu1 %v14171_v29 }
 0x731   : > { %15942 = vmatprep.subr.mxu1 %v14170_v46  ;;  %15880 = vmatprep.subr.mxu0 %v14137_v56 }
 0x732   : > { %15943 = vmatpush3.msra.mxu1 %v14170_v46  ;;  %15881 = vmatpush3.msra.mxu0 %v14137_v56 }
 0x733   : > { %15907 = vmatmul.mubr.msk.f32.gmra.mxu1 %vm1036_vm1, %v17975_v39  ;;  %15944 = vmatprep.subr.mxu1 %v14169_v55 }
 0x734   : > { %15909 = vmatprep.mubr.msk.f32.mxu1 %vm1036_vm1, %v17973_v60  ;;  %15945 = vmatpush3.msra.mxu1 %v14169_v55  ;;  %v14159_v60 = vld [vmem:[%s20804_s1 + $0x88] sm:$0xff] }
 0x735   : > { %15946 = vmatprep.subr.mxu1 %v14168_v59 }
 0x736   : > { %15947 = vmatpush3.msra.mxu1 %v14168_v59 }
 0x737   : > { %15910 = vmatmul.mubr.msk.f32.gmra.mxu1 %vm1036_vm1, %v17969_v58  ;;  %v14136_v58 = vld [vmem:[%s20778_s4 + $0x10] sm:$0xff] }
 0x738   : > { %15948 = vmatprep.mubr.msk.f32.mxu1 %vm545_vm0, %v17690_v42  ;;  %15882 = vmatprep.subr.mxu0 %v14136_v58 }
 0x739   : > { %15883 = vmatpush3.msra.mxu0 %v14136_v58 }
 0x73a   : > { %15912 = vmatprep.subr.mxu0 %v14159_v60 }
 0x73b   : > { %15949 = vmatmul.mubr.msk.f32.vlgmr.msra.gmra.mxu1 %vm545_vm0, %v17698_v50 }
 0x73c   : > { %15951 = vmatprep.mubr.msk.f32.mxu1 %vm545_vm0, %v17701_v52 }
 0x73f   : > { %15952 = vmatmul.mubr.msk.f32.gmra.mxu1 %vm545_vm0, %v17715_v38 }
 0x740   : > { %15954 = vmatprep.mubr.msk.f32.mxu1 %vm545_vm0, %v17719_v57 }
 0x743   : > { %15955 = vmatmul.mubr.msk.f32.gmra.mxu1 %vm545_vm0, %v17733_v48 }
 0x744   : > { %15957 = vmatprep.mubr.msk.f32.mxu1 %vm545_vm0, %v17736_v63 }
 0x747   : > { %15958 = vmatmul.mubr.msk.f32.gmra.mxu1 %vm545_vm0, %v17750_v2 }
 0x7d7   : > { %v15858_v39 = vpop.f32.mrf.mxu0 }
 0x7d9   : > { %v2675_v1 = vpop.f32.mrf.mxu0 }
 0x7da   : > { %15884 = vmatprep.mubr.msk.f32.mxu0 %vm1036_vm1, %v2675_v1 }
 0x7db   : > { %15885 = vmatmul.mubr.msk.f32.vlgmr.msra.gmra.mxu0 %vm1036_vm1, %v15858_v39 }
 0x7dc   : > { %15913 = vmatpush3.msra.mxu0 %v14159_v60 }
 0x7dd   : > { %15914 = vmatprep.subr.mxu0 %v14158_v47 }
 0x7de   : > { %15915 = vmatpush3.msra.mxu0 %v14158_v47 }
 0x7df   : > { %v15865_v53 = vpop.f32.mrf.mxu1  ;;  %15916 = vmatprep.subr.mxu0 %v14157_v51 }
 0x7e0   : > { %15917 = vmatpush3.msra.mxu0 %v14157_v51 }
 0x7e1   : > { %v2756_v54 = vpop.f32.mrf.mxu1  ;;  %15918 = vmatprep.subr.mxu0 %v14156_v28 }
 0x7e2   : > { %15887 = vmatprep.mubr.msk.f32.mxu0 %vm1036_vm1, %v2756_v54  ;;  %15919 = vmatpush3.msra.mxu0 %v14156_v28 }
 0x7e3   : > { %v15872_v62 = vpop.f32.mrf.mxu0  ;;  %15888 = vmatmul.mubr.msk.f32.gmra.mxu0 %vm1036_vm1, %v15865_v53  ;;  %15920 = vmatprep.subr.mxu0 %v14155_v21 }
 0x7e4   : > { %15921 = vmatpush3.msra.mxu0 %v14155_v21 }
 0x7e5   : > { %v2837_v49 = vpop.f32.mrf.mxu0  ;;  %15922 = vmatprep.subr.mxu0 %v14154_v61 }
 0x7e6   : > { %15890 = vmatprep.mubr.msk.f32.mxu0 %vm1036_vm1, %v2837_v49  ;;  %15923 = vmatpush3.msra.mxu0 %v14154_v61 }
 0x7e7   : > { %v15879_v3 = vpop.f32.mrf.mxu1  ;;  %15891 = vmatmul.mubr.msk.f32.gmra.mxu0 %vm1036_vm1, %v15872_v62  ;;  %15960 = vmatprep.subr.mxu0 %v14187_v0 }
 0x7e9   : > { %v2918_v4 = vpop.f32.mrf.mxu1 }
 0x7ea   : > { %15893 = vmatprep.mubr.msk.f32.mxu0 %vm1036_vm1, %v2918_v4 }
 0x7eb   : > { %15894 = vmatmul.mubr.msk.f32.gmra.mxu0 %vm1036_vm1, %v15879_v3  ;;  %v18142_v5 = vpop.f32.mrf.mxu1 }
 0x7ec   : > { %15924 = vmatprep.mubr.msk.f32.mxu0 %vm545_vm0, %v17690_v42 }
 0x7ed   : > { %v18146_v6 = vpop.f32.mrf.mxu1 }
 0x7ef   : > { %v18151_v8 = vpop.f32.mrf.mxu1  ;;  %15925 = vmatmul.mubr.msk.f32.vlgmr.msra.gmra.mxu0 %vm545_vm0, %v17698_v50 }
 0x7f0   : > { %15927 = vmatprep.mubr.msk.f32.mxu0 %vm545_vm0, %v17701_v52  ;;  %15961 = vmatpush3.msra.mxu0 %v14187_v0 }
 0x7f1   : > { %v18160_v10 = vpop.f32.mrf.mxu1  ;;  %15962 = vmatprep.subr.mxu0 %v14186_v7 }
 0x7f2   : > { %15963 = vmatpush3.msra.mxu0 %v14186_v7 }
 0x7f3   : > { %v18165_v12 = vpop.f32.mrf.mxu1  ;;  %15928 = vmatmul.mubr.msk.f32.gmra.mxu0 %vm545_vm0, %v17715_v38  ;;  %15964 = vmatprep.subr.mxu0 %v14185_v9 }
 0x7f4   : > { %15930 = vmatprep.mubr.msk.f32.mxu0 %vm545_vm0, %v17719_v57  ;;  %15965 = vmatpush3.msra.mxu0 %v14185_v9 }
 0x7f5   : > { %v18174_v14 = vpop.f32.mrf.mxu1  ;;  %15966 = vmatprep.subr.mxu0 %v14184_v11 }
 0x7f6   : > { %15967 = vmatpush3.msra.mxu0 %v14184_v11 }
 0x7f7   : > { %v18179_v16 = vpop.f32.mrf.mxu1  ;;  %15931 = vmatmul.mubr.msk.f32.gmra.mxu0 %vm545_vm0, %v17733_v48  ;;  %15968 = vmatprep.subr.mxu0 %v14183_v13 }
 0x7f8   : > { %15933 = vmatprep.mubr.msk.f32.mxu0 %vm545_vm0, %v17736_v63  ;;  %15969 = vmatpush3.msra.mxu0 %v14183_v13 }
 0x7f9   : > { %v18185_v18 = vpop.f32.mrf.mxu1  ;;  %15970 = vmatprep.subr.mxu0 %v14182_v15 }
 0x7fa   : > { %15971 = vmatpush3.msra.mxu0 %v14182_v15 }
 0x7fb   : > { %15934 = vmatmul.mubr.msk.f32.gmra.mxu0 %vm545_vm0, %v17750_v2  ;;  %v15950_v19 = vpop.f32.mrf.mxu1 }
 0x7fc   : > { %15972 = vmatprep.mubr.msk.f32.mxu0 %vm545_vm0, %v17690_v42  ;;  %15984 = vmatprep.subr.msk.mxu1 %vm1036_vm1, %v15950_v19 }
 0x7fd   : > { %v3373_v22 = vpop.f32.mrf.mxu1  ;;  %15985 = vmatpush3.xpose.msk.msra.mxu1 %vm1036_vm1, %v15950_v19 }
 0x7fe   : > { %15986 = vmatprep.subr.msk.mxu1 %vm1036_vm1, %v3373_v22 }
 0x7ff   : > { %v15953_v27 = vpop.f32.mrf.mxu1  ;;  %15973 = vmatmul.mubr.msk.f32.vlgmr.msra.gmra.mxu0 %vm545_vm0, %v17698_v50 }
 0x800   : > { %15975 = vmatprep.mubr.msk.f32.mxu0 %vm545_vm0, %v17701_v52 }
 0x801   : > { %v3383_v30 = vpop.f32.mrf.mxu1  ;;  %15987 = vmatpush3.xpose.msk.msra.mxu1 %vm1036_vm1, %v3373_v22 }
 0x802   : > { %15991 = vmatprep.subr.msk.mxu1 %vm1036_vm1, %v15953_v27 }
 0x803   : > { %v15956_v42 = vpop.f32.mrf.mxu1  ;;  %15976 = vmatmul.mubr.msk.f32.gmra.mxu0 %vm545_vm0, %v17715_v38 }
 0x804   : > { %15978 = vmatprep.mubr.msk.f32.mxu0 %vm545_vm0, %v17719_v57  ;;  %15998 = vmatprep.subr.msk.mxu0 %vm1036_vm1, %v15956_v42 }
 0x805   : > { %v3393_v31 = vpop.f32.mrf.mxu1  ;;  %15999 = vmatpush3.xpose.msk.msra.mxu0 %vm1036_vm1, %v15956_v42 }
 0x806   : > { %16000 = vmatprep.subr.msk.mxu0 %vm1036_vm1, %v3393_v31 }
 0x807   : > { %15979 = vmatmul.mubr.msk.f32.gmra.mxu0 %vm545_vm0, %v17733_v48  ;;  %v15959_v43 = vpop.f32.mrf.mxu1 }
 0x808   : > { %15981 = vmatprep.mubr.msk.f32.mxu0 %vm545_vm0, %v17736_v63 }
 0x809   : > { %16001 = vmatpush3.xpose.msk.msra.mxu0 %vm1036_vm1, %v3393_v31  ;;  %v3403_v26 = vpop.f32.mrf.mxu1 }
 0x80b   : > { %15982 = vmatmul.mubr.msk.f32.gmra.mxu0 %vm545_vm0, %v17750_v2 }
 0x89b   : > { %v18214_v50 = vpop.f32.mrf.mxu0 }
 0x89d   : > { %v18216_v52 = vpop.f32.mrf.mxu0 }
 0x8a3   : > { %v18218_v38 = vpop.f32.mrf.mxu0 }
 0x8a5   : > { %v18220_v57 = vpop.f32.mrf.mxu0 }
 0x8a7   : > { %v18222_v34 = vpop.f32.mrf.mxu0 }
 0x8a9   : > { %v18224_v37 = vpop.f32.mrf.mxu0 }
 0x8ab   : > { %v18226_v48 = vpop.f32.mrf.mxu0 }
 0x8ad   : > { %v18228_v63 = vpop.f32.mrf.mxu0 }
 0x8af   : > { %v15926_v41 = vpop.f32.mrf.mxu0 }
 0x8b1   : > { %v3261_v24 = vpop.f32.mrf.mxu0 }
 0x8b2   : > { %15988 = vmatprep.mubr.msk.f32.mxu1 %vm1036_vm1, %v3261_v24 }
 0x8b3   : > { %v15929_v2 = vpop.f32.mrf.mxu0  ;;  %15989 = vmatmul.mubr.msk.f32.vlgmr.msra.gmra.mxu1 %vm1036_vm1, %v15926_v41 }
 0x8b4   : > { %15992 = vmatpush3.xpose.msk.msra.mxu1 %vm1036_vm1, %v15953_v27 }
 0x8b5   : > { %15993 = vmatprep.subr.msk.mxu1 %vm1036_vm1, %v3383_v30  ;;  %v3271_v32 = vpop.f32.mrf.mxu0 }
 0x8b6   : > { %15995 = vmatprep.mubr.msk.f32.mxu1 %vm1036_vm1, %v3271_v32 }
 0x8b7   : > { %v15932_v23 = vpop.f32.mrf.mxu0 }
 0x8b8   : > { %15994 = vmatpush3.xpose.msk.msra.mxu1 %vm1036_vm1, %v3383_v30 }
 0x8b9   : > { %16005 = vmatprep.subr.msk.mxu1 %vm1036_vm1, %v15959_v43  ;;  %v3281_v17 = vpop.f32.mrf.mxu0 }
 0x8ba   : > { %16002 = vmatprep.mubr.msk.f32.mxu0 %vm1036_vm1, %v3281_v17 }
 0x8bb   : > { %15996 = vmatmul.mubr.msk.f32.vlgmr.msra.gmra.mxu1 %vm1036_vm1, %v15929_v2  ;;  %v15935_v35 = vpop.f32.mrf.mxu0  ;;  %16003 = vmatmul.mubr.msk.f32.vlgmr.msra.gmra.mxu0 %vm1036_vm1, %v15932_v23 }
 0x8bc   : > { %16006 = vmatpush3.xpose.msk.msra.mxu1 %vm1036_vm1, %v15959_v43 }
 0x8bd   : > { %16007 = vmatprep.subr.msk.mxu1 %vm1036_vm1, %v3403_v26  ;;  %v3291_v45 = vpop.f32.mrf.mxu0 }
 0x8be   : > { %16009 = vmatprep.mubr.msk.f32.mxu1 %vm1036_vm1, %v3291_v45 }
 0x8bf   : > { %v15974_v25 = vpop.f32.mrf.mxu0 }
 0x8c0   : > { %16008 = vmatpush3.xpose.msk.msra.mxu1 %vm1036_vm1, %v3403_v26  ;;  %16012 = vmatprep.subr.mxu0 %v15974_v25 }
 0x8c1   : > { %v3485_v36 = vpop.f32.mrf.mxu0  ;;  %16013 = vmatpush3.msra.mxu0 %v15974_v25 }
 0x8c2   : > { %16014 = vmatprep.subr.mxu0 %v3485_v36 }
 0x8c3   : > { %16010 = vmatmul.mubr.msk.f32.vlgmr.msra.gmra.mxu1 %vm1036_vm1, %v15935_v35  ;;  %v15977_v20 = vpop.f32.mrf.mxu0  ;;  %16015 = vmatpush3.msra.mxu0 %v3485_v36 }
 0x8c4   : > { %16019 = vmatprep.subr.mxu1 %v15977_v20 }
 0x8c5   : > { %v3495_v29 = vpop.f32.mrf.mxu0  ;;  %16020 = vmatpush3.msra.mxu1 %v15977_v20 }
 0x8c6   : > { %16021 = vmatprep.subr.mxu1 %v3495_v29 }
 0x8c7   : > { %v18245_v46 = vpop.f32.mrf.mxu0  ;;  %16022 = vmatpush3.msra.mxu1 %v3495_v29 }
 0x8c8   : > { %16026 = vmatprep.subr.mxu0 %v18245_v46 }
 0x8c9   : > { %v18248_v55 = vpop.f32.mrf.mxu0 }
 0x8cb   : > { %v18250_v59 = vpop.f32.mrf.mxu0 }
 0x8cc   : > { %16033 = vmatprep.subr.mxu1 %v18250_v59 }
 0x8cd   : > { %v18256_v28 = vpop.f32.mrf.mxu0 }
 0x973   : > { %v15990_v56 = vpop.f32.mrf.mxu1 }
 0x974   : > { %v3873_v58 = vmul.f32 0.14433756, %v15990_v56 }
 0x975   : > { %v3602_v60 = vpop.f32.mrf.mxu1 }
 0x976   : > { %v3872_v39 = vmul.f32 0.14433756, %v3602_v60  ;;  %v3881_v1 = vadd.f32 %v3873_v58, %v17814_v40 }
 0x978   : > { %v3891_v47 = vsel %vm1036_vm1, %v3881_v1, -inf  ;;  %v3880_v51 = vadd.f32 %v3872_v39, %v17816_v44 }
 0x979   : > { %3892 = vmax.xlane.f32.xlu1 %v3891_v47 }
 0x97a   : > { %v3888_v53 = vsel %vm1036_vm1, %v3880_v51, -inf }
 0x97b   : > { %v15997_v21 = vpop.f32.mrf.mxu1  ;;  %3889 = vmax.xlane.f32.xlu0 %v3888_v53  ;;  %v16004_v54 = vpop.f32.mrf.mxu0 }
 0x97c   : > { %v3875_v61 = vmul.f32 0.14433756, %v15997_v21  ;;  %v3877_v62 = vmul.f32 0.14433756, %v16004_v54 }
 0x97d   : > { %v3689_v0 = vpop.f32.mrf.mxu1  ;;  %v3776_v49 = vpop.f32.mrf.mxu0 }
 0x97e   : > { %v3874_v3 = vmul.f32 0.14433756, %v3689_v0  ;;  %v3876_v4 = vmul.f32 0.14433756, %v3776_v49  ;;  %v3883_v7 = vadd.f32 %v3875_v61, %v17814_v40  ;;  %v3885_v13 = vadd.f32 %v3877_v62, %v17814_v40 }
 0x980   : > { %v3897_v9 = vsel %vm1036_vm1, %v3883_v7, -inf  ;;  %v3882_v11 = vadd.f32 %v3874_v3, %v17816_v44  ;;  %v3884_v19 = vadd.f32 %v3876_v4, %v17816_v44  ;;  %v3903_v30 = vsel %vm1036_vm1, %v3885_v13, -inf }
 0x981   : > { %3898 = vmax.xlane.f32.xlu1 %v3897_v9 }
 0x982   : > { %v3894_v15 = vsel %vm1036_vm1, %v3882_v11, -inf  ;;  %v3900_v41 = vsel %vm1036_vm1, %v3884_v19, -inf }
 0x983   : > { %3895 = vmax.xlane.f32.xlu0 %v3894_v15  ;;  %v16011_v22 = vpop.f32.mrf.mxu1 }
 0x984   : > { %v3879_v27 = vmul.f32 0.14433756, %v16011_v22 }
 0x985   : > { %v3863_v42 = vpop.f32.mrf.mxu1  ;;  %3904 = vmax.xlane.f32.xlu1 %v3903_v30 }
 0x986   : > { %v3878_v31 = vmul.f32 0.14433756, %v3863_v42  ;;  %v3887_v24 = vadd.f32 %v3879_v27, %v17814_v40 }
 0x987   : > { %3901 = vmax.xlane.f32.xlu0 %v3900_v41 }
 0x988   : > { %v3909_v2 = vsel %vm1036_vm1, %v3887_v24, -inf  ;;  %v3886_v32 = vadd.f32 %v3878_v31, %v17816_v44 }
 0x989   : > { %3910 = vmax.xlane.f32.xlu1 %v3909_v2 }
 0x98a   : > { %v3906_v23 = vsel %vm1036_vm1, %v3886_v32, -inf }
 0x98b   : > { %3907 = vmax.xlane.f32.xlu0 %v3906_v23 }
 0xa02   : > { %v3893_v43 = vpop.xlane.xlu1 %3892 }
 0xa03   : > { %v3913_v17 = vsub.f32 %v3881_v1, %v3893_v43 }
 0xa04   : > { %v3890_v35 = vpop.xlane.xlu0 %3889 }
 0xa05   : > { %v3922_v26 = vmul.f32 1.442695, %v3913_v17  ;;  %v3912_v45 = vsub.f32 %v3880_v51, %v3890_v35 }
 0xa07   : > { %17067 = vpow2.f32 %v3922_v26  ;;  %v3920_v25 = vmul.f32 1.442695, %v3912_v45 }
 0xa09   : > { %17069 = vpow2.f32 %v3920_v25 }
 0xa0a   : > { %v3899_v36 = vpop.xlane.xlu1 %3898 }
 0xa0b   : > { %v3915_v20 = vsub.f32 %v3883_v7, %v3899_v36 }
 0xa0c   : > { %v3896_v29 = vpop.xlane.xlu0 %3895 }
 0xa0d   : > { %v3926_v56 = vmul.f32 1.442695, %v3915_v20  ;;  %v3914_v58 = vsub.f32 %v3882_v11, %v3896_v29 }
 0xa0e   : > { %v3905_v60 = vpop.xlane.xlu1 %3904 }
 0xa0f   : > { %17071 = vpow2.f32 %v3926_v56  ;;  %v3924_v39 = vmul.f32 1.442695, %v3914_v58  ;;  %v3917_v47 = vsub.f32 %v3885_v13, %v3905_v60 }
 0xa10   : > { %v3902_v53 = vpop.xlane.xlu0 %3901 }
 0xa11   : > { %17073 = vpow2.f32 %v3924_v39  ;;  %v3930_v21 = vmul.f32 1.442695, %v3917_v47  ;;  %v3916_v54 = vsub.f32 %v3884_v19, %v3902_v53 }
 0xa12   : > { %v3911_v1 = vpop.xlane.xlu1 %3910 }
 0xa13   : > { %17075 = vpow2.f32 %v3930_v21  ;;  %v3928_v61 = vmul.f32 1.442695, %v3916_v54  ;;  %v3919_v51 = vsub.f32 %v3887_v24, %v3911_v1 }
 0xa14   : > { %v17068_v62 = vpop.eup %17067  ;;  %v3908_v0 = vpop.xlane.xlu0 %3907 }
 0xa15   : > { %17077 = vpow2.f32 %v3928_v61  ;;  %v3934_v49 = vmul.f32 1.442695, %v3919_v51  ;;  %v3918_v3 = vsub.f32 %v3886_v32, %v3908_v0  ;;  %v3939_v4 = vsel %vm1036_vm1, %v17068_v62, 0.0 }
 0xa16   : > { %v17070_v7 = vpop.eup %17069  ;;  %3940 = vadd.xlane.f32.xlu1 %v3939_v4 }
 0xa17   : > { %17079 = vpow2.f32 %v3934_v49  ;;  %v3932_v9 = vmul.f32 1.442695, %v3918_v3  ;;  %v3936_v11 = vsel %vm1036_vm1, %v17070_v7, 0.0 }
 0xa18   : > { %3937 = vadd.xlane.f32.xlu0 %v3936_v11 }
 0xa19   : > { %17081 = vpow2.f32 %v3932_v9 }
 0xa1c   : > { %v17072_v13 = vpop.eup %17071 }
 0xa1d   : > { %v3945_v15 = vsel %vm1036_vm1, %v17072_v13, 0.0 }
 0xa1e   : > { %v17074_v19 = vpop.eup %17073  ;;  %3946 = vadd.xlane.f32.xlu1 %v3945_v15  ;;  %v3155_v15 = vadd.f32 %v18142_v5, %v18214_v50  ;;  %v3165_v5 = vadd.f32 %v18151_v8, %v18218_v38  ;;  %v3175_v8 = vadd.f32 %v18165_v12, %v18222_v34  ;;  %v17373_v38 = vld [vmem:[%s17583_s29 + $0x18] sm:$0xff] }
 0xa1f   : > { %v3942_v22 = vsel %vm1036_vm1, %v17074_v19, 0.0 }
 0xa20   : > { %v17076_v27 = vpop.eup %17075  ;;  %3943 = vadd.xlane.f32.xlu0 %v3942_v22  ;;  %v3150_v22 = vadd.f32 %v18146_v6, %v18216_v52 }
 0xa21   : > { %v3951_v30 = vsel %vm1036_vm1, %v17076_v27, 0.0 }
 0xa22   : > { %v17078_v42 = vpop.eup %17077  ;;  %3952 = vadd.xlane.f32.xlu1 %v3951_v30  ;;  %v14230_v30 = vld [vmem:[%s20779_s5] ss:$0 sm:$0xff] }
 0xa23   : > { %v3948_v31 = vsel %vm1036_vm1, %v17078_v42, 0.0 }
 0xa24   : > { %v17080_v41 = vpop.eup %17079  ;;  %3949 = vadd.xlane.f32.xlu0 %v3948_v31  ;;  %v17371_v31 = vld [vmem:[%s17583_s29 + $0x8] sm:$0xff] }
 0xa25   : > { %v3957_v24 = vsel %vm1036_vm1, %v17080_v41, 0.0 }
 0xa26   : > { %v17082_v2 = vpop.eup %17081  ;;  %3958 = vadd.xlane.f32.xlu1 %v3957_v24 }
 0xa27   : > { %v3954_v32 = vsel %vm1036_vm1, %v17082_v2, 0.0 }
 0xa28   : > { %3955 = vadd.xlane.f32.xlu0 %v3954_v32  ;;  %v17372_v32 = vld [vmem:[%s17583_s29] sm:$0xff] }
 0xa9f   : > { %v3941_v23 = vpop.xlane.xlu1 %3940 }
 0xaa0   : > { %17083 = vrcp.f32 %v3941_v23 }
 0xaa1   : > { %v3938_v43 = vpop.xlane.xlu0 %3937 }
 0xaa2   : > { %17085 = vrcp.f32 %v3938_v43  ;;  %v3160_v43 = vadd.f32 %v18160_v10, %v18220_v57  ;;  %v17374_v10 = vld [vmem:[%s17583_s29 + $0x10] sm:$0xff] }
 0xaa7   : > { %v3947_v17 = vpop.xlane.xlu1 %3946 }
 0xaa8   : > { %17087 = vrcp.f32 %v3947_v17 }
 0xaa9   : > { %v3944_v35 = vpop.xlane.xlu0 %3943 }
 0xaaa   : > { %17089 = vrcp.f32 %v3944_v35 }
 0xaab   : > { %v3953_v26 = vpop.xlane.xlu1 %3952 }
 0xaac   : > { %17091 = vrcp.f32 %v3953_v26 }
 0xaad   : > { %v3950_v45 = vpop.xlane.xlu0 %3949  ;;  %v17084_v25 = vpop.eup %17083 }
 0xaae   : > { %17093 = vrcp.f32 %v3950_v45  ;;  %v3963_v58 = vmul.f32 %v17084_v25, %v17068_v62 }
 0xaaf   : > { %v17086_v36 = vpop.eup %17085  ;;  %v3959_v20 = vpop.xlane.xlu1 %3958 }
 0xab0   : > { %v3961_v29 = vmul.f32 %v17086_v36, %v17070_v7  ;;  %17095 = vrcp.f32 %v3959_v20  ;;  %v3170_v20 = vadd.f32 %v18174_v14, %v18224_v37  ;;  %v3180_v14 = vadd.f32 %v18185_v18, %v18228_v63 }
 0xab1   : > { %v3956_v56 = vpop.xlane.xlu0 %3955 }
 0xab2   : > { %17097 = vrcp.f32 %v3956_v56  ;;  %16016 = vmatprep.mubr.msk.f32.mxu0 %vm1036_vm1, %v3961_v29 }
 0xab3   : > { %16017 = vmatmul.mubr.msk.f32.vlgmr.msra.gmra.mxu0 %vm1036_vm1, %v3963_v58  ;;  %v3185_v58 = vadd.f32 %v18179_v16, %v18226_v48 }
 0xab4   : > { %16027 = vmatpush3.msra.mxu0 %v18245_v46 }
 0xab5   : > { %16028 = vmatprep.subr.mxu0 %v18248_v55  ;;  %v17088_v60 = vpop.eup %17087 }
 0xab6   : > { %16029 = vmatpush3.msra.mxu0 %v18248_v55  ;;  %v3967_v53 = vmul.f32 %v17088_v60, %v17072_v13 }
 0xab7   : > { %v17090_v39 = vpop.eup %17089 }
 0xab8   : > { %v3965_v47 = vmul.f32 %v17090_v39, %v17074_v19  ;;  %v17375_v39 = vld [vmem:[%s17583_s29 + $0x28] sm:$0xff] }
 0xab9   : > { %v17092_v21 = vpop.eup %17091 }
 0xaba   : > { %16023 = vmatprep.mubr.msk.f32.mxu1 %vm1036_vm1, %v3965_v47  ;;  %v3971_v46 = vmul.f32 %v17092_v21, %v17076_v27 }
 0xabb   : > { %v17094_v54 = vpop.eup %17093  ;;  %16024 = vmatmul.mubr.msk.f32.vlgmr.msra.gmra.mxu1 %vm1036_vm1, %v3967_v53 }
 0xabc   : > { %16034 = vmatpush3.msra.mxu1 %v18250_v59  ;;  %v3969_v1 = vmul.f32 %v17094_v54, %v17078_v42  ;;  %v14221_v59 = vld [vmem:[%s20778_s4 + $0x28] sm:$0xff]  ;;  %v17376_v54 = vld [vmem:[%s17583_s29 + $0x20] sm:$0xff] }
 0xabd   : > { %16035 = vmatprep.subr.mxu1 %v18256_v28  ;;  %v17096_v61 = vpop.eup %17095  ;;  %16040 = vmatprep.subr.mxu0 %v14221_v59 }
 0xabe   : > { %16036 = vmatpush3.msra.mxu1 %v18256_v28  ;;  %16030 = vmatprep.mubr.msk.f32.mxu0 %vm1036_vm1, %v3969_v1  ;;  %v3975_v62 = vmul.f32 %v17096_v61, %v17080_v41  ;;  %v14220_v28 = vld [vmem:[%s20778_s4 + $0x20] sm:$0xff]  ;;  %v17377_v61 = vld [vmem:[%s17583_s29 + $0x38] sm:$0xff] }
 0xabf   : > { %v17098_v55 = vpop.eup %17097  ;;  %16031 = vmatmul.mubr.msk.f32.vlgmr.msra.gmra.mxu0 %vm1036_vm1, %v3971_v46 }
 0xac0   : > { %v3973_v51 = vmul.f32 %v17098_v55, %v17082_v2  ;;  %16041 = vmatpush3.msra.mxu0 %v14221_v59  ;;  %v17378_v59 = vld [vmem:[%s17583_s29 + $0x30] sm:$0xff]  ;;  %s13950_s29 = sshll.u32 %s517_s17, 4  ;;  %s20730_s29 = int_to_ptr.vmem [resolvable:$true] %s13950_s29 }
 0xac1   : > { %16042 = vmatprep.subr.mxu0 %v14220_v28  ;;  %s17379_s25 = scalar_lea.vmem %s20730_s29, 1024  ;;  %p17386_p0 = scmp.lt.s32.totalorder %s20730_s29, %s17384_s30 }
 0xac2   : > { %16037 = vmatprep.mubr.msk.f32.mxu1 %vm1036_vm1, %v3973_v51  ;;  %16043 = vmatpush3.msra.mxu0 %v14220_v28  ;;  %p17380_p11 = scmp.ne.s32.totalorder %s20730_s29, %s17379_s25  ;;  %p17387_p1 = scmp.lt.s32.totalorder %s17385_s28, %s17379_s25 }
 0xac3   : > { %16038 = vmatmul.mubr.msk.f32.vlgmr.msra.gmra.mxu1 %vm1036_vm1, %v3975_v62 }
 0xac4   : > { %p17381_p12 = pnand %p17380_p11, %p17569_p5  ;;  %p17388_p2 = por %p17387_p1, %p17386_p0 }
 0xac6   : > { %p17382_p13 = pneg %p17381_p12 }
 0xac8   : > { %p17389_p3 = pnand %p17388_p2, %p17382_p13 }
 0xb73   : > { %v16018_v0 = vpop.f32.mrf.mxu0 }
 0xb75   : > { %v4048_v49 = vpop.f32.mrf.mxu0 }
 0xb76   : > { %16044 = vmatprep.mubr.msk.f32.mxu0 %vm1036_vm1, %v4048_v49 }
 0xb77   : > { %16045 = vmatmul.mubr.msk.f32.vlgmr.msra.gmra.mxu0 %vm1036_vm1, %v16018_v0 }
 0xb7b   : > { %v16025_v3 = vpop.f32.mrf.mxu1 }
 0xb7d   : > { %v4129_v4 = vpop.f32.mrf.mxu1 }
 0xb7e   : > { %16047 = vmatprep.mubr.msk.f32.mxu0 %vm1036_vm1, %v4129_v4 }
 0xb7f   : > { %v16032_v7 = vpop.f32.mrf.mxu0  ;;  %16048 = vmatmul.mubr.msk.f32.gmra.mxu0 %vm1036_vm1, %v16025_v3 }
 0xb81   : > { %v4210_v9 = vpop.f32.mrf.mxu0 }
 0xb82   : > { %16050 = vmatprep.mubr.msk.f32.mxu0 %vm1036_vm1, %v4210_v9 }
 0xb83   : > { %v16039_v11 = vpop.f32.mrf.mxu1  ;;  %16051 = vmatmul.mubr.msk.f32.gmra.mxu0 %vm1036_vm1, %v16032_v7 }
 0xb85   : > { %v4291_v13 = vpop.f32.mrf.mxu1 }
 0xb86   : > { %16053 = vmatprep.mubr.msk.f32.mxu0 %vm1036_vm1, %v4291_v13 }
 0xb87   : > { %16054 = vmatmul.mubr.msk.f32.gmra.mxu0 %vm1036_vm1, %v16039_v11 }
 0xc37   : > { %v16046_v19 = vpop.f32.mrf.mxu0 }
 0xc38   : > { %v4433_v27 = vadd.f32 %v16046_v19, %v3155_v15 }
 0xc39   : > { %v4393_v42 = vpop.f32.mrf.mxu0 }
 0xc3a   : > { %v4441_v41 = vadd.f32 %v17371_v31, %v4433_v27  ;;  %v4432_v24 = vadd.f32 %v4393_v42, %v3150_v22 }
 0xc3c   : > { %v18315_v2 = vadd.f32 %v14230_v30, %v4441_v41  ;;  %v4440_v23 = vadd.f32 %v17372_v32, %v4432_v24 }
 0xc3e   : > { %v4468_v6 = vsel %vm545_vm0, %v18315_v2, 0.0  ;;  %v18322_v50 = vadd.f32 %v14230_v30, %v4440_v23 }
 0xc3f   : > { %v16049_v52 = vpop.f32.mrf.mxu0  ;;  %4469 = vadd.xlane.f32.xlu1 %v4468_v6 }
 0xc40   : > { %v4435_v17 = vadd.f32 %v16049_v52, %v3165_v5  ;;  %v4465_v35 = vsel %vm545_vm0, %v18322_v50, 0.0 }
 0xc41   : > { %v4403_v26 = vpop.f32.mrf.mxu0  ;;  %4466 = vadd.xlane.f32.xlu0 %v4465_v35 }
 0xc42   : > { %v4443_v45 = vadd.f32 %v17373_v38, %v4435_v17  ;;  %v4434_v25 = vadd.f32 %v4403_v26, %v3160_v43 }
 0xc43   : > { %v16052_v36 = vpop.f32.mrf.mxu0 }
 0xc44   : > { %v18333_v29 = vadd.f32 %v14230_v30, %v4443_v45  ;;  %v4442_v57 = vadd.f32 %v17374_v10, %v4434_v25  ;;  %v4437_v56 = vadd.f32 %v16052_v36, %v3175_v8 }
 0xc45   : > { %v4413_v60 = vpop.f32.mrf.mxu0 }
 0xc46   : > { %v4445_v12 = vadd.f32 %v17375_v39, %v4437_v56  ;;  %v4436_v34 = vadd.f32 %v4413_v60, %v3170_v20  ;;  %v4474_v47 = vsel %vm545_vm0, %v18333_v29, 0.0  ;;  %v18341_v53 = vadd.f32 %v14230_v30, %v4442_v57 }
 0xc47   : > { %4475 = vadd.xlane.f32.xlu1 %v4474_v47  ;;  %v16055_v37 = vpop.f32.mrf.mxu0 }
 0xc48   : > { %v18345_v21 = vadd.f32 %v14230_v30, %v4445_v12  ;;  %v4444_v16 = vadd.f32 %v17376_v54, %v4436_v34  ;;  %v4439_v48 = vadd.f32 %v16055_v37, %v3185_v58  ;;  %v4471_v1 = vsel %vm545_vm0, %v18341_v53, 0.0 }
 0xc49   : > { %4472 = vadd.xlane.f32.xlu0 %v4471_v1  ;;  %v4423_v46 = vpop.f32.mrf.mxu0  ;;  %v4606_v1 = vld [vmem:[%s20784_s10 + $0x48] sm:$0xff] }
 0xc4a   : > { %v4447_v55 = vadd.f32 %v17377_v61, %v4439_v48  ;;  %v4438_v51 = vadd.f32 %v4423_v46, %v3180_v14  ;;  %v4480_v62 = vsel %vm545_vm0, %v18345_v21, 0.0  ;;  %v18353_v18 = vadd.f32 %v14230_v30, %v4444_v16  ;;  %v4608_v16 = vld [vmem:[%s20784_s10 + $0x58] sm:$0xff]  ;;  %v4607_v48 = vld [vmem:[%s20784_s10 + $0x50] sm:$0xff]  ;;  %v4605_v46 = vld [vmem:[%s20784_s10 + $0x40] sm:$0xff] }
 0xc4b   : > { %4481 = vadd.xlane.f32.xlu1 %v4480_v62  ;;  %4665 = vmatprep.subr.mxu1 %v4608_v16  ;;  %v4604_v61 = vld [vmem:[%s20784_s10 + $0x38] sm:$0xff]  ;;  %v4601_v62 = vld [vmem:[%s20784_s10 + $0x20] sm:$0xff] }
 0xc4c   : > { %v18355_v63 = vadd.f32 %v14230_v30, %v4447_v55  ;;  %v4446_v28 = vadd.f32 %v17378_v59, %v4438_v51  ;;  %v4477_v0 = vsel %vm545_vm0, %v18353_v18, 0.0  ;;  %4666 = vmatpush1.msra.mxu1 %v4607_v48  ;;  %v4603_v55 = vld [vmem:[%s20784_s10 + $0x30] sm:$0xff]  ;;  %v4602_v51 = vld [vmem:[%s20784_s10 + $0x28] sm:$0xff]  ;;  %v4600_v59 = vld [vmem:[%s20784_s10 + $0x18] sm:$0xff] }
 0xc4d   : > { %4478 = vadd.xlane.f32.xlu0 %v4477_v0  ;;  %4667 = vmatprep.subr.mxu1 %v4606_v1  ;;  %v4598_v0 = vld [vmem:[%s20784_s10 + $0x8] sm:$0xff] }
 0xc4e   : > { %v4486_v49 = vsel %vm545_vm0, %v18355_v63, 0.0  ;;  %v18362_v3 = vadd.f32 %v14230_v30, %v4446_v28  ;;  %4668 = vmatpush1.msra.mxu1 %v4605_v46  ;;  %v4599_v28 = vld [vmem:[%s20784_s10 + $0x10] sm:$0xff] }
 0xc4f   : > { %4487 = vadd.xlane.f32.xlu1 %v4486_v49  ;;  %4669 = vmatprep.subr.mxu1 %v4604_v61  ;;  %v17442_v49 = vmov 0.0  }
 0xc50   : > { %v4483_v4 = vsel %vm545_vm0, %v18362_v3, 0.0  ;;  %4670 = vmatpush1.msra.mxu1 %v4603_v55  ;;  %4709 = vmatprep.mubr.f32.mxu1 %v17442_v49 }
 0xc51   : > { %4484 = vadd.xlane.f32.xlu0 %v4483_v4  ;;  %4671 = vmatprep.subr.mxu1 %v4602_v51  ;;  %v4597_v4 = vld [vmem:[%s20784_s10] sm:$0xff] }
 0xc52   : > { %4672 = vmatpush1.msra.mxu1 %v4601_v62  ;;  %4823 = vmatprep.subr.mxu0 %v17442_v49 }
 0xc53   : > { %4673 = vmatprep.subr.mxu1 %v4600_v59 }
 0xc54   : > { %4674 = vmatpush1.msra.mxu1 %v4599_v28 }
 0xc55   : > { %4675 = vmatprep.subr.mxu1 %v4598_v0 }
 0xc56   : > { %4676 = vmatpush1.msra.mxu1 %v4597_v4 }
 0xcc8   : > { %v4470_v7 = vpop.xlane.xlu1 %4469 }
 0xcc9   : > { %v4490_v9 = vmul.f32 0.020833334, %v4470_v7  ;;  %v4789_v7 = vld [vmem:[%s20786_s12 + $0x78] sm:$0xff] }
 0xcca   : > { %v4467_v11 = vpop.xlane.xlu0 %4466  ;;  %4824 = vmatpush1.msra.mxu0 %v4789_v7 }
 0xccb   : > { %v18367_v13 = vsub.f32 %v18315_v2, %v4490_v9  ;;  %v4489_v15 = vmul.f32 0.020833334, %v4467_v11  ;;  %v4788_v9 = vld [vmem:[%s20786_s12 + $0x70] sm:$0xff]  ;;  %4825 = vmatprep.subr.mxu0 %v17442_v49  ;;  %v4787_v11 = vld [vmem:[%s20786_s12 + $0x68] sm:$0xff] }
 0xccc   : > { %4826 = vmatpush1.msra.mxu0 %v4788_v9 }
 0xccd   : > { %v18370_v19 = vsub.f32 %v18322_v50, %v4489_v15  ;;  %v4506_v22 = vmul.f32 %v18367_v13, %v18367_v13  ;;  %4827 = vmatprep.subr.mxu0 %v17442_v49  ;;  %v4786_v15 = vld [vmem:[%s20786_s12 + $0x60] sm:$0xff] }
 0xcce   : > { %4828 = vmatpush1.msra.mxu0 %v4787_v11 }
 0xccf   : > { %v4516_v27 = vsel %vm545_vm0, %v4506_v22, 0.0  ;;  %v4505_v30 = vmul.f32 %v18370_v19, %v18370_v19  ;;  %4829 = vmatprep.subr.mxu0 %v17442_v49  ;;  %v4785_v22 = vld [vmem:[%s20786_s12 + $0x58] sm:$0xff] }
 0xcd0   : > { %v4476_v42 = vpop.xlane.xlu1 %4475  ;;  %4517 = vadd.xlane.f32.xlu1 %v4516_v27  ;;  %4830 = vmatpush1.msra.mxu0 %v4786_v15  ;;  %v4784_v27 = vld [vmem:[%s20786_s12 + $0x50] sm:$0xff]  ;;  %v14231_v15 = vld [vmem:[%s20782_s8] ss:$0 sm:$0xff] }
 0xcd1   : > { %v4492_v31 = vmul.f32 0.020833334, %v4476_v42  ;;  %v4513_v41 = vsel %vm545_vm0, %v4505_v30, 0.0  ;;  %4831 = vmatprep.subr.mxu0 %v17442_v49  ;;  %v4783_v30 = vld [vmem:[%s20786_s12 + $0x48] sm:$0xff]  ;;  %v4782_v42 = vld [vmem:[%s20786_s12 + $0x40] sm:$0xff] }
 0xcd2   : > { %v4473_v24 = vpop.xlane.xlu0 %4472  ;;  %4514 = vadd.xlane.f32.xlu0 %v4513_v41  ;;  %4832 = vmatpush1.msra.mxu0 %v4785_v22  ;;  %v4780_v41 = vld [vmem:[%s20786_s12 + $0x30] sm:$0xff] }
 0xcd3   : > { %v18379_v32 = vsub.f32 %v18333_v29, %v4492_v31  ;;  %v4491_v23 = vmul.f32 0.020833334, %v4473_v24  ;;  %4833 = vmatprep.subr.mxu0 %v17442_v49  ;;  %v4781_v31 = vld [vmem:[%s20786_s12 + $0x38] sm:$0xff]  ;;  %v4779_v24 = vld [vmem:[%s20786_s12 + $0x28] sm:$0xff] }
 0xcd4   : > { %v4482_v5 = vpop.xlane.xlu1 %4481  ;;  %4834 = vmatpush1.msra.mxu0 %v4784_v27  ;;  %v14232_v27 = vld [vmem:[%s20783_s9] ss:$0 sm:$0xff] }
 0xcd5   : > { %v18382_v6 = vsub.f32 %v18341_v53, %v4491_v23  ;;  %v4494_v52 = vmul.f32 0.020833334, %v4482_v5  ;;  %v4508_v43 = vmul.f32 %v18379_v32, %v18379_v32  ;;  %4835 = vmatprep.subr.mxu0 %v17442_v49  ;;  %v4778_v23 = vld [vmem:[%s20786_s12 + $0x20] sm:$0xff]  ;;  %v4777_v5 = vld [vmem:[%s20786_s12 + $0x18] sm:$0xff] }
 0xcd6   : > { %v4479_v17 = vpop.xlane.xlu0 %4478  ;;  %4836 = vmatpush1.msra.mxu0 %v4783_v30 }
 0xcd7   : > { %v18387_v35 = vsub.f32 %v18345_v21, %v4494_v52  ;;  %v4493_v26 = vmul.f32 0.020833334, %v4479_v17  ;;  %v4522_v8 = vsel %vm545_vm0, %v4508_v43, 0.0  ;;  %v4507_v38 = vmul.f32 %v18382_v6, %v18382_v6  ;;  %4837 = vmatprep.subr.mxu0 %v17442_v49  ;;  %v4776_v52 = vld [vmem:[%s20786_s12 + $0x10] sm:$0xff]  ;;  %v4775_v43 = vld [vmem:[%s20786_s12 + $0x8] sm:$0xff]  ;;  %v4774_v17 = vld [vmem:[%s20786_s12] sm:$0xff] }
 0xcd8   : > { %4523 = vadd.xlane.f32.xlu1 %v4522_v8  ;;  %v4488_v45 = vpop.xlane.xlu1 %4487  ;;  %4838 = vmatpush1.msra.mxu0 %v4782_v42  ;;  %v4796_v8 = vld [vmem:[%s20786_s12 + $0xb0] sm:$0xff] }
 0xcd9   : > { %v18393_v25 = vsub.f32 %v18353_v18, %v4493_v26  ;;  %v4496_v36 = vmul.f32 0.020833334, %v4488_v45  ;;  %v4519_v20 = vsel %vm545_vm0, %v4507_v38, 0.0  ;;  %v4510_v10 = vmul.f32 %v18387_v35, %v18387_v35  ;;  %4839 = vmatprep.subr.mxu0 %v17442_v49  ;;  %v4797_v26 = vld [vmem:[%s20786_s12 + $0xb8] sm:$0xff]  ;;  %v4795_v38 = vld [vmem:[%s20786_s12 + $0xa8] sm:$0xff]  ;;  %v4794_v45 = vld [vmem:[%s20786_s12 + $0xa0] sm:$0xff] }
 0xcda   : > { %4520 = vadd.xlane.f32.xlu0 %v4519_v20  ;;  %v4485_v57 = vpop.xlane.xlu0 %4484  ;;  %4840 = vmatpush1.msra.mxu0 %v4781_v31 }
 0xcdb   : > { %v18399_v56 = vsub.f32 %v18355_v63, %v4496_v36  ;;  %v4495_v58 = vmul.f32 0.020833334, %v4485_v57  ;;  %v4528_v60 = vsel %vm545_vm0, %v4510_v10, 0.0  ;;  %v4509_v39 = vmul.f32 %v18393_v25, %v18393_v25  ;;  %4841 = vmatprep.subr.mxu0 %v17442_v49 }
 0xcdc   : > { %4529 = vadd.xlane.f32.xlu1 %v4528_v60  ;;  %4842 = vmatpush1.msra.mxu0 %v4780_v41 }
 0xcdd   : > { %v18405_v12 = vsub.f32 %v18362_v3, %v4495_v58  ;;  %v4525_v34 = vsel %vm545_vm0, %v4509_v39, 0.0  ;;  %v4512_v47 = vmul.f32 %v18399_v56, %v18399_v56  ;;  %4843 = vmatprep.subr.mxu0 %v17442_v49 }
 0xcde   : > { %4526 = vadd.xlane.f32.xlu0 %v4525_v34  ;;  %4844 = vmatpush1.msra.mxu0 %v4779_v24 }
 0xcdf   : > { %v4534_v14 = vsel %vm545_vm0, %v4512_v47, 0.0  ;;  %v4511_v37 = vmul.f32 %v18405_v12, %v18405_v12  ;;  %4845 = vmatprep.subr.mxu0 %v17442_v49 }
 0xce0   : > { %4535 = vadd.xlane.f32.xlu1 %v4534_v14  ;;  %4846 = vmatpush1.msra.mxu0 %v4778_v23 }
 0xce1   : > { %v4531_v54 = vsel %vm545_vm0, %v4511_v37, 0.0  ;;  %4847 = vmatprep.subr.mxu0 %v17442_v49 }
 0xce2   : > { %4532 = vadd.xlane.f32.xlu0 %v4531_v54  ;;  %4848 = vmatpush1.msra.mxu0 %v4777_v5 }
 0xce3   : > { %4849 = vmatprep.subr.mxu0 %v17442_v49 }
 0xce4   : > { %4850 = vmatpush1.msra.mxu0 %v4776_v52 }
 0xce5   : > { %4851 = vmatprep.subr.mxu0 %v17442_v49 }
 0xce6   : > { %4852 = vmatpush1.msra.mxu0 %v4775_v43 }
 0xce7   : > { %4853 = vmatprep.subr.mxu0 %v17442_v49 }
 0xce8   : > { %4854 = vmatpush1.msra.mxu0 %v4774_v17 }
 0xce9   : > { %4871 = vmatprep.subr.mxu0 %v17442_v49 }
 0xcea   : > { %4872 = vmatpush2.msra.mxu0 %v4797_v26 }
 0xceb   : > { %4873 = vmatprep.subr.mxu0 %v17442_v49 }
 0xcec   : > { %4874 = vmatpush2.msra.mxu0 %v4796_v8 }
 0xced   : > { %4875 = vmatprep.subr.mxu0 %v17442_v49 }
 0xcee   : > { %4876 = vmatpush2.msra.mxu0 %v4795_v38 }
 0xcef   : > { %4877 = vmatprep.subr.mxu0 %v17442_v49 }
 0xcf0   : > { %4878 = vmatpush2.msra.mxu0 %v4794_v45 }
 0xcf1   : > { %4879 = vmatprep.subr.mxu0 %v17442_v49 }
 0xd59   : > { %v4518_v36 = vpop.xlane.xlu1 %4517 }
 0xd5a   : > { %v4538_v20 = vmul.f32 0.020833334, %v4518_v36 }
 0xd5b   : > { %v4515_v10 = vpop.xlane.xlu0 %4514 }
 0xd5c   : > { %v4546_v57 = vadd.f32 1e-05, %v4538_v20  ;;  %v4537_v58 = vmul.f32 0.020833334, %v4515_v10 }
 0xd5e   : > { %17099 = vrsqrt.f32 %v4546_v57  ;;  %v4545_v60 = vadd.f32 1e-05, %v4537_v58 }
 0xd60   : > { %17101 = vrsqrt.f32 %v4545_v60 }
 0xd61   : > { %v4524_v39 = vpop.xlane.xlu1 %4523 }
 0xd62   : > { %v4540_v34 = vmul.f32 0.020833334, %v4524_v39 }
 0xd63   : > { %v4521_v47 = vpop.xlane.xlu0 %4520 }
 0xd64   : > { %v4548_v14 = vadd.f32 1e-05, %v4540_v34  ;;  %v4539_v37 = vmul.f32 0.020833334, %v4521_v47  ;;  %v4793_v34 = vld [vmem:[%s20786_s12 + $0x98] sm:$0xff]  ;;  %v4791_v47 = vld [vmem:[%s20786_s12 + $0x88] sm:$0xff] }
 0xd65   : > { %v4530_v54 = vpop.xlane.xlu1 %4529  ;;  %4880 = vmatpush2.msra.mxu0 %v4793_v34 }
 0xd66   : > { %17103 = vrsqrt.f32 %v4548_v14  ;;  %v4547_v16 = vadd.f32 1e-05, %v4539_v37  ;;  %v4542_v48 = vmul.f32 0.020833334, %v4530_v54  ;;  %4881 = vmatprep.subr.mxu0 %v17442_v49  ;;  %v4790_v14 = vld [vmem:[%s20786_s12 + $0x80] sm:$0xff]  ;;  %v18577_v37 = vsub.s32 0, %v17810_v33 }
 0xd67   : > { %v4527_v1 = vpop.xlane.xlu0 %4526  ;;  %v4609_v54 = vld [vmem:[%s20785_s11] sm:$0x3] }
 0xd68   : > { %17105 = vrsqrt.f32 %v4547_v16  ;;  %v4541_v46 = vmul.f32 0.020833334, %v4527_v1  ;;  %v4550_v61 = vadd.f32 1e-05, %v4542_v48  ;;  %v18583_v16 = vsub.s32 1, %v17810_v33 }
 0xd69   : > { %v4536_v62 = vpop.xlane.xlu1 %4535  ;;  %v4614_v48 = vrot.slane %v4609_v54, %v18577_v37 }
 0xd6a   : > { %v4549_v55 = vadd.f32 1e-05, %v4541_v46  ;;  %v4544_v4 = vmul.f32 0.020833334, %v4536_v62  ;;  %v4618_v1 = vrot.slane %v4609_v54, %v18583_v16 }
 0xd6b   : > { %v17100_v51 = vpop.eup %17099  ;;  %v4533_v59 = vpop.xlane.xlu0 %4532 }
 0xd6c   : > { %17107 = vrsqrt.f32 %v4549_v55  ;;  %v4543_v28 = vmul.f32 0.020833334, %v4533_v59  ;;  %v4562_v11 = vmul.f32 %v17100_v51, %v18367_v13  ;;  %v4552_v30 = vadd.f32 1e-05, %v4544_v4 }
 0xd6d   : > { %v17102_v0 = vpop.eup %17101  ;;  %17109 = vrsqrt.f32 %v4550_v61 }
 0xd6e   : > { %v4551_v7 = vadd.f32 1e-05, %v4543_v28  ;;  %v4561_v9 = vmul.f32 %v17102_v0, %v18370_v19  ;;  %v4576_v31 = vmul.f32 %v14231_v15, %v4562_v11 }
 0xd70   : > { %v4575_v22 = vmul.f32 %v14231_v15, %v4561_v9  ;;  %17111 = vrsqrt.f32 %v4551_v7  ;;  %v4590_v13 = vadd.f32 %v14232_v27, %v4576_v31 }
 0xd71   : > { %17113 = vrsqrt.f32 %v4552_v30 }
 0xd72   : > { %v4589_v42 = vadd.f32 %v14232_v27, %v4575_v22 }
 0xd73   : > { %v17104_v41 = vpop.eup %17103 }
 0xd74   : > { %14233 = vmatmul.mubr.msk.f32.vlgmr.msra.gmra.mxu1 %vm545_vm0, %v4589_v42  ;;  %v4564_v23 = vmul.f32 %v17104_v41, %v18379_v32 }
 0xd75   : > { %v17106_v24 = vpop.eup %17105  ;;  %4715 = vmatprep.mubr.f32.mxu1 %v17442_v49 }
 0xd76   : > { %v4563_v19 = vmul.f32 %v17106_v24, %v18382_v6  ;;  %v4578_v26 = vmul.f32 %v14231_v15, %v4564_v23 }
 0xd78   : > { %14234 = vmatmul.mubr.msk.f32.gmra.mxu1 %vm545_vm0, %v4590_v13  ;;  %v4577_v5 = vmul.f32 %v14231_v15, %v4563_v19  ;;  %v4592_v38 = vadd.f32 %v14232_v27, %v4578_v26 }
 0xd79   : > { %v17108_v52 = vpop.eup %17107  ;;  %4721 = vmatprep.mubr.f32.mxu1 %v17442_v49 }
 0xd7a   : > { %v17110_v43 = vpop.eup %17109  ;;  %v4591_v17 = vadd.f32 %v14232_v27, %v4577_v5  ;;  %v4565_v8 = vmul.f32 %v17108_v52, %v18393_v25 }
 0xd7b   : > { %v4566_v6 = vmul.f32 %v17110_v43, %v18387_v35 }
 0xd7c   : > { %14235 = vmatmul.mubr.msk.f32.gmra.mxu1 %vm545_vm0, %v4591_v17  ;;  %v4579_v45 = vmul.f32 %v14231_v15, %v4565_v8 }
 0xd7d   : > { %4727 = vmatprep.mubr.f32.mxu1 %v17442_v49  ;;  %v17112_v32 = vpop.eup %17111  ;;  %v4580_v20 = vmul.f32 %v14231_v15, %v4566_v6 }
 0xd7e   : > { %v4593_v36 = vadd.f32 %v14232_v27, %v4579_v45  ;;  %v4567_v10 = vmul.f32 %v17112_v32, %v18405_v12  ;;  %v17114_v57 = vpop.eup %17113 }
 0xd7f   : > { %v4594_v25 = vadd.f32 %v14232_v27, %v4580_v20  ;;  %v4568_v60 = vmul.f32 %v17114_v57, %v18399_v56  ;;  %v4792_v56 = vld [vmem:[%s20786_s12 + $0x90] sm:$0xff] }
 0xd80   : > { %14236 = vmatmul.mubr.msk.f32.gmra.mxu1 %vm545_vm0, %v4592_v38  ;;  %v4581_v58 = vmul.f32 %v14231_v15, %v4567_v10  ;;  %4882 = vmatpush2.msra.mxu0 %v4792_v56 }
 0xd81   : > { %4733 = vmatprep.mubr.f32.mxu1 %v17442_v49  ;;  %v4582_v39 = vmul.f32 %v14231_v15, %v4568_v60  ;;  %4883 = vmatprep.subr.mxu0 %v17442_v49 }
 0xd82   : > { %v4595_v35 = vadd.f32 %v14232_v27, %v4581_v58  ;;  %4884 = vmatpush2.msra.mxu0 %v4791_v47 }
 0xd83   : > { %v4596_v12 = vadd.f32 %v14232_v27, %v4582_v39  ;;  %4885 = vmatprep.subr.mxu0 %v17442_v49 }
 0xd84   : > { %14237 = vmatmul.mubr.msk.f32.gmra.mxu1 %vm545_vm0, %v4593_v36  ;;  %4886 = vmatpush2.msra.mxu0 %v4790_v14 }
 0xd85   : > { %4739 = vmatprep.mubr.f32.mxu1 %v17442_v49 }
 0xd88   : > { %14238 = vmatmul.mubr.msk.f32.gmra.mxu1 %vm545_vm0, %v4594_v25 }
 0xd89   : > { %4745 = vmatprep.mubr.f32.mxu1 %v17442_v49 }
 0xd8c   : > { %14239 = vmatmul.mubr.msk.f32.gmra.mxu1 %vm545_vm0, %v4595_v35 }
 0xd8d   : > { %4751 = vmatprep.mubr.f32.mxu1 %v17442_v49 }
 0xd90   : > { %14240 = vmatmul.mubr.msk.f32.gmra.mxu1 %vm545_vm0, %v4596_v12 }
 0xe34   : > { %v4711_v46 = vpop.f32.mrf.mxu1 }
 0xe35   : > { %v4712_v61 = vadd.f32 %v4711_v46, %v4614_v48  ;;  %v14249_v46 = vld [vmem:[%s20787_s13] ss:$0 sm:$0xff] }
 0xe36   : > { %v4713_v55 = vpop.f32.mrf.mxu1 }
 0xe37   : > { %v4714_v51 = vadd.f32 %v4713_v55, %v4618_v1  ;;  %v4758_v28 = vmax.f32 %v4712_v61, 0.0 }
 0xe38   : > { %v4717_v62 = vpop.f32.mrf.mxu1 }
 0xe39   : > { %v4759_v59 = vmax.f32 %v4714_v51, 0.0  ;;  %v4718_v0 = vadd.f32 %v4717_v62, %v4614_v48 }
 0xe3a   : > { %v4719_v4 = vpop.f32.mrf.mxu1 }
 0xe3b   : > { %v4720_v7 = vadd.f32 %v4719_v4, %v4618_v1  ;;  %14241 = vmatprep.mubr.msk.f32.mxu0 %vm4798_vm4, %v4759_v59  ;;  %v4760_v11 = vmax.f32 %v4718_v0, 0.0 }
 0xe3c   : > { %v4723_v9 = vpop.f32.mrf.mxu1  ;;  %4888 = vmatmul.mubr.f32.vlgmr.msra.gmra.mxu0 %v4758_v28 }
 0xe3d   : > { %v4761_v33 = vmax.f32 %v4720_v7, 0.0  ;;  %v4724_v15 = vadd.f32 %v4723_v9, %v4614_v48 }
 0xe3e   : > { %v4725_v22 = vpop.f32.mrf.mxu1 }
 0xe3f   : > { %v4726_v27 = vadd.f32 %v4725_v22, %v4618_v1  ;;  %14242 = vmatprep.mubr.msk.f32.mxu0 %vm4798_vm4, %v4761_v33  ;;  %v4762_v31 = vmax.f32 %v4724_v15, 0.0 }
 0xe40   : > { %v4729_v30 = vpop.f32.mrf.mxu1  ;;  %4893 = vmatmul.mubr.f32.gmra.mxu0 %v4760_v11 }
 0xe41   : > { %v4763_v42 = vmax.f32 %v4726_v27, 0.0  ;;  %v4730_v41 = vadd.f32 %v4729_v30, %v4614_v48 }
 0xe42   : > { %v4731_v24 = vpop.f32.mrf.mxu1 }
 0xe43   : > { %v4732_v13 = vadd.f32 %v4731_v24, %v4618_v1  ;;  %14243 = vmatprep.mubr.msk.f32.mxu0 %vm4798_vm4, %v4763_v42  ;;  %v4764_v5 = vmax.f32 %v4730_v41, 0.0 }
 0xe44   : > { %v4735_v19 = vpop.f32.mrf.mxu1  ;;  %4898 = vmatmul.mubr.f32.gmra.mxu0 %v4762_v31 }
 0xe45   : > { %v4765_v23 = vmax.f32 %v4732_v13, 0.0  ;;  %v4736_v52 = vadd.f32 %v4735_v19, %v4614_v48 }
 0xe46   : > { %v4737_v43 = vpop.f32.mrf.mxu1 }
 0xe47   : > { %v4738_v17 = vadd.f32 %v4737_v43, %v4618_v1  ;;  %14244 = vmatprep.mubr.msk.f32.mxu0 %vm4798_vm4, %v4765_v23  ;;  %v4766_v38 = vmax.f32 %v4736_v52, 0.0 }
 0xe48   : > { %v4741_v26 = vpop.f32.mrf.mxu1  ;;  %4903 = vmatmul.mubr.f32.gmra.mxu0 %v4764_v5 }
 0xe49   : > { %v4767_v8 = vmax.f32 %v4738_v17, 0.0  ;;  %v4742_v45 = vadd.f32 %v4741_v26, %v4614_v48 }
 0xe4a   : > { %v4743_v6 = vpop.f32.mrf.mxu1 }
 0xe4b   : > { %v4744_v32 = vadd.f32 %v4743_v6, %v4618_v1  ;;  %14245 = vmatprep.mubr.msk.f32.mxu0 %vm4798_vm4, %v4767_v8  ;;  %v4768_v10 = vmax.f32 %v4742_v45, 0.0 }
 0xe4c   : > { %v4747_v36 = vpop.f32.mrf.mxu1  ;;  %4908 = vmatmul.mubr.f32.gmra.mxu0 %v4766_v38 }
 0xe4d   : > { %v4769_v20 = vmax.f32 %v4744_v32, 0.0  ;;  %v4748_v57 = vadd.f32 %v4747_v36, %v4614_v48 }
 0xe4e   : > { %v4749_v25 = vpop.f32.mrf.mxu1 }
 0xe4f   : > { %v4750_v58 = vadd.f32 %v4749_v25, %v4618_v1  ;;  %14246 = vmatprep.mubr.msk.f32.mxu0 %vm4798_vm4, %v4769_v20  ;;  %v4770_v39 = vmax.f32 %v4748_v57, 0.0 }
 0xe50   : > { %v4753_v60 = vpop.f32.mrf.mxu1  ;;  %4913 = vmatmul.mubr.f32.gmra.mxu0 %v4768_v10 }
 0xe51   : > { %v4771_v35 = vmax.f32 %v4750_v58, 0.0  ;;  %v4754_v12 = vadd.f32 %v4753_v60, %v4614_v48 }
 0xe52   : > { %v4755_v34 = vpop.f32.mrf.mxu1 }
 0xe53   : > { %v4756_v56 = vadd.f32 %v4755_v34, %v4618_v1  ;;  %14247 = vmatprep.mubr.msk.f32.mxu0 %vm4798_vm4, %v4771_v35  ;;  %v4772_v14 = vmax.f32 %v4754_v12, 0.0 }
 0xe54   : > { %4918 = vmatmul.mubr.f32.gmra.mxu0 %v4770_v39 }
 0xe55   : > { %v4773_v47 = vmax.f32 %v4756_v56, 0.0 }
 0xe57   : > { %14248 = vmatprep.mubr.msk.f32.mxu0 %vm4798_vm4, %v4773_v47 }
 0xe58   : > { %4923 = vmatmul.mubr.f32.gmra.mxu0 %v4772_v14 }
 0xefc   : > { %v4889_v54 = vpop.f32.mrf.mxu0 }
 0xefd   : > { %v4928_v61 = vadd.f32 %v4889_v54, %v18322_v50 }
 0xefe   : > { %v4891_v55 = vpop.f32.mrf.mxu0 }
 0xeff   : > { %v18599_v51 = vadd.f32 %v14249_v46, %v4928_v61 }
 0xf00   : > { %v4894_v48 = vpop.f32.mrf.mxu0 }
 0xf01   : > { %v4929_v1 = vadd.f32 %v4894_v48, %v18315_v2  ;;  %v4955_v62 = vsel %vm545_vm0, %v18599_v51, 0.0 }
 0xf02   : > { %4956 = vadd.xlane.f32.xlu0 %v4955_v62  ;;  %v4896_v59 = vpop.f32.mrf.mxu0 }
 0xf03   : > { %v18604_v28 = vadd.f32 %v14249_v46, %v4929_v1 }
 0xf04   : > { %v4899_v0 = vpop.f32.mrf.mxu0 }
 0xf05   : > { %v4930_v4 = vadd.f32 %v4899_v0, %v18341_v53  ;;  %v4958_v7 = vsel %vm545_vm0, %v18604_v28, 0.0 }
 0xf06   : > { %4959 = vadd.xlane.f32.xlu1 %v4958_v7  ;;  %v4901_v50 = vpop.f32.mrf.mxu0 }
 0xf07   : > { %v18609_v9 = vadd.f32 %v14249_v46, %v4930_v4 }
 0xf08   : > { %v4904_v33 = vpop.f32.mrf.mxu0 }
 0xf09   : > { %v4931_v2 = vadd.f32 %v4904_v33, %v18333_v29  ;;  %v4961_v11 = vsel %vm545_vm0, %v18609_v9, 0.0 }
 0xf0a   : > { %4962 = vadd.xlane.f32.xlu0 %v4961_v11  ;;  %v4906_v15 = vpop.f32.mrf.mxu0 }
 0xf0b   : > { %v18614_v22 = vadd.f32 %v14249_v46, %v4931_v2 }
 0xf0c   : > { %v4909_v27 = vpop.f32.mrf.mxu0 }
 0xf0d   : > { %v4932_v53 = vadd.f32 %v4909_v27, %v18353_v18  ;;  %v4964_v30 = vsel %vm545_vm0, %v18614_v22, 0.0 }
 0xf0e   : > { %4965 = vadd.xlane.f32.xlu1 %v4964_v30  ;;  %v4911_v42 = vpop.f32.mrf.mxu0 }
 0xf0f   : > { %v18619_v31 = vadd.f32 %v14249_v46, %v4932_v53 }
 0xf10   : > { %v4914_v41 = vpop.f32.mrf.mxu0 }
 0xf11   : > { %v4933_v29 = vadd.f32 %v4914_v41, %v18345_v21  ;;  %v4967_v24 = vsel %vm545_vm0, %v18619_v31, 0.0 }
 0xf12   : > { %4968 = vadd.xlane.f32.xlu0 %v4967_v24  ;;  %v4916_v13 = vpop.f32.mrf.mxu0  ;;  %v14259_v24 = vld [vmem:[%s20804_s1 + $0xb8] sm:$0xff] }
 0xf13   : > { %v18624_v19 = vadd.f32 %v14249_v46, %v4933_v29  ;;  %16056 = vmatprep.subr.mxu1 %v14259_v24  ;;  %v14258_v13 = vld [vmem:[%s20804_s1 + $0xb0] sm:$0xff] }
 0xf14   : > { %v4919_v23 = vpop.f32.mrf.mxu0  ;;  %16057 = vmatpush3.msra.mxu1 %v14259_v24  ;;  %v14271_v24 = vld [vmem:[%s20776_s2 + $0xa8] sm:$0xff] }
 0xf15   : > { %v4934_v18 = vadd.f32 %v4919_v23, %v18362_v3  ;;  %v4970_v5 = vsel %vm545_vm0, %v18624_v19, 0.0  ;;  %16058 = vmatprep.subr.mxu1 %v14258_v13  ;;  %v14257_v23 = vld [vmem:[%s20804_s1 + $0xa8] sm:$0xff] }
 0xf16   : > { %4971 = vadd.xlane.f32.xlu1 %v4970_v5  ;;  %v4921_v52 = vpop.f32.mrf.mxu0  ;;  %16059 = vmatpush3.msra.mxu1 %v14258_v13  ;;  %v14255_v5 = vld [vmem:[%s20804_s1 + $0x98] sm:$0xff] }
 0xf17   : > { %v18629_v43 = vadd.f32 %v14249_v46, %v4934_v18  ;;  %16060 = vmatprep.subr.mxu1 %v14257_v23  ;;  %v14256_v18 = vld [vmem:[%s20804_s1 + $0xa0] sm:$0xff]  ;;  %v14254_v52 = vld [vmem:[%s20804_s1 + $0x90] sm:$0xff] }
 0xf18   : > { %v4924_v17 = vpop.f32.mrf.mxu0  ;;  %16061 = vmatpush3.msra.mxu1 %v14257_v23 }
 0xf19   : > { %v4935_v21 = vadd.f32 %v4924_v17, %v18355_v63  ;;  %v4973_v26 = vsel %vm545_vm0, %v18629_v43, 0.0  ;;  %16062 = vmatprep.subr.mxu1 %v14256_v18  ;;  %v14273_v17 = vld [vmem:[%s20776_s2 + $0xb8] sm:$0xff] }
 0xf1a   : > { %4974 = vadd.xlane.f32.xlu0 %v4973_v26  ;;  %v4926_v8 = vpop.f32.mrf.mxu0  ;;  %16063 = vmatpush3.msra.mxu1 %v14256_v18  ;;  %v14270_v18 = vld [vmem:[%s20776_s2 + $0xa0] sm:$0xff] }
 0xf1b   : > { %v18634_v38 = vadd.f32 %v14249_v46, %v4935_v21  ;;  %16064 = vmatprep.subr.mxu1 %v14255_v5 }
 0xf1c   : > { %16065 = vmatpush3.msra.mxu1 %v14255_v5 }
 0xf1d   : > { %v4976_v3 = vsel %vm545_vm0, %v18634_v38, 0.0  ;;  %16066 = vmatprep.subr.mxu1 %v14254_v52 }
 0xf1e   : > { %4977 = vadd.xlane.f32.xlu1 %v4976_v3  ;;  %16067 = vmatpush3.msra.mxu1 %v14254_v52 }
 0xf1f   : > { %16080 = vmatprep.subr.mxu1 %v14273_v17 }
 0xf8b   : > { %v4957_v45 = vpop.xlane.xlu0 %4956 }
 0xf8c   : > { %v4979_v6 = vmul.f32 0.020833334, %v4957_v45 }
 0xf8e   : > { %v18639_v32 = vsub.f32 %v18599_v51, %v4979_v6 }
 0xf8f   : > { %v4960_v36 = vpop.xlane.xlu1 %4959 }
 0xf90   : > { %v4980_v20 = vmul.f32 0.020833334, %v4960_v36  ;;  %v4995_v63 = vmul.f32 %v18639_v32, %v18639_v32 }
 0xf92   : > { %v18644_v10 = vsub.f32 %v18604_v28, %v4980_v20  ;;  %v5003_v57 = vsel %vm545_vm0, %v4995_v63, 0.0 }
 0xf93   : > { %5004 = vadd.xlane.f32.xlu0 %v5003_v57  ;;  %v4963_v25 = vpop.xlane.xlu0 %4962 }
 0xf94   : > { %v4981_v58 = vmul.f32 0.020833334, %v4963_v25  ;;  %v4996_v60 = vmul.f32 %v18644_v10, %v18644_v10 }
 0xf96   : > { %v18650_v35 = vsub.f32 %v18609_v9, %v4981_v58  ;;  %v5006_v39 = vsel %vm545_vm0, %v4996_v60, 0.0 }
 0xf97   : > { %v4966_v12 = vpop.xlane.xlu1 %4965  ;;  %5007 = vadd.xlane.f32.xlu1 %v5006_v39 }
 0xf98   : > { %v4982_v34 = vmul.f32 0.020833334, %v4966_v12  ;;  %v4997_v56 = vmul.f32 %v18650_v35, %v18650_v35 }
 0xf9a   : > { %v18656_v47 = vsub.f32 %v18614_v22, %v4982_v34  ;;  %v5009_v14 = vsel %vm545_vm0, %v4997_v56, 0.0  ;;  %v18710_v34 = vld [vmem:[%s20780_s6 + $0x1] ss:$0 sm:$0xff] }
 0xf9b   : > { %5010 = vadd.xlane.f32.xlu0 %v5009_v14  ;;  %v4969_v54 = vpop.xlane.xlu0 %4968 }
 0xf9c   : > { %v4983_v46 = vmul.f32 0.020833334, %v4969_v54  ;;  %v4998_v61 = vmul.f32 %v18656_v47, %v18656_v47  ;;  %v18716_v54 = vld [vmem:[%s20781_s7 + $0x1] ss:$0 sm:$0xff] }
 0xf9e   : > { %v18662_v55 = vsub.f32 %v18619_v31, %v4983_v46  ;;  %v5012_v48 = vsel %vm545_vm0, %v4998_v61, 0.0 }
 0xf9f   : > { %v4972_v1 = vpop.xlane.xlu1 %4971  ;;  %5013 = vadd.xlane.f32.xlu1 %v5012_v48 }
 0xfa0   : > { %v4984_v62 = vmul.f32 0.020833334, %v4972_v1  ;;  %v4999_v59 = vmul.f32 %v18662_v55, %v18662_v55 }
 0xfa2   : > { %v18668_v0 = vsub.f32 %v18624_v19, %v4984_v62  ;;  %v5015_v4 = vsel %vm545_vm0, %v4999_v59, 0.0 }
 0xfa3   : > { %5016 = vadd.xlane.f32.xlu0 %v5015_v4  ;;  %v4975_v7 = vpop.xlane.xlu0 %4974 }
 0xfa4   : > { %v4985_v50 = vmul.f32 0.020833334, %v4975_v7  ;;  %v5000_v33 = vmul.f32 %v18668_v0, %v18668_v0 }
 0xfa6   : > { %v18674_v2 = vsub.f32 %v18629_v43, %v4985_v50  ;;  %v5018_v11 = vsel %vm545_vm0, %v5000_v33, 0.0 }
 0xfa7   : > { %5019 = vadd.xlane.f32.xlu1 %v5018_v11  ;;  %v4978_v15 = vpop.xlane.xlu1 %4977 }
 0xfa8   : > { %v4986_v27 = vmul.f32 0.020833334, %v4978_v15  ;;  %v5001_v53 = vmul.f32 %v18674_v2, %v18674_v2 }
 0xfaa   : > { %v18680_v30 = vsub.f32 %v18634_v38, %v4986_v27  ;;  %v5021_v42 = vsel %vm545_vm0, %v5001_v53, 0.0 }
 0xfab   : > { %5022 = vadd.xlane.f32.xlu0 %v5021_v42 }
 0xfac   : > { %v5002_v41 = vmul.f32 %v18680_v30, %v18680_v30 }
 0xfae   : > { %v5024_v29 = vsel %vm545_vm0, %v5002_v41, 0.0 }
 0xfaf   : > { %5025 = vadd.xlane.f32.xlu1 %v5024_v29 }
0x101c   : > { %v5005_v21 = vpop.xlane.xlu0 %5004 }
0x101d   : > { %v5027_v26 = vmul.f32 0.020833334, %v5005_v21 }
0x101f   : > { %v5035_v8 = vadd.f32 1e-05, %v5027_v26  ;;  %v14268_v26 = vld [vmem:[%s20776_s2 + $0x90] sm:$0xff] }
0x1020   : > { %v5008_v3 = vpop.xlane.xlu1 %5007 }
0x1021   : > { %17115 = vrsqrt.f32 %v5035_v8  ;;  %v5028_v45 = vmul.f32 0.020833334, %v5008_v3 }
0x1023   : > { %v5036_v6 = vadd.f32 1e-05, %v5028_v45  ;;  %v14287_v45 = vld [vmem:[%s20777_s3 + $0xb8] sm:$0xff] }
0x1024   : > { %v5011_v36 = vpop.xlane.xlu0 %5010 }
0x1025   : > { %17117 = vrsqrt.f32 %v5036_v6  ;;  %v5029_v20 = vmul.f32 0.020833334, %v5011_v36 }
0x1027   : > { %v5037_v63 = vadd.f32 1e-05, %v5029_v20 }
0x1028   : > { %v5014_v57 = vpop.xlane.xlu1 %5013 }
0x1029   : > { %17119 = vrsqrt.f32 %v5037_v63  ;;  %v5030_v25 = vmul.f32 0.020833334, %v5014_v57 }
0x102b   : > { %v5038_v58 = vadd.f32 1e-05, %v5030_v25 }
0x102c   : > { %v5017_v60 = vpop.xlane.xlu0 %5016 }
0x102d   : > { %17121 = vrsqrt.f32 %v5038_v58  ;;  %v5031_v39 = vmul.f32 0.020833334, %v5017_v60 }
0x102e   : > { %v17116_v12 = vpop.eup %17115 }
0x102f   : > { %v5051_v56 = vmul.f32 %v17116_v12, %v18639_v32  ;;  %v5039_v14 = vadd.f32 1e-05, %v5031_v39 }
0x1030   : > { %v5020_v46 = vpop.xlane.xlu1 %5019 }
0x1031   : > { %v5065_v61 = vmul.f32 %v18710_v34, %v5051_v56  ;;  %17123 = vrsqrt.f32 %v5039_v14  ;;  %v5032_v48 = vmul.f32 0.020833334, %v5020_v46  ;;  %v14283_v56 = vld [vmem:[%s20777_s3 + $0x98] sm:$0xff]  ;;  %v14282_v14 = vld [vmem:[%s20777_s3 + $0x90] sm:$0xff] }
0x1032   : > { %v17118_v1 = vpop.eup %17117 }
0x1033   : > { %v18720_v62 = vadd.f32 %v18716_v54, %v5065_v61  ;;  %v5052_v59 = vmul.f32 %v17118_v1, %v18644_v10  ;;  %v5040_v4 = vadd.f32 1e-05, %v5032_v48  ;;  %v14272_v10 = vld [vmem:[%s20776_s2 + $0xb0] sm:$0xff] }
0x1034   : > { %v5023_v7 = vpop.xlane.xlu0 %5022 }
0x1035   : > { %v5066_v32 = vmul.f32 %v18710_v34, %v5052_v59  ;;  %17125 = vrsqrt.f32 %v5040_v4  ;;  %v5033_v50 = vmul.f32 0.020833334, %v5023_v7  ;;  %16068 = vmatprep.mubr.msk.f32.mxu1 %vm545_vm0, %v18720_v62 }
0x1036   : > { %v17120_v33 = vpop.eup %17119 }
0x1037   : > { %v18727_v11 = vadd.f32 %v18716_v54, %v5066_v32  ;;  %v5053_v15 = vmul.f32 %v17120_v33, %v18650_v35  ;;  %v5041_v27 = vadd.f32 1e-05, %v5033_v50 }
0x1038   : > { %v5026_v53 = vpop.xlane.xlu1 %5025 }
0x1039   : > { %v5067_v42 = vmul.f32 %v18710_v34, %v5053_v15  ;;  %17127 = vrsqrt.f32 %v5041_v27  ;;  %v5034_v41 = vmul.f32 0.020833334, %v5026_v53  ;;  %16069 = vmatmul.mubr.msk.f32.vlgmr.msra.gmra.mxu1 %vm545_vm0, %v18727_v11 }
0x103a   : > { %v17122_v29 = vpop.eup %17121  ;;  %16081 = vmatpush3.msra.mxu1 %v14273_v17 }
0x103b   : > { %v18740_v35 = vadd.f32 %v18716_v54, %v5067_v42  ;;  %v5054_v13 = vmul.f32 %v17122_v29, %v18656_v47  ;;  %v5042_v23 = vadd.f32 1e-05, %v5034_v41  ;;  %16082 = vmatprep.subr.mxu1 %v14272_v10  ;;  %v14269_v47 = vld [vmem:[%s20776_s2 + $0x98] sm:$0xff] }
0x103c   : > { %16083 = vmatpush3.msra.mxu1 %v14272_v10 }
0x103d   : > { %v5068_v5 = vmul.f32 %v18710_v34, %v5054_v13  ;;  %17129 = vrsqrt.f32 %v5042_v23  ;;  %16071 = vmatprep.mubr.msk.f32.mxu1 %vm545_vm0, %v18740_v35  ;;  %16084 = vmatprep.subr.mxu1 %v14271_v24 }
0x103e   : > { %v17124_v52 = vpop.eup %17123  ;;  %16085 = vmatpush3.msra.mxu1 %v14271_v24 }
0x103f   : > { %v18753_v17 = vadd.f32 %v18716_v54, %v5068_v5  ;;  %v5055_v21 = vmul.f32 %v17124_v52, %v18662_v55  ;;  %16086 = vmatprep.subr.mxu1 %v14270_v18 }
0x1040   : > { %16087 = vmatpush3.msra.mxu1 %v14270_v18 }
0x1041   : > { %v5069_v8 = vmul.f32 %v18710_v34, %v5055_v21  ;;  %16072 = vmatmul.mubr.msk.f32.gmra.mxu1 %vm545_vm0, %v18753_v17  ;;  %16088 = vmatprep.subr.mxu1 %v14269_v47 }
0x1042   : > { %v17126_v3 = vpop.eup %17125  ;;  %16089 = vmatpush3.msra.mxu1 %v14269_v47 }
0x1043   : > { %v18766_v55 = vadd.f32 %v18716_v54, %v5069_v8  ;;  %v5056_v6 = vmul.f32 %v17126_v3, %v18668_v0  ;;  %16090 = vmatprep.subr.mxu1 %v14268_v26 }
0x1044   : > { %16091 = vmatpush3.msra.mxu1 %v14268_v26 }
0x1045   : > { %v5070_v36 = vmul.f32 %v18710_v34, %v5056_v6  ;;  %16074 = vmatprep.mubr.msk.f32.mxu1 %vm545_vm0, %v18766_v55  ;;  %16104 = vmatprep.subr.mxu1 %v14287_v45 }
0x1046   : > { %v17128_v20 = vpop.eup %17127 }
0x1047   : > { %v18773_v63 = vadd.f32 %v18716_v54, %v5070_v36  ;;  %v5057_v57 = vmul.f32 %v17128_v20, %v18674_v2  ;;  %v14286_v2 = vld [vmem:[%s20777_s3 + $0xb0] sm:$0xff] }
0x1049   : > { %v5071_v25 = vmul.f32 %v18710_v34, %v5057_v57  ;;  %16075 = vmatmul.mubr.msk.f32.gmra.mxu1 %vm545_vm0, %v18773_v63 }
0x104a   : > { %v17130_v0 = vpop.eup %17129 }
0x104b   : > { %v18780_v58 = vadd.f32 %v18716_v54, %v5071_v25  ;;  %v5058_v60 = vmul.f32 %v17130_v0, %v18680_v30  ;;  %v14285_v30 = vld [vmem:[%s20777_s3 + $0xa8] sm:$0xff] }
0x104d   : > { %v5072_v39 = vmul.f32 %v18710_v34, %v5058_v60  ;;  %16077 = vmatprep.mubr.msk.f32.mxu1 %vm545_vm0, %v18780_v58  ;;  %v14284_v34 = vld [vmem:[%s20777_s3 + $0xa0] sm:$0xff] }
0x104f   : > { %v18787_v12 = vadd.f32 %v18716_v54, %v5072_v39 }
0x1051   : > { %16078 = vmatmul.mubr.msk.f32.gmra.mxu1 %vm545_vm0, %v18787_v12 }
0x1052   : > { %16092 = vmatprep.mubr.msk.f32.mxu1 %vm545_vm0, %v18720_v62 }
0x1055   : > { %16093 = vmatmul.mubr.msk.f32.vlgmr.msra.gmra.mxu1 %vm545_vm0, %v18727_v11 }
0x1056   : > { %16095 = vmatprep.mubr.msk.f32.mxu1 %vm545_vm0, %v18740_v35  ;;  %16105 = vmatpush3.msra.mxu1 %v14287_v45 }
0x1057   : > { %16106 = vmatprep.subr.mxu1 %v14286_v2 }
0x1058   : > { %16107 = vmatpush3.msra.mxu1 %v14286_v2 }
0x1059   : > { %16096 = vmatmul.mubr.msk.f32.gmra.mxu1 %vm545_vm0, %v18753_v17  ;;  %16108 = vmatprep.subr.mxu1 %v14285_v30 }
0x105a   : > { %16098 = vmatprep.mubr.msk.f32.mxu1 %vm545_vm0, %v18766_v55  ;;  %16109 = vmatpush3.msra.mxu1 %v14285_v30 }
0x105b   : > { %16110 = vmatprep.subr.mxu1 %v14284_v34 }
0x105c   : > { %16111 = vmatpush3.msra.mxu1 %v14284_v34 }
0x105d   : > { %16099 = vmatmul.mubr.msk.f32.gmra.mxu1 %vm545_vm0, %v18773_v63  ;;  %16112 = vmatprep.subr.mxu1 %v14283_v56 }
0x105e   : > { %16101 = vmatprep.mubr.msk.f32.mxu1 %vm545_vm0, %v18780_v58  ;;  %16113 = vmatpush3.msra.mxu1 %v14283_v56 }
0x105f   : > { %16114 = vmatprep.subr.mxu1 %v14282_v14 }
0x1060   : > { %16115 = vmatpush3.msra.mxu1 %v14282_v14 }
0x1061   : > { %16102 = vmatmul.mubr.msk.f32.gmra.mxu1 %vm545_vm0, %v18787_v12 }
0x1062   : > { %16116 = vmatprep.mubr.msk.f32.mxu1 %vm545_vm0, %v18720_v62 }
0x1065   : > { %16117 = vmatmul.mubr.msk.f32.vlgmr.msra.gmra.mxu1 %vm545_vm0, %v18727_v11 }
0x1066   : > { %16119 = vmatprep.mubr.msk.f32.mxu1 %vm545_vm0, %v18740_v35 }
0x1069   : > { %16120 = vmatmul.mubr.msk.f32.gmra.mxu1 %vm545_vm0, %v18753_v17 }
0x106a   : > { %16122 = vmatprep.mubr.msk.f32.mxu1 %vm545_vm0, %v18766_v55 }
0x106d   : > { %16123 = vmatmul.mubr.msk.f32.gmra.mxu1 %vm545_vm0, %v18773_v63 }
0x106e   : > { %16125 = vmatprep.mubr.msk.f32.mxu1 %vm545_vm0, %v18780_v58 }
0x1071   : > { %16126 = vmatmul.mubr.msk.f32.gmra.mxu1 %vm545_vm0, %v18787_v12 }
0x10f9   : > { %v16070_v54 = vpop.f32.mrf.mxu1 }
0x10fb   : > { %v5184_v46 = vpop.f32.mrf.mxu1 }
0x10fc   : > { %16132 = vmatprep.mubr.msk.f32.mxu0 %vm1036_vm1, %v5184_v46 }
0x1101   : > { %v16073_v61 = vpop.f32.mrf.mxu1 }
0x1103   : > { %v5194_v48 = vpop.f32.mrf.mxu1 }
0x1109   : > { %v16076_v1 = vpop.f32.mrf.mxu1 }
0x110b   : > { %v5204_v59 = vpop.f32.mrf.mxu1 }
0x110c   : > { %16146 = vmatprep.mubr.msk.f32.mxu1 %vm1036_vm1, %v5204_v59 }
0x1111   : > { %v16079_v4 = vpop.f32.mrf.mxu1 }
0x1113   : > { %v5214_v7 = vpop.f32.mrf.mxu1 }
0x1115   : > { %v16094_v32 = vpop.f32.mrf.mxu1 }
0x1116   : > { %16128 = vmatprep.subr.msk.mxu0 %vm1036_vm1, %v16094_v32 }
0x1117   : > { %v5296_v50 = vpop.f32.mrf.mxu1  ;;  %16129 = vmatpush3.xpose.msk.msra.mxu0 %vm1036_vm1, %v16094_v32 }
0x1118   : > { %16130 = vmatprep.subr.msk.mxu0 %vm1036_vm1, %v5296_v50 }
0x1119   : > { %v16097_v33 = vpop.f32.mrf.mxu1 }
0x111b   : > { %v5306_v15 = vpop.f32.mrf.mxu1  ;;  %16131 = vmatpush3.xpose.msk.msra.mxu0 %vm1036_vm1, %v5296_v50 }
0x111c   : > { %16135 = vmatprep.subr.msk.mxu0 %vm1036_vm1, %v16097_v33 }
0x111d   : > { %v16100_v27 = vpop.f32.mrf.mxu1 }
0x111e   : > { %16133 = vmatmul.mubr.msk.f32.vlgmr.msra.gmra.mxu0 %vm1036_vm1, %v16070_v54  ;;  %16142 = vmatprep.subr.msk.mxu1 %vm1036_vm1, %v16100_v27 }
0x111f   : > { %v5316_v53 = vpop.f32.mrf.mxu1  ;;  %16136 = vmatpush3.xpose.msk.msra.mxu0 %vm1036_vm1, %v16097_v33  ;;  %16139 = vmatprep.mubr.msk.f32.mxu0 %vm1036_vm1, %v5194_v48 }
0x1120   : > { %16143 = vmatpush3.xpose.msk.msra.mxu1 %vm1036_vm1, %v16100_v27  ;;  %16137 = vmatprep.subr.msk.mxu0 %vm1036_vm1, %v5306_v15 }
0x1121   : > { %16144 = vmatprep.subr.msk.mxu1 %vm1036_vm1, %v5316_v53  ;;  %v16103_v10 = vpop.f32.mrf.mxu1 }
0x1123   : > { %v5326_v42 = vpop.f32.mrf.mxu1  ;;  %16138 = vmatpush3.xpose.msk.msra.mxu0 %vm1036_vm1, %v5306_v15 }
0x1124   : > { %16145 = vmatpush3.xpose.msk.msra.mxu1 %vm1036_vm1, %v5316_v53  ;;  %16149 = vmatprep.subr.msk.mxu0 %vm1036_vm1, %v16103_v10 }
0x1125   : > { %v16118_v41 = vpop.f32.mrf.mxu1 }
0x1126   : > { %16140 = vmatmul.mubr.msk.f32.vlgmr.msra.gmra.mxu0 %vm1036_vm1, %v16073_v61  ;;  %16156 = vmatprep.subr.mxu1 %v16118_v41 }
0x1127   : > { %16147 = vmatmul.mubr.msk.f32.vlgmr.msra.gmra.mxu1 %vm1036_vm1, %v16076_v1  ;;  %v5408_v29 = vpop.f32.mrf.mxu1  ;;  %16150 = vmatpush3.xpose.msk.msra.mxu0 %vm1036_vm1, %v16103_v10 }
0x1128   : > { %16153 = vmatprep.mubr.msk.f32.mxu0 %vm1036_vm1, %v5214_v7  ;;  %16157 = vmatpush3.msra.mxu1 %v16118_v41 }
0x1129   : > { %16151 = vmatprep.subr.msk.mxu0 %vm1036_vm1, %v5326_v42  ;;  %16158 = vmatprep.subr.mxu1 %v5408_v29  ;;  %v18860_v24 = vpop.f32.mrf.mxu1 }
0x112a   : > { %16159 = vmatpush3.msra.mxu1 %v5408_v29 }
0x112b   : > { %16163 = vmatprep.subr.mxu1 %v18860_v24  ;;  %v18863_v13 = vpop.f32.mrf.mxu1  ;;  %16152 = vmatpush3.xpose.msk.msra.mxu0 %vm1036_vm1, %v5326_v42 }
0x112d   : > { %v16124_v23 = vpop.f32.mrf.mxu1 }
0x112e   : > { %16154 = vmatmul.mubr.msk.f32.vlgmr.msra.gmra.mxu0 %vm1036_vm1, %v16079_v4  ;;  %16170 = vmatprep.subr.mxu0 %v16124_v23 }
0x112f   : > { %v5428_v18 = vpop.f32.mrf.mxu1  ;;  %16171 = vmatpush3.msra.mxu0 %v16124_v23 }
0x1130   : > { %16172 = vmatprep.subr.mxu0 %v5428_v18 }
0x1131   : > { %16173 = vmatpush3.msra.mxu0 %v5428_v18  ;;  %v18870_v45 = vpop.f32.mrf.mxu1 }
0x1133   : > { %v18873_v57 = vpop.f32.mrf.mxu1 }
0x11de   : > { %v16134_v5 = vpop.f32.mrf.mxu0 }
0x11df   : > { %v5796_v52 = vmul.f32 0.14433756, %v16134_v5 }
0x11e0   : > { %v5525_v47 = vpop.f32.mrf.mxu0 }
0x11e1   : > { %v5795_v21 = vmul.f32 0.14433756, %v5525_v47  ;;  %v5804_v26 = vadd.f32 %v5796_v52, %v17814_v40 }
0x11e3   : > { %v5814_v8 = vsel %vm1036_vm1, %v5804_v26, -inf  ;;  %v5803_v3 = vadd.f32 %v5795_v21, %v17816_v44 }
0x11e4   : > { %5815 = vmax.xlane.f32.xlu1 %v5814_v8 }
0x11e5   : > { %v5811_v6 = vsel %vm1036_vm1, %v5803_v3, -inf }
0x11e6   : > { %5812 = vmax.xlane.f32.xlu0 %v5811_v6  ;;  %v16141_v36 = vpop.f32.mrf.mxu0 }
0x11e7   : > { %v5798_v20 = vmul.f32 0.14433756, %v16141_v36  ;;  %v16148_v39 = vpop.f32.mrf.mxu1 }
0x11e8   : > { %v5612_v25 = vpop.f32.mrf.mxu0  ;;  %v5800_v54 = vmul.f32 0.14433756, %v16148_v39 }
0x11e9   : > { %v5806_v0 = vadd.f32 %v5798_v20, %v17814_v40  ;;  %v5797_v60 = vmul.f32 0.14433756, %v5612_v25  ;;  %v5699_v56 = vpop.f32.mrf.mxu1 }
0x11ea   : > { %v5799_v48 = vmul.f32 0.14433756, %v5699_v56  ;;  %v5808_v4 = vadd.f32 %v5800_v54, %v17814_v40 }
0x11eb   : > { %v5820_v2 = vsel %vm1036_vm1, %v5806_v0, -inf  ;;  %v5805_v30 = vadd.f32 %v5797_v60, %v17816_v44 }
0x11ec   : > { %5821 = vmax.xlane.f32.xlu1 %v5820_v2  ;;  %v5807_v33 = vadd.f32 %v5799_v48, %v17816_v44  ;;  %v5826_v15 = vsel %vm1036_vm1, %v5808_v4, -inf }
0x11ed   : > { %v5817_v34 = vsel %vm1036_vm1, %v5805_v30, -inf }
0x11ee   : > { %5818 = vmax.xlane.f32.xlu0 %v5817_v34  ;;  %v16155_v14 = vpop.f32.mrf.mxu0  ;;  %v5823_v27 = vsel %vm1036_vm1, %v5807_v33, -inf }
0x11ef   : > { %v5802_v46 = vmul.f32 0.14433756, %v16155_v14 }
0x11f0   : > { %v5786_v61 = vpop.f32.mrf.mxu0 }
0x11f1   : > { %v5810_v1 = vadd.f32 %v5802_v46, %v17814_v40  ;;  %v5801_v59 = vmul.f32 0.14433756, %v5786_v61 }
0x11f3   : > { %v5832_v7 = vsel %vm1036_vm1, %v5810_v1, -inf  ;;  %v5809_v32 = vadd.f32 %v5801_v59, %v17816_v44 }
0x11f4   : > { %5833 = vmax.xlane.f32.xlu1 %v5832_v7 }
0x11f5   : > { %v5829_v50 = vsel %vm1036_vm1, %v5809_v32, -inf }
0x11f6   : > { %5830 = vmax.xlane.f32.xlu0 %v5829_v50 }
0x11f8   : > { %5827 = vmax.xlane.f32.xlu1 %v5826_v15 }
0x11fa   : > { %5824 = vmax.xlane.f32.xlu0 %v5823_v27 }
0x126d   : > { %v5816_v53 = vpop.xlane.xlu1 %5815 }
0x126e   : > { %v5836_v10 = vsub.f32 %v5804_v26, %v5816_v53 }
0x126f   : > { %v5813_v42 = vpop.xlane.xlu0 %5812 }
0x1270   : > { %v5845_v41 = vmul.f32 1.442695, %v5836_v10  ;;  %v5835_v29 = vsub.f32 %v5803_v3, %v5813_v42  ;;  %v14327_v10 = vld [vmem:[%s20804_s1 + $0xe8] sm:$0xff] }
0x1271   : > { %16184 = vmatprep.subr.mxu0 %v14327_v10 }
0x1272   : > { %17131 = vpow2.f32 %v5845_v41  ;;  %v5843_v23 = vmul.f32 1.442695, %v5835_v29 }
0x1274   : > { %17133 = vpow2.f32 %v5843_v23 }
0x1275   : > { %v5822_v18 = vpop.xlane.xlu1 %5821 }
0x1276   : > { %v5838_v5 = vsub.f32 %v5806_v0, %v5822_v18 }
0x1277   : > { %v5819_v52 = vpop.xlane.xlu0 %5818 }
0x1278   : > { %v5849_v47 = vmul.f32 1.442695, %v5838_v5  ;;  %v5837_v21 = vsub.f32 %v5805_v30, %v5819_v52 }
0x127a   : > { %17135 = vpow2.f32 %v5849_v47  ;;  %v5847_v8 = vmul.f32 1.442695, %v5837_v21 }
0x127c   : > { %17137 = vpow2.f32 %v5847_v8 }
0x127d   : > { %v5834_v6 = vpop.xlane.xlu1 %5833 }
0x127e   : > { %v5842_v36 = vsub.f32 %v5810_v1, %v5834_v6 }
0x127f   : > { %v17132_v20 = vpop.eup %17131  ;;  %v5831_v25 = vpop.xlane.xlu0 %5830 }
0x1280   : > { %v5857_v60 = vmul.f32 1.442695, %v5842_v36  ;;  %v5841_v26 = vsub.f32 %v5809_v32, %v5831_v25  ;;  %v5862_v39 = vsel %vm1036_vm1, %v17132_v20, 0.0 }
0x1281   : > { %v17134_v3 = vpop.eup %17133  ;;  %5863 = vadd.xlane.f32.xlu1 %v5862_v39  ;;  %v5828_v2 = vpop.xlane.xlu1 %5827 }
0x1282   : > { %17139 = vpow2.f32 %v5857_v60  ;;  %v5855_v34 = vmul.f32 1.442695, %v5841_v26  ;;  %v5840_v0 = vsub.f32 %v5808_v4, %v5828_v2  ;;  %v5859_v56 = vsel %vm1036_vm1, %v17134_v3, 0.0 }
0x1283   : > { %5860 = vadd.xlane.f32.xlu0 %v5859_v56  ;;  %v5825_v30 = vpop.xlane.xlu0 %5824 }
0x1284   : > { %17141 = vpow2.f32 %v5855_v34  ;;  %v5853_v14 = vmul.f32 1.442695, %v5840_v0  ;;  %v5839_v54 = vsub.f32 %v5807_v33, %v5825_v30 }
0x1286   : > { %17143 = vpow2.f32 %v5853_v14  ;;  %v5851_v46 = vmul.f32 1.442695, %v5839_v54  ;;  %v14326_v14 = vld [vmem:[%s20804_s1 + $0xe0] sm:$0xff]  ;;  %v14338_v54 = vld [vmem:[%s20776_s2 + $0xd0] sm:$0xff] }
0x1287   : > { %v17136_v61 = vpop.eup %17135 }
0x1288   : > { %17145 = vpow2.f32 %v5851_v46  ;;  %v5868_v48 = vsel %vm1036_vm1, %v17136_v61, 0.0  ;;  %v14325_v46 = vld [vmem:[%s20804_s1 + $0xd8] sm:$0xff] }
0x1289   : > { %v17138_v1 = vpop.eup %17137  ;;  %5869 = vadd.xlane.f32.xlu1 %v5868_v48  ;;  %v14324_v48 = vld [vmem:[%s20804_s1 + $0xd0] sm:$0xff] }
0x128a   : > { %v5865_v59 = vsel %vm1036_vm1, %v17138_v1, 0.0 }
0x128b   : > { %5866 = vadd.xlane.f32.xlu0 %v5865_v59  ;;  %v14323_v59 = vld [vmem:[%s20804_s1 + $0xc8] sm:$0xff] }
0x128f   : > { %v17140_v7 = vpop.eup %17139 }
0x1290   : > { %v5880_v4 = vsel %vm1036_vm1, %v17140_v7, 0.0 }
0x1291   : > { %v17142_v32 = vpop.eup %17141  ;;  %5881 = vadd.xlane.f32.xlu1 %v5880_v4  ;;  %v14355_v4 = vld [vmem:[%s20777_s3 + $0xe8] sm:$0xff] }
0x1292   : > { %v5877_v50 = vsel %vm1036_vm1, %v17142_v32, 0.0 }
0x1293   : > { %v17144_v15 = vpop.eup %17143  ;;  %5878 = vadd.xlane.f32.xlu0 %v5877_v50  ;;  %v14353_v50 = vld [vmem:[%s20777_s3 + $0xd8] sm:$0xff] }
0x1294   : > { %v5874_v33 = vsel %vm1036_vm1, %v17144_v15, 0.0 }
0x1295   : > { %v17146_v27 = vpop.eup %17145  ;;  %5875 = vadd.xlane.f32.xlu1 %v5874_v33  ;;  %v14351_v33 = vld [vmem:[%s20777_s3 + $0xc8] sm:$0xff] }
0x1296   : > { %v5871_v53 = vsel %vm1036_vm1, %v17146_v27, 0.0 }
0x1297   : > { %5872 = vadd.xlane.f32.xlu0 %v5871_v53 }
0x130a   : > { %v5864_v42 = vpop.xlane.xlu1 %5863 }
0x130b   : > { %17147 = vrcp.f32 %v5864_v42 }
0x130c   : > { %v5861_v41 = vpop.xlane.xlu0 %5860 }
0x130d   : > { %17149 = vrcp.f32 %v5861_v41 }
0x1312   : > { %v5870_v29 = vpop.xlane.xlu1 %5869 }
0x1313   : > { %17151 = vrcp.f32 %v5870_v29 }
0x1314   : > { %v5867_v23 = vpop.xlane.xlu0 %5866 }
0x1315   : > { %17153 = vrcp.f32 %v5867_v23 }
0x1318   : > { %v17148_v18 = vpop.eup %17147 }
0x1319   : > { %v5886_v8 = vmul.f32 %v17148_v18, %v17132_v20 }
0x131a   : > { %v17150_v5 = vpop.eup %17149  ;;  %v5882_v52 = vpop.xlane.xlu1 %5881 }
0x131b   : > { %v5884_v47 = vmul.f32 %v17150_v5, %v17134_v3  ;;  %17155 = vrcp.f32 %v5882_v52 }
0x131c   : > { %v5879_v21 = vpop.xlane.xlu0 %5878 }
0x131d   : > { %17157 = vrcp.f32 %v5879_v21  ;;  %16160 = vmatprep.mubr.msk.f32.mxu1 %vm1036_vm1, %v5884_v47 }
0x131e   : > { %v5876_v6 = vpop.xlane.xlu1 %5875  ;;  %16161 = vmatmul.mubr.msk.f32.vlgmr.msra.gmra.mxu1 %vm1036_vm1, %v5886_v8 }
0x131f   : > { %16164 = vmatpush3.msra.mxu1 %v18860_v24  ;;  %17159 = vrcp.f32 %v5876_v6  ;;  %v14341_v24 = vld [vmem:[%s20776_s2 + $0xe8] sm:$0xff] }
0x1320   : > { %16165 = vmatprep.subr.mxu1 %v18863_v13  ;;  %v5873_v36 = vpop.xlane.xlu0 %5872  ;;  %v17152_v25 = vpop.eup %17151 }
0x1321   : > { %16166 = vmatpush3.msra.mxu1 %v18863_v13  ;;  %17161 = vrcp.f32 %v5873_v36  ;;  %v5890_v26 = vmul.f32 %v17152_v25, %v17136_v61  ;;  %v14337_v61 = vld [vmem:[%s20776_s2 + $0xc8] sm:$0xff] }
0x1322   : > { %v17154_v60 = vpop.eup %17153  ;;  %16177 = vmatprep.subr.mxu1 %v18870_v45 }
0x1323   : > { %v5888_v20 = vmul.f32 %v17154_v60, %v17138_v1  ;;  %v14336_v1 = vld [vmem:[%s20776_s2 + $0xc0] sm:$0xff] }
0x1325   : > { %16167 = vmatprep.mubr.msk.f32.mxu1 %vm1036_vm1, %v5888_v20 }
0x1326   : > { %16168 = vmatmul.mubr.msk.f32.vlgmr.msra.gmra.mxu1 %vm1036_vm1, %v5890_v26 }
0x1327   : > { %16178 = vmatpush3.msra.mxu1 %v18870_v45  ;;  %v14340_v45 = vld [vmem:[%s20776_s2 + $0xe0] sm:$0xff] }
0x1328   : > { %16179 = vmatprep.subr.mxu1 %v18873_v57  ;;  %v17156_v39 = vpop.eup %17155 }
0x1329   : > { %16180 = vmatpush3.msra.mxu1 %v18873_v57  ;;  %v5898_v2 = vmul.f32 %v17156_v39, %v17140_v7  ;;  %v14339_v57 = vld [vmem:[%s20776_s2 + $0xd8] sm:$0xff]  ;;  %v14322_v7 = vld [vmem:[%s20804_s1 + $0xc0] sm:$0xff] }
0x132a   : > { %v17158_v13 = vpop.eup %17157  ;;  %16208 = vmatprep.subr.mxu1 %v14341_v24 }
0x132b   : > { %v5896_v3 = vmul.f32 %v17158_v13, %v17142_v32  ;;  %v14354_v32 = vld [vmem:[%s20777_s3 + $0xe0] sm:$0xff] }
0x132c   : > { %v17160_v34 = vpop.eup %17159 }
0x132d   : > { %16181 = vmatprep.mubr.msk.f32.mxu1 %vm1036_vm1, %v5896_v3  ;;  %v5894_v30 = vmul.f32 %v17160_v34, %v17144_v15  ;;  %v14352_v15 = vld [vmem:[%s20777_s3 + $0xd0] sm:$0xff] }
0x132e   : > { %v17162_v0 = vpop.eup %17161  ;;  %16182 = vmatmul.mubr.msk.f32.vlgmr.msra.gmra.mxu1 %vm1036_vm1, %v5898_v2 }
0x132f   : > { %16209 = vmatpush3.msra.mxu1 %v14341_v24  ;;  %16220 = vmatprep.mubr.msk.f32.mxu1 %vm545_vm0, %v18720_v62  ;;  %v5892_v56 = vmul.f32 %v17162_v0, %v17146_v27  ;;  %v14350_v27 = vld [vmem:[%s20777_s3 + $0xc0] sm:$0xff] }
0x1330   : > { %16210 = vmatprep.subr.mxu1 %v14340_v45 }
0x1331   : > { %16211 = vmatpush3.msra.mxu1 %v14340_v45  ;;  %16174 = vmatprep.mubr.msk.f32.mxu0 %vm1036_vm1, %v5892_v56 }
0x1332   : > { %16212 = vmatprep.subr.mxu1 %v14339_v57  ;;  %16175 = vmatmul.mubr.msk.f32.vlgmr.msra.gmra.mxu0 %vm1036_vm1, %v5894_v30 }
0x1333   : > { %16185 = vmatpush3.msra.mxu0 %v14327_v10  ;;  %16213 = vmatpush3.msra.mxu1 %v14339_v57 }
0x1334   : > { %16186 = vmatprep.subr.mxu0 %v14326_v14  ;;  %16196 = vmatprep.mubr.msk.f32.mxu0 %vm545_vm0, %v18720_v62 }
0x1335   : > { %16214 = vmatprep.subr.mxu1 %v14338_v54  ;;  %16187 = vmatpush3.msra.mxu0 %v14326_v14 }
0x1336   : > { %16215 = vmatpush3.msra.mxu1 %v14338_v54  ;;  %16188 = vmatprep.subr.mxu0 %v14325_v46 }
0x1337   : > { %16216 = vmatprep.subr.mxu1 %v14337_v61  ;;  %16189 = vmatpush3.msra.mxu0 %v14325_v46 }
0x1338   : > { %16217 = vmatpush3.msra.mxu1 %v14337_v61  ;;  %16190 = vmatprep.subr.mxu0 %v14324_v48 }
0x1339   : > { %16218 = vmatprep.subr.mxu1 %v14336_v1  ;;  %16191 = vmatpush3.msra.mxu0 %v14324_v48 }
0x133a   : > { %16219 = vmatpush3.msra.mxu1 %v14336_v1  ;;  %16192 = vmatprep.subr.mxu0 %v14323_v59 }
0x133b   : > { %16221 = vmatmul.mubr.msk.f32.vlgmr.msra.gmra.mxu1 %vm545_vm0, %v18727_v11  ;;  %16193 = vmatpush3.msra.mxu0 %v14323_v59 }
0x133c   : > { %16223 = vmatprep.mubr.msk.f32.mxu1 %vm545_vm0, %v18740_v35  ;;  %16194 = vmatprep.subr.mxu0 %v14322_v7 }
0x133d   : > { %16195 = vmatpush3.msra.mxu0 %v14322_v7 }
0x133e   : > { %16197 = vmatmul.mubr.msk.f32.vlgmr.msra.gmra.mxu0 %vm545_vm0, %v18727_v11  ;;  %16232 = vmatprep.subr.mxu0 %v14355_v4 }
0x133f   : > { %16224 = vmatmul.mubr.msk.f32.gmra.mxu1 %vm545_vm0, %v18753_v17  ;;  %16199 = vmatprep.mubr.msk.f32.mxu0 %vm545_vm0, %v18740_v35 }
0x1340   : > { %16226 = vmatprep.mubr.msk.f32.mxu1 %vm545_vm0, %v18766_v55  ;;  %16233 = vmatpush3.msra.mxu0 %v14355_v4 }
0x1341   : > { %16234 = vmatprep.subr.mxu0 %v14354_v32 }
0x1342   : > { %16200 = vmatmul.mubr.msk.f32.gmra.mxu0 %vm545_vm0, %v18753_v17 }
0x1343   : > { %16227 = vmatmul.mubr.msk.f32.gmra.mxu1 %vm545_vm0, %v18773_v63  ;;  %16202 = vmatprep.mubr.msk.f32.mxu0 %vm545_vm0, %v18766_v55 }
0x1344   : > { %16229 = vmatprep.mubr.msk.f32.mxu1 %vm545_vm0, %v18780_v58  ;;  %16235 = vmatpush3.msra.mxu0 %v14354_v32 }
0x1345   : > { %16236 = vmatprep.subr.mxu0 %v14353_v50 }
0x1346   : > { %16203 = vmatmul.mubr.msk.f32.gmra.mxu0 %vm545_vm0, %v18773_v63 }
0x1347   : > { %16230 = vmatmul.mubr.msk.f32.gmra.mxu1 %vm545_vm0, %v18787_v12  ;;  %16205 = vmatprep.mubr.msk.f32.mxu0 %vm545_vm0, %v18780_v58 }
0x1348   : > { %16237 = vmatpush3.msra.mxu0 %v14353_v50 }
0x1349   : > { %16238 = vmatprep.subr.mxu0 %v14352_v15 }
0x134a   : > { %16239 = vmatpush3.msra.mxu0 %v14352_v15 }
0x134b   : > { %16206 = vmatmul.mubr.msk.f32.gmra.mxu0 %vm545_vm0, %v18787_v12  ;;  %16240 = vmatprep.subr.mxu0 %v14351_v33 }
0x134c   : > { %16241 = vmatpush3.msra.mxu0 %v14351_v33  ;;  %16244 = vmatprep.mubr.msk.f32.mxu0 %vm545_vm0, %v18720_v62 }
0x134d   : > { %16242 = vmatprep.subr.mxu0 %v14350_v27 }
0x134e   : > { %16243 = vmatpush3.msra.mxu0 %v14350_v27 }
0x134f   : > { %16245 = vmatmul.mubr.msk.f32.vlgmr.msra.gmra.mxu0 %vm545_vm0, %v18727_v11 }
0x1350   : > { %16247 = vmatprep.mubr.msk.f32.mxu0 %vm545_vm0, %v18740_v35 }
0x1353   : > { %16248 = vmatmul.mubr.msk.f32.gmra.mxu0 %vm545_vm0, %v18753_v17 }
0x1354   : > { %16250 = vmatprep.mubr.msk.f32.mxu0 %vm545_vm0, %v18766_v55 }
0x1357   : > { %16251 = vmatmul.mubr.msk.f32.gmra.mxu0 %vm545_vm0, %v18773_v63 }
0x1358   : > { %16253 = vmatprep.mubr.msk.f32.mxu0 %vm545_vm0, %v18780_v58 }
0x135b   : > { %16254 = vmatmul.mubr.msk.f32.gmra.mxu0 %vm545_vm0, %v18787_v12 }
0x13de   : > { %v19012_v53 = vpop.f32.mrf.mxu1 }
0x13e0   : > { %v19014_v10 = vpop.f32.mrf.mxu1 }
0x13e6   : > { %v19016_v42 = vpop.f32.mrf.mxu1 }
0x13e8   : > { %v19018_v41 = vpop.f32.mrf.mxu1 }
0x13ee   : > { %v19020_v29 = vpop.f32.mrf.mxu1 }
0x13f0   : > { %v19024_v18 = vpop.f32.mrf.mxu1 }
0x13f2   : > { %v19022_v23 = vpop.f32.mrf.mxu0 }
0x13f4   : > { %v19026_v52 = vpop.f32.mrf.mxu0 }
0x13fb   : > { %v16222_v5 = vpop.f32.mrf.mxu1 }
0x13fc   : > { %16256 = vmatprep.subr.msk.mxu1 %vm1036_vm1, %v16222_v5 }
0x13fd   : > { %v6411_v47 = vpop.f32.mrf.mxu1  ;;  %16257 = vmatpush3.xpose.msk.msra.mxu1 %vm1036_vm1, %v16222_v5 }
0x13fe   : > { %16258 = vmatprep.subr.msk.mxu1 %vm1036_vm1, %v6411_v47  ;;  %v16198_v21 = vpop.f32.mrf.mxu0 }
0x13ff   : > { %v16225_v8 = vpop.f32.mrf.mxu1 }
0x1400   : > { %v6299_v6 = vpop.f32.mrf.mxu0 }
0x1401   : > { %v6421_v36 = vpop.f32.mrf.mxu1  ;;  %16259 = vmatpush3.xpose.msk.msra.mxu1 %vm1036_vm1, %v6411_v47  ;;  %16260 = vmatprep.mubr.msk.f32.mxu1 %vm1036_vm1, %v6299_v6 }
0x1402   : > { %16263 = vmatprep.subr.msk.mxu1 %vm1036_vm1, %v16225_v8  ;;  %v16201_v25 = vpop.f32.mrf.mxu0 }
0x1403   : > { %v16228_v60 = vpop.f32.mrf.mxu1 }
0x1404   : > { %16261 = vmatmul.mubr.msk.f32.vlgmr.msra.gmra.mxu1 %vm1036_vm1, %v16198_v21  ;;  %16270 = vmatprep.subr.msk.mxu0 %vm1036_vm1, %v16228_v60  ;;  %v6309_v20 = vpop.f32.mrf.mxu0 }
0x1405   : > { %v6431_v26 = vpop.f32.mrf.mxu1  ;;  %16264 = vmatpush3.xpose.msk.msra.mxu1 %vm1036_vm1, %v16225_v8  ;;  %16271 = vmatpush3.xpose.msk.msra.mxu0 %vm1036_vm1, %v16228_v60 }
0x1406   : > { %16265 = vmatprep.subr.msk.mxu1 %vm1036_vm1, %v6421_v36  ;;  %16267 = vmatprep.mubr.msk.f32.mxu1 %vm1036_vm1, %v6309_v20  ;;  %v16204_v24 = vpop.f32.mrf.mxu0 }
0x1407   : > { %16272 = vmatprep.subr.msk.mxu0 %vm1036_vm1, %v6431_v26  ;;  %v16231_v13 = vpop.f32.mrf.mxu1 }
0x1408   : > { %v6319_v39 = vpop.f32.mrf.mxu0 }
0x1409   : > { %16266 = vmatpush3.xpose.msk.msra.mxu1 %vm1036_vm1, %v6421_v36  ;;  %16273 = vmatpush3.xpose.msk.msra.mxu0 %vm1036_vm1, %v6431_v26  ;;  %v6441_v2 = vpop.f32.mrf.mxu1 }
0x140a   : > { %16274 = vmatprep.mubr.msk.f32.mxu0 %vm1036_vm1, %v6319_v39  ;;  %16277 = vmatprep.subr.msk.mxu1 %vm1036_vm1, %v16231_v13 }
0x140b   : > { %v16207_v3 = vpop.f32.mrf.mxu0 }
0x140c   : > { %16268 = vmatmul.mubr.msk.f32.vlgmr.msra.gmra.mxu1 %vm1036_vm1, %v16201_v25  ;;  %16275 = vmatmul.mubr.msk.f32.vlgmr.msra.gmra.mxu0 %vm1036_vm1, %v16204_v24 }
0x140d   : > { %v6329_v34 = vpop.f32.mrf.mxu0  ;;  %16278 = vmatpush3.xpose.msk.msra.mxu1 %vm1036_vm1, %v16231_v13 }
0x140e   : > { %16279 = vmatprep.subr.msk.mxu1 %vm1036_vm1, %v6441_v2  ;;  %16281 = vmatprep.mubr.msk.f32.mxu1 %vm1036_vm1, %v6329_v34 }
0x140f   : > { %v16246_v45 = vpop.f32.mrf.mxu0 }
0x1410   : > { %16284 = vmatprep.subr.mxu0 %v16246_v45 }
0x1411   : > { %v6523_v0 = vpop.f32.mrf.mxu0  ;;  %16280 = vmatpush3.xpose.msk.msra.mxu1 %vm1036_vm1, %v6441_v2  ;;  %16285 = vmatpush3.msra.mxu0 %v16246_v45 }
0x1412   : > { %16286 = vmatprep.subr.mxu0 %v6523_v0 }
0x1413   : > { %v16249_v56 = vpop.f32.mrf.mxu0  ;;  %16287 = vmatpush3.msra.mxu0 %v6523_v0 }
0x1414   : > { %16282 = vmatmul.mubr.msk.f32.vlgmr.msra.gmra.mxu1 %vm1036_vm1, %v16207_v3  ;;  %16291 = vmatprep.subr.mxu1 %v16249_v56 }
0x1415   : > { %v6533_v57 = vpop.f32.mrf.mxu0  ;;  %16292 = vmatpush3.msra.mxu1 %v16249_v56 }
0x1416   : > { %16293 = vmatprep.subr.mxu1 %v6533_v57 }
0x1417   : > { %v19052_v30 = vpop.f32.mrf.mxu0  ;;  %16294 = vmatpush3.msra.mxu1 %v6533_v57 }
0x1418   : > { %16298 = vmatprep.subr.mxu0 %v19052_v30 }
0x1419   : > { %v19055_v14 = vpop.f32.mrf.mxu0 }
0x141b   : > { %v19057_v54 = vpop.f32.mrf.mxu0 }
0x141c   : > { %16305 = vmatprep.subr.mxu1 %v19057_v54 }
0x141d   : > { %v19063_v32 = vpop.f32.mrf.mxu0 }
0x14c4   : > { %v16262_v46 = vpop.f32.mrf.mxu1 }
0x14c5   : > { %v6911_v61 = vmul.f32 0.14433756, %v16262_v46 }
0x14c6   : > { %v6640_v48 = vpop.f32.mrf.mxu1 }
0x14c7   : > { %v6919_v1 = vadd.f32 %v6911_v61, %v17814_v40  ;;  %v6910_v59 = vmul.f32 0.14433756, %v6640_v48 }
0x14c9   : > { %v6929_v7 = vsel %vm1036_vm1, %v6919_v1, -inf  ;;  %v6918_v4 = vadd.f32 %v6910_v59, %v17816_v44 }
0x14ca   : > { %6930 = vmax.xlane.f32.xlu1 %v6929_v7 }
0x14cb   : > { %v6926_v50 = vsel %vm1036_vm1, %v6918_v4, -inf }
0x14cc   : > { %6927 = vmax.xlane.f32.xlu0 %v6926_v50  ;;  %v16269_v15 = vpop.f32.mrf.mxu1  ;;  %v16276_v33 = vpop.f32.mrf.mxu0 }
0x14cd   : > { %v6913_v27 = vmul.f32 0.14433756, %v16269_v15  ;;  %v6915_v5 = vmul.f32 0.14433756, %v16276_v33 }
0x14ce   : > { %v6727_v47 = vpop.f32.mrf.mxu1  ;;  %v6814_v21 = vpop.f32.mrf.mxu0 }
0x14cf   : > { %v6921_v8 = vadd.f32 %v6913_v27, %v17814_v40  ;;  %v6912_v6 = vmul.f32 0.14433756, %v6727_v47  ;;  %v6914_v36 = vmul.f32 0.14433756, %v6814_v21  ;;  %v6923_v25 = vadd.f32 %v6915_v5, %v17814_v40 }
0x14d1   : > { %v6935_v60 = vsel %vm1036_vm1, %v6921_v8, -inf  ;;  %v6920_v20 = vadd.f32 %v6912_v6, %v17816_v44  ;;  %v6922_v24 = vadd.f32 %v6914_v36, %v17816_v44  ;;  %v6941_v3 = vsel %vm1036_vm1, %v6923_v25, -inf }
0x14d2   : > { %6936 = vmax.xlane.f32.xlu1 %v6935_v60 }
0x14d3   : > { %v6932_v26 = vsel %vm1036_vm1, %v6920_v20, -inf  ;;  %v6938_v0 = vsel %vm1036_vm1, %v6922_v24, -inf }
0x14d4   : > { %6933 = vmax.xlane.f32.xlu0 %v6932_v26  ;;  %v16283_v39 = vpop.f32.mrf.mxu1 }
0x14d5   : > { %v6917_v13 = vmul.f32 0.14433756, %v16283_v39 }
0x14d6   : > { %v6901_v2 = vpop.f32.mrf.mxu1  ;;  %6942 = vmax.xlane.f32.xlu1 %v6941_v3 }
0x14d7   : > { %v6925_v34 = vadd.f32 %v6917_v13, %v17814_v40  ;;  %v6916_v45 = vmul.f32 0.14433756, %v6901_v2 }
0x14d8   : > { %6939 = vmax.xlane.f32.xlu0 %v6938_v0 }
0x14d9   : > { %v6947_v56 = vsel %vm1036_vm1, %v6925_v34, -inf  ;;  %v6924_v57 = vadd.f32 %v6916_v45, %v17816_v44 }
0x14da   : > { %6948 = vmax.xlane.f32.xlu1 %v6947_v56 }
0x14db   : > { %v6944_v46 = vsel %vm1036_vm1, %v6924_v57, -inf }
0x14dc   : > { %6945 = vmax.xlane.f32.xlu0 %v6944_v46 }
0x1553   : > { %v6931_v61 = vpop.xlane.xlu1 %6930 }
0x1554   : > { %v6951_v48 = vsub.f32 %v6919_v1, %v6931_v61 }
0x1555   : > { %v6928_v59 = vpop.xlane.xlu0 %6927 }
0x1556   : > { %v6960_v7 = vmul.f32 1.442695, %v6951_v48  ;;  %v6950_v50 = vsub.f32 %v6918_v4, %v6928_v59 }
0x1558   : > { %17163 = vpow2.f32 %v6960_v7  ;;  %v6958_v15 = vmul.f32 1.442695, %v6950_v50 }
0x155a   : > { %17165 = vpow2.f32 %v6958_v15 }
0x155b   : > { %v6937_v33 = vpop.xlane.xlu1 %6936 }
0x155c   : > { %v6953_v27 = vsub.f32 %v6921_v8, %v6937_v33 }
0x155d   : > { %v6934_v5 = vpop.xlane.xlu0 %6933 }
0x155e   : > { %v6964_v47 = vmul.f32 1.442695, %v6953_v27  ;;  %v6952_v21 = vsub.f32 %v6920_v20, %v6934_v5 }
0x155f   : > { %v6943_v6 = vpop.xlane.xlu1 %6942 }
0x1560   : > { %17167 = vpow2.f32 %v6964_v47  ;;  %v6962_v36 = vmul.f32 1.442695, %v6952_v21  ;;  %v6955_v60 = vsub.f32 %v6923_v25, %v6943_v6 }
0x1561   : > { %v6940_v26 = vpop.xlane.xlu0 %6939 }
0x1562   : > { %17169 = vpow2.f32 %v6962_v36  ;;  %v6968_v39 = vmul.f32 1.442695, %v6955_v60  ;;  %v6954_v13 = vsub.f32 %v6922_v24, %v6940_v26 }
0x1563   : > { %v6949_v1 = vpop.xlane.xlu1 %6948 }
0x1564   : > { %17171 = vpow2.f32 %v6968_v39  ;;  %v6966_v3 = vmul.f32 1.442695, %v6954_v13  ;;  %v6957_v4 = vsub.f32 %v6925_v34, %v6949_v1 }
0x1565   : > { %v17164_v2 = vpop.eup %17163  ;;  %v6946_v45 = vpop.xlane.xlu0 %6945 }
0x1566   : > { %17173 = vpow2.f32 %v6966_v3  ;;  %v6972_v0 = vmul.f32 1.442695, %v6957_v4  ;;  %v6956_v8 = vsub.f32 %v6924_v57, %v6946_v45  ;;  %v6977_v56 = vsel %vm1036_vm1, %v17164_v2, 0.0 }
0x1567   : > { %v17166_v20 = vpop.eup %17165  ;;  %6978 = vadd.xlane.f32.xlu1 %v6977_v56 }
0x1568   : > { %17175 = vpow2.f32 %v6972_v0  ;;  %v6970_v46 = vmul.f32 1.442695, %v6956_v8  ;;  %v6974_v25 = vsel %vm1036_vm1, %v17166_v20, 0.0 }
0x1569   : > { %6975 = vadd.xlane.f32.xlu0 %v6974_v25 }
0x156a   : > { %17177 = vpow2.f32 %v6970_v46 }
0x156d   : > { %v17168_v24 = vpop.eup %17167 }
0x156e   : > { %v6983_v61 = vsel %vm1036_vm1, %v17168_v24, 0.0 }
0x156f   : > { %v17170_v48 = vpop.eup %17169  ;;  %6984 = vadd.xlane.f32.xlu1 %v6983_v61 }
0x1570   : > { %v6980_v34 = vsel %vm1036_vm1, %v17170_v48, 0.0 }
0x1571   : > { %v17172_v59 = vpop.eup %17171  ;;  %6981 = vadd.xlane.f32.xlu0 %v6980_v34 }
0x1572   : > { %v6989_v57 = vsel %vm1036_vm1, %v17172_v59, 0.0 }
0x1573   : > { %v17174_v7 = vpop.eup %17173  ;;  %6990 = vadd.xlane.f32.xlu1 %v6989_v57  ;;  %v14422_v57 = vld [vmem:[%s20776_s2 + $0x100] sm:$0xff] }
0x1574   : > { %v6986_v50 = vsel %vm1036_vm1, %v17174_v7, 0.0 }
0x1575   : > { %v17176_v15 = vpop.eup %17175  ;;  %6987 = vadd.xlane.f32.xlu0 %v6986_v50  ;;  %v14409_v50 = vld [vmem:[%s20804_s1 + $0x108] sm:$0xff] }
0x1576   : > { %v6995_v33 = vsel %vm1036_vm1, %v17176_v15, 0.0 }
0x1577   : > { %v17178_v27 = vpop.eup %17177  ;;  %6996 = vadd.xlane.f32.xlu1 %v6995_v33 }
0x1578   : > { %v6992_v5 = vsel %vm1036_vm1, %v17178_v27, 0.0 }
0x1579   : > { %6993 = vadd.xlane.f32.xlu0 %v6992_v5 }
0x15f0   : > { %v6979_v47 = vpop.xlane.xlu1 %6978 }
0x15f1   : > { %17179 = vrcp.f32 %v6979_v47  ;;  %v14406_v47 = vld [vmem:[%s20804_s1 + $0xf0] sm:$0xff] }
0x15f2   : > { %v6976_v21 = vpop.xlane.xlu0 %6975 }
0x15f3   : > { %17181 = vrcp.f32 %v6976_v21 }
0x15f8   : > { %v6985_v6 = vpop.xlane.xlu1 %6984 }
0x15f9   : > { %17183 = vrcp.f32 %v6985_v6  ;;  %v14439_v6 = vld [vmem:[%s20777_s3 + $0x118] sm:$0xff] }
0x15fa   : > { %v6982_v36 = vpop.xlane.xlu0 %6981 }
0x15fb   : > { %17185 = vrcp.f32 %v6982_v36 }
0x15fc   : > { %v6991_v60 = vpop.xlane.xlu1 %6990 }
0x15fd   : > { %17187 = vrcp.f32 %v6991_v60 }
0x15fe   : > { %v6988_v26 = vpop.xlane.xlu0 %6987  ;;  %v17180_v39 = vpop.eup %17179 }
0x15ff   : > { %17189 = vrcp.f32 %v6988_v26  ;;  %v7001_v4 = vmul.f32 %v17180_v39, %v17164_v2 }
0x1600   : > { %v17182_v13 = vpop.eup %17181  ;;  %v6997_v1 = vpop.xlane.xlu1 %6996 }
0x1601   : > { %v6999_v3 = vmul.f32 %v17182_v13, %v17166_v20  ;;  %17191 = vrcp.f32 %v6997_v1  ;;  %v14438_v1 = vld [vmem:[%s20777_s3 + $0x110] sm:$0xff] }
0x1602   : > { %v6994_v45 = vpop.xlane.xlu0 %6993 }
0x1603   : > { %17193 = vrcp.f32 %v6994_v45  ;;  %16288 = vmatprep.mubr.msk.f32.mxu0 %vm1036_vm1, %v6999_v3 }
0x1604   : > { %16289 = vmatmul.mubr.msk.f32.vlgmr.msra.gmra.mxu0 %vm1036_vm1, %v7001_v4  ;;  %v14437_v4 = vld [vmem:[%s20777_s3 + $0x108] sm:$0xff] }
0x1605   : > { %16299 = vmatpush3.msra.mxu0 %v19052_v30  ;;  %v14321_v30 = vld [vmem:[%s20778_s4 + $0x38] sm:$0xff] }
0x1606   : > { %16300 = vmatprep.subr.mxu0 %v19055_v14  ;;  %v17184_v0 = vpop.eup %17183 }
0x1607   : > { %16301 = vmatpush3.msra.mxu0 %v19055_v14  ;;  %v7005_v46 = vmul.f32 %v17184_v0, %v17168_v24  ;;  %v14436_v0 = vld [vmem:[%s20777_s3 + $0x100] sm:$0xff] }
0x1608   : > { %v17186_v8 = vpop.eup %17185 }
0x1609   : > { %v7003_v56 = vmul.f32 %v17186_v8, %v17170_v48 }
0x160a   : > { %v17188_v25 = vpop.eup %17187 }
0x160b   : > { %16295 = vmatprep.mubr.msk.f32.mxu1 %vm1036_vm1, %v7003_v56  ;;  %v7009_v61 = vmul.f32 %v17188_v25, %v17172_v59  ;;  %v14424_v59 = vld [vmem:[%s20776_s2 + $0x110] sm:$0xff]  ;;  %v14435_v56 = vld [vmem:[%s20777_s3 + $0xf8] sm:$0xff] }
0x160c   : > { %v17190_v2 = vpop.eup %17189  ;;  %16296 = vmatmul.mubr.msk.f32.vlgmr.msra.gmra.mxu1 %vm1036_vm1, %v7005_v46  ;;  %v14434_v25 = vld [vmem:[%s20777_s3 + $0xf0] sm:$0xff] }
0x160d   : > { %16306 = vmatpush3.msra.mxu1 %v19057_v54  ;;  %v7007_v20 = vmul.f32 %v17190_v2, %v17174_v7  ;;  %v14320_v54 = vld [vmem:[%s20778_s4 + $0x30] sm:$0xff] }
0x160e   : > { %16307 = vmatprep.subr.mxu1 %v19063_v32  ;;  %v17192_v14 = vpop.eup %17191  ;;  %v14410_v7 = vld [vmem:[%s20804_s1 + $0x110] sm:$0xff] }
0x160f   : > { %16308 = vmatpush3.msra.mxu1 %v19063_v32  ;;  %16302 = vmatprep.mubr.msk.f32.mxu0 %vm1036_vm1, %v7007_v20  ;;  %v7013_v34 = vmul.f32 %v17192_v14, %v17176_v15  ;;  %v14425_v32 = vld [vmem:[%s20776_s2 + $0x118] sm:$0xff]  ;;  %v14408_v15 = vld [vmem:[%s20804_s1 + $0x100] sm:$0xff] }
0x1610   : > { %v17194_v24 = vpop.eup %17193  ;;  %16303 = vmatmul.mubr.msk.f32.vlgmr.msra.gmra.mxu0 %vm1036_vm1, %v7009_v61  ;;  %16328 = vmatprep.subr.mxu1 %v14321_v30 }
0x1611   : > { %v7011_v48 = vmul.f32 %v17194_v24, %v17178_v27  ;;  %v14407_v27 = vld [vmem:[%s20804_s1 + $0xf8] sm:$0xff] }
0x1613   : > { %16309 = vmatprep.mubr.msk.f32.mxu1 %vm1036_vm1, %v7011_v48 }
0x1614   : > { %16310 = vmatmul.mubr.msk.f32.vlgmr.msra.gmra.mxu1 %vm1036_vm1, %v7013_v34 }
0x1615   : > { %16329 = vmatpush3.msra.mxu1 %v14321_v30  ;;  %16332 = vmatprep.mubr.msk.f32.mxu1 %vm1036_vm1, %v19014_v10  ;;  %v14423_v10 = vld [vmem:[%s20776_s2 + $0x108] sm:$0xff] }
0x1616   : > { %16330 = vmatprep.subr.mxu1 %v14320_v54 }
0x1617   : > { %16331 = vmatpush3.msra.mxu1 %v14320_v54 }
0x1618   : > { %16333 = vmatmul.mubr.msk.f32.vlgmr.msra.gmra.mxu1 %vm1036_vm1, %v19012_v53  ;;  %16368 = vmatprep.subr.mxu1 %v14425_v32  ;;  %v14421_v53 = vld [vmem:[%s20776_s2 + $0xf8] sm:$0xff] }
0x1619   : > { %16335 = vmatprep.mubr.msk.f32.mxu1 %vm1036_vm1, %v19018_v41  ;;  %16369 = vmatpush3.msra.mxu1 %v14425_v32  ;;  %v14420_v41 = vld [vmem:[%s20776_s2 + $0xf0] sm:$0xff] }
0x161a   : > { %16370 = vmatprep.subr.mxu1 %v14424_v59 }
0x161b   : > { %16371 = vmatpush3.msra.mxu1 %v14424_v59 }
0x161c   : > { %16336 = vmatmul.mubr.msk.f32.gmra.mxu1 %vm1036_vm1, %v19016_v42  ;;  %16372 = vmatprep.subr.mxu1 %v14423_v10  ;;  %v14389_v42 = vld [vmem:[%s20778_s4 + $0x48] sm:$0xff] }
0x161d   : > { %16338 = vmatprep.mubr.msk.f32.mxu1 %vm1036_vm1, %v19026_v52  ;;  %16373 = vmatpush3.msra.mxu1 %v14423_v10 }
0x161e   : > { %16374 = vmatprep.subr.mxu1 %v14422_v57  ;;  %16312 = vmatprep.subr.mxu0 %v14389_v42 }
0x161f   : > { %16375 = vmatpush3.msra.mxu1 %v14422_v57  ;;  %16313 = vmatpush3.msra.mxu0 %v14389_v42 }
0x1620   : > { %16339 = vmatmul.mubr.msk.f32.gmra.mxu1 %vm1036_vm1, %v19022_v23  ;;  %16376 = vmatprep.subr.mxu1 %v14421_v53  ;;  %v14411_v23 = vld [vmem:[%s20804_s1 + $0x118] sm:$0xff] }
0x1621   : > { %16341 = vmatprep.mubr.msk.f32.mxu1 %vm1036_vm1, %v19024_v18  ;;  %16377 = vmatpush3.msra.mxu1 %v14421_v53 }
0x1622   : > { %16378 = vmatprep.subr.mxu1 %v14420_v41 }
0x1623   : > { %16379 = vmatpush3.msra.mxu1 %v14420_v41 }
0x1624   : > { %16342 = vmatmul.mubr.msk.f32.gmra.mxu1 %vm1036_vm1, %v19020_v29  ;;  %v14388_v29 = vld [vmem:[%s20778_s4 + $0x40] sm:$0xff] }
0x1625   : > { %16380 = vmatprep.mubr.msk.f32.mxu1 %vm545_vm0, %v18720_v62  ;;  %16314 = vmatprep.subr.mxu0 %v14388_v29 }
0x1626   : > { %16315 = vmatpush3.msra.mxu0 %v14388_v29 }
0x1627   : > { %16344 = vmatprep.subr.mxu0 %v14411_v23 }
0x1628   : > { %16381 = vmatmul.mubr.msk.f32.vlgmr.msra.gmra.mxu1 %vm545_vm0, %v18727_v11 }
0x1629   : > { %16383 = vmatprep.mubr.msk.f32.mxu1 %vm545_vm0, %v18740_v35 }
0x162c   : > { %16384 = vmatmul.mubr.msk.f32.gmra.mxu1 %vm545_vm0, %v18753_v17 }
0x162d   : > { %16386 = vmatprep.mubr.msk.f32.mxu1 %vm545_vm0, %v18766_v55 }
0x1630   : > { %16387 = vmatmul.mubr.msk.f32.gmra.mxu1 %vm545_vm0, %v18773_v63 }
0x1631   : > { %16389 = vmatprep.mubr.msk.f32.mxu1 %vm545_vm0, %v18780_v58 }
0x1634   : > { %16390 = vmatmul.mubr.msk.f32.gmra.mxu1 %vm545_vm0, %v18787_v12 }
0x16c4   : > { %v16290_v18 = vpop.f32.mrf.mxu0 }
0x16c6   : > { %v7086_v52 = vpop.f32.mrf.mxu0 }
0x16c7   : > { %16316 = vmatprep.mubr.msk.f32.mxu0 %vm1036_vm1, %v7086_v52 }
0x16c8   : > { %16317 = vmatmul.mubr.msk.f32.vlgmr.msra.gmra.mxu0 %vm1036_vm1, %v16290_v18 }
0x16c9   : > { %16345 = vmatpush3.msra.mxu0 %v14411_v23 }
0x16ca   : > { %16346 = vmatprep.subr.mxu0 %v14410_v7 }
0x16cb   : > { %16347 = vmatpush3.msra.mxu0 %v14410_v7 }
0x16cc   : > { %v16297_v33 = vpop.f32.mrf.mxu1  ;;  %16348 = vmatprep.subr.mxu0 %v14409_v50 }
0x16cd   : > { %16349 = vmatpush3.msra.mxu0 %v14409_v50 }
0x16ce   : > { %v7167_v5 = vpop.f32.mrf.mxu1  ;;  %16350 = vmatprep.subr.mxu0 %v14408_v15 }
0x16cf   : > { %16319 = vmatprep.mubr.msk.f32.mxu0 %vm1036_vm1, %v7167_v5  ;;  %16351 = vmatpush3.msra.mxu0 %v14408_v15 }
0x16d0   : > { %v16304_v21 = vpop.f32.mrf.mxu0  ;;  %16320 = vmatmul.mubr.msk.f32.gmra.mxu0 %vm1036_vm1, %v16297_v33  ;;  %16352 = vmatprep.subr.mxu0 %v14407_v27 }
0x16d1   : > { %16353 = vmatpush3.msra.mxu0 %v14407_v27 }
0x16d2   : > { %v7248_v36 = vpop.f32.mrf.mxu0  ;;  %16354 = vmatprep.subr.mxu0 %v14406_v47 }
0x16d3   : > { %16322 = vmatprep.mubr.msk.f32.mxu0 %vm1036_vm1, %v7248_v36  ;;  %16355 = vmatpush3.msra.mxu0 %v14406_v47 }
0x16d4   : > { %v16311_v60 = vpop.f32.mrf.mxu1  ;;  %16323 = vmatmul.mubr.msk.f32.gmra.mxu0 %vm1036_vm1, %v16304_v21  ;;  %16392 = vmatprep.subr.mxu0 %v14439_v6 }
0x16d6   : > { %v7329_v26 = vpop.f32.mrf.mxu1 }
0x16d7   : > { %16325 = vmatprep.mubr.msk.f32.mxu0 %vm1036_vm1, %v7329_v26 }
0x16d8   : > { %16326 = vmatmul.mubr.msk.f32.gmra.mxu0 %vm1036_vm1, %v16311_v60  ;;  %v19191_v39 = vpop.f32.mrf.mxu1 }
0x16d9   : > { %16356 = vmatprep.mubr.msk.f32.mxu0 %vm545_vm0, %v18720_v62 }
0x16da   : > { %v19195_v13 = vpop.f32.mrf.mxu1 }
0x16dc   : > { %v19200_v3 = vpop.f32.mrf.mxu1  ;;  %16357 = vmatmul.mubr.msk.f32.vlgmr.msra.gmra.mxu0 %vm545_vm0, %v18727_v11 }
0x16dd   : > { %16359 = vmatprep.mubr.msk.f32.mxu0 %vm545_vm0, %v18740_v35  ;;  %16393 = vmatpush3.msra.mxu0 %v14439_v6 }
0x16de   : > { %v19209_v45 = vpop.f32.mrf.mxu1  ;;  %16394 = vmatprep.subr.mxu0 %v14438_v1 }
0x16df   : > { %16395 = vmatpush3.msra.mxu0 %v14438_v1 }
0x16e0   : > { %v19214_v8 = vpop.f32.mrf.mxu1  ;;  %16360 = vmatmul.mubr.msk.f32.gmra.mxu0 %vm545_vm0, %v18753_v17  ;;  %16396 = vmatprep.subr.mxu0 %v14437_v4 }
0x16e1   : > { %16362 = vmatprep.mubr.msk.f32.mxu0 %vm545_vm0, %v18766_v55  ;;  %16397 = vmatpush3.msra.mxu0 %v14437_v4 }
0x16e2   : > { %v19223_v46 = vpop.f32.mrf.mxu1  ;;  %16398 = vmatprep.subr.mxu0 %v14436_v0 }
0x16e3   : > { %16399 = vmatpush3.msra.mxu0 %v14436_v0 }
0x16e4   : > { %v19228_v2 = vpop.f32.mrf.mxu1  ;;  %16363 = vmatmul.mubr.msk.f32.gmra.mxu0 %vm545_vm0, %v18773_v63  ;;  %16400 = vmatprep.subr.mxu0 %v14435_v56 }
0x16e5   : > { %16365 = vmatprep.mubr.msk.f32.mxu0 %vm545_vm0, %v18780_v58  ;;  %16401 = vmatpush3.msra.mxu0 %v14435_v56 }
0x16e6   : > { %v19234_v20 = vpop.f32.mrf.mxu1  ;;  %16402 = vmatprep.subr.mxu0 %v14434_v25 }
0x16e7   : > { %16403 = vmatpush3.msra.mxu0 %v14434_v25 }
0x16e8   : > { %16366 = vmatmul.mubr.msk.f32.gmra.mxu0 %vm545_vm0, %v18787_v12  ;;  %v16382_v30 = vpop.f32.mrf.mxu1 }
0x16e9   : > { %16404 = vmatprep.mubr.msk.f32.mxu0 %vm545_vm0, %v18720_v62  ;;  %16416 = vmatprep.subr.msk.mxu1 %vm1036_vm1, %v16382_v30 }
0x16ea   : > { %v7784_v61 = vpop.f32.mrf.mxu1  ;;  %16417 = vmatpush3.xpose.msk.msra.mxu1 %vm1036_vm1, %v16382_v30 }
0x16eb   : > { %16418 = vmatprep.subr.msk.mxu1 %vm1036_vm1, %v7784_v61 }
0x16ec   : > { %v16385_v14 = vpop.f32.mrf.mxu1  ;;  %16405 = vmatmul.mubr.msk.f32.vlgmr.msra.gmra.mxu0 %vm545_vm0, %v18727_v11 }
0x16ed   : > { %16407 = vmatprep.mubr.msk.f32.mxu0 %vm545_vm0, %v18740_v35 }
0x16ee   : > { %v7794_v24 = vpop.f32.mrf.mxu1  ;;  %16419 = vmatpush3.xpose.msk.msra.mxu1 %vm1036_vm1, %v7784_v61 }
0x16ef   : > { %16423 = vmatprep.subr.msk.mxu1 %vm1036_vm1, %v16385_v14 }
0x16f0   : > { %v16388_v62 = vpop.f32.mrf.mxu1  ;;  %16408 = vmatmul.mubr.msk.f32.gmra.mxu0 %vm545_vm0, %v18753_v17 }
0x16f1   : > { %16410 = vmatprep.mubr.msk.f32.mxu0 %vm545_vm0, %v18766_v55  ;;  %16430 = vmatprep.subr.msk.mxu0 %vm1036_vm1, %v16388_v62 }
0x16f2   : > { %v7804_v48 = vpop.f32.mrf.mxu1  ;;  %16431 = vmatpush3.xpose.msk.msra.mxu0 %vm1036_vm1, %v16388_v62 }
0x16f3   : > { %16432 = vmatprep.subr.msk.mxu0 %vm1036_vm1, %v7804_v48 }
0x16f4   : > { %16411 = vmatmul.mubr.msk.f32.gmra.mxu0 %vm545_vm0, %v18773_v63  ;;  %v16391_v53 = vpop.f32.mrf.mxu1 }
0x16f5   : > { %16413 = vmatprep.mubr.msk.f32.mxu0 %vm545_vm0, %v18780_v58 }
0x16f6   : > { %16433 = vmatpush3.xpose.msk.msra.mxu0 %vm1036_vm1, %v7804_v48  ;;  %v7814_v29 = vpop.f32.mrf.mxu1 }
0x16f8   : > { %16414 = vmatmul.mubr.msk.f32.gmra.mxu0 %vm545_vm0, %v18787_v12 }
0x1788   : > { %v19263_v11 = vpop.f32.mrf.mxu0 }
0x178a   : > { %v19265_v35 = vpop.f32.mrf.mxu0 }
0x1790   : > { %v19267_v17 = vpop.f32.mrf.mxu0 }
0x1792   : > { %v19269_v55 = vpop.f32.mrf.mxu0 }
0x1794   : > { %v19271_v34 = vpop.f32.mrf.mxu0 }
0x1796   : > { %v19273_v54 = vpop.f32.mrf.mxu0 }
0x1798   : > { %v19275_v63 = vpop.f32.mrf.mxu0 }
0x179a   : > { %v19277_v58 = vpop.f32.mrf.mxu0 }
0x179c   : > { %v16358_v32 = vpop.f32.mrf.mxu0 }
0x179e   : > { %v7672_v59 = vpop.f32.mrf.mxu0 }
0x179f   : > { %16420 = vmatprep.mubr.msk.f32.mxu1 %vm1036_vm1, %v7672_v59 }
0x17a0   : > { %v16361_v12 = vpop.f32.mrf.mxu0  ;;  %16421 = vmatmul.mubr.msk.f32.vlgmr.msra.gmra.mxu1 %vm1036_vm1, %v16358_v32 }
0x17a1   : > { %16424 = vmatpush3.xpose.msk.msra.mxu1 %vm1036_vm1, %v16385_v14 }
0x17a2   : > { %16425 = vmatprep.subr.msk.mxu1 %vm1036_vm1, %v7794_v24  ;;  %v7682_v10 = vpop.f32.mrf.mxu0 }
0x17a3   : > { %16427 = vmatprep.mubr.msk.f32.mxu1 %vm1036_vm1, %v7682_v10 }
0x17a4   : > { %v16364_v57 = vpop.f32.mrf.mxu0 }
0x17a5   : > { %16426 = vmatpush3.xpose.msk.msra.mxu1 %vm1036_vm1, %v7794_v24 }
0x17a6   : > { %16437 = vmatprep.subr.msk.mxu1 %vm1036_vm1, %v16391_v53  ;;  %v7692_v41 = vpop.f32.mrf.mxu0 }
0x17a7   : > { %16434 = vmatprep.mubr.msk.f32.mxu0 %vm1036_vm1, %v7692_v41 }
0x17a8   : > { %16428 = vmatmul.mubr.msk.f32.vlgmr.msra.gmra.mxu1 %vm1036_vm1, %v16361_v12  ;;  %v16367_v42 = vpop.f32.mrf.mxu0  ;;  %16435 = vmatmul.mubr.msk.f32.vlgmr.msra.gmra.mxu0 %vm1036_vm1, %v16364_v57 }
0x17a9   : > { %16438 = vmatpush3.xpose.msk.msra.mxu1 %vm1036_vm1, %v16391_v53 }
0x17aa   : > { %16439 = vmatprep.subr.msk.mxu1 %vm1036_vm1, %v7814_v29  ;;  %v7702_v23 = vpop.f32.mrf.mxu0 }
0x17ab   : > { %16441 = vmatprep.mubr.msk.f32.mxu1 %vm1036_vm1, %v7702_v23 }
0x17ac   : > { %v16406_v18 = vpop.f32.mrf.mxu0 }
0x17ad   : > { %16440 = vmatpush3.xpose.msk.msra.mxu1 %vm1036_vm1, %v7814_v29  ;;  %16444 = vmatprep.subr.mxu0 %v16406_v18 }
0x17ae   : > { %v7896_v52 = vpop.f32.mrf.mxu0  ;;  %16445 = vmatpush3.msra.mxu0 %v16406_v18 }
0x17af   : > { %16446 = vmatprep.subr.mxu0 %v7896_v52 }
0x17b0   : > { %16442 = vmatmul.mubr.msk.f32.vlgmr.msra.gmra.mxu1 %vm1036_vm1, %v16367_v42  ;;  %v16409_v7 = vpop.f32.mrf.mxu0  ;;  %16447 = vmatpush3.msra.mxu0 %v7896_v52 }
0x17b1   : > { %16451 = vmatprep.subr.mxu1 %v16409_v7 }
0x17b2   : > { %v7906_v50 = vpop.f32.mrf.mxu0  ;;  %16452 = vmatpush3.msra.mxu1 %v16409_v7 }
0x17b3   : > { %16453 = vmatprep.subr.mxu1 %v7906_v50 }
0x17b4   : > { %v19294_v15 = vpop.f32.mrf.mxu0  ;;  %16454 = vmatpush3.msra.mxu1 %v7906_v50 }
0x17b5   : > { %16458 = vmatprep.subr.mxu0 %v19294_v15 }
0x17b6   : > { %v19297_v33 = vpop.f32.mrf.mxu0 }
0x17b8   : > { %v19299_v27 = vpop.f32.mrf.mxu0 }
0x17b9   : > { %16465 = vmatprep.subr.mxu1 %v19299_v27 }
0x17ba   : > { %v19305_v1 = vpop.f32.mrf.mxu0 }
0x1860   : > { %v16422_v5 = vpop.f32.mrf.mxu1 }
0x1861   : > { %v8284_v47 = vmul.f32 0.14433756, %v16422_v5 }
0x1862   : > { %v8013_v21 = vpop.f32.mrf.mxu1 }
0x1863   : > { %v8292_v6 = vadd.f32 %v8284_v47, %v17814_v40  ;;  %v8283_v36 = vmul.f32 0.14433756, %v8013_v21 }
0x1865   : > { %v8302_v60 = vsel %vm1036_vm1, %v8292_v6, -inf  ;;  %v8291_v26 = vadd.f32 %v8283_v36, %v17816_v44 }
0x1866   : > { %8303 = vmax.xlane.f32.xlu1 %v8302_v60 }
0x1867   : > { %v8299_v4 = vsel %vm1036_vm1, %v8291_v26, -inf }
0x1868   : > { %v16429_v0 = vpop.f32.mrf.mxu1  ;;  %8300 = vmax.xlane.f32.xlu0 %v8299_v4  ;;  %v16436_v56 = vpop.f32.mrf.mxu0 }
0x1869   : > { %v8286_v25 = vmul.f32 0.14433756, %v16429_v0  ;;  %v8288_v30 = vmul.f32 0.14433756, %v16436_v56 }
0x186a   : > { %v8100_v61 = vpop.f32.mrf.mxu1  ;;  %v8187_v14 = vpop.f32.mrf.mxu0 }
0x186b   : > { %v8294_v24 = vadd.f32 %v8286_v25, %v17814_v40  ;;  %v8285_v62 = vmul.f32 0.14433756, %v8100_v61  ;;  %v8287_v48 = vmul.f32 0.14433756, %v8187_v14  ;;  %v8296_v32 = vadd.f32 %v8288_v30, %v17814_v40 }
0x186d   : > { %v8308_v59 = vsel %vm1036_vm1, %v8294_v24, -inf  ;;  %v8293_v12 = vadd.f32 %v8285_v62, %v17816_v44  ;;  %v8295_v57 = vadd.f32 %v8287_v48, %v17816_v44  ;;  %v8314_v42 = vsel %vm1036_vm1, %v8296_v32, -inf }
0x186e   : > { %8309 = vmax.xlane.f32.xlu1 %v8308_v59 }
0x186f   : > { %v8305_v10 = vsel %vm1036_vm1, %v8293_v12, -inf  ;;  %v8311_v52 = vsel %vm1036_vm1, %v8295_v57, -inf }
0x1870   : > { %8306 = vmax.xlane.f32.xlu0 %v8305_v10  ;;  %v16443_v53 = vpop.f32.mrf.mxu1 }
0x1871   : > { %v8290_v41 = vmul.f32 0.14433756, %v16443_v53 }
0x1872   : > { %v8274_v29 = vpop.f32.mrf.mxu1  ;;  %8315 = vmax.xlane.f32.xlu1 %v8314_v42 }
0x1873   : > { %v8298_v23 = vadd.f32 %v8290_v41, %v17814_v40  ;;  %v8289_v18 = vmul.f32 0.14433756, %v8274_v29 }
0x1874   : > { %8312 = vmax.xlane.f32.xlu0 %v8311_v52 }
0x1875   : > { %v8320_v7 = vsel %vm1036_vm1, %v8298_v23, -inf  ;;  %v8297_v50 = vadd.f32 %v8289_v18, %v17816_v44 }
0x1876   : > { %8321 = vmax.xlane.f32.xlu1 %v8320_v7 }
0x1877   : > { %v8317_v5 = vsel %vm1036_vm1, %v8297_v50, -inf }
0x1878   : > { %8318 = vmax.xlane.f32.xlu0 %v8317_v5 }
0x18ef   : > { %v8304_v47 = vpop.xlane.xlu1 %8303 }
0x18f0   : > { %v8324_v21 = vsub.f32 %v8292_v6, %v8304_v47 }
0x18f1   : > { %v8301_v36 = vpop.xlane.xlu0 %8300 }
0x18f2   : > { %v8333_v60 = vmul.f32 1.442695, %v8324_v21  ;;  %v8323_v4 = vsub.f32 %v8291_v26, %v8301_v36 }
0x18f4   : > { %17195 = vpow2.f32 %v8333_v60  ;;  %v8331_v0 = vmul.f32 1.442695, %v8323_v4 }
0x18f6   : > { %17197 = vpow2.f32 %v8331_v0 }
0x18f7   : > { %v8310_v56 = vpop.xlane.xlu1 %8309 }
0x18f8   : > { %v8326_v25 = vsub.f32 %v8294_v24, %v8310_v56 }
0x18f9   : > { %v8307_v30 = vpop.xlane.xlu0 %8306 }
0x18fa   : > { %v8337_v61 = vmul.f32 1.442695, %v8326_v25  ;;  %v8325_v14 = vsub.f32 %v8293_v12, %v8307_v30 }
0x18fb   : > { %v8316_v62 = vpop.xlane.xlu1 %8315 }
0x18fc   : > { %17199 = vpow2.f32 %v8337_v61  ;;  %v8335_v48 = vmul.f32 1.442695, %v8325_v14  ;;  %v8328_v59 = vsub.f32 %v8296_v32, %v8316_v62 }
0x18fd   : > { %v8313_v10 = vpop.xlane.xlu0 %8312 }
0x18fe   : > { %17201 = vpow2.f32 %v8335_v48  ;;  %v8341_v53 = vmul.f32 1.442695, %v8328_v59  ;;  %v8327_v41 = vsub.f32 %v8295_v57, %v8313_v10 }
0x18ff   : > { %v8322_v6 = vpop.xlane.xlu1 %8321 }
0x1900   : > { %17203 = vpow2.f32 %v8341_v53  ;;  %v8339_v42 = vmul.f32 1.442695, %v8327_v41  ;;  %v8330_v26 = vsub.f32 %v8298_v23, %v8322_v6 }
0x1901   : > { %v17196_v29 = vpop.eup %17195  ;;  %v8319_v18 = vpop.xlane.xlu0 %8318 }
0x1902   : > { %17205 = vpow2.f32 %v8339_v42  ;;  %v8345_v52 = vmul.f32 1.442695, %v8330_v26  ;;  %v8329_v24 = vsub.f32 %v8297_v50, %v8319_v18  ;;  %v8350_v7 = vsel %vm1036_vm1, %v17196_v29, 0.0 }
0x1903   : > { %v17198_v12 = vpop.eup %17197  ;;  %8351 = vadd.xlane.f32.xlu1 %v8350_v7 }
0x1904   : > { %17207 = vpow2.f32 %v8345_v52  ;;  %v8343_v5 = vmul.f32 1.442695, %v8329_v24  ;;  %v8347_v32 = vsel %vm1036_vm1, %v17198_v12, 0.0 }
0x1905   : > { %8348 = vadd.xlane.f32.xlu0 %v8347_v32 }
0x1906   : > { %17209 = vpow2.f32 %v8343_v5 }
0x1909   : > { %v17200_v57 = vpop.eup %17199 }
0x190a   : > { %v8356_v47 = vsel %vm1036_vm1, %v17200_v57, 0.0 }
0x190b   : > { %v17202_v21 = vpop.eup %17201  ;;  %8357 = vadd.xlane.f32.xlu1 %v8356_v47 }
0x190c   : > { %v8353_v23 = vsel %vm1036_vm1, %v17202_v21, 0.0 }
0x190d   : > { %v17204_v36 = vpop.eup %17203  ;;  %8354 = vadd.xlane.f32.xlu0 %v8353_v23 }
0x190e   : > { %v8362_v50 = vsel %vm1036_vm1, %v17204_v36, 0.0 }
0x190f   : > { %v17206_v60 = vpop.eup %17205  ;;  %8363 = vadd.xlane.f32.xlu1 %v8362_v50 }
0x1910   : > { %v8359_v4 = vsel %vm1036_vm1, %v17206_v60, 0.0 }
0x1911   : > { %v17208_v0 = vpop.eup %17207  ;;  %8360 = vadd.xlane.f32.xlu0 %v8359_v4 }
0x1912   : > { %v8368_v56 = vsel %vm1036_vm1, %v17208_v0, 0.0 }
0x1913   : > { %v17210_v25 = vpop.eup %17209  ;;  %8369 = vadd.xlane.f32.xlu1 %v8368_v56 }
0x1914   : > { %v8365_v30 = vsel %vm1036_vm1, %v17210_v25, 0.0 }
0x1915   : > { %8366 = vadd.xlane.f32.xlu0 %v8365_v30  ;;  %v7566_v30 = vadd.f32 %v19191_v39, %v19263_v11  ;;  %v7576_v39 = vadd.f32 %v19200_v3, %v19267_v17 }
0x198c   : > { %v8352_v61 = vpop.xlane.xlu1 %8351 }
0x198d   : > { %17211 = vrcp.f32 %v8352_v61 }
0x198e   : > { %v8349_v14 = vpop.xlane.xlu0 %8348 }
0x198f   : > { %17213 = vrcp.f32 %v8349_v14  ;;  %v7561_v14 = vadd.f32 %v19195_v13, %v19265_v35 }
0x1994   : > { %v8358_v62 = vpop.xlane.xlu1 %8357 }
0x1995   : > { %17215 = vrcp.f32 %v8358_v62 }
0x1996   : > { %v8355_v48 = vpop.xlane.xlu0 %8354 }
0x1997   : > { %17217 = vrcp.f32 %v8355_v48  ;;  %v14483_v48 = vld [vmem:[%s20779_s5 + $0x1] ss:$0 sm:$0xff] }
0x1998   : > { %v8364_v59 = vpop.xlane.xlu1 %8363 }
0x1999   : > { %17219 = vrcp.f32 %v8364_v59 }
0x199a   : > { %v8361_v10 = vpop.xlane.xlu0 %8360  ;;  %v17212_v53 = vpop.eup %17211 }
0x199b   : > { %17221 = vrcp.f32 %v8361_v10  ;;  %v8374_v26 = vmul.f32 %v17212_v53, %v17196_v29 }
0x199c   : > { %v17214_v41 = vpop.eup %17213  ;;  %v8370_v6 = vpop.xlane.xlu1 %8369 }
0x199d   : > { %v8372_v42 = vmul.f32 %v17214_v41, %v17198_v12  ;;  %17223 = vrcp.f32 %v8370_v6 }
0x199e   : > { %v8367_v18 = vpop.xlane.xlu0 %8366 }
0x199f   : > { %17225 = vrcp.f32 %v8367_v18  ;;  %16448 = vmatprep.mubr.msk.f32.mxu0 %vm1036_vm1, %v8372_v42  ;;  %v7571_v42 = vadd.f32 %v19209_v45, %v19269_v55 }
0x19a0   : > { %16449 = vmatmul.mubr.msk.f32.vlgmr.msra.gmra.mxu0 %vm1036_vm1, %v8374_v26 }
0x19a1   : > { %16459 = vmatpush3.msra.mxu0 %v19294_v15 }
0x19a2   : > { %16460 = vmatprep.subr.mxu0 %v19297_v33  ;;  %v17216_v52 = vpop.eup %17215 }
0x19a3   : > { %16461 = vmatpush3.msra.mxu0 %v19297_v33  ;;  %v8378_v5 = vmul.f32 %v17216_v52, %v17200_v57 }
0x19a4   : > { %v17218_v24 = vpop.eup %17217 }
0x19a5   : > { %v8376_v7 = vmul.f32 %v17218_v24, %v17202_v21  ;;  %v7581_v24 = vadd.f32 %v19223_v46, %v19273_v54  ;;  %v7591_v46 = vadd.f32 %v19234_v20, %v19277_v58 }
0x19a6   : > { %v17220_v32 = vpop.eup %17219 }
0x19a7   : > { %16455 = vmatprep.mubr.msk.f32.mxu1 %vm1036_vm1, %v8376_v7  ;;  %v8382_v47 = vmul.f32 %v17220_v32, %v17204_v36 }
0x19a8   : > { %v17222_v29 = vpop.eup %17221  ;;  %16456 = vmatmul.mubr.msk.f32.vlgmr.msra.gmra.mxu1 %vm1036_vm1, %v8378_v5  ;;  %v7596_v5 = vadd.f32 %v19228_v2, %v19275_v63 }
0x19a9   : > { %16466 = vmatpush3.msra.mxu1 %v19299_v27  ;;  %v8380_v12 = vmul.f32 %v17222_v29, %v17206_v60  ;;  %v14473_v27 = vld [vmem:[%s20778_s4 + $0x58] sm:$0xff] }
0x19aa   : > { %16467 = vmatprep.subr.mxu1 %v19305_v1  ;;  %v17224_v15 = vpop.eup %17223  ;;  %16472 = vmatprep.subr.mxu0 %v14473_v27 }
0x19ab   : > { %16468 = vmatpush3.msra.mxu1 %v19305_v1  ;;  %16462 = vmatprep.mubr.msk.f32.mxu0 %vm1036_vm1, %v8380_v12  ;;  %v8386_v21 = vmul.f32 %v17224_v15, %v17208_v0  ;;  %v14472_v1 = vld [vmem:[%s20778_s4 + $0x50] sm:$0xff] }
0x19ac   : > { %v17226_v33 = vpop.eup %17225  ;;  %16463 = vmatmul.mubr.msk.f32.vlgmr.msra.gmra.mxu0 %vm1036_vm1, %v8382_v47 }
0x19ad   : > { %v8384_v57 = vmul.f32 %v17226_v33, %v17210_v25  ;;  %16473 = vmatpush3.msra.mxu0 %v14473_v27 }
0x19ae   : > { %16474 = vmatprep.subr.mxu0 %v14472_v1 }
0x19af   : > { %16469 = vmatprep.mubr.msk.f32.mxu1 %vm1036_vm1, %v8384_v57  ;;  %16475 = vmatpush3.msra.mxu0 %v14472_v1 }
0x19b0   : > { %16470 = vmatmul.mubr.msk.f32.vlgmr.msra.gmra.mxu1 %vm1036_vm1, %v8386_v21  ;;  %9239 = vmatprep.subr.mxu0 %v17442_v49 }
0x19b1   : > { %9125 = vmatprep.mubr.f32.mxu1 %v17442_v49 }
0x1a60   : > { %v16450_v23 = vpop.f32.mrf.mxu0 }
0x1a62   : > { %v8459_v36 = vpop.f32.mrf.mxu0 }
0x1a63   : > { %16476 = vmatprep.mubr.msk.f32.mxu0 %vm1036_vm1, %v8459_v36 }
0x1a64   : > { %16477 = vmatmul.mubr.msk.f32.vlgmr.msra.gmra.mxu0 %vm1036_vm1, %v16450_v23 }
0x1a68   : > { %v16457_v50 = vpop.f32.mrf.mxu1 }
0x1a6a   : > { %v8540_v60 = vpop.f32.mrf.mxu1 }
0x1a6b   : > { %16479 = vmatprep.mubr.msk.f32.mxu0 %vm1036_vm1, %v8540_v60 }
0x1a6c   : > { %v16464_v4 = vpop.f32.mrf.mxu0  ;;  %16480 = vmatmul.mubr.msk.f32.gmra.mxu0 %vm1036_vm1, %v16457_v50 }
0x1a6e   : > { %v8621_v0 = vpop.f32.mrf.mxu0 }
0x1a6f   : > { %16482 = vmatprep.mubr.msk.f32.mxu0 %vm1036_vm1, %v8621_v0 }
0x1a70   : > { %v16471_v56 = vpop.f32.mrf.mxu1  ;;  %16483 = vmatmul.mubr.msk.f32.gmra.mxu0 %vm1036_vm1, %v16464_v4 }
0x1a72   : > { %v8702_v25 = vpop.f32.mrf.mxu1 }
0x1a73   : > { %16485 = vmatprep.mubr.msk.f32.mxu0 %vm1036_vm1, %v8702_v25 }
0x1a74   : > { %16486 = vmatmul.mubr.msk.f32.gmra.mxu0 %vm1036_vm1, %v16471_v56 }
0x1b24   : > { %v16478_v61 = vpop.f32.mrf.mxu0 }
0x1b25   : > { %v8844_v62 = vadd.f32 %v16478_v61, %v7566_v30 }
0x1b26   : > { %v8804_v59 = vpop.f32.mrf.mxu0 }
0x1b27   : > { %v8852_v10 = vadd.f32 %v8844_v62, %v18604_v28  ;;  %v8843_v53 = vadd.f32 %v8804_v59, %v7561_v14 }
0x1b29   : > { %v19366_v41 = vadd.f32 %v14483_v48, %v8852_v10  ;;  %v8851_v6 = vadd.f32 %v8843_v53, %v18599_v51  ;;  %v7586_v51 = vadd.f32 %v19214_v8, %v19271_v34 }
0x1b2b   : > { %v19371_v11 = vadd.f32 %v14483_v48, %v8851_v6  ;;  %v8882_v13 = vsel %vm545_vm0, %v19366_v41, 0.0 }
0x1b2c   : > { %v16481_v35 = vpop.f32.mrf.mxu0  ;;  %8883 = vadd.xlane.f32.xlu1 %v8882_v13 }
0x1b2d   : > { %v8846_v26 = vadd.f32 %v16481_v35, %v7576_v39  ;;  %v8879_v28 = vsel %vm545_vm0, %v19371_v11, 0.0 }
0x1b2e   : > { %v8814_v18 = vpop.f32.mrf.mxu0  ;;  %8880 = vadd.xlane.f32.xlu0 %v8879_v28 }
0x1b2f   : > { %v8854_v3 = vadd.f32 %v8846_v26, %v18614_v22  ;;  %v8845_v17 = vadd.f32 %v8814_v18, %v7571_v42 }
0x1b30   : > { %v16484_v52 = vpop.f32.mrf.mxu0 }
0x1b31   : > { %v19384_v7 = vadd.f32 %v14483_v48, %v8854_v3  ;;  %v8853_v45 = vadd.f32 %v8845_v17, %v18609_v9  ;;  %v8848_v55 = vadd.f32 %v16484_v52, %v7586_v51 }
0x1b32   : > { %v8824_v32 = vpop.f32.mrf.mxu0 }
0x1b33   : > { %v19389_v29 = vadd.f32 %v14483_v48, %v8853_v45  ;;  %v8856_v8 = vadd.f32 %v8848_v55, %v18624_v19  ;;  %v8847_v34 = vadd.f32 %v8824_v32, %v7581_v24  ;;  %v8888_v22 = vsel %vm545_vm0, %v19384_v7, 0.0 }
0x1b34   : > { %8889 = vadd.xlane.f32.xlu1 %v8888_v22  ;;  %v16487_v54 = vpop.f32.mrf.mxu0 }
0x1b35   : > { %v19396_v12 = vadd.f32 %v14483_v48, %v8856_v8  ;;  %v8855_v9 = vadd.f32 %v8847_v34, %v18619_v31  ;;  %v8850_v47 = vadd.f32 %v16487_v54, %v7596_v5  ;;  %v8885_v2 = vsel %vm545_vm0, %v19389_v29, 0.0 }
0x1b36   : > { %8886 = vadd.xlane.f32.xlu0 %v8885_v2  ;;  %v8834_v63 = vpop.f32.mrf.mxu0  ;;  %v14497_v2 = vld [vmem:[%s20784_s10 + $0xa8] sm:$0xff] }
0x1b37   : > { %v19401_v19 = vadd.f32 %v14483_v48, %v8855_v9  ;;  %v8858_v15 = vadd.f32 %v8850_v47, %v18634_v38  ;;  %v8849_v33 = vadd.f32 %v8834_v63, %v7591_v46  ;;  %v8894_v20 = vsel %vm545_vm0, %v19396_v12, 0.0  ;;  %v14499_v9 = vld [vmem:[%s20784_s10 + $0xb8] sm:$0xff]  ;;  %v14498_v47 = vld [vmem:[%s20784_s10 + $0xb0] sm:$0xff]  ;;  %v14496_v63 = vld [vmem:[%s20784_s10 + $0xa0] sm:$0xff] }
0x1b38   : > { %8895 = vadd.xlane.f32.xlu1 %v8894_v20  ;;  %9081 = vmatprep.subr.mxu1 %v14499_v9  ;;  %v14493_v20 = vld [vmem:[%s20784_s10 + $0x88] sm:$0xff] }
0x1b39   : > { %v19406_v58 = vadd.f32 %v14483_v48, %v8858_v15  ;;  %v8857_v57 = vadd.f32 %v8849_v33, %v18629_v43  ;;  %v8891_v31 = vsel %vm545_vm0, %v19401_v19, 0.0  ;;  %9082 = vmatpush1.msra.mxu1 %v14498_v47  ;;  %v14495_v15 = vld [vmem:[%s20784_s10 + $0x98] sm:$0xff]  ;;  %v14494_v33 = vld [vmem:[%s20784_s10 + $0x90] sm:$0xff] }
0x1b3a   : > { %8892 = vadd.xlane.f32.xlu0 %v8891_v31  ;;  %9083 = vmatprep.subr.mxu1 %v14497_v2  ;;  %v14491_v31 = vld [vmem:[%s20784_s10 + $0x78] sm:$0xff] }
0x1b3b   : > { %v19411_v21 = vadd.f32 %v14483_v48, %v8857_v57  ;;  %v8900_v27 = vsel %vm545_vm0, %v19406_v58, 0.0  ;;  %9084 = vmatpush1.msra.mxu1 %v14496_v63  ;;  %v14492_v57 = vld [vmem:[%s20784_s10 + $0x80] sm:$0xff] }
0x1b3c   : > { %8901 = vadd.xlane.f32.xlu1 %v8900_v27  ;;  %9085 = vmatprep.subr.mxu1 %v14495_v15  ;;  %v14490_v27 = vld [vmem:[%s20784_s10 + $0x70] sm:$0xff] }
0x1b3d   : > { %v8897_v38 = vsel %vm545_vm0, %v19411_v21, 0.0  ;;  %9086 = vmatpush1.msra.mxu1 %v14494_v33 }
0x1b3e   : > { %8898 = vadd.xlane.f32.xlu0 %v8897_v38  ;;  %9087 = vmatprep.subr.mxu1 %v14493_v20  ;;  %v14489_v38 = vld [vmem:[%s20784_s10 + $0x68] sm:$0xff] }
0x1b3f   : > { %9088 = vmatpush1.msra.mxu1 %v14492_v57 }
0x1b40   : > { %9089 = vmatprep.subr.mxu1 %v14491_v31 }
0x1b41   : > { %9090 = vmatpush1.msra.mxu1 %v14490_v27 }
0x1b42   : > { %9091 = vmatprep.subr.mxu1 %v14489_v38 }
0x1bb5   : > { %v8884_v1 = vpop.xlane.xlu1 %8883 }
0x1bb6   : > { %v8904_v23 = vmul.f32 0.020833334, %v8884_v1  ;;  %v14488_v1 = vld [vmem:[%s20784_s10 + $0x60] sm:$0xff] }
0x1bb7   : > { %v8881_v36 = vpop.xlane.xlu0 %8880  ;;  %9092 = vmatpush1.msra.mxu1 %v14488_v1 }
0x1bb8   : > { %v19418_v50 = vsub.f32 %v19366_v41, %v8904_v23  ;;  %v8903_v43 = vmul.f32 0.020833334, %v8881_v36  ;;  %v14524_v23 = vld [vmem:[%s20786_s12 + $0x138] sm:$0xff]  ;;  %v14523_v36 = vld [vmem:[%s20786_s12 + $0x130] sm:$0xff] }
0x1bb9   : > { %9240 = vmatpush1.msra.mxu0 %v14524_v23 }
0x1bba   : > { %v19421_v60 = vsub.f32 %v19371_v11, %v8903_v43  ;;  %v8920_v4 = vmul.f32 %v19418_v50, %v19418_v50  ;;  %9241 = vmatprep.subr.mxu0 %v17442_v49  ;;  %v14522_v43 = vld [vmem:[%s20786_s12 + $0x128] sm:$0xff] }
0x1bbb   : > { %9242 = vmatpush1.msra.mxu0 %v14523_v36 }
0x1bbc   : > { %v8930_v0 = vsel %vm545_vm0, %v8920_v4, 0.0  ;;  %v8919_v56 = vmul.f32 %v19421_v60, %v19421_v60  ;;  %9243 = vmatprep.subr.mxu0 %v17442_v49  ;;  %v14521_v4 = vld [vmem:[%s20786_s12 + $0x120] sm:$0xff] }
0x1bbd   : > { %v8890_v25 = vpop.xlane.xlu1 %8889  ;;  %8931 = vadd.xlane.f32.xlu1 %v8930_v0  ;;  %9244 = vmatpush1.msra.mxu0 %v14522_v43  ;;  %v14520_v0 = vld [vmem:[%s20786_s12 + $0x118] sm:$0xff] }
0x1bbe   : > { %v8906_v30 = vmul.f32 0.020833334, %v8890_v25  ;;  %v8927_v61 = vsel %vm545_vm0, %v8919_v56, 0.0  ;;  %9245 = vmatprep.subr.mxu0 %v17442_v49  ;;  %v14519_v56 = vld [vmem:[%s20786_s12 + $0x110] sm:$0xff]  ;;  %v14518_v25 = vld [vmem:[%s20786_s12 + $0x108] sm:$0xff] }
0x1bbf   : > { %v8887_v14 = vpop.xlane.xlu0 %8886  ;;  %8928 = vadd.xlane.f32.xlu0 %v8927_v61  ;;  %9246 = vmatpush1.msra.mxu0 %v14521_v4  ;;  %v14516_v61 = vld [vmem:[%s20786_s12 + $0xf8] sm:$0xff] }
0x1bc0   : > { %v19430_v62 = vsub.f32 %v19384_v7, %v8906_v30  ;;  %v8905_v48 = vmul.f32 0.020833334, %v8887_v14  ;;  %9247 = vmatprep.subr.mxu0 %v17442_v49  ;;  %v14517_v30 = vld [vmem:[%s20786_s12 + $0x100] sm:$0xff]  ;;  %v14515_v14 = vld [vmem:[%s20786_s12 + $0xf0] sm:$0xff] }
0x1bc1   : > { %v8896_v59 = vpop.xlane.xlu1 %8895  ;;  %9248 = vmatpush1.msra.mxu0 %v14520_v0  ;;  %v14486_v0 = vld [vmem:[%s20782_s8 + $0x1] ss:$0 sm:$0xff] }
0x1bc2   : > { %v19433_v10 = vsub.f32 %v19389_v29, %v8905_v48  ;;  %v8908_v53 = vmul.f32 0.020833334, %v8896_v59  ;;  %v8922_v6 = vmul.f32 %v19430_v62, %v19430_v62  ;;  %9249 = vmatprep.subr.mxu0 %v17442_v49  ;;  %v14514_v48 = vld [vmem:[%s20786_s12 + $0xe8] sm:$0xff]  ;;  %v14513_v59 = vld [vmem:[%s20786_s12 + $0xe0] sm:$0xff] }
0x1bc3   : > { %v8893_v39 = vpop.xlane.xlu0 %8892  ;;  %9250 = vmatpush1.msra.mxu0 %v14519_v56 }
0x1bc4   : > { %v19438_v13 = vsub.f32 %v19396_v12, %v8908_v53  ;;  %v8907_v35 = vmul.f32 0.020833334, %v8893_v39  ;;  %v8936_v42 = vsel %vm545_vm0, %v8922_v6, 0.0  ;;  %v8921_v26 = vmul.f32 %v19433_v10, %v19433_v10  ;;  %9251 = vmatprep.subr.mxu0 %v17442_v49  ;;  %v14512_v53 = vld [vmem:[%s20786_s12 + $0xd8] sm:$0xff]  ;;  %v14511_v6 = vld [vmem:[%s20786_s12 + $0xd0] sm:$0xff]  ;;  %v14510_v39 = vld [vmem:[%s20786_s12 + $0xc8] sm:$0xff] }
0x1bc5   : > { %8937 = vadd.xlane.f32.xlu1 %v8936_v42  ;;  %v8902_v28 = vpop.xlane.xlu1 %8901  ;;  %9252 = vmatpush1.msra.mxu0 %v14518_v25  ;;  %v14532_v42 = vld [vmem:[%s20786_s12 + $0x178] sm:$0xff]  ;;  %v14487_v25 = vld [vmem:[%s20783_s9 + $0x1] ss:$0 sm:$0xff] }
0x1bc6   : > { %v19444_v18 = vsub.f32 %v19401_v19, %v8907_v35  ;;  %v8910_v51 = vmul.f32 0.020833334, %v8902_v28  ;;  %v8933_v3 = vsel %vm545_vm0, %v8921_v26, 0.0  ;;  %v8924_v17 = vmul.f32 %v19438_v13, %v19438_v13  ;;  %9253 = vmatprep.subr.mxu0 %v17442_v49  ;;  %v14509_v35 = vld [vmem:[%s20786_s12 + $0xc0] sm:$0xff]  ;;  %v14531_v26 = vld [vmem:[%s20786_s12 + $0x170] sm:$0xff]  ;;  %v14530_v28 = vld [vmem:[%s20786_s12 + $0x168] sm:$0xff] }
0x1bc7   : > { %8934 = vadd.xlane.f32.xlu0 %v8933_v3  ;;  %v8899_v52 = vpop.xlane.xlu0 %8898  ;;  %9254 = vmatpush1.msra.mxu0 %v14517_v30 }
0x1bc8   : > { %v19450_v24 = vsub.f32 %v19406_v58, %v8910_v51  ;;  %v8909_v45 = vmul.f32 0.020833334, %v8899_v52  ;;  %v8942_v55 = vsel %vm545_vm0, %v8924_v17, 0.0  ;;  %v8923_v5 = vmul.f32 %v19444_v18, %v19444_v18  ;;  %9255 = vmatprep.subr.mxu0 %v17442_v49  ;;  %v14529_v51 = vld [vmem:[%s20786_s12 + $0x160] sm:$0xff] }
0x1bc9   : > { %8943 = vadd.xlane.f32.xlu1 %v8942_v55  ;;  %9256 = vmatpush1.msra.mxu0 %v14516_v61 }
0x1bca   : > { %v19456_v32 = vsub.f32 %v19411_v21, %v8909_v45  ;;  %v8939_v8 = vsel %vm545_vm0, %v8923_v5, 0.0  ;;  %v8926_v34 = vmul.f32 %v19450_v24, %v19450_v24  ;;  %9257 = vmatprep.subr.mxu0 %v17442_v49 }
0x1bcb   : > { %8940 = vadd.xlane.f32.xlu0 %v8939_v8  ;;  %9258 = vmatpush1.msra.mxu0 %v14515_v14 }
0x1bcc   : > { %v8948_v22 = vsel %vm545_vm0, %v8926_v34, 0.0  ;;  %v8925_v46 = vmul.f32 %v19456_v32, %v19456_v32  ;;  %9259 = vmatprep.subr.mxu0 %v17442_v49 }
0x1bcd   : > { %8949 = vadd.xlane.f32.xlu1 %v8948_v22  ;;  %9260 = vmatpush1.msra.mxu0 %v14514_v48 }
0x1bce   : > { %v8945_v54 = vsel %vm545_vm0, %v8925_v46, 0.0  ;;  %9261 = vmatprep.subr.mxu0 %v17442_v49 }
0x1bcf   : > { %8946 = vadd.xlane.f32.xlu0 %v8945_v54  ;;  %9262 = vmatpush1.msra.mxu0 %v14513_v59 }
0x1bd0   : > { %9263 = vmatprep.subr.mxu0 %v17442_v49 }
0x1bd1   : > { %9264 = vmatpush1.msra.mxu0 %v14512_v53 }
0x1bd2   : > { %9265 = vmatprep.subr.mxu0 %v17442_v49 }
0x1bd3   : > { %9266 = vmatpush1.msra.mxu0 %v14511_v6 }
0x1bd4   : > { %9267 = vmatprep.subr.mxu0 %v17442_v49 }
0x1bd5   : > { %9268 = vmatpush1.msra.mxu0 %v14510_v39 }
0x1bd6   : > { %9269 = vmatprep.subr.mxu0 %v17442_v49 }
0x1bd7   : > { %9270 = vmatpush1.msra.mxu0 %v14509_v35 }
0x1bd8   : > { %9287 = vmatprep.subr.mxu0 %v17442_v49 }
0x1bd9   : > { %9288 = vmatpush2.msra.mxu0 %v14532_v42 }
0x1bda   : > { %9289 = vmatprep.subr.mxu0 %v17442_v49 }
0x1bdb   : > { %9290 = vmatpush2.msra.mxu0 %v14531_v26 }
0x1bdc   : > { %9291 = vmatprep.subr.mxu0 %v17442_v49 }
0x1bdd   : > { %9292 = vmatpush2.msra.mxu0 %v14530_v28 }
0x1bde   : > { %9293 = vmatprep.subr.mxu0 %v17442_v49 }
0x1bdf   : > { %9294 = vmatpush2.msra.mxu0 %v14529_v51 }
0x1be0   : > { %9295 = vmatprep.subr.mxu0 %v17442_v49 }
0x1c46   : > { %v8932_v3 = vpop.xlane.xlu1 %8931 }
0x1c47   : > { %v8952_v17 = vmul.f32 0.020833334, %v8932_v3 }
0x1c48   : > { %v8929_v52 = vpop.xlane.xlu0 %8928 }
0x1c49   : > { %v8960_v45 = vadd.f32 1e-05, %v8952_v17  ;;  %v8951_v55 = vmul.f32 0.020833334, %v8929_v52 }
0x1c4b   : > { %17227 = vrsqrt.f32 %v8960_v45  ;;  %v8959_v5 = vadd.f32 1e-05, %v8951_v55 }
0x1c4d   : > { %17229 = vrsqrt.f32 %v8959_v5 }
0x1c4e   : > { %v8938_v8 = vpop.xlane.xlu1 %8937 }
0x1c4f   : > { %v8954_v34 = vmul.f32 0.020833334, %v8938_v8 }
0x1c50   : > { %v8935_v22 = vpop.xlane.xlu0 %8934 }
0x1c51   : > { %v8962_v46 = vadd.f32 1e-05, %v8954_v34  ;;  %v8953_v54 = vmul.f32 0.020833334, %v8935_v22  ;;  %v14528_v22 = vld [vmem:[%s20786_s12 + $0x158] sm:$0xff] }
0x1c52   : > { %v8944_v9 = vpop.xlane.xlu1 %8943  ;;  %9296 = vmatpush2.msra.mxu0 %v14528_v22 }
0x1c53   : > { %17231 = vrsqrt.f32 %v8962_v46  ;;  %v8961_v47 = vadd.f32 1e-05, %v8953_v54  ;;  %v8956_v2 = vmul.f32 0.020833334, %v8944_v9  ;;  %9297 = vmatprep.subr.mxu0 %v17442_v49  ;;  %v14526_v46 = vld [vmem:[%s20786_s12 + $0x148] sm:$0xff]  ;;  %v14525_v54 = vld [vmem:[%s20786_s12 + $0x140] sm:$0xff] }
0x1c54   : > { %v8941_v63 = vpop.xlane.xlu0 %8940  ;;  %v14500_v9 = vld [vmem:[%s20785_s11 + $0x2] sm:$0x3] }
0x1c55   : > { %17233 = vrsqrt.f32 %v8961_v47  ;;  %v8955_v15 = vmul.f32 0.020833334, %v8941_v63  ;;  %v8964_v33 = vadd.f32 1e-05, %v8956_v2  ;;  %v9030_v47 = vrot.slane %v14500_v9, %v18577_v37 }
0x1c56   : > { %v8950_v31 = vpop.xlane.xlu1 %8949  ;;  %v9034_v2 = vrot.slane %v14500_v9, %v18583_v16 }
0x1c57   : > { %v8963_v20 = vadd.f32 1e-05, %v8955_v15  ;;  %v8958_v43 = vmul.f32 0.020833334, %v8950_v31 }
0x1c58   : > { %v17228_v57 = vpop.eup %17227  ;;  %v8947_v27 = vpop.xlane.xlu0 %8946 }
0x1c59   : > { %17235 = vrsqrt.f32 %v8963_v20  ;;  %v8957_v38 = vmul.f32 0.020833334, %v8947_v27  ;;  %v8976_v23 = vmul.f32 %v17228_v57, %v19418_v50  ;;  %v8966_v30 = vadd.f32 1e-05, %v8958_v43 }
0x1c5a   : > { %v17230_v1 = vpop.eup %17229  ;;  %17237 = vrsqrt.f32 %v8964_v33 }
0x1c5b   : > { %v8975_v36 = vmul.f32 %v17230_v1, %v19421_v60  ;;  %v8965_v4 = vadd.f32 1e-05, %v8957_v38  ;;  %v8990_v14 = vmul.f32 %v14486_v0, %v8976_v23 }
0x1c5d   : > { %v8989_v56 = vmul.f32 %v14486_v0, %v8975_v36  ;;  %17239 = vrsqrt.f32 %v8965_v4  ;;  %v9004_v53 = vadd.f32 %v14487_v25, %v8990_v14 }
0x1c5e   : > { %17241 = vrsqrt.f32 %v8966_v30 }
0x1c5f   : > { %v9003_v61 = vadd.f32 %v14487_v25, %v8989_v56 }
0x1c60   : > { %v17232_v48 = vpop.eup %17231 }
0x1c61   : > { %14501 = vmatmul.mubr.msk.f32.vlgmr.msra.gmra.mxu1 %vm545_vm0, %v9003_v61  ;;  %v8978_v60 = vmul.f32 %v17232_v48, %v19430_v62 }
0x1c62   : > { %v17234_v50 = vpop.eup %17233  ;;  %9131 = vmatprep.mubr.f32.mxu1 %v17442_v49 }
0x1c63   : > { %v8977_v59 = vmul.f32 %v17234_v50, %v19433_v10  ;;  %v8992_v28 = vmul.f32 %v14486_v0, %v8978_v60 }
0x1c65   : > { %14502 = vmatmul.mubr.msk.f32.gmra.mxu1 %vm545_vm0, %v9004_v53  ;;  %v8991_v6 = vmul.f32 %v14486_v0, %v8977_v59  ;;  %v9006_v10 = vadd.f32 %v14487_v25, %v8992_v28 }
0x1c66   : > { %v17236_v39 = vpop.eup %17235  ;;  %9137 = vmatprep.mubr.f32.mxu1 %v17442_v49 }
0x1c67   : > { %v17238_v35 = vpop.eup %17237  ;;  %v8979_v42 = vmul.f32 %v17236_v39, %v19444_v18  ;;  %v9005_v26 = vadd.f32 %v14487_v25, %v8991_v6 }
0x1c68   : > { %v8980_v62 = vmul.f32 %v17238_v35, %v19438_v13 }
0x1c69   : > { %14503 = vmatmul.mubr.msk.f32.gmra.mxu1 %vm545_vm0, %v9005_v26  ;;  %v8993_v51 = vmul.f32 %v14486_v0, %v8979_v42 }
0x1c6a   : > { %9143 = vmatprep.mubr.f32.mxu1 %v17442_v49  ;;  %v17240_v3 = vpop.eup %17239  ;;  %v8994_v45 = vmul.f32 %v14486_v0, %v8980_v62 }
0x1c6b   : > { %v8981_v17 = vmul.f32 %v17240_v3, %v19456_v32  ;;  %v9007_v52 = vadd.f32 %v14487_v25, %v8993_v51  ;;  %v17242_v18 = vpop.eup %17241 }
0x1c6c   : > { %v8982_v55 = vmul.f32 %v17242_v18, %v19450_v24  ;;  %v9008_v5 = vadd.f32 %v14487_v25, %v8994_v45  ;;  %v14527_v24 = vld [vmem:[%s20786_s12 + $0x150] sm:$0xff] }
0x1c6d   : > { %14504 = vmatmul.mubr.msk.f32.gmra.mxu1 %vm545_vm0, %v9006_v10  ;;  %v8995_v13 = vmul.f32 %v14486_v0, %v8981_v17  ;;  %9298 = vmatpush2.msra.mxu0 %v14527_v24 }
0x1c6e   : > { %9149 = vmatprep.mubr.f32.mxu1 %v17442_v49  ;;  %v8996_v34 = vmul.f32 %v14486_v0, %v8982_v55  ;;  %9299 = vmatprep.subr.mxu0 %v17442_v49 }
0x1c6f   : > { %v9009_v8 = vadd.f32 %v14487_v25, %v8995_v13  ;;  %9300 = vmatpush2.msra.mxu0 %v14526_v46 }
0x1c70   : > { %v9010_v32 = vadd.f32 %v14487_v25, %v8996_v34  ;;  %9301 = vmatprep.subr.mxu0 %v17442_v49 }
0x1c71   : > { %14505 = vmatmul.mubr.msk.f32.gmra.mxu1 %vm545_vm0, %v9007_v52  ;;  %9302 = vmatpush2.msra.mxu0 %v14525_v54 }
0x1c72   : > { %9155 = vmatprep.mubr.f32.mxu1 %v17442_v49 }
0x1c75   : > { %14506 = vmatmul.mubr.msk.f32.gmra.mxu1 %vm545_vm0, %v9008_v5 }
0x1c76   : > { %9161 = vmatprep.mubr.f32.mxu1 %v17442_v49 }
0x1c79   : > { %14507 = vmatmul.mubr.msk.f32.gmra.mxu1 %vm545_vm0, %v9009_v8 }
0x1c7a   : > { %9167 = vmatprep.mubr.f32.mxu1 %v17442_v49 }
0x1c7d   : > { %14508 = vmatmul.mubr.msk.f32.gmra.mxu1 %vm545_vm0, %v9010_v32 }
0x1d21   : > { %v9127_v63 = vpop.f32.mrf.mxu1 }
0x1d22   : > { %v9128_v15 = vadd.f32 %v9127_v63, %v9030_v47  ;;  %v14542_v63 = vld [vmem:[%s20787_s13 + $0x1] ss:$0 sm:$0xff] }
0x1d23   : > { %v9129_v33 = vpop.f32.mrf.mxu1 }
0x1d24   : > { %v9130_v20 = vadd.f32 %v9129_v33, %v9034_v2  ;;  %v9174_v27 = vmax.f32 %v9128_v15, 0.0 }
0x1d25   : > { %v9133_v57 = vpop.f32.mrf.mxu1 }
0x1d26   : > { %v9175_v31 = vmax.f32 %v9130_v20, 0.0  ;;  %v9134_v38 = vadd.f32 %v9133_v57, %v9030_v47 }
0x1d27   : > { %v9135_v1 = vpop.f32.mrf.mxu1 }
0x1d28   : > { %v9136_v23 = vadd.f32 %v9135_v1, %v9034_v2  ;;  %14533 = vmatprep.mubr.msk.f32.mxu0 %vm4798_vm4, %v9175_v31  ;;  %v9176_v4 = vmax.f32 %v9134_v38, 0.0 }
0x1d29   : > { %v9139_v36 = vpop.f32.mrf.mxu1  ;;  %9304 = vmatmul.mubr.f32.vlgmr.msra.gmra.mxu0 %v9174_v27 }
0x1d2a   : > { %v9177_v43 = vmax.f32 %v9136_v23, 0.0  ;;  %v9140_v0 = vadd.f32 %v9139_v36, %v9030_v47 }
0x1d2b   : > { %v9141_v56 = vpop.f32.mrf.mxu1 }
0x1d2c   : > { %v9142_v25 = vadd.f32 %v9141_v56, %v9034_v2  ;;  %14534 = vmatprep.mubr.msk.f32.mxu0 %vm4798_vm4, %v9177_v43  ;;  %v9178_v14 = vmax.f32 %v9140_v0, 0.0 }
0x1d2d   : > { %v9145_v30 = vpop.f32.mrf.mxu1  ;;  %9309 = vmatmul.mubr.f32.gmra.mxu0 %v9176_v4 }
0x1d2e   : > { %v9179_v61 = vmax.f32 %v9142_v25, 0.0  ;;  %v9146_v48 = vadd.f32 %v9145_v30, %v9030_v47 }
0x1d2f   : > { %v9147_v50 = vpop.f32.mrf.mxu1 }
0x1d30   : > { %v9148_v60 = vadd.f32 %v9147_v50, %v9034_v2  ;;  %14535 = vmatprep.mubr.msk.f32.mxu0 %vm4798_vm4, %v9179_v61  ;;  %v9180_v6 = vmax.f32 %v9146_v48, 0.0 }
0x1d31   : > { %v9151_v59 = vpop.f32.mrf.mxu1  ;;  %9314 = vmatmul.mubr.f32.gmra.mxu0 %v9178_v14 }
0x1d32   : > { %v9181_v53 = vmax.f32 %v9148_v60, 0.0  ;;  %v9152_v39 = vadd.f32 %v9151_v59, %v9030_v47 }
0x1d33   : > { %v9153_v35 = vpop.f32.mrf.mxu1 }
0x1d34   : > { %v9154_v42 = vadd.f32 %v9153_v35, %v9034_v2  ;;  %14536 = vmatprep.mubr.msk.f32.mxu0 %vm4798_vm4, %v9181_v53  ;;  %v9182_v62 = vmax.f32 %v9152_v39, 0.0 }
0x1d35   : > { %v9157_v26 = vpop.f32.mrf.mxu1  ;;  %9319 = vmatmul.mubr.f32.gmra.mxu0 %v9180_v6 }
0x1d36   : > { %v9183_v28 = vmax.f32 %v9154_v42, 0.0  ;;  %v9158_v10 = vadd.f32 %v9157_v26, %v9030_v47 }
0x1d37   : > { %v9159_v51 = vpop.f32.mrf.mxu1 }
0x1d38   : > { %v9160_v3 = vadd.f32 %v9159_v51, %v9034_v2  ;;  %14537 = vmatprep.mubr.msk.f32.mxu0 %vm4798_vm4, %v9183_v28  ;;  %v9184_v45 = vmax.f32 %v9158_v10, 0.0 }
0x1d39   : > { %v9163_v17 = vpop.f32.mrf.mxu1  ;;  %9324 = vmatmul.mubr.f32.gmra.mxu0 %v9182_v62 }
0x1d3a   : > { %v9185_v52 = vmax.f32 %v9160_v3, 0.0  ;;  %v9164_v18 = vadd.f32 %v9163_v17, %v9030_v47 }
0x1d3b   : > { %v9165_v55 = vpop.f32.mrf.mxu1 }
0x1d3c   : > { %v9166_v5 = vadd.f32 %v9165_v55, %v9034_v2  ;;  %14538 = vmatprep.mubr.msk.f32.mxu0 %vm4798_vm4, %v9185_v52  ;;  %v9186_v34 = vmax.f32 %v9164_v18, 0.0 }
0x1d3d   : > { %v9169_v13 = vpop.f32.mrf.mxu1  ;;  %9329 = vmatmul.mubr.f32.gmra.mxu0 %v9184_v45 }
0x1d3e   : > { %v9187_v8 = vmax.f32 %v9166_v5, 0.0  ;;  %v9170_v32 = vadd.f32 %v9169_v13, %v9030_v47 }
0x1d3f   : > { %v9171_v22 = vpop.f32.mrf.mxu1 }
0x1d40   : > { %v9172_v24 = vadd.f32 %v9171_v22, %v9034_v2  ;;  %14539 = vmatprep.mubr.msk.f32.mxu0 %vm4798_vm4, %v9187_v8  ;;  %v9188_v54 = vmax.f32 %v9170_v32, 0.0 }
0x1d41   : > { %9334 = vmatmul.mubr.f32.gmra.mxu0 %v9186_v34 }
0x1d42   : > { %v9189_v46 = vmax.f32 %v9172_v24, 0.0 }
0x1d44   : > { %14540 = vmatprep.mubr.msk.f32.mxu0 %vm4798_vm4, %v9189_v46 }
0x1d45   : > { %9339 = vmatmul.mubr.f32.gmra.mxu0 %v9188_v54 }
0x1de9   : > { %v9305_v9 = vpop.f32.mrf.mxu0 }
0x1dea   : > { %v9344_v15 = vadd.f32 %v9305_v9, %v19371_v11 }
0x1deb   : > { %v9307_v33 = vpop.f32.mrf.mxu0 }
0x1dec   : > { %v19642_v20 = vadd.f32 %v14542_v63, %v9344_v15 }
0x1ded   : > { %v9310_v47 = vpop.f32.mrf.mxu0 }
0x1dee   : > { %v9345_v2 = vadd.f32 %v9310_v47, %v19366_v41  ;;  %v9372_v57 = vsel %vm545_vm0, %v19642_v20, 0.0 }
0x1def   : > { %9373 = vadd.xlane.f32.xlu0 %v9372_v57  ;;  %v9312_v31 = vpop.f32.mrf.mxu0 }
0x1df0   : > { %v19647_v27 = vadd.f32 %v14542_v63, %v9345_v2 }
0x1df1   : > { %v9315_v38 = vpop.f32.mrf.mxu0 }
0x1df2   : > { %v9346_v1 = vadd.f32 %v9315_v38, %v19389_v29  ;;  %v9375_v23 = vsel %vm545_vm0, %v19647_v27, 0.0 }
0x1df3   : > { %9376 = vadd.xlane.f32.xlu1 %v9375_v23  ;;  %v9317_v11 = vpop.f32.mrf.mxu0 }
0x1df4   : > { %v19652_v36 = vadd.f32 %v14542_v63, %v9346_v1 }
0x1df5   : > { %v9320_v43 = vpop.f32.mrf.mxu0 }
0x1df6   : > { %v9347_v41 = vadd.f32 %v9320_v43, %v19384_v7  ;;  %v9378_v4 = vsel %vm545_vm0, %v19652_v36, 0.0 }
0x1df7   : > { %9379 = vadd.xlane.f32.xlu0 %v9378_v4  ;;  %v9322_v0 = vpop.f32.mrf.mxu0 }
0x1df8   : > { %v19657_v56 = vadd.f32 %v14542_v63, %v9347_v41 }
0x1df9   : > { %v9325_v25 = vpop.f32.mrf.mxu0 }
0x1dfa   : > { %v9348_v29 = vadd.f32 %v9325_v25, %v19401_v19  ;;  %v9381_v30 = vsel %vm545_vm0, %v19657_v56, 0.0 }
0x1dfb   : > { %9382 = vadd.xlane.f32.xlu1 %v9381_v30  ;;  %v9327_v61 = vpop.f32.mrf.mxu0 }
0x1dfc   : > { %v19662_v14 = vadd.f32 %v14542_v63, %v9348_v29 }
0x1dfd   : > { %v9330_v48 = vpop.f32.mrf.mxu0 }
0x1dfe   : > { %v9349_v7 = vadd.f32 %v9330_v48, %v19396_v12  ;;  %v9384_v50 = vsel %vm545_vm0, %v19662_v14, 0.0 }
0x1dff   : > { %9385 = vadd.xlane.f32.xlu0 %v9384_v50  ;;  %v9332_v60 = vpop.f32.mrf.mxu0  ;;  %v14552_v50 = vld [vmem:[%s20804_s1 + $0x148] sm:$0xff] }
0x1e00   : > { %v19667_v59 = vadd.f32 %v14542_v63, %v9349_v7  ;;  %16488 = vmatprep.subr.mxu1 %v14552_v50  ;;  %v14551_v60 = vld [vmem:[%s20804_s1 + $0x140] sm:$0xff] }
0x1e01   : > { %v9335_v53 = vpop.f32.mrf.mxu0  ;;  %16489 = vmatpush3.msra.mxu1 %v14552_v50  ;;  %v14564_v50 = vld [vmem:[%s20776_s2 + $0x138] sm:$0xff] }
0x1e02   : > { %v9350_v19 = vadd.f32 %v9335_v53, %v19411_v21  ;;  %v9387_v6 = vsel %vm545_vm0, %v19667_v59, 0.0  ;;  %16490 = vmatprep.subr.mxu1 %v14551_v60  ;;  %v14550_v53 = vld [vmem:[%s20804_s1 + $0x138] sm:$0xff] }
0x1e03   : > { %9388 = vadd.xlane.f32.xlu1 %v9387_v6  ;;  %v9337_v39 = vpop.f32.mrf.mxu0  ;;  %16491 = vmatpush3.msra.mxu1 %v14551_v60  ;;  %v14548_v6 = vld [vmem:[%s20804_s1 + $0x128] sm:$0xff] }
0x1e04   : > { %v19672_v35 = vadd.f32 %v14542_v63, %v9350_v19  ;;  %16492 = vmatprep.subr.mxu1 %v14550_v53  ;;  %v14549_v19 = vld [vmem:[%s20804_s1 + $0x130] sm:$0xff]  ;;  %v14547_v39 = vld [vmem:[%s20804_s1 + $0x120] sm:$0xff] }
0x1e05   : > { %v9340_v42 = vpop.f32.mrf.mxu0  ;;  %16493 = vmatpush3.msra.mxu1 %v14550_v53 }
0x1e06   : > { %v9351_v12 = vadd.f32 %v9340_v42, %v19406_v58  ;;  %v9390_v26 = vsel %vm545_vm0, %v19672_v35, 0.0  ;;  %16494 = vmatprep.subr.mxu1 %v14549_v19  ;;  %v14566_v42 = vld [vmem:[%s20776_s2 + $0x148] sm:$0xff] }
0x1e07   : > { %9391 = vadd.xlane.f32.xlu0 %v9390_v26  ;;  %v9342_v28 = vpop.f32.mrf.mxu0  ;;  %16495 = vmatpush3.msra.mxu1 %v14549_v19  ;;  %v14563_v19 = vld [vmem:[%s20776_s2 + $0x130] sm:$0xff] }
0x1e08   : > { %v19677_v62 = vadd.f32 %v14542_v63, %v9351_v12  ;;  %16496 = vmatprep.subr.mxu1 %v14548_v6 }
0x1e09   : > { %16497 = vmatpush3.msra.mxu1 %v14548_v6 }
0x1e0a   : > { %v9393_v21 = vsel %vm545_vm0, %v19677_v62, 0.0  ;;  %16498 = vmatprep.subr.mxu1 %v14547_v39 }
0x1e0b   : > { %9394 = vadd.xlane.f32.xlu1 %v9393_v21  ;;  %16499 = vmatpush3.msra.mxu1 %v14547_v39 }
0x1e0c   : > { %16512 = vmatprep.subr.mxu1 %v14566_v42 }
0x1e78   : > { %v9374_v10 = vpop.xlane.xlu0 %9373 }
0x1e79   : > { %v9396_v51 = vmul.f32 0.020833334, %v9374_v10 }
0x1e7b   : > { %v19682_v3 = vsub.f32 %v19642_v20, %v9396_v51 }
0x1e7c   : > { %v9377_v17 = vpop.xlane.xlu1 %9376 }
0x1e7d   : > { %v9397_v52 = vmul.f32 0.020833334, %v9377_v17  ;;  %v9412_v58 = vmul.f32 %v19682_v3, %v19682_v3 }
0x1e7f   : > { %v19687_v45 = vsub.f32 %v19647_v27, %v9397_v52  ;;  %v9420_v18 = vsel %vm545_vm0, %v9412_v58, 0.0 }
0x1e80   : > { %9421 = vadd.xlane.f32.xlu0 %v9420_v18  ;;  %v9380_v55 = vpop.xlane.xlu0 %9379 }
0x1e81   : > { %v9398_v5 = vmul.f32 0.020833334, %v9380_v55  ;;  %v9413_v13 = vmul.f32 %v19687_v45, %v19687_v45 }
0x1e83   : > { %v19693_v8 = vsub.f32 %v19652_v36, %v9398_v5  ;;  %v9423_v34 = vsel %vm545_vm0, %v9413_v13, 0.0 }
0x1e84   : > { %v9383_v32 = vpop.xlane.xlu1 %9382  ;;  %9424 = vadd.xlane.f32.xlu1 %v9423_v34 }
0x1e85   : > { %v9399_v22 = vmul.f32 0.020833334, %v9383_v32  ;;  %v9414_v24 = vmul.f32 %v19693_v8, %v19693_v8 }
0x1e87   : > { %v19699_v46 = vsub.f32 %v19657_v56, %v9399_v22  ;;  %v9426_v54 = vsel %vm545_vm0, %v9414_v24, 0.0  ;;  %v19753_v22 = vld [vmem:[%s20780_s6 + $0x2] ss:$0 sm:$0xff] }
0x1e88   : > { %9427 = vadd.xlane.f32.xlu0 %v9426_v54  ;;  %v9386_v9 = vpop.xlane.xlu0 %9385 }
0x1e89   : > { %v9400_v63 = vmul.f32 0.020833334, %v9386_v9  ;;  %v9415_v15 = vmul.f32 %v19699_v46, %v19699_v46  ;;  %v19759_v9 = vld [vmem:[%s20781_s7 + $0x2] ss:$0 sm:$0xff] }
0x1e8b   : > { %v19705_v33 = vsub.f32 %v19662_v14, %v9400_v63  ;;  %v9429_v47 = vsel %vm545_vm0, %v9415_v15, 0.0 }
0x1e8c   : > { %v9389_v2 = vpop.xlane.xlu1 %9388  ;;  %9430 = vadd.xlane.f32.xlu1 %v9429_v47 }
0x1e8d   : > { %v9401_v57 = vmul.f32 0.020833334, %v9389_v2  ;;  %v9416_v31 = vmul.f32 %v19705_v33, %v19705_v33 }
0x1e8f   : > { %v19711_v38 = vsub.f32 %v19667_v59, %v9401_v57  ;;  %v9432_v1 = vsel %vm545_vm0, %v9416_v31, 0.0 }
0x1e90   : > { %9433 = vadd.xlane.f32.xlu0 %v9432_v1  ;;  %v9392_v23 = vpop.xlane.xlu0 %9391 }
0x1e91   : > { %v9402_v11 = vmul.f32 0.020833334, %v9392_v23  ;;  %v9417_v43 = vmul.f32 %v19711_v38, %v19711_v38 }
0x1e93   : > { %v19717_v41 = vsub.f32 %v19672_v35, %v9402_v11  ;;  %v9435_v4 = vsel %vm545_vm0, %v9417_v43, 0.0 }
0x1e94   : > { %9436 = vadd.xlane.f32.xlu1 %v9435_v4  ;;  %v9395_v0 = vpop.xlane.xlu1 %9394 }
0x1e95   : > { %v9403_v25 = vmul.f32 0.020833334, %v9395_v0  ;;  %v9418_v29 = vmul.f32 %v19717_v41, %v19717_v41 }
0x1e97   : > { %v19723_v30 = vsub.f32 %v19677_v62, %v9403_v25  ;;  %v9438_v61 = vsel %vm545_vm0, %v9418_v29, 0.0 }
0x1e98   : > { %9439 = vadd.xlane.f32.xlu0 %v9438_v61 }
0x1e99   : > { %v9419_v48 = vmul.f32 %v19723_v30, %v19723_v30 }
0x1e9b   : > { %v9441_v7 = vsel %vm545_vm0, %v9419_v48, 0.0 }
0x1e9c   : > { %9442 = vadd.xlane.f32.xlu1 %v9441_v7 }
0x1f09   : > { %v9422_v12 = vpop.xlane.xlu0 %9421 }
0x1f0a   : > { %v9444_v26 = vmul.f32 0.020833334, %v9422_v12 }
0x1f0c   : > { %v9452_v28 = vadd.f32 1e-05, %v9444_v26  ;;  %v14561_v26 = vld [vmem:[%s20776_s2 + $0x120] sm:$0xff] }
0x1f0d   : > { %v9425_v21 = vpop.xlane.xlu1 %9424 }
0x1f0e   : > { %17243 = vrsqrt.f32 %v9452_v28  ;;  %v9445_v10 = vmul.f32 0.020833334, %v9425_v21 }
0x1f10   : > { %v9453_v51 = vadd.f32 1e-05, %v9445_v10  ;;  %v14580_v10 = vld [vmem:[%s20777_s3 + $0x148] sm:$0xff] }
0x1f11   : > { %v9428_v17 = vpop.xlane.xlu0 %9427 }
0x1f12   : > { %17245 = vrsqrt.f32 %v9453_v51  ;;  %v9446_v52 = vmul.f32 0.020833334, %v9428_v17 }
0x1f14   : > { %v9454_v58 = vadd.f32 1e-05, %v9446_v52 }
0x1f15   : > { %v9431_v18 = vpop.xlane.xlu1 %9430 }
0x1f16   : > { %17247 = vrsqrt.f32 %v9454_v58  ;;  %v9447_v55 = vmul.f32 0.020833334, %v9431_v18 }
0x1f18   : > { %v9455_v5 = vadd.f32 1e-05, %v9447_v55 }
0x1f19   : > { %v9434_v13 = vpop.xlane.xlu0 %9433 }
0x1f1a   : > { %17249 = vrsqrt.f32 %v9455_v5  ;;  %v9448_v34 = vmul.f32 0.020833334, %v9434_v13 }
0x1f1b   : > { %v17244_v32 = vpop.eup %17243 }
0x1f1c   : > { %v9468_v24 = vmul.f32 %v17244_v32, %v19682_v3  ;;  %v9456_v54 = vadd.f32 1e-05, %v9448_v34 }
0x1f1d   : > { %v9437_v63 = vpop.xlane.xlu1 %9436 }
0x1f1e   : > { %v9482_v15 = vmul.f32 %v19753_v22, %v9468_v24  ;;  %17251 = vrsqrt.f32 %v9456_v54  ;;  %v9449_v47 = vmul.f32 0.020833334, %v9437_v63  ;;  %v14576_v24 = vld [vmem:[%s20777_s3 + $0x128] sm:$0xff]  ;;  %v14575_v54 = vld [vmem:[%s20777_s3 + $0x120] sm:$0xff] }
0x1f1f   : > { %v17246_v2 = vpop.eup %17245 }
0x1f20   : > { %v19763_v57 = vadd.f32 %v19759_v9, %v9482_v15  ;;  %v9469_v31 = vmul.f32 %v17246_v2, %v19687_v45  ;;  %v9457_v1 = vadd.f32 1e-05, %v9449_v47  ;;  %v14565_v45 = vld [vmem:[%s20776_s2 + $0x140] sm:$0xff] }
0x1f21   : > { %v9440_v23 = vpop.xlane.xlu0 %9439 }
0x1f22   : > { %v9483_v3 = vmul.f32 %v19753_v22, %v9469_v31  ;;  %17253 = vrsqrt.f32 %v9457_v1  ;;  %v9450_v11 = vmul.f32 0.020833334, %v9440_v23  ;;  %16500 = vmatprep.mubr.msk.f32.mxu1 %vm545_vm0, %v19763_v57 }
0x1f23   : > { %v17248_v43 = vpop.eup %17247 }
0x1f24   : > { %v19770_v4 = vadd.f32 %v19759_v9, %v9483_v3  ;;  %v9470_v0 = vmul.f32 %v17248_v43, %v19693_v8  ;;  %v9458_v25 = vadd.f32 1e-05, %v9450_v11 }
0x1f25   : > { %v9443_v29 = vpop.xlane.xlu1 %9442 }
0x1f26   : > { %v9484_v61 = vmul.f32 %v19753_v22, %v9470_v0  ;;  %17255 = vrsqrt.f32 %v9458_v25  ;;  %v9451_v48 = vmul.f32 0.020833334, %v9443_v29  ;;  %16501 = vmatmul.mubr.msk.f32.vlgmr.msra.gmra.mxu1 %vm545_vm0, %v19770_v4 }
0x1f27   : > { %v17250_v7 = vpop.eup %17249  ;;  %16513 = vmatpush3.msra.mxu1 %v14566_v42 }
0x1f28   : > { %v19783_v8 = vadd.f32 %v19759_v9, %v9484_v61  ;;  %v9471_v60 = vmul.f32 %v17250_v7, %v19699_v46  ;;  %v9459_v53 = vadd.f32 1e-05, %v9451_v48  ;;  %16514 = vmatprep.subr.mxu1 %v14565_v45  ;;  %v14562_v46 = vld [vmem:[%s20776_s2 + $0x128] sm:$0xff] }
0x1f29   : > { %16515 = vmatpush3.msra.mxu1 %v14565_v45 }
0x1f2a   : > { %v9485_v6 = vmul.f32 %v19753_v22, %v9471_v60  ;;  %17257 = vrsqrt.f32 %v9459_v53  ;;  %16503 = vmatprep.mubr.msk.f32.mxu1 %vm545_vm0, %v19783_v8  ;;  %16516 = vmatprep.subr.mxu1 %v14564_v50 }
0x1f2b   : > { %v17252_v39 = vpop.eup %17251  ;;  %16517 = vmatpush3.msra.mxu1 %v14564_v50 }
0x1f2c   : > { %v19796_v42 = vadd.f32 %v19759_v9, %v9485_v6  ;;  %v9472_v12 = vmul.f32 %v17252_v39, %v19705_v33  ;;  %16518 = vmatprep.subr.mxu1 %v14563_v19 }
0x1f2d   : > { %16519 = vmatpush3.msra.mxu1 %v14563_v19 }
0x1f2e   : > { %v9486_v28 = vmul.f32 %v19753_v22, %v9472_v12  ;;  %16504 = vmatmul.mubr.msk.f32.gmra.mxu1 %vm545_vm0, %v19796_v42  ;;  %16520 = vmatprep.subr.mxu1 %v14562_v46 }
0x1f2f   : > { %v17254_v21 = vpop.eup %17253  ;;  %16521 = vmatpush3.msra.mxu1 %v14562_v46 }
0x1f30   : > { %v19809_v33 = vadd.f32 %v19759_v9, %v9486_v28  ;;  %v9473_v51 = vmul.f32 %v17254_v21, %v19711_v38  ;;  %16522 = vmatprep.subr.mxu1 %v14561_v26 }
0x1f31   : > { %16523 = vmatpush3.msra.mxu1 %v14561_v26 }
0x1f32   : > { %v9487_v17 = vmul.f32 %v19753_v22, %v9473_v51  ;;  %16506 = vmatprep.mubr.msk.f32.mxu1 %vm545_vm0, %v19809_v33  ;;  %16536 = vmatprep.subr.mxu1 %v14580_v10 }
0x1f33   : > { %v17256_v52 = vpop.eup %17255 }
0x1f34   : > { %v19816_v58 = vadd.f32 %v19759_v9, %v9487_v17  ;;  %v9474_v18 = vmul.f32 %v17256_v52, %v19717_v41  ;;  %v14579_v41 = vld [vmem:[%s20777_s3 + $0x140] sm:$0xff] }
0x1f36   : > { %v9488_v55 = vmul.f32 %v19753_v22, %v9474_v18  ;;  %16507 = vmatmul.mubr.msk.f32.gmra.mxu1 %vm545_vm0, %v19816_v58 }
0x1f37   : > { %v17258_v38 = vpop.eup %17257 }
0x1f38   : > { %v19823_v5 = vadd.f32 %v19759_v9, %v9488_v55  ;;  %v9475_v13 = vmul.f32 %v17258_v38, %v19723_v30  ;;  %v14578_v30 = vld [vmem:[%s20777_s3 + $0x138] sm:$0xff] }
0x1f3a   : > { %v9489_v34 = vmul.f32 %v19753_v22, %v9475_v13  ;;  %16509 = vmatprep.mubr.msk.f32.mxu1 %vm545_vm0, %v19823_v5  ;;  %v14577_v22 = vld [vmem:[%s20777_s3 + $0x130] sm:$0xff] }
0x1f3c   : > { %v19830_v32 = vadd.f32 %v19759_v9, %v9489_v34 }
0x1f3e   : > { %16510 = vmatmul.mubr.msk.f32.gmra.mxu1 %vm545_vm0, %v19830_v32 }
0x1f3f   : > { %16524 = vmatprep.mubr.msk.f32.mxu1 %vm545_vm0, %v19763_v57 }
0x1f42   : > { %16525 = vmatmul.mubr.msk.f32.vlgmr.msra.gmra.mxu1 %vm545_vm0, %v19770_v4 }
0x1f43   : > { %16527 = vmatprep.mubr.msk.f32.mxu1 %vm545_vm0, %v19783_v8  ;;  %16537 = vmatpush3.msra.mxu1 %v14580_v10 }
0x1f44   : > { %16538 = vmatprep.subr.mxu1 %v14579_v41 }
0x1f45   : > { %16539 = vmatpush3.msra.mxu1 %v14579_v41 }
0x1f46   : > { %16528 = vmatmul.mubr.msk.f32.gmra.mxu1 %vm545_vm0, %v19796_v42  ;;  %16540 = vmatprep.subr.mxu1 %v14578_v30 }
0x1f47   : > { %16530 = vmatprep.mubr.msk.f32.mxu1 %vm545_vm0, %v19809_v33  ;;  %16541 = vmatpush3.msra.mxu1 %v14578_v30 }
0x1f48   : > { %16542 = vmatprep.subr.mxu1 %v14577_v22 }
0x1f49   : > { %16543 = vmatpush3.msra.mxu1 %v14577_v22 }
0x1f4a   : > { %16531 = vmatmul.mubr.msk.f32.gmra.mxu1 %vm545_vm0, %v19816_v58  ;;  %16544 = vmatprep.subr.mxu1 %v14576_v24 }
0x1f4b   : > { %16533 = vmatprep.mubr.msk.f32.mxu1 %vm545_vm0, %v19823_v5  ;;  %16545 = vmatpush3.msra.mxu1 %v14576_v24 }
0x1f4c   : > { %16546 = vmatprep.subr.mxu1 %v14575_v54 }
0x1f4d   : > { %16547 = vmatpush3.msra.mxu1 %v14575_v54 }
0x1f4e   : > { %16534 = vmatmul.mubr.msk.f32.gmra.mxu1 %vm545_vm0, %v19830_v32 }
0x1f4f   : > { %16548 = vmatprep.mubr.msk.f32.mxu1 %vm545_vm0, %v19763_v57 }
0x1f52   : > { %16549 = vmatmul.mubr.msk.f32.vlgmr.msra.gmra.mxu1 %vm545_vm0, %v19770_v4 }
0x1f53   : > { %16551 = vmatprep.mubr.msk.f32.mxu1 %vm545_vm0, %v19783_v8 }
0x1f56   : > { %16552 = vmatmul.mubr.msk.f32.gmra.mxu1 %vm545_vm0, %v19796_v42 }
0x1f57   : > { %16554 = vmatprep.mubr.msk.f32.mxu1 %vm545_vm0, %v19809_v33 }
0x1f5a   : > { %16555 = vmatmul.mubr.msk.f32.gmra.mxu1 %vm545_vm0, %v19816_v58 }
0x1f5b   : > { %16557 = vmatprep.mubr.msk.f32.mxu1 %vm545_vm0, %v19823_v5 }
0x1f5e   : > { %16558 = vmatmul.mubr.msk.f32.gmra.mxu1 %vm545_vm0, %v19830_v32 }
0x1fe6   : > { %v16502_v9 = vpop.f32.mrf.mxu1 }
0x1fe8   : > { %v9601_v63 = vpop.f32.mrf.mxu1 }
0x1fe9   : > { %16564 = vmatprep.mubr.msk.f32.mxu0 %vm1036_vm1, %v9601_v63 }
0x1fee   : > { %v16505_v15 = vpop.f32.mrf.mxu1 }
0x1ff0   : > { %v9611_v47 = vpop.f32.mrf.mxu1 }
0x1ff6   : > { %v16508_v2 = vpop.f32.mrf.mxu1 }
0x1ff8   : > { %v9621_v31 = vpop.f32.mrf.mxu1 }
0x1ff9   : > { %16578 = vmatprep.mubr.msk.f32.mxu1 %vm1036_vm1, %v9621_v31 }
0x1ffe   : > { %v16511_v1 = vpop.f32.mrf.mxu1 }
0x2000   : > { %v9631_v23 = vpop.f32.mrf.mxu1 }
0x2002   : > { %v16526_v3 = vpop.f32.mrf.mxu1 }
0x2003   : > { %16560 = vmatprep.subr.msk.mxu0 %vm1036_vm1, %v16526_v3 }
0x2004   : > { %v9713_v11 = vpop.f32.mrf.mxu1  ;;  %16561 = vmatpush3.xpose.msk.msra.mxu0 %vm1036_vm1, %v16526_v3 }
0x2005   : > { %16562 = vmatprep.subr.msk.mxu0 %vm1036_vm1, %v9713_v11 }
0x2006   : > { %v16529_v43 = vpop.f32.mrf.mxu1 }
0x2008   : > { %v9723_v0 = vpop.f32.mrf.mxu1  ;;  %16563 = vmatpush3.xpose.msk.msra.mxu0 %vm1036_vm1, %v9713_v11 }
0x2009   : > { %16567 = vmatprep.subr.msk.mxu0 %vm1036_vm1, %v16529_v43 }
0x200a   : > { %v16532_v25 = vpop.f32.mrf.mxu1 }
0x200b   : > { %16565 = vmatmul.mubr.msk.f32.vlgmr.msra.gmra.mxu0 %vm1036_vm1, %v16502_v9  ;;  %16574 = vmatprep.subr.msk.mxu1 %vm1036_vm1, %v16532_v25 }
0x200c   : > { %v9733_v29 = vpop.f32.mrf.mxu1  ;;  %16568 = vmatpush3.xpose.msk.msra.mxu0 %vm1036_vm1, %v16529_v43  ;;  %16571 = vmatprep.mubr.msk.f32.mxu0 %vm1036_vm1, %v9611_v47 }
0x200d   : > { %16575 = vmatpush3.xpose.msk.msra.mxu1 %vm1036_vm1, %v16532_v25  ;;  %16569 = vmatprep.subr.msk.mxu0 %vm1036_vm1, %v9723_v0 }
0x200e   : > { %16576 = vmatprep.subr.msk.mxu1 %vm1036_vm1, %v9733_v29  ;;  %v16535_v45 = vpop.f32.mrf.mxu1 }
0x2010   : > { %v9743_v61 = vpop.f32.mrf.mxu1  ;;  %16570 = vmatpush3.xpose.msk.msra.mxu0 %vm1036_vm1, %v9723_v0 }
0x2011   : > { %16577 = vmatpush3.xpose.msk.msra.mxu1 %vm1036_vm1, %v9733_v29  ;;  %16581 = vmatprep.subr.msk.mxu0 %vm1036_vm1, %v16535_v45 }
0x2012   : > { %v16550_v48 = vpop.f32.mrf.mxu1 }
0x2013   : > { %16572 = vmatmul.mubr.msk.f32.vlgmr.msra.gmra.mxu0 %vm1036_vm1, %v16505_v15  ;;  %16588 = vmatprep.subr.mxu1 %v16550_v48 }
0x2014   : > { %16579 = vmatmul.mubr.msk.f32.vlgmr.msra.gmra.mxu1 %vm1036_vm1, %v16508_v2  ;;  %v9825_v7 = vpop.f32.mrf.mxu1  ;;  %16582 = vmatpush3.xpose.msk.msra.mxu0 %vm1036_vm1, %v16535_v45 }
0x2015   : > { %16585 = vmatprep.mubr.msk.f32.mxu0 %vm1036_vm1, %v9631_v23  ;;  %16589 = vmatpush3.msra.mxu1 %v16550_v48 }
0x2016   : > { %16583 = vmatprep.subr.msk.mxu0 %vm1036_vm1, %v9743_v61  ;;  %16590 = vmatprep.subr.mxu1 %v9825_v7  ;;  %v19903_v50 = vpop.f32.mrf.mxu1 }
0x2017   : > { %16591 = vmatpush3.msra.mxu1 %v9825_v7 }
0x2018   : > { %16595 = vmatprep.subr.mxu1 %v19903_v50  ;;  %v19906_v60 = vpop.f32.mrf.mxu1  ;;  %16584 = vmatpush3.xpose.msk.msra.mxu0 %vm1036_vm1, %v9743_v61 }
0x201a   : > { %v16556_v53 = vpop.f32.mrf.mxu1 }
0x201b   : > { %16586 = vmatmul.mubr.msk.f32.vlgmr.msra.gmra.mxu0 %vm1036_vm1, %v16511_v1  ;;  %16602 = vmatprep.subr.mxu0 %v16556_v53 }
0x201c   : > { %v9845_v19 = vpop.f32.mrf.mxu1  ;;  %16603 = vmatpush3.msra.mxu0 %v16556_v53 }
0x201d   : > { %16604 = vmatprep.subr.mxu0 %v9845_v19 }
0x201e   : > { %16605 = vmatpush3.msra.mxu0 %v9845_v19  ;;  %v19913_v10 = vpop.f32.mrf.mxu1 }
0x2020   : > { %v19916_v18 = vpop.f32.mrf.mxu1 }
0x20cb   : > { %v16566_v6 = vpop.f32.mrf.mxu0 }
0x20cc   : > { %v10213_v39 = vmul.f32 0.14433756, %v16566_v6 }
0x20cd   : > { %v9942_v46 = vpop.f32.mrf.mxu0 }
0x20ce   : > { %v10221_v12 = vadd.f32 %v10213_v39, %v17814_v40  ;;  %v10212_v26 = vmul.f32 0.14433756, %v9942_v46 }
0x20d0   : > { %v10220_v28 = vadd.f32 %v10212_v26, %v17816_v44  ;;  %v10231_v21 = vsel %vm1036_vm1, %v10221_v12, -inf }
0x20d1   : > { %10232 = vmax.xlane.f32.xlu1 %v10231_v21 }
0x20d2   : > { %v10228_v51 = vsel %vm1036_vm1, %v10220_v28, -inf }
0x20d3   : > { %10229 = vmax.xlane.f32.xlu0 %v10228_v51  ;;  %v16573_v17 = vpop.f32.mrf.mxu0 }
0x20d4   : > { %v10215_v52 = vmul.f32 0.14433756, %v16573_v17  ;;  %v16580_v34 = vpop.f32.mrf.mxu1 }
0x20d5   : > { %v10029_v55 = vpop.f32.mrf.mxu0  ;;  %v10217_v9 = vmul.f32 0.14433756, %v16580_v34 }
0x20d6   : > { %v10223_v38 = vadd.f32 %v10215_v52, %v17814_v40  ;;  %v10214_v13 = vmul.f32 0.14433756, %v10029_v55  ;;  %v10116_v24 = vpop.f32.mrf.mxu1 }
0x20d7   : > { %v10216_v47 = vmul.f32 0.14433756, %v10116_v24  ;;  %v10225_v1 = vadd.f32 %v10217_v9, %v17814_v40 }
0x20d8   : > { %v10222_v41 = vadd.f32 %v10214_v13, %v17816_v44  ;;  %v10237_v30 = vsel %vm1036_vm1, %v10223_v38, -inf }
0x20d9   : > { %10238 = vmax.xlane.f32.xlu1 %v10237_v30  ;;  %v10224_v11 = vadd.f32 %v10216_v47, %v17816_v44  ;;  %v10243_v0 = vsel %vm1036_vm1, %v10225_v1, -inf }
0x20da   : > { %v10234_v22 = vsel %vm1036_vm1, %v10222_v41, -inf }
0x20db   : > { %10235 = vmax.xlane.f32.xlu0 %v10234_v22  ;;  %v16587_v54 = vpop.f32.mrf.mxu0  ;;  %v10240_v25 = vsel %vm1036_vm1, %v10224_v11, -inf }
0x20dc   : > { %v10219_v63 = vmul.f32 0.14433756, %v16587_v54 }
0x20dd   : > { %v10203_v15 = vpop.f32.mrf.mxu0 }
0x20de   : > { %v10227_v2 = vadd.f32 %v10219_v63, %v17814_v40  ;;  %v10218_v31 = vmul.f32 0.14433756, %v10203_v15 }
0x20e0   : > { %v10226_v23 = vadd.f32 %v10218_v31, %v17816_v44  ;;  %v10249_v3 = vsel %vm1036_vm1, %v10227_v2, -inf }
0x20e1   : > { %10250 = vmax.xlane.f32.xlu1 %v10249_v3 }
0x20e2   : > { %v10246_v43 = vsel %vm1036_vm1, %v10226_v23, -inf }
0x20e3   : > { %10247 = vmax.xlane.f32.xlu0 %v10246_v43 }
0x20e5   : > { %10244 = vmax.xlane.f32.xlu1 %v10243_v0 }
0x20e7   : > { %10241 = vmax.xlane.f32.xlu0 %v10240_v25 }
0x215a   : > { %v10233_v29 = vpop.xlane.xlu1 %10232 }
0x215b   : > { %v10253_v45 = vsub.f32 %v10221_v12, %v10233_v29 }
0x215c   : > { %v10230_v61 = vpop.xlane.xlu0 %10229 }
0x215d   : > { %v10262_v48 = vmul.f32 1.442695, %v10253_v45  ;;  %v10252_v7 = vsub.f32 %v10220_v28, %v10230_v61  ;;  %v14620_v45 = vld [vmem:[%s20804_s1 + $0x178] sm:$0xff] }
0x215e   : > { %16616 = vmatprep.subr.mxu0 %v14620_v45 }
0x215f   : > { %17259 = vpow2.f32 %v10262_v48  ;;  %v10260_v53 = vmul.f32 1.442695, %v10252_v7 }
0x2161   : > { %17261 = vpow2.f32 %v10260_v53 }
0x2162   : > { %v10239_v19 = vpop.xlane.xlu1 %10238 }
0x2163   : > { %v10255_v6 = vsub.f32 %v10223_v38, %v10239_v19 }
0x2164   : > { %v10236_v39 = vpop.xlane.xlu0 %10235 }
0x2165   : > { %v10266_v46 = vmul.f32 1.442695, %v10255_v6  ;;  %v10254_v26 = vsub.f32 %v10222_v41, %v10236_v39 }
0x2167   : > { %17263 = vpow2.f32 %v10266_v46  ;;  %v10264_v21 = vmul.f32 1.442695, %v10254_v26 }
0x2169   : > { %17265 = vpow2.f32 %v10264_v21 }
0x216a   : > { %v10251_v51 = vpop.xlane.xlu1 %10250 }
0x216b   : > { %v10259_v17 = vsub.f32 %v10227_v2, %v10251_v51 }
0x216c   : > { %v17260_v52 = vpop.eup %17259  ;;  %v10248_v55 = vpop.xlane.xlu0 %10247 }
0x216d   : > { %v10274_v13 = vmul.f32 1.442695, %v10259_v17  ;;  %v10258_v12 = vsub.f32 %v10226_v23, %v10248_v55  ;;  %v10279_v34 = vsel %vm1036_vm1, %v17260_v52, 0.0 }
0x216e   : > { %v17262_v28 = vpop.eup %17261  ;;  %10280 = vadd.xlane.f32.xlu1 %v10279_v34  ;;  %v10245_v30 = vpop.xlane.xlu1 %10244 }
0x216f   : > { %17267 = vpow2.f32 %v10274_v13  ;;  %v10272_v22 = vmul.f32 1.442695, %v10258_v12  ;;  %v10257_v38 = vsub.f32 %v10225_v1, %v10245_v30  ;;  %v10276_v24 = vsel %vm1036_vm1, %v17262_v28, 0.0 }
0x2170   : > { %10277 = vadd.xlane.f32.xlu0 %v10276_v24  ;;  %v10242_v41 = vpop.xlane.xlu0 %10241 }
0x2171   : > { %17269 = vpow2.f32 %v10272_v22  ;;  %v10270_v54 = vmul.f32 1.442695, %v10257_v38  ;;  %v10256_v9 = vsub.f32 %v10224_v11, %v10242_v41 }
0x2173   : > { %17271 = vpow2.f32 %v10270_v54  ;;  %v10268_v63 = vmul.f32 1.442695, %v10256_v9  ;;  %v14619_v54 = vld [vmem:[%s20804_s1 + $0x170] sm:$0xff]  ;;  %v14631_v9 = vld [vmem:[%s20776_s2 + $0x160] sm:$0xff] }
0x2174   : > { %v17264_v15 = vpop.eup %17263 }
0x2175   : > { %17273 = vpow2.f32 %v10268_v63  ;;  %v10285_v47 = vsel %vm1036_vm1, %v17264_v15, 0.0  ;;  %v14618_v63 = vld [vmem:[%s20804_s1 + $0x168] sm:$0xff] }
0x2176   : > { %v17266_v2 = vpop.eup %17265  ;;  %10286 = vadd.xlane.f32.xlu1 %v10285_v47  ;;  %v14617_v47 = vld [vmem:[%s20804_s1 + $0x160] sm:$0xff] }
0x2177   : > { %v10282_v31 = vsel %vm1036_vm1, %v17266_v2, 0.0 }
0x2178   : > { %10283 = vadd.xlane.f32.xlu0 %v10282_v31  ;;  %v14616_v31 = vld [vmem:[%s20804_s1 + $0x158] sm:$0xff] }
0x217c   : > { %v17268_v23 = vpop.eup %17267 }
0x217d   : > { %v10297_v1 = vsel %vm1036_vm1, %v17268_v23, 0.0 }
0x217e   : > { %v17270_v3 = vpop.eup %17269  ;;  %10298 = vadd.xlane.f32.xlu1 %v10297_v1  ;;  %v14648_v1 = vld [vmem:[%s20777_s3 + $0x178] sm:$0xff] }
0x217f   : > { %v10294_v43 = vsel %vm1036_vm1, %v17270_v3, 0.0 }
0x2180   : > { %v17272_v0 = vpop.eup %17271  ;;  %10295 = vadd.xlane.f32.xlu0 %v10294_v43  ;;  %v14646_v43 = vld [vmem:[%s20777_s3 + $0x168] sm:$0xff] }
0x2181   : > { %v10291_v11 = vsel %vm1036_vm1, %v17272_v0, 0.0 }
0x2182   : > { %v17274_v25 = vpop.eup %17273  ;;  %10292 = vadd.xlane.f32.xlu1 %v10291_v11  ;;  %v14644_v11 = vld [vmem:[%s20777_s3 + $0x158] sm:$0xff] }
0x2183   : > { %v10288_v29 = vsel %vm1036_vm1, %v17274_v25, 0.0 }
0x2184   : > { %10289 = vadd.xlane.f32.xlu0 %v10288_v29 }
0x21f7   : > { %v10281_v61 = vpop.xlane.xlu1 %10280 }
0x21f8   : > { %17275 = vrcp.f32 %v10281_v61 }
0x21f9   : > { %v10278_v48 = vpop.xlane.xlu0 %10277 }
0x21fa   : > { %17277 = vrcp.f32 %v10278_v48 }
0x21ff   : > { %v10287_v7 = vpop.xlane.xlu1 %10286 }
0x2200   : > { %17279 = vrcp.f32 %v10287_v7 }
0x2201   : > { %v10284_v53 = vpop.xlane.xlu0 %10283 }
0x2202   : > { %17281 = vrcp.f32 %v10284_v53 }
0x2205   : > { %v17276_v19 = vpop.eup %17275 }
0x2206   : > { %v10303_v26 = vmul.f32 %v17276_v19, %v17260_v52 }
0x2207   : > { %v17278_v6 = vpop.eup %17277  ;;  %v10299_v39 = vpop.xlane.xlu1 %10298 }
0x2208   : > { %v10301_v46 = vmul.f32 %v17278_v6, %v17262_v28  ;;  %17283 = vrcp.f32 %v10299_v39 }
0x2209   : > { %v10296_v21 = vpop.xlane.xlu0 %10295 }
0x220a   : > { %17285 = vrcp.f32 %v10296_v21  ;;  %16592 = vmatprep.mubr.msk.f32.mxu1 %vm1036_vm1, %v10301_v46 }
0x220b   : > { %v10293_v51 = vpop.xlane.xlu1 %10292  ;;  %16593 = vmatmul.mubr.msk.f32.vlgmr.msra.gmra.mxu1 %vm1036_vm1, %v10303_v26 }
0x220c   : > { %16596 = vmatpush3.msra.mxu1 %v19903_v50  ;;  %17287 = vrcp.f32 %v10293_v51  ;;  %v14634_v50 = vld [vmem:[%s20776_s2 + $0x178] sm:$0xff] }
0x220d   : > { %16597 = vmatprep.subr.mxu1 %v19906_v60  ;;  %v10290_v17 = vpop.xlane.xlu0 %10289  ;;  %v17280_v55 = vpop.eup %17279 }
0x220e   : > { %16598 = vmatpush3.msra.mxu1 %v19906_v60  ;;  %17289 = vrcp.f32 %v10290_v17  ;;  %v10307_v12 = vmul.f32 %v17280_v55, %v17264_v15  ;;  %v14630_v15 = vld [vmem:[%s20776_s2 + $0x158] sm:$0xff] }
0x220f   : > { %v17282_v13 = vpop.eup %17281  ;;  %16609 = vmatprep.subr.mxu1 %v19913_v10 }
0x2210   : > { %v10305_v52 = vmul.f32 %v17282_v13, %v17266_v2  ;;  %v14629_v2 = vld [vmem:[%s20776_s2 + $0x150] sm:$0xff] }
0x2212   : > { %16599 = vmatprep.mubr.msk.f32.mxu1 %vm1036_vm1, %v10305_v52 }
0x2213   : > { %16600 = vmatmul.mubr.msk.f32.vlgmr.msra.gmra.mxu1 %vm1036_vm1, %v10307_v12 }
0x2214   : > { %16610 = vmatpush3.msra.mxu1 %v19913_v10  ;;  %v14633_v10 = vld [vmem:[%s20776_s2 + $0x170] sm:$0xff] }
0x2215   : > { %16611 = vmatprep.subr.mxu1 %v19916_v18  ;;  %v17284_v34 = vpop.eup %17283 }
0x2216   : > { %16612 = vmatpush3.msra.mxu1 %v19916_v18  ;;  %v10315_v30 = vmul.f32 %v17284_v34, %v17268_v23  ;;  %v14632_v18 = vld [vmem:[%s20776_s2 + $0x168] sm:$0xff]  ;;  %v14615_v23 = vld [vmem:[%s20804_s1 + $0x150] sm:$0xff] }
0x2217   : > { %v17286_v60 = vpop.eup %17285  ;;  %16640 = vmatprep.subr.mxu1 %v14634_v50 }
0x2218   : > { %v10313_v28 = vmul.f32 %v17286_v60, %v17270_v3  ;;  %v14647_v3 = vld [vmem:[%s20777_s3 + $0x170] sm:$0xff] }
0x2219   : > { %v17288_v22 = vpop.eup %17287 }
0x221a   : > { %16613 = vmatprep.mubr.msk.f32.mxu1 %vm1036_vm1, %v10313_v28  ;;  %v10311_v41 = vmul.f32 %v17288_v22, %v17272_v0  ;;  %v14645_v0 = vld [vmem:[%s20777_s3 + $0x160] sm:$0xff] }
0x221b   : > { %v17290_v38 = vpop.eup %17289  ;;  %16614 = vmatmul.mubr.msk.f32.vlgmr.msra.gmra.mxu1 %vm1036_vm1, %v10315_v30 }
0x221c   : > { %16641 = vmatpush3.msra.mxu1 %v14634_v50  ;;  %16652 = vmatprep.mubr.msk.f32.mxu1 %vm545_vm0, %v19763_v57  ;;  %v10309_v24 = vmul.f32 %v17290_v38, %v17274_v25  ;;  %v14643_v25 = vld [vmem:[%s20777_s3 + $0x150] sm:$0xff] }
0x221d   : > { %16642 = vmatprep.subr.mxu1 %v14633_v10 }
0x221e   : > { %16643 = vmatpush3.msra.mxu1 %v14633_v10  ;;  %16606 = vmatprep.mubr.msk.f32.mxu0 %vm1036_vm1, %v10309_v24 }
0x221f   : > { %16644 = vmatprep.subr.mxu1 %v14632_v18  ;;  %16607 = vmatmul.mubr.msk.f32.vlgmr.msra.gmra.mxu0 %vm1036_vm1, %v10311_v41 }
0x2220   : > { %16617 = vmatpush3.msra.mxu0 %v14620_v45  ;;  %16645 = vmatpush3.msra.mxu1 %v14632_v18 }
0x2221   : > { %16618 = vmatprep.subr.mxu0 %v14619_v54  ;;  %16628 = vmatprep.mubr.msk.f32.mxu0 %vm545_vm0, %v19763_v57 }
0x2222   : > { %16646 = vmatprep.subr.mxu1 %v14631_v9  ;;  %16619 = vmatpush3.msra.mxu0 %v14619_v54 }
0x2223   : > { %16647 = vmatpush3.msra.mxu1 %v14631_v9  ;;  %16620 = vmatprep.subr.mxu0 %v14618_v63 }
0x2224   : > { %16648 = vmatprep.subr.mxu1 %v14630_v15  ;;  %16621 = vmatpush3.msra.mxu0 %v14618_v63 }
0x2225   : > { %16649 = vmatpush3.msra.mxu1 %v14630_v15  ;;  %16622 = vmatprep.subr.mxu0 %v14617_v47 }
0x2226   : > { %16650 = vmatprep.subr.mxu1 %v14629_v2  ;;  %16623 = vmatpush3.msra.mxu0 %v14617_v47 }
0x2227   : > { %16651 = vmatpush3.msra.mxu1 %v14629_v2  ;;  %16624 = vmatprep.subr.mxu0 %v14616_v31 }
0x2228   : > { %16653 = vmatmul.mubr.msk.f32.vlgmr.msra.gmra.mxu1 %vm545_vm0, %v19770_v4  ;;  %16625 = vmatpush3.msra.mxu0 %v14616_v31 }
0x2229   : > { %16655 = vmatprep.mubr.msk.f32.mxu1 %vm545_vm0, %v19783_v8  ;;  %16626 = vmatprep.subr.mxu0 %v14615_v23 }
0x222a   : > { %16627 = vmatpush3.msra.mxu0 %v14615_v23 }
0x222b   : > { %16629 = vmatmul.mubr.msk.f32.vlgmr.msra.gmra.mxu0 %vm545_vm0, %v19770_v4  ;;  %16664 = vmatprep.subr.mxu0 %v14648_v1 }
0x222c   : > { %16656 = vmatmul.mubr.msk.f32.gmra.mxu1 %vm545_vm0, %v19796_v42  ;;  %16631 = vmatprep.mubr.msk.f32.mxu0 %vm545_vm0, %v19783_v8 }
0x222d   : > { %16658 = vmatprep.mubr.msk.f32.mxu1 %vm545_vm0, %v19809_v33  ;;  %16665 = vmatpush3.msra.mxu0 %v14648_v1 }
0x222e   : > { %16666 = vmatprep.subr.mxu0 %v14647_v3 }
0x222f   : > { %16632 = vmatmul.mubr.msk.f32.gmra.mxu0 %vm545_vm0, %v19796_v42 }
0x2230   : > { %16659 = vmatmul.mubr.msk.f32.gmra.mxu1 %vm545_vm0, %v19816_v58  ;;  %16634 = vmatprep.mubr.msk.f32.mxu0 %vm545_vm0, %v19809_v33 }
0x2231   : > { %16661 = vmatprep.mubr.msk.f32.mxu1 %vm545_vm0, %v19823_v5  ;;  %16667 = vmatpush3.msra.mxu0 %v14647_v3 }
0x2232   : > { %16668 = vmatprep.subr.mxu0 %v14646_v43 }
0x2233   : > { %16635 = vmatmul.mubr.msk.f32.gmra.mxu0 %vm545_vm0, %v19816_v58 }
0x2234   : > { %16662 = vmatmul.mubr.msk.f32.gmra.mxu1 %vm545_vm0, %v19830_v32  ;;  %16637 = vmatprep.mubr.msk.f32.mxu0 %vm545_vm0, %v19823_v5 }
0x2235   : > { %16669 = vmatpush3.msra.mxu0 %v14646_v43 }
0x2236   : > { %16670 = vmatprep.subr.mxu0 %v14645_v0 }
0x2237   : > { %16671 = vmatpush3.msra.mxu0 %v14645_v0 }
0x2238   : > { %16638 = vmatmul.mubr.msk.f32.gmra.mxu0 %vm545_vm0, %v19830_v32  ;;  %16672 = vmatprep.subr.mxu0 %v14644_v11 }
0x2239   : > { %16673 = vmatpush3.msra.mxu0 %v14644_v11  ;;  %16676 = vmatprep.mubr.msk.f32.mxu0 %vm545_vm0, %v19763_v57 }
0x223a   : > { %16674 = vmatprep.subr.mxu0 %v14643_v25 }
0x223b   : > { %16675 = vmatpush3.msra.mxu0 %v14643_v25 }
0x223c   : > { %16677 = vmatmul.mubr.msk.f32.vlgmr.msra.gmra.mxu0 %vm545_vm0, %v19770_v4 }
0x223d   : > { %16679 = vmatprep.mubr.msk.f32.mxu0 %vm545_vm0, %v19783_v8 }
0x2240   : > { %16680 = vmatmul.mubr.msk.f32.gmra.mxu0 %vm545_vm0, %v19796_v42 }
0x2241   : > { %16682 = vmatprep.mubr.msk.f32.mxu0 %vm545_vm0, %v19809_v33 }
0x2244   : > { %16683 = vmatmul.mubr.msk.f32.gmra.mxu0 %vm545_vm0, %v19816_v58 }
0x2245   : > { %16685 = vmatprep.mubr.msk.f32.mxu0 %vm545_vm0, %v19823_v5 }
0x2248   : > { %16686 = vmatmul.mubr.msk.f32.gmra.mxu0 %vm545_vm0, %v19830_v32 }
0x22cb   : > { %v20055_v29 = vpop.f32.mrf.mxu1 }
0x22cd   : > { %v20057_v45 = vpop.f32.mrf.mxu1 }
0x22d3   : > { %v20059_v61 = vpop.f32.mrf.mxu1 }
0x22d5   : > { %v20061_v48 = vpop.f32.mrf.mxu1 }
0x22db   : > { %v20063_v7 = vpop.f32.mrf.mxu1 }
0x22dd   : > { %v20067_v19 = vpop.f32.mrf.mxu1 }
0x22df   : > { %v20065_v53 = vpop.f32.mrf.mxu0 }
0x22e1   : > { %v20069_v39 = vpop.f32.mrf.mxu0 }
0x22e8   : > { %v16654_v6 = vpop.f32.mrf.mxu1 }
0x22e9   : > { %16688 = vmatprep.subr.msk.mxu1 %vm1036_vm1, %v16654_v6 }
0x22ea   : > { %v10828_v46 = vpop.f32.mrf.mxu1  ;;  %16689 = vmatpush3.xpose.msk.msra.mxu1 %vm1036_vm1, %v16654_v6 }
0x22eb   : > { %16690 = vmatprep.subr.msk.mxu1 %vm1036_vm1, %v10828_v46  ;;  %v16630_v26 = vpop.f32.mrf.mxu0 }
0x22ec   : > { %v16657_v21 = vpop.f32.mrf.mxu1 }
0x22ed   : > { %v10716_v51 = vpop.f32.mrf.mxu0 }
0x22ee   : > { %v10838_v17 = vpop.f32.mrf.mxu1  ;;  %16691 = vmatpush3.xpose.msk.msra.mxu1 %vm1036_vm1, %v10828_v46  ;;  %16692 = vmatprep.mubr.msk.f32.mxu1 %vm1036_vm1, %v10716_v51 }
0x22ef   : > { %16695 = vmatprep.subr.msk.mxu1 %vm1036_vm1, %v16657_v21  ;;  %v16633_v55 = vpop.f32.mrf.mxu0 }
0x22f0   : > { %v16660_v13 = vpop.f32.mrf.mxu1 }
0x22f1   : > { %16693 = vmatmul.mubr.msk.f32.vlgmr.msra.gmra.mxu1 %vm1036_vm1, %v16630_v26  ;;  %16702 = vmatprep.subr.msk.mxu0 %vm1036_vm1, %v16660_v13  ;;  %v10726_v52 = vpop.f32.mrf.mxu0 }
0x22f2   : > { %v10848_v12 = vpop.f32.mrf.mxu1  ;;  %16696 = vmatpush3.xpose.msk.msra.mxu1 %vm1036_vm1, %v16657_v21  ;;  %16703 = vmatpush3.xpose.msk.msra.mxu0 %vm1036_vm1, %v16660_v13 }
0x22f3   : > { %16697 = vmatprep.subr.msk.mxu1 %vm1036_vm1, %v10838_v17  ;;  %16699 = vmatprep.mubr.msk.f32.mxu1 %vm1036_vm1, %v10726_v52  ;;  %v16636_v50 = vpop.f32.mrf.mxu0 }
0x22f4   : > { %16704 = vmatprep.subr.msk.mxu0 %vm1036_vm1, %v10848_v12  ;;  %v16663_v60 = vpop.f32.mrf.mxu1 }
0x22f5   : > { %v10736_v34 = vpop.f32.mrf.mxu0 }
0x22f6   : > { %16698 = vmatpush3.xpose.msk.msra.mxu1 %vm1036_vm1, %v10838_v17  ;;  %16705 = vmatpush3.xpose.msk.msra.mxu0 %vm1036_vm1, %v10848_v12  ;;  %v10858_v30 = vpop.f32.mrf.mxu1 }
0x22f7   : > { %16706 = vmatprep.mubr.msk.f32.mxu0 %vm1036_vm1, %v10736_v34  ;;  %16709 = vmatprep.subr.msk.mxu1 %vm1036_vm1, %v16663_v60 }
0x22f8   : > { %v16639_v28 = vpop.f32.mrf.mxu0 }
0x22f9   : > { %16700 = vmatmul.mubr.msk.f32.vlgmr.msra.gmra.mxu1 %vm1036_vm1, %v16633_v55  ;;  %16707 = vmatmul.mubr.msk.f32.vlgmr.msra.gmra.mxu0 %vm1036_vm1, %v16636_v50 }
0x22fa   : > { %v10746_v22 = vpop.f32.mrf.mxu0  ;;  %16710 = vmatpush3.xpose.msk.msra.mxu1 %vm1036_vm1, %v16663_v60 }
0x22fb   : > { %16711 = vmatprep.subr.msk.mxu1 %vm1036_vm1, %v10858_v30  ;;  %16713 = vmatprep.mubr.msk.f32.mxu1 %vm1036_vm1, %v10746_v22 }
0x22fc   : > { %v16678_v10 = vpop.f32.mrf.mxu0 }
0x22fd   : > { %16716 = vmatprep.subr.mxu0 %v16678_v10 }
0x22fe   : > { %v10940_v38 = vpop.f32.mrf.mxu0  ;;  %16712 = vmatpush3.xpose.msk.msra.mxu1 %vm1036_vm1, %v10858_v30  ;;  %16717 = vmatpush3.msra.mxu0 %v16678_v10 }
0x22ff   : > { %16718 = vmatprep.subr.mxu0 %v10940_v38 }
0x2300   : > { %v16681_v24 = vpop.f32.mrf.mxu0  ;;  %16719 = vmatpush3.msra.mxu0 %v10940_v38 }
0x2301   : > { %16714 = vmatmul.mubr.msk.f32.vlgmr.msra.gmra.mxu1 %vm1036_vm1, %v16639_v28  ;;  %16723 = vmatprep.subr.mxu1 %v16681_v24 }
0x2302   : > { %v10950_v18 = vpop.f32.mrf.mxu0  ;;  %16724 = vmatpush3.msra.mxu1 %v16681_v24 }
0x2303   : > { %16725 = vmatprep.subr.mxu1 %v10950_v18 }
0x2304   : > { %v20095_v41 = vpop.f32.mrf.mxu0  ;;  %16726 = vmatpush3.msra.mxu1 %v10950_v18 }
0x2305   : > { %16730 = vmatprep.subr.mxu0 %v20095_v41 }
0x2306   : > { %v20098_v54 = vpop.f32.mrf.mxu0 }
0x2308   : > { %v20100_v9 = vpop.f32.mrf.mxu0 }
0x2309   : > { %16737 = vmatprep.subr.mxu1 %v20100_v9 }
0x230a   : > { %v20106_v3 = vpop.f32.mrf.mxu0 }
0x23b1   : > { %v16694_v63 = vpop.f32.mrf.mxu1 }
0x23b2   : > { %v11328_v15 = vmul.f32 0.14433756, %v16694_v63 }
0x23b3   : > { %v11057_v47 = vpop.f32.mrf.mxu1 }
0x23b4   : > { %v11336_v2 = vadd.f32 %v11328_v15, %v17814_v40  ;;  %v11327_v31 = vmul.f32 0.14433756, %v11057_v47 }
0x23b6   : > { %v11335_v23 = vadd.f32 %v11327_v31, %v17816_v44  ;;  %v11346_v1 = vsel %vm1036_vm1, %v11336_v2, -inf }
0x23b7   : > { %11347 = vmax.xlane.f32.xlu1 %v11346_v1 }
0x23b8   : > { %v11343_v43 = vsel %vm1036_vm1, %v11335_v23, -inf }
0x23b9   : > { %11344 = vmax.xlane.f32.xlu0 %v11343_v43  ;;  %v16701_v0 = vpop.f32.mrf.mxu1  ;;  %v16708_v11 = vpop.f32.mrf.mxu0 }
0x23ba   : > { %v11330_v25 = vmul.f32 0.14433756, %v16701_v0  ;;  %v11332_v6 = vmul.f32 0.14433756, %v16708_v11 }
0x23bb   : > { %v11144_v46 = vpop.f32.mrf.mxu1  ;;  %v11231_v26 = vpop.f32.mrf.mxu0 }
0x23bc   : > { %v11338_v21 = vadd.f32 %v11330_v25, %v17814_v40  ;;  %v11329_v51 = vmul.f32 0.14433756, %v11144_v46  ;;  %v11331_v17 = vmul.f32 0.14433756, %v11231_v26  ;;  %v11340_v55 = vadd.f32 %v11332_v6, %v17814_v40 }
0x23be   : > { %v11337_v13 = vadd.f32 %v11329_v51, %v17816_v44  ;;  %v11352_v52 = vsel %vm1036_vm1, %v11338_v21, -inf  ;;  %v11339_v12 = vadd.f32 %v11331_v17, %v17816_v44  ;;  %v11358_v28 = vsel %vm1036_vm1, %v11340_v55, -inf }
0x23bf   : > { %11353 = vmax.xlane.f32.xlu1 %v11352_v52 }
0x23c0   : > { %v11349_v50 = vsel %vm1036_vm1, %v11337_v13, -inf  ;;  %v11355_v38 = vsel %vm1036_vm1, %v11339_v12, -inf }
0x23c1   : > { %11350 = vmax.xlane.f32.xlu0 %v11349_v50  ;;  %v16715_v34 = vpop.f32.mrf.mxu1 }
0x23c2   : > { %v11334_v60 = vmul.f32 0.14433756, %v16715_v34 }
0x23c3   : > { %v11318_v30 = vpop.f32.mrf.mxu1  ;;  %11359 = vmax.xlane.f32.xlu1 %v11358_v28 }
0x23c4   : > { %v11342_v22 = vadd.f32 %v11334_v60, %v17814_v40  ;;  %v11333_v10 = vmul.f32 0.14433756, %v11318_v30 }
0x23c5   : > { %11356 = vmax.xlane.f32.xlu0 %v11355_v38 }
0x23c6   : > { %v11341_v24 = vadd.f32 %v11333_v10, %v17816_v44  ;;  %v11364_v18 = vsel %vm1036_vm1, %v11342_v22, -inf }
0x23c7   : > { %11365 = vmax.xlane.f32.xlu1 %v11364_v18 }
0x23c8   : > { %v11361_v63 = vsel %vm1036_vm1, %v11341_v24, -inf }
0x23c9   : > { %11362 = vmax.xlane.f32.xlu0 %v11361_v63 }
0x2440   : > { %v11348_v15 = vpop.xlane.xlu1 %11347 }
0x2441   : > { %v11368_v47 = vsub.f32 %v11336_v2, %v11348_v15 }
0x2442   : > { %v11345_v31 = vpop.xlane.xlu0 %11344 }
0x2443   : > { %v11377_v1 = vmul.f32 1.442695, %v11368_v47  ;;  %v11367_v43 = vsub.f32 %v11335_v23, %v11345_v31 }
0x2445   : > { %17291 = vpow2.f32 %v11377_v1  ;;  %v11375_v0 = vmul.f32 1.442695, %v11367_v43 }
0x2447   : > { %17293 = vpow2.f32 %v11375_v0 }
0x2448   : > { %v11354_v11 = vpop.xlane.xlu1 %11353 }
0x2449   : > { %v11370_v25 = vsub.f32 %v11338_v21, %v11354_v11 }
0x244a   : > { %v11351_v6 = vpop.xlane.xlu0 %11350 }
0x244b   : > { %v11381_v46 = vmul.f32 1.442695, %v11370_v25  ;;  %v11369_v26 = vsub.f32 %v11337_v13, %v11351_v6 }
0x244c   : > { %v11360_v51 = vpop.xlane.xlu1 %11359 }
0x244d   : > { %17295 = vpow2.f32 %v11381_v46  ;;  %v11379_v17 = vmul.f32 1.442695, %v11369_v26  ;;  %v11372_v52 = vsub.f32 %v11340_v55, %v11360_v51 }
0x244e   : > { %v11357_v50 = vpop.xlane.xlu0 %11356 }
0x244f   : > { %17297 = vpow2.f32 %v11379_v17  ;;  %v11385_v34 = vmul.f32 1.442695, %v11372_v52  ;;  %v11371_v60 = vsub.f32 %v11339_v12, %v11357_v50 }
0x2450   : > { %v11366_v2 = vpop.xlane.xlu1 %11365 }
0x2451   : > { %17299 = vpow2.f32 %v11385_v34  ;;  %v11383_v28 = vmul.f32 1.442695, %v11371_v60  ;;  %v11374_v23 = vsub.f32 %v11342_v22, %v11366_v2 }
0x2452   : > { %v17292_v30 = vpop.eup %17291  ;;  %v11363_v10 = vpop.xlane.xlu0 %11362 }
0x2453   : > { %17301 = vpow2.f32 %v11383_v28  ;;  %v11389_v38 = vmul.f32 1.442695, %v11374_v23  ;;  %v11373_v21 = vsub.f32 %v11341_v24, %v11363_v10  ;;  %v11394_v18 = vsel %vm1036_vm1, %v17292_v30, 0.0 }
0x2454   : > { %v17294_v13 = vpop.eup %17293  ;;  %11395 = vadd.xlane.f32.xlu1 %v11394_v18 }
0x2455   : > { %17303 = vpow2.f32 %v11389_v38  ;;  %v11387_v63 = vmul.f32 1.442695, %v11373_v21  ;;  %v11391_v55 = vsel %vm1036_vm1, %v17294_v13, 0.0 }
0x2456   : > { %11392 = vadd.xlane.f32.xlu0 %v11391_v55 }
0x2457   : > { %17305 = vpow2.f32 %v11387_v63 }
0x245a   : > { %v17296_v12 = vpop.eup %17295 }
0x245b   : > { %v11400_v15 = vsel %vm1036_vm1, %v17296_v12, 0.0 }
0x245c   : > { %v17298_v47 = vpop.eup %17297  ;;  %11401 = vadd.xlane.f32.xlu1 %v11400_v15 }
0x245d   : > { %v11397_v22 = vsel %vm1036_vm1, %v17298_v47, 0.0 }
0x245e   : > { %v17300_v31 = vpop.eup %17299  ;;  %11398 = vadd.xlane.f32.xlu0 %v11397_v22 }
0x245f   : > { %v11406_v24 = vsel %vm1036_vm1, %v17300_v31, 0.0 }
0x2460   : > { %v17302_v1 = vpop.eup %17301  ;;  %11407 = vadd.xlane.f32.xlu1 %v11406_v24  ;;  %v14715_v24 = vld [vmem:[%s20776_s2 + $0x190] sm:$0xff] }
0x2461   : > { %v11403_v43 = vsel %vm1036_vm1, %v17302_v1, 0.0 }
0x2462   : > { %v17304_v0 = vpop.eup %17303  ;;  %11404 = vadd.xlane.f32.xlu0 %v11403_v43  ;;  %v14702_v43 = vld [vmem:[%s20804_s1 + $0x198] sm:$0xff] }
0x2463   : > { %v11412_v11 = vsel %vm1036_vm1, %v17304_v0, 0.0 }
0x2464   : > { %v17306_v25 = vpop.eup %17305  ;;  %11413 = vadd.xlane.f32.xlu1 %v11412_v11 }
0x2465   : > { %v11409_v6 = vsel %vm1036_vm1, %v17306_v25, 0.0 }
0x2466   : > { %11410 = vadd.xlane.f32.xlu0 %v11409_v6 }
0x24dd   : > { %v11396_v46 = vpop.xlane.xlu1 %11395 }
0x24de   : > { %17307 = vrcp.f32 %v11396_v46  ;;  %v14699_v46 = vld [vmem:[%s20804_s1 + $0x180] sm:$0xff] }
0x24df   : > { %v11393_v26 = vpop.xlane.xlu0 %11392 }
0x24e0   : > { %17309 = vrcp.f32 %v11393_v26 }
0x24e5   : > { %v11402_v51 = vpop.xlane.xlu1 %11401 }
0x24e6   : > { %17311 = vrcp.f32 %v11402_v51  ;;  %v14732_v51 = vld [vmem:[%s20777_s3 + $0x1a8] sm:$0xff] }
0x24e7   : > { %v11399_v17 = vpop.xlane.xlu0 %11398 }
0x24e8   : > { %17313 = vrcp.f32 %v11399_v17 }
0x24e9   : > { %v11408_v52 = vpop.xlane.xlu1 %11407 }
0x24ea   : > { %17315 = vrcp.f32 %v11408_v52 }
0x24eb   : > { %v11405_v50 = vpop.xlane.xlu0 %11404  ;;  %v17308_v34 = vpop.eup %17307 }
0x24ec   : > { %17317 = vrcp.f32 %v11405_v50  ;;  %v11418_v23 = vmul.f32 %v17308_v34, %v17292_v30 }
0x24ed   : > { %v17310_v60 = vpop.eup %17309  ;;  %v11414_v2 = vpop.xlane.xlu1 %11413 }
0x24ee   : > { %v11416_v28 = vmul.f32 %v17310_v60, %v17294_v13  ;;  %17319 = vrcp.f32 %v11414_v2  ;;  %v14731_v2 = vld [vmem:[%s20777_s3 + $0x1a0] sm:$0xff] }
0x24ef   : > { %v11411_v10 = vpop.xlane.xlu0 %11410 }
0x24f0   : > { %17321 = vrcp.f32 %v11411_v10  ;;  %16720 = vmatprep.mubr.msk.f32.mxu0 %vm1036_vm1, %v11416_v28 }
0x24f1   : > { %16721 = vmatmul.mubr.msk.f32.vlgmr.msra.gmra.mxu0 %vm1036_vm1, %v11418_v23  ;;  %v14730_v23 = vld [vmem:[%s20777_s3 + $0x198] sm:$0xff] }
0x24f2   : > { %16731 = vmatpush3.msra.mxu0 %v20095_v41  ;;  %v14614_v41 = vld [vmem:[%s20778_s4 + $0x68] sm:$0xff] }
0x24f3   : > { %16732 = vmatprep.subr.mxu0 %v20098_v54  ;;  %v17312_v38 = vpop.eup %17311 }
0x24f4   : > { %16733 = vmatpush3.msra.mxu0 %v20098_v54  ;;  %v11422_v63 = vmul.f32 %v17312_v38, %v17296_v12  ;;  %v14729_v38 = vld [vmem:[%s20777_s3 + $0x190] sm:$0xff] }
0x24f5   : > { %v17314_v21 = vpop.eup %17313 }
0x24f6   : > { %v11420_v18 = vmul.f32 %v17314_v21, %v17298_v47 }
0x24f7   : > { %v17316_v55 = vpop.eup %17315 }
0x24f8   : > { %16727 = vmatprep.mubr.msk.f32.mxu1 %vm1036_vm1, %v11420_v18  ;;  %v11426_v15 = vmul.f32 %v17316_v55, %v17300_v31  ;;  %v14717_v31 = vld [vmem:[%s20776_s2 + $0x1a0] sm:$0xff]  ;;  %v14728_v18 = vld [vmem:[%s20777_s3 + $0x188] sm:$0xff] }
0x24f9   : > { %v17318_v30 = vpop.eup %17317  ;;  %16728 = vmatmul.mubr.msk.f32.vlgmr.msra.gmra.mxu1 %vm1036_vm1, %v11422_v63  ;;  %v14727_v55 = vld [vmem:[%s20777_s3 + $0x180] sm:$0xff] }
0x24fa   : > { %16738 = vmatpush3.msra.mxu1 %v20100_v9  ;;  %v11424_v13 = vmul.f32 %v17318_v30, %v17302_v1  ;;  %v14613_v9 = vld [vmem:[%s20778_s4 + $0x60] sm:$0xff] }
0x24fb   : > { %16739 = vmatprep.subr.mxu1 %v20106_v3  ;;  %v17320_v54 = vpop.eup %17319  ;;  %v14703_v1 = vld [vmem:[%s20804_s1 + $0x1a0] sm:$0xff] }
0x24fc   : > { %16740 = vmatpush3.msra.mxu1 %v20106_v3  ;;  %16734 = vmatprep.mubr.msk.f32.mxu0 %vm1036_vm1, %v11424_v13  ;;  %v11430_v22 = vmul.f32 %v17320_v54, %v17304_v0  ;;  %v14718_v3 = vld [vmem:[%s20776_s2 + $0x1a8] sm:$0xff]  ;;  %v14701_v0 = vld [vmem:[%s20804_s1 + $0x190] sm:$0xff] }
0x24fd   : > { %v17322_v12 = vpop.eup %17321  ;;  %16735 = vmatmul.mubr.msk.f32.vlgmr.msra.gmra.mxu0 %vm1036_vm1, %v11426_v15  ;;  %16760 = vmatprep.subr.mxu1 %v14614_v41 }
0x24fe   : > { %v11428_v47 = vmul.f32 %v17322_v12, %v17306_v25  ;;  %v14700_v25 = vld [vmem:[%s20804_s1 + $0x188] sm:$0xff] }
0x2500   : > { %16741 = vmatprep.mubr.msk.f32.mxu1 %vm1036_vm1, %v11428_v47 }
0x2501   : > { %16742 = vmatmul.mubr.msk.f32.vlgmr.msra.gmra.mxu1 %vm1036_vm1, %v11430_v22 }
0x2502   : > { %16761 = vmatpush3.msra.mxu1 %v14614_v41  ;;  %16764 = vmatprep.mubr.msk.f32.mxu1 %vm1036_vm1, %v20057_v45  ;;  %v14716_v45 = vld [vmem:[%s20776_s2 + $0x198] sm:$0xff] }
0x2503   : > { %16762 = vmatprep.subr.mxu1 %v14613_v9 }
0x2504   : > { %16763 = vmatpush3.msra.mxu1 %v14613_v9 }
0x2505   : > { %16765 = vmatmul.mubr.msk.f32.vlgmr.msra.gmra.mxu1 %vm1036_vm1, %v20055_v29  ;;  %16800 = vmatprep.subr.mxu1 %v14718_v3  ;;  %v14714_v29 = vld [vmem:[%s20776_s2 + $0x188] sm:$0xff] }
0x2506   : > { %16767 = vmatprep.mubr.msk.f32.mxu1 %vm1036_vm1, %v20061_v48  ;;  %16801 = vmatpush3.msra.mxu1 %v14718_v3  ;;  %v14713_v48 = vld [vmem:[%s20776_s2 + $0x180] sm:$0xff] }
0x2507   : > { %16802 = vmatprep.subr.mxu1 %v14717_v31 }
0x2508   : > { %16803 = vmatpush3.msra.mxu1 %v14717_v31 }
0x2509   : > { %16768 = vmatmul.mubr.msk.f32.gmra.mxu1 %vm1036_vm1, %v20059_v61  ;;  %16804 = vmatprep.subr.mxu1 %v14716_v45  ;;  %v14682_v61 = vld [vmem:[%s20778_s4 + $0x78] sm:$0xff] }
0x250a   : > { %16770 = vmatprep.mubr.msk.f32.mxu1 %vm1036_vm1, %v20069_v39  ;;  %16805 = vmatpush3.msra.mxu1 %v14716_v45 }
0x250b   : > { %16806 = vmatprep.subr.mxu1 %v14715_v24  ;;  %16744 = vmatprep.subr.mxu0 %v14682_v61 }
0x250c   : > { %16807 = vmatpush3.msra.mxu1 %v14715_v24  ;;  %16745 = vmatpush3.msra.mxu0 %v14682_v61 }
0x250d   : > { %16771 = vmatmul.mubr.msk.f32.gmra.mxu1 %vm1036_vm1, %v20065_v53  ;;  %16808 = vmatprep.subr.mxu1 %v14714_v29  ;;  %v14704_v53 = vld [vmem:[%s20804_s1 + $0x1a8] sm:$0xff] }
0x250e   : > { %16773 = vmatprep.mubr.msk.f32.mxu1 %vm1036_vm1, %v20067_v19  ;;  %16809 = vmatpush3.msra.mxu1 %v14714_v29 }
0x250f   : > { %16810 = vmatprep.subr.mxu1 %v14713_v48 }
0x2510   : > { %16811 = vmatpush3.msra.mxu1 %v14713_v48 }
0x2511   : > { %16774 = vmatmul.mubr.msk.f32.gmra.mxu1 %vm1036_vm1, %v20063_v7  ;;  %v14681_v7 = vld [vmem:[%s20778_s4 + $0x70] sm:$0xff] }
0x2512   : > { %16812 = vmatprep.mubr.msk.f32.mxu1 %vm545_vm0, %v19763_v57  ;;  %16746 = vmatprep.subr.mxu0 %v14681_v7 }
0x2513   : > { %16747 = vmatpush3.msra.mxu0 %v14681_v7 }
0x2514   : > { %16776 = vmatprep.subr.mxu0 %v14704_v53 }
0x2515   : > { %16813 = vmatmul.mubr.msk.f32.vlgmr.msra.gmra.mxu1 %vm545_vm0, %v19770_v4 }
0x2516   : > { %16815 = vmatprep.mubr.msk.f32.mxu1 %vm545_vm0, %v19783_v8 }
0x2519   : > { %16816 = vmatmul.mubr.msk.f32.gmra.mxu1 %vm545_vm0, %v19796_v42 }
0x251a   : > { %16818 = vmatprep.mubr.msk.f32.mxu1 %vm545_vm0, %v19809_v33 }
0x251d   : > { %16819 = vmatmul.mubr.msk.f32.gmra.mxu1 %vm545_vm0, %v19816_v58 }
0x251e   : > { %16821 = vmatprep.mubr.msk.f32.mxu1 %vm545_vm0, %v19823_v5 }
0x2521   : > { %16822 = vmatmul.mubr.msk.f32.gmra.mxu1 %vm545_vm0, %v19830_v32 }
0x25b1   : > { %v16722_v19 = vpop.f32.mrf.mxu0 }
0x25b3   : > { %v11503_v39 = vpop.f32.mrf.mxu0 }
0x25b4   : > { %16748 = vmatprep.mubr.msk.f32.mxu0 %vm1036_vm1, %v11503_v39 }
0x25b5   : > { %16749 = vmatmul.mubr.msk.f32.vlgmr.msra.gmra.mxu0 %vm1036_vm1, %v16722_v19 }
0x25b6   : > { %16777 = vmatpush3.msra.mxu0 %v14704_v53 }
0x25b7   : > { %16778 = vmatprep.subr.mxu0 %v14703_v1 }
0x25b8   : > { %16779 = vmatpush3.msra.mxu0 %v14703_v1 }
0x25b9   : > { %v16729_v11 = vpop.f32.mrf.mxu1  ;;  %16780 = vmatprep.subr.mxu0 %v14702_v43 }
0x25ba   : > { %16781 = vmatpush3.msra.mxu0 %v14702_v43 }
0x25bb   : > { %v11584_v6 = vpop.f32.mrf.mxu1  ;;  %16782 = vmatprep.subr.mxu0 %v14701_v0 }
0x25bc   : > { %16751 = vmatprep.mubr.msk.f32.mxu0 %vm1036_vm1, %v11584_v6  ;;  %16783 = vmatpush3.msra.mxu0 %v14701_v0 }
0x25bd   : > { %v16736_v26 = vpop.f32.mrf.mxu0  ;;  %16752 = vmatmul.mubr.msk.f32.gmra.mxu0 %vm1036_vm1, %v16729_v11  ;;  %16784 = vmatprep.subr.mxu0 %v14700_v25 }
0x25be   : > { %16785 = vmatpush3.msra.mxu0 %v14700_v25 }
0x25bf   : > { %v11665_v17 = vpop.f32.mrf.mxu0  ;;  %16786 = vmatprep.subr.mxu0 %v14699_v46 }
0x25c0   : > { %16754 = vmatprep.mubr.msk.f32.mxu0 %vm1036_vm1, %v11665_v17  ;;  %16787 = vmatpush3.msra.mxu0 %v14699_v46 }
0x25c1   : > { %v16743_v52 = vpop.f32.mrf.mxu1  ;;  %16755 = vmatmul.mubr.msk.f32.gmra.mxu0 %vm1036_vm1, %v16736_v26  ;;  %16824 = vmatprep.subr.mxu0 %v14732_v51 }
0x25c3   : > { %v11746_v50 = vpop.f32.mrf.mxu1 }
0x25c4   : > { %16757 = vmatprep.mubr.msk.f32.mxu0 %vm1036_vm1, %v11746_v50 }
0x25c5   : > { %16758 = vmatmul.mubr.msk.f32.gmra.mxu0 %vm1036_vm1, %v16743_v52  ;;  %v20234_v34 = vpop.f32.mrf.mxu1 }
0x25c6   : > { %16788 = vmatprep.mubr.msk.f32.mxu0 %vm545_vm0, %v19763_v57 }
0x25c7   : > { %v20238_v60 = vpop.f32.mrf.mxu1 }
0x25c9   : > { %v20243_v28 = vpop.f32.mrf.mxu1  ;;  %16789 = vmatmul.mubr.msk.f32.vlgmr.msra.gmra.mxu0 %vm545_vm0, %v19770_v4 }
0x25ca   : > { %16791 = vmatprep.mubr.msk.f32.mxu0 %vm545_vm0, %v19783_v8  ;;  %16825 = vmatpush3.msra.mxu0 %v14732_v51 }
0x25cb   : > { %v20252_v10 = vpop.f32.mrf.mxu1  ;;  %16826 = vmatprep.subr.mxu0 %v14731_v2 }
0x25cc   : > { %16827 = vmatpush3.msra.mxu0 %v14731_v2 }
0x25cd   : > { %v20257_v21 = vpop.f32.mrf.mxu1  ;;  %16792 = vmatmul.mubr.msk.f32.gmra.mxu0 %vm545_vm0, %v19796_v42  ;;  %16828 = vmatprep.subr.mxu0 %v14730_v23 }
0x25ce   : > { %16794 = vmatprep.mubr.msk.f32.mxu0 %vm545_vm0, %v19809_v33  ;;  %16829 = vmatpush3.msra.mxu0 %v14730_v23 }
0x25cf   : > { %v20266_v63 = vpop.f32.mrf.mxu1  ;;  %16830 = vmatprep.subr.mxu0 %v14729_v38 }
0x25d0   : > { %16831 = vmatpush3.msra.mxu0 %v14729_v38 }
0x25d1   : > { %v20271_v30 = vpop.f32.mrf.mxu1  ;;  %16795 = vmatmul.mubr.msk.f32.gmra.mxu0 %vm545_vm0, %v19816_v58  ;;  %16832 = vmatprep.subr.mxu0 %v14728_v18 }
0x25d2   : > { %16797 = vmatprep.mubr.msk.f32.mxu0 %vm545_vm0, %v19823_v5  ;;  %16833 = vmatpush3.msra.mxu0 %v14728_v18 }
0x25d3   : > { %v20277_v13 = vpop.f32.mrf.mxu1  ;;  %16834 = vmatprep.subr.mxu0 %v14727_v55 }
0x25d4   : > { %16835 = vmatpush3.msra.mxu0 %v14727_v55 }
0x25d5   : > { %16798 = vmatmul.mubr.msk.f32.gmra.mxu0 %vm545_vm0, %v19830_v32  ;;  %v16814_v41 = vpop.f32.mrf.mxu1 }
0x25d6   : > { %16836 = vmatprep.mubr.msk.f32.mxu0 %vm545_vm0, %v19763_v57  ;;  %16848 = vmatprep.subr.msk.mxu1 %vm1036_vm1, %v16814_v41 }
0x25d7   : > { %v12201_v15 = vpop.f32.mrf.mxu1  ;;  %16849 = vmatpush3.xpose.msk.msra.mxu1 %vm1036_vm1, %v16814_v41 }
0x25d8   : > { %16850 = vmatprep.subr.msk.mxu1 %vm1036_vm1, %v12201_v15 }
0x25d9   : > { %v16817_v54 = vpop.f32.mrf.mxu1  ;;  %16837 = vmatmul.mubr.msk.f32.vlgmr.msra.gmra.mxu0 %vm545_vm0, %v19770_v4 }
0x25da   : > { %16839 = vmatprep.mubr.msk.f32.mxu0 %vm545_vm0, %v19783_v8 }
0x25db   : > { %v12211_v12 = vpop.f32.mrf.mxu1  ;;  %16851 = vmatpush3.xpose.msk.msra.mxu1 %vm1036_vm1, %v12201_v15 }
0x25dc   : > { %16855 = vmatprep.subr.msk.mxu1 %vm1036_vm1, %v16817_v54 }
0x25dd   : > { %v16820_v57 = vpop.f32.mrf.mxu1  ;;  %16840 = vmatmul.mubr.msk.f32.gmra.mxu0 %vm545_vm0, %v19796_v42 }
0x25de   : > { %16842 = vmatprep.mubr.msk.f32.mxu0 %vm545_vm0, %v19809_v33  ;;  %16862 = vmatprep.subr.msk.mxu0 %vm1036_vm1, %v16820_v57 }
0x25df   : > { %v12221_v47 = vpop.f32.mrf.mxu1  ;;  %16863 = vmatpush3.xpose.msk.msra.mxu0 %vm1036_vm1, %v16820_v57 }
0x25e0   : > { %16864 = vmatprep.subr.msk.mxu0 %vm1036_vm1, %v12221_v47 }
0x25e1   : > { %16843 = vmatmul.mubr.msk.f32.gmra.mxu0 %vm545_vm0, %v19816_v58  ;;  %v16823_v29 = vpop.f32.mrf.mxu1 }
0x25e2   : > { %16845 = vmatprep.mubr.msk.f32.mxu0 %vm545_vm0, %v19823_v5 }
0x25e3   : > { %16865 = vmatpush3.xpose.msk.msra.mxu0 %vm1036_vm1, %v12221_v47  ;;  %v12231_v7 = vpop.f32.mrf.mxu1 }
0x25e5   : > { %16846 = vmatmul.mubr.msk.f32.gmra.mxu0 %vm545_vm0, %v19830_v32 }
0x2675   : > { %v20306_v4 = vpop.f32.mrf.mxu0 }
0x2677   : > { %v20308_v8 = vpop.f32.mrf.mxu0 }
0x267d   : > { %v20310_v42 = vpop.f32.mrf.mxu0 }
0x267f   : > { %v20312_v33 = vpop.f32.mrf.mxu0 }
0x2681   : > { %v20314_v22 = vpop.f32.mrf.mxu0 }
0x2683   : > { %v20316_v9 = vpop.f32.mrf.mxu0 }
0x2685   : > { %v20318_v58 = vpop.f32.mrf.mxu0 }
0x2687   : > { %v20320_v5 = vpop.f32.mrf.mxu0 }
0x2689   : > { %v16790_v3 = vpop.f32.mrf.mxu0 }
0x268b   : > { %v12089_v31 = vpop.f32.mrf.mxu0 }
0x268c   : > { %16852 = vmatprep.mubr.msk.f32.mxu1 %vm1036_vm1, %v12089_v31 }
0x268d   : > { %v16793_v32 = vpop.f32.mrf.mxu0  ;;  %16853 = vmatmul.mubr.msk.f32.vlgmr.msra.gmra.mxu1 %vm1036_vm1, %v16790_v3 }
0x268e   : > { %16856 = vmatpush3.xpose.msk.msra.mxu1 %vm1036_vm1, %v16817_v54 }
0x268f   : > { %16857 = vmatprep.subr.msk.mxu1 %vm1036_vm1, %v12211_v12  ;;  %v12099_v45 = vpop.f32.mrf.mxu0 }
0x2690   : > { %16859 = vmatprep.mubr.msk.f32.mxu1 %vm1036_vm1, %v12099_v45 }
0x2691   : > { %v16796_v24 = vpop.f32.mrf.mxu0 }
0x2692   : > { %16858 = vmatpush3.xpose.msk.msra.mxu1 %vm1036_vm1, %v12211_v12 }
0x2693   : > { %16869 = vmatprep.subr.msk.mxu1 %vm1036_vm1, %v16823_v29  ;;  %v12109_v48 = vpop.f32.mrf.mxu0 }
0x2694   : > { %16866 = vmatprep.mubr.msk.f32.mxu0 %vm1036_vm1, %v12109_v48 }
0x2695   : > { %16860 = vmatmul.mubr.msk.f32.vlgmr.msra.gmra.mxu1 %vm1036_vm1, %v16793_v32  ;;  %v16799_v61 = vpop.f32.mrf.mxu0  ;;  %16867 = vmatmul.mubr.msk.f32.vlgmr.msra.gmra.mxu0 %vm1036_vm1, %v16796_v24 }
0x2696   : > { %16870 = vmatpush3.xpose.msk.msra.mxu1 %vm1036_vm1, %v16823_v29 }
0x2697   : > { %16871 = vmatprep.subr.msk.mxu1 %vm1036_vm1, %v12231_v7  ;;  %v12119_v53 = vpop.f32.mrf.mxu0 }
0x2698   : > { %16873 = vmatprep.mubr.msk.f32.mxu1 %vm1036_vm1, %v12119_v53 }
0x2699   : > { %v16838_v19 = vpop.f32.mrf.mxu0 }
0x269a   : > { %16872 = vmatpush3.xpose.msk.msra.mxu1 %vm1036_vm1, %v12231_v7  ;;  %16876 = vmatprep.subr.mxu0 %v16838_v19 }
0x269b   : > { %v12313_v39 = vpop.f32.mrf.mxu0  ;;  %16877 = vmatpush3.msra.mxu0 %v16838_v19 }
0x269c   : > { %16878 = vmatprep.subr.mxu0 %v12313_v39 }
0x269d   : > { %16874 = vmatmul.mubr.msk.f32.vlgmr.msra.gmra.mxu1 %vm1036_vm1, %v16799_v61  ;;  %v16841_v1 = vpop.f32.mrf.mxu0  ;;  %16879 = vmatpush3.msra.mxu0 %v12313_v39 }
0x269e   : > { %16883 = vmatprep.subr.mxu1 %v16841_v1 }
0x269f   : > { %v12323_v43 = vpop.f32.mrf.mxu0  ;;  %16884 = vmatpush3.msra.mxu1 %v16841_v1 }
0x26a0   : > { %16885 = vmatprep.subr.mxu1 %v12323_v43 }
0x26a1   : > { %v20337_v0 = vpop.f32.mrf.mxu0  ;;  %16886 = vmatpush3.msra.mxu1 %v12323_v43 }
0x26a2   : > { %16890 = vmatprep.subr.mxu0 %v20337_v0 }
0x26a3   : > { %v20340_v11 = vpop.f32.mrf.mxu0 }
0x26a5   : > { %v20342_v25 = vpop.f32.mrf.mxu0 }
0x26a6   : > { %16897 = vmatprep.subr.mxu1 %v20342_v25 }
0x26a7   : > { %v20348_v2 = vpop.f32.mrf.mxu0 }
0x274d   : > { %v16854_v6 = vpop.f32.mrf.mxu1 }
0x274e   : > { %v12701_v46 = vmul.f32 0.14433756, %v16854_v6 }
0x274f   : > { %v12430_v26 = vpop.f32.mrf.mxu1 }
0x2750   : > { %v12709_v51 = vadd.f32 %v12701_v46, %v17814_v40  ;;  %v12700_v17 = vmul.f32 0.14433756, %v12430_v26 }
0x2752   : > { %v12708_v52 = vadd.f32 %v12700_v17, %v17816_v44  ;;  %v12719_v50 = vsel %vm1036_vm1, %v12709_v51, -inf }
0x2753   : > { %12720 = vmax.xlane.f32.xlu1 %v12719_v50 }
0x2754   : > { %v12716_v23 = vsel %vm1036_vm1, %v12708_v52, -inf }
0x2755   : > { %v16861_v38 = vpop.f32.mrf.mxu1  ;;  %12717 = vmax.xlane.f32.xlu0 %v12716_v23  ;;  %v16868_v18 = vpop.f32.mrf.mxu0 }
0x2756   : > { %v12703_v55 = vmul.f32 0.14433756, %v16861_v38  ;;  %v12705_v41 = vmul.f32 0.14433756, %v16868_v18 }
0x2757   : > { %v12517_v15 = vpop.f32.mrf.mxu1  ;;  %v12604_v54 = vpop.f32.mrf.mxu0 }
0x2758   : > { %v12711_v12 = vadd.f32 %v12703_v55, %v17814_v40  ;;  %v12702_v57 = vmul.f32 0.14433756, %v12517_v15  ;;  %v12704_v47 = vmul.f32 0.14433756, %v12604_v54  ;;  %v12713_v3 = vadd.f32 %v12705_v41, %v17814_v40 }
0x275a   : > { %v12710_v31 = vadd.f32 %v12702_v57, %v17816_v44  ;;  %v12725_v32 = vsel %vm1036_vm1, %v12711_v12, -inf  ;;  %v12712_v45 = vadd.f32 %v12704_v47, %v17816_v44  ;;  %v12731_v61 = vsel %vm1036_vm1, %v12713_v3, -inf }
0x275b   : > { %12726 = vmax.xlane.f32.xlu1 %v12725_v32 }
0x275c   : > { %v12722_v24 = vsel %vm1036_vm1, %v12710_v31, -inf  ;;  %v12728_v39 = vsel %vm1036_vm1, %v12712_v45, -inf }
0x275d   : > { %12723 = vmax.xlane.f32.xlu0 %v12722_v24  ;;  %v16875_v29 = vpop.f32.mrf.mxu1 }
0x275e   : > { %v12707_v48 = vmul.f32 0.14433756, %v16875_v29 }
0x275f   : > { %v12691_v7 = vpop.f32.mrf.mxu1  ;;  %12732 = vmax.xlane.f32.xlu1 %v12731_v61 }
0x2760   : > { %v12715_v53 = vadd.f32 %v12707_v48, %v17814_v40  ;;  %v12706_v19 = vmul.f32 0.14433756, %v12691_v7 }
0x2761   : > { %12729 = vmax.xlane.f32.xlu0 %v12728_v39 }
0x2762   : > { %v12714_v1 = vadd.f32 %v12706_v19, %v17816_v44  ;;  %v12737_v43 = vsel %vm1036_vm1, %v12715_v53, -inf }
0x2763   : > { %12738 = vmax.xlane.f32.xlu1 %v12737_v43 }
0x2764   : > { %v12734_v6 = vsel %vm1036_vm1, %v12714_v1, -inf }
0x2765   : > { %12735 = vmax.xlane.f32.xlu0 %v12734_v6 }
0x27dc   : > { %v12721_v46 = vpop.xlane.xlu1 %12720 }
0x27dd   : > { %v12741_v26 = vsub.f32 %v12709_v51, %v12721_v46 }
0x27de   : > { %v12718_v17 = vpop.xlane.xlu0 %12717 }
0x27df   : > { %v12750_v50 = vmul.f32 1.442695, %v12741_v26  ;;  %v12740_v23 = vsub.f32 %v12708_v52, %v12718_v17 }
0x27e1   : > { %17323 = vpow2.f32 %v12750_v50  ;;  %v12748_v38 = vmul.f32 1.442695, %v12740_v23 }
0x27e3   : > { %17325 = vpow2.f32 %v12748_v38 }
0x27e4   : > { %v12727_v40 = vpop.xlane.xlu1 %12726 }
0x27e5   : > { %v12743_v18 = vsub.f32 %v12711_v12, %v12727_v40 }
0x27e6   : > { %v12724_v55 = vpop.xlane.xlu0 %12723 }
0x27e7   : > { %v12754_v41 = vmul.f32 1.442695, %v12743_v18  ;;  %v12742_v15 = vsub.f32 %v12710_v31, %v12724_v55 }
0x27e8   : > { %v12733_v44 = vpop.xlane.xlu1 %12732 }
0x27e9   : > { %17327 = vpow2.f32 %v12754_v41  ;;  %v12752_v54 = vmul.f32 1.442695, %v12742_v15  ;;  %v12745_v57 = vsub.f32 %v12713_v3, %v12733_v44 }
0x27ea   : > { %v12730_v47 = vpop.xlane.xlu0 %12729 }
0x27eb   : > { %17329 = vpow2.f32 %v12752_v54  ;;  %v12758_v32 = vmul.f32 1.442695, %v12745_v57  ;;  %v12744_v24 = vsub.f32 %v12712_v45, %v12730_v47 }
0x27ec   : > { %v12739_v51 = vpop.xlane.xlu1 %12738 }
0x27ed   : > { %17331 = vpow2.f32 %v12758_v32  ;;  %v12756_v29 = vmul.f32 1.442695, %v12744_v24  ;;  %v12747_v52 = vsub.f32 %v12715_v53, %v12739_v51 }
0x27ee   : > { %v17324_v48 = vpop.eup %17323  ;;  %v12736_v61 = vpop.xlane.xlu0 %12735 }
0x27ef   : > { %17333 = vpow2.f32 %v12756_v29  ;;  %v12762_v7 = vmul.f32 1.442695, %v12747_v52  ;;  %v12746_v12 = vsub.f32 %v12714_v1, %v12736_v61  ;;  %v12767_v19 = vsel %vm1036_vm1, %v17324_v48, 0.0 }
0x27f0   : > { %v17326_v31 = vpop.eup %17325  ;;  %12768 = vadd.xlane.f32.xlu1 %v12767_v19 }
0x27f1   : > { %17335 = vpow2.f32 %v12762_v7  ;;  %v12760_v39 = vmul.f32 1.442695, %v12746_v12  ;;  %v12764_v3 = vsel %vm1036_vm1, %v17326_v31, 0.0 }
0x27f2   : > { %12765 = vadd.xlane.f32.xlu0 %v12764_v3 }
0x27f3   : > { %17337 = vpow2.f32 %v12760_v39 }
0x27f6   : > { %v17328_v45 = vpop.eup %17327 }
0x27f7   : > { %v12773_v43 = vsel %vm1036_vm1, %v17328_v45, 0.0 }
0x27f8   : > { %v17330_v6 = vpop.eup %17329  ;;  %12774 = vadd.xlane.f32.xlu1 %v12773_v43 }
0x27f9   : > { %v12770_v53 = vsel %vm1036_vm1, %v17330_v6, 0.0 }
0x27fa   : > { %v17332_v46 = vpop.eup %17331  ;;  %12771 = vadd.xlane.f32.xlu0 %v12770_v53 }
0x27fb   : > { %v12779_v1 = vsel %vm1036_vm1, %v17332_v46, 0.0 }
0x27fc   : > { %v17334_v26 = vpop.eup %17333  ;;  %12780 = vadd.xlane.f32.xlu1 %v12779_v1 }
0x27fd   : > { %v12776_v17 = vsel %vm1036_vm1, %v17334_v26, 0.0 }
0x27fe   : > { %v17336_v50 = vpop.eup %17335  ;;  %12777 = vadd.xlane.f32.xlu0 %v12776_v17 }
0x27ff   : > { %v12785_v23 = vsel %vm1036_vm1, %v17336_v50, 0.0 }
0x2800   : > { %v17338_v38 = vpop.eup %17337  ;;  %12786 = vadd.xlane.f32.xlu1 %v12785_v23  ;;  %v11983_v23 = vadd.f32 %v20234_v34, %v20306_v4  ;;  %v11993_v34 = vadd.f32 %v20243_v28, %v20310_v42 }
0x2801   : > { %v12782_v40 = vsel %vm1036_vm1, %v17338_v38, 0.0 }
0x2802   : > { %12783 = vadd.xlane.f32.xlu0 %v12782_v40  ;;  %v11978_v40 = vadd.f32 %v20238_v60, %v20308_v8 }
0x2879   : > { %v12769_v18 = vpop.xlane.xlu1 %12768 }
0x287a   : > { %17339 = vrcp.f32 %v12769_v18 }
0x287b   : > { %v12766_v55 = vpop.xlane.xlu0 %12765 }
0x287c   : > { %17341 = vrcp.f32 %v12766_v55  ;;  %v14776_v55 = vld [vmem:[%s20779_s5 + $0x2] ss:$0 sm:$0xff] }
0x2881   : > { %v12775_v41 = vpop.xlane.xlu1 %12774 }
0x2882   : > { %17343 = vrcp.f32 %v12775_v41 }
0x2883   : > { %v12772_v15 = vpop.xlane.xlu0 %12771 }
0x2884   : > { %17345 = vrcp.f32 %v12772_v15 }
0x2885   : > { %v12781_v44 = vpop.xlane.xlu1 %12780 }
0x2886   : > { %17347 = vrcp.f32 %v12781_v44 }
0x2887   : > { %v12778_v54 = vpop.xlane.xlu0 %12777  ;;  %v17340_v57 = vpop.eup %17339 }
0x2888   : > { %17349 = vrcp.f32 %v12778_v54  ;;  %v12791_v51 = vmul.f32 %v17340_v57, %v17324_v48 }
0x2889   : > { %v17342_v47 = vpop.eup %17341  ;;  %v12787_v32 = vpop.xlane.xlu1 %12786 }
0x288a   : > { %v12789_v24 = vmul.f32 %v17342_v47, %v17326_v31  ;;  %17351 = vrcp.f32 %v12787_v32  ;;  %v11988_v47 = vadd.f32 %v20252_v10, %v20312_v33 }
0x288b   : > { %v12784_v29 = vpop.xlane.xlu0 %12783 }
0x288c   : > { %17353 = vrcp.f32 %v12784_v29  ;;  %16880 = vmatprep.mubr.msk.f32.mxu0 %vm1036_vm1, %v12789_v24  ;;  %v11998_v29 = vadd.f32 %v20266_v63, %v20316_v9  ;;  %v12008_v63 = vadd.f32 %v20277_v13, %v20320_v5 }
0x288d   : > { %16881 = vmatmul.mubr.msk.f32.vlgmr.msra.gmra.mxu0 %vm1036_vm1, %v12791_v51 }
0x288e   : > { %16891 = vmatpush3.msra.mxu0 %v20337_v0 }
0x288f   : > { %16892 = vmatprep.subr.mxu0 %v20340_v11  ;;  %v17344_v52 = vpop.eup %17343 }
0x2890   : > { %16893 = vmatpush3.msra.mxu0 %v20340_v11  ;;  %v12795_v12 = vmul.f32 %v17344_v52, %v17328_v45 }
0x2891   : > { %v17346_v61 = vpop.eup %17345 }
0x2892   : > { %v12793_v7 = vmul.f32 %v17346_v61, %v17330_v6  ;;  %v12013_v61 = vadd.f32 %v20271_v30, %v20318_v58 }
0x2893   : > { %v17348_v19 = vpop.eup %17347 }
0x2894   : > { %16887 = vmatprep.mubr.msk.f32.mxu1 %vm1036_vm1, %v12793_v7  ;;  %v12799_v39 = vmul.f32 %v17348_v19, %v17332_v46 }
0x2895   : > { %v17350_v48 = vpop.eup %17349  ;;  %16888 = vmatmul.mubr.msk.f32.vlgmr.msra.gmra.mxu1 %vm1036_vm1, %v12795_v12 }
0x2896   : > { %16898 = vmatpush3.msra.mxu1 %v20342_v25  ;;  %v12797_v31 = vmul.f32 %v17350_v48, %v17334_v26  ;;  %v14766_v25 = vld [vmem:[%s20778_s4 + $0x88] sm:$0xff] }
0x2897   : > { %16899 = vmatprep.subr.mxu1 %v20348_v2  ;;  %v17352_v0 = vpop.eup %17351  ;;  %16904 = vmatprep.subr.mxu0 %v14766_v25 }
0x2898   : > { %16900 = vmatpush3.msra.mxu1 %v20348_v2  ;;  %16894 = vmatprep.mubr.msk.f32.mxu0 %vm1036_vm1, %v12797_v31  ;;  %v12803_v45 = vmul.f32 %v17352_v0, %v17336_v50  ;;  %v14765_v2 = vld [vmem:[%s20778_s4 + $0x80] sm:$0xff] }
0x2899   : > { %v17354_v11 = vpop.eup %17353  ;;  %16895 = vmatmul.mubr.msk.f32.vlgmr.msra.gmra.mxu0 %vm1036_vm1, %v12799_v39 }
0x289a   : > { %v12801_v3 = vmul.f32 %v17354_v11, %v17338_v38  ;;  %16905 = vmatpush3.msra.mxu0 %v14766_v25 }
0x289b   : > { %16906 = vmatprep.subr.mxu0 %v14765_v2 }
0x289c   : > { %16901 = vmatprep.mubr.msk.f32.mxu1 %vm1036_vm1, %v12801_v3  ;;  %16907 = vmatpush3.msra.mxu0 %v14765_v2 }
0x289d   : > { %16902 = vmatmul.mubr.msk.f32.vlgmr.msra.gmra.mxu1 %vm1036_vm1, %v12803_v45  ;;  %13656 = vmatprep.subr.mxu0 %v17442_v49 }
0x289e   : > { %13542 = vmatprep.mubr.f32.mxu1 %v17442_v49 }
0x294d   : > { %v16882_v43 = vpop.f32.mrf.mxu0 }
0x294f   : > { %v12876_v6 = vpop.f32.mrf.mxu0 }
0x2950   : > { %16908 = vmatprep.mubr.msk.f32.mxu0 %vm1036_vm1, %v12876_v6 }
0x2951   : > { %16909 = vmatmul.mubr.msk.f32.vlgmr.msra.gmra.mxu0 %vm1036_vm1, %v16882_v43 }
0x2955   : > { %v16889_v53 = vpop.f32.mrf.mxu1 }
0x2957   : > { %v12957_v46 = vpop.f32.mrf.mxu1 }
0x2958   : > { %16911 = vmatprep.mubr.msk.f32.mxu0 %vm1036_vm1, %v12957_v46 }
0x2959   : > { %v16896_v1 = vpop.f32.mrf.mxu0  ;;  %16912 = vmatmul.mubr.msk.f32.gmra.mxu0 %vm1036_vm1, %v16889_v53 }
0x295b   : > { %v13038_v26 = vpop.f32.mrf.mxu0 }
0x295c   : > { %16914 = vmatprep.mubr.msk.f32.mxu0 %vm1036_vm1, %v13038_v26 }
0x295d   : > { %v16903_v17 = vpop.f32.mrf.mxu1  ;;  %16915 = vmatmul.mubr.msk.f32.gmra.mxu0 %vm1036_vm1, %v16896_v1 }
0x295f   : > { %v13119_v50 = vpop.f32.mrf.mxu1 }
0x2960   : > { %16917 = vmatprep.mubr.msk.f32.mxu0 %vm1036_vm1, %v13119_v50 }
0x2961   : > { %16918 = vmatmul.mubr.msk.f32.gmra.mxu0 %vm1036_vm1, %v16903_v17 }
0x2a11   : > { %v16910_v38 = vpop.f32.mrf.mxu0 }
0x2a12   : > { %v13261_v18 = vadd.f32 %v16910_v38, %v11983_v23 }
0x2a13   : > { %v13221_v41 = vpop.f32.mrf.mxu0 }
0x2a14   : > { %v13269_v15 = vadd.f32 %v13261_v18, %v19647_v27  ;;  %v13260_v44 = vadd.f32 %v13221_v41, %v11978_v40 }
0x2a16   : > { %v20409_v54 = vadd.f32 %v14776_v55, %v13269_v15  ;;  %v13268_v57 = vadd.f32 %v13260_v44, %v19642_v20  ;;  %v12003_v20 = vadd.f32 %v20257_v21, %v20314_v22 }
0x2a18   : > { %v20414_v4 = vadd.f32 %v14776_v55, %v13268_v57  ;;  %v13299_v60 = vsel %vm545_vm0, %v20409_v54, 0.0 }
0x2a19   : > { %v16913_v8 = vpop.f32.mrf.mxu0  ;;  %13300 = vadd.xlane.f32.xlu1 %v13299_v60 }
0x2a1a   : > { %v13263_v32 = vadd.f32 %v16913_v8, %v11993_v34  ;;  %v13296_v27 = vsel %vm545_vm0, %v20414_v4, 0.0 }
0x2a1b   : > { %v13231_v24 = vpop.f32.mrf.mxu0  ;;  %13297 = vadd.xlane.f32.xlu0 %v13296_v27 }
0x2a1c   : > { %v13271_v28 = vadd.f32 %v13263_v32, %v19657_v56  ;;  %v13262_v42 = vadd.f32 %v13231_v24, %v11988_v47 }
0x2a1d   : > { %v16916_v51 = vpop.f32.mrf.mxu0 }
0x2a1e   : > { %v20427_v52 = vadd.f32 %v14776_v55, %v13271_v28  ;;  %v13270_v10 = vadd.f32 %v13262_v42, %v19652_v36  ;;  %v13265_v33 = vadd.f32 %v16916_v51, %v12003_v20 }
0x2a1f   : > { %v13241_v7 = vpop.f32.mrf.mxu0 }
0x2a20   : > { %v20432_v12 = vadd.f32 %v14776_v55, %v13270_v10  ;;  %v13273_v21 = vadd.f32 %v13265_v33, %v19667_v59  ;;  %v13264_v22 = vadd.f32 %v13241_v7, %v11998_v29  ;;  %v13305_v56 = vsel %vm545_vm0, %v20427_v52, 0.0 }
0x2a21   : > { %13306 = vadd.xlane.f32.xlu1 %v13305_v56  ;;  %v16919_v9 = vpop.f32.mrf.mxu0 }
0x2a22   : > { %v20439_v19 = vadd.f32 %v14776_v55, %v13273_v21  ;;  %v13272_v36 = vadd.f32 %v13264_v22, %v19662_v14  ;;  %v13267_v48 = vadd.f32 %v16919_v9, %v12013_v61  ;;  %v13302_v30 = vsel %vm545_vm0, %v20432_v12, 0.0  ;;  %v14791_v9 = vld [vmem:[%s20784_s10 + $0x110] sm:$0xff] }
0x2a23   : > { %13303 = vadd.xlane.f32.xlu0 %v13302_v30  ;;  %v13251_v58 = vpop.f32.mrf.mxu0  ;;  %v14788_v30 = vld [vmem:[%s20784_s10 + $0xf8] sm:$0xff] }
0x2a24   : > { %v20444_v59 = vadd.f32 %v14776_v55, %v13272_v36  ;;  %v13275_v31 = vadd.f32 %v13267_v48, %v19677_v62  ;;  %v13266_v39 = vadd.f32 %v13251_v58, %v12008_v63  ;;  %v13311_v13 = vsel %vm545_vm0, %v20439_v19, 0.0  ;;  %v14792_v63 = vld [vmem:[%s20784_s10 + $0x118] sm:$0xff]  ;;  %v14790_v36 = vld [vmem:[%s20784_s10 + $0x108] sm:$0xff]  ;;  %v14789_v48 = vld [vmem:[%s20784_s10 + $0x100] sm:$0xff] }
0x2a25   : > { %13312 = vadd.xlane.f32.xlu1 %v13311_v13  ;;  %13498 = vmatprep.subr.mxu1 %v14792_v63  ;;  %v14787_v58 = vld [vmem:[%s20784_s10 + $0xf0] sm:$0xff]  ;;  %v14784_v13 = vld [vmem:[%s20784_s10 + $0xd8] sm:$0xff] }
0x2a26   : > { %v20449_v5 = vadd.f32 %v14776_v55, %v13275_v31  ;;  %v13274_v0 = vadd.f32 %v13266_v39, %v19672_v35  ;;  %v13308_v14 = vsel %vm545_vm0, %v20444_v59, 0.0  ;;  %13499 = vmatpush1.msra.mxu1 %v14791_v9  ;;  %v14786_v31 = vld [vmem:[%s20784_s10 + $0xe8] sm:$0xff]  ;;  %v14785_v39 = vld [vmem:[%s20784_s10 + $0xe0] sm:$0xff] }
0x2a27   : > { %13309 = vadd.xlane.f32.xlu0 %v13308_v14  ;;  %13500 = vmatprep.subr.mxu1 %v14790_v36  ;;  %v14782_v14 = vld [vmem:[%s20784_s10 + $0xc8] sm:$0xff] }
0x2a28   : > { %v20454_v11 = vadd.f32 %v14776_v55, %v13274_v0  ;;  %v13317_v3 = vsel %vm545_vm0, %v20449_v5, 0.0  ;;  %13501 = vmatpush1.msra.mxu1 %v14789_v48  ;;  %v14783_v0 = vld [vmem:[%s20784_s10 + $0xd0] sm:$0xff] }
0x2a29   : > { %13318 = vadd.xlane.f32.xlu1 %v13317_v3  ;;  %13502 = vmatprep.subr.mxu1 %v14788_v30  ;;  %v14781_v3 = vld [vmem:[%s20784_s10 + $0xc0] sm:$0xff] }
0x2a2a   : > { %v13314_v62 = vsel %vm545_vm0, %v20454_v11, 0.0  ;;  %13503 = vmatpush1.msra.mxu1 %v14787_v58 }
0x2a2b   : > { %13315 = vadd.xlane.f32.xlu0 %v13314_v62  ;;  %13504 = vmatprep.subr.mxu1 %v14786_v31  ;;  %v14817_v62 = vld [vmem:[%s20786_s12 + $0x1f8] sm:$0xff] }
0x2a2c   : > { %13505 = vmatpush1.msra.mxu1 %v14785_v39  ;;  %13657 = vmatpush1.msra.mxu0 %v14817_v62 }
0x2a2d   : > { %13506 = vmatprep.subr.mxu1 %v14784_v13  ;;  %13658 = vmatprep.subr.mxu0 %v17442_v49 }
0x2a2e   : > { %13507 = vmatpush1.msra.mxu1 %v14783_v0 }
0x2a2f   : > { %13508 = vmatprep.subr.mxu1 %v14782_v14 }
0x2a30   : > { %13509 = vmatpush1.msra.mxu1 %v14781_v3 }
0x2aa2   : > { %v13301_v45 = vpop.xlane.xlu1 %13300 }
0x2aa3   : > { %v13321_v25 = vmul.f32 0.020833334, %v13301_v45  ;;  %v14816_v45 = vld [vmem:[%s20786_s12 + $0x1f0] sm:$0xff] }
0x2aa4   : > { %v13298_v2 = vpop.xlane.xlu0 %13297  ;;  %13659 = vmatpush1.msra.mxu0 %v14816_v45 }
0x2aa5   : > { %v20461_v43 = vsub.f32 %v20409_v54, %v13321_v25  ;;  %v13320_v35 = vmul.f32 0.020833334, %v13298_v2  ;;  %v14815_v25 = vld [vmem:[%s20786_s12 + $0x1e8] sm:$0xff]  ;;  %13660 = vmatprep.subr.mxu0 %v17442_v49  ;;  %v14814_v2 = vld [vmem:[%s20786_s12 + $0x1e0] sm:$0xff] }
0x2aa6   : > { %13661 = vmatpush1.msra.mxu0 %v14815_v25  ;;  %v14779_v25 = vld [vmem:[%s20782_s8 + $0x2] ss:$0 sm:$0xff] }
0x2aa7   : > { %v20464_v6 = vsub.f32 %v20414_v4, %v13320_v35  ;;  %v13337_v53 = vmul.f32 %v20461_v43, %v20461_v43  ;;  %13662 = vmatprep.subr.mxu0 %v17442_v49  ;;  %v14813_v35 = vld [vmem:[%s20786_s12 + $0x1d8] sm:$0xff] }
0x2aa8   : > { %13663 = vmatpush1.msra.mxu0 %v14814_v2 }
0x2aa9   : > { %v13347_v46 = vsel %vm545_vm0, %v13337_v53, 0.0  ;;  %v13336_v1 = vmul.f32 %v20464_v6, %v20464_v6  ;;  %13664 = vmatprep.subr.mxu0 %v17442_v49  ;;  %v14812_v53 = vld [vmem:[%s20786_s12 + $0x1d0] sm:$0xff] }
0x2aaa   : > { %v13307_v26 = vpop.xlane.xlu1 %13306  ;;  %13348 = vadd.xlane.f32.xlu1 %v13347_v46  ;;  %13665 = vmatpush1.msra.mxu0 %v14813_v35  ;;  %v14811_v46 = vld [vmem:[%s20786_s12 + $0x1c8] sm:$0xff]  ;;  %v14780_v35 = vld [vmem:[%s20783_s9 + $0x2] ss:$0 sm:$0xff] }
0x2aab   : > { %v13323_v17 = vmul.f32 0.020833334, %v13307_v26  ;;  %v13344_v50 = vsel %vm545_vm0, %v13336_v1, 0.0  ;;  %13666 = vmatprep.subr.mxu0 %v17442_v49  ;;  %v14810_v1 = vld [vmem:[%s20786_s12 + $0x1c0] sm:$0xff]  ;;  %v14809_v26 = vld [vmem:[%s20786_s12 + $0x1b8] sm:$0xff] }
0x2aac   : > { %v13304_v23 = vpop.xlane.xlu0 %13303  ;;  %13345 = vadd.xlane.f32.xlu0 %v13344_v50  ;;  %13667 = vmatpush1.msra.mxu0 %v14812_v53  ;;  %v14807_v50 = vld [vmem:[%s20786_s12 + $0x1a8] sm:$0xff] }
0x2aad   : > { %v20473_v38 = vsub.f32 %v20427_v52, %v13323_v17  ;;  %v13322_v40 = vmul.f32 0.020833334, %v13304_v23  ;;  %13668 = vmatprep.subr.mxu0 %v17442_v49  ;;  %v14808_v17 = vld [vmem:[%s20786_s12 + $0x1b0] sm:$0xff]  ;;  %v14806_v23 = vld [vmem:[%s20786_s12 + $0x1a0] sm:$0xff] }
0x2aae   : > { %v13313_v18 = vpop.xlane.xlu1 %13312  ;;  %13669 = vmatpush1.msra.mxu0 %v14811_v46 }
0x2aaf   : > { %v20476_v55 = vsub.f32 %v20432_v12, %v13322_v40  ;;  %v13325_v41 = vmul.f32 0.020833334, %v13313_v18  ;;  %v13339_v15 = vmul.f32 %v20473_v38, %v20473_v38  ;;  %13670 = vmatprep.subr.mxu0 %v17442_v49  ;;  %v14805_v40 = vld [vmem:[%s20786_s12 + $0x198] sm:$0xff]  ;;  %v14804_v18 = vld [vmem:[%s20786_s12 + $0x190] sm:$0xff] }
0x2ab0   : > { %v13310_v44 = vpop.xlane.xlu0 %13309  ;;  %13671 = vmatpush1.msra.mxu0 %v14810_v1 }
0x2ab1   : > { %v20481_v57 = vsub.f32 %v20439_v19, %v13325_v41  ;;  %v13324_v34 = vmul.f32 0.020833334, %v13310_v44  ;;  %v13353_v60 = vsel %vm545_vm0, %v13339_v15, 0.0  ;;  %v13338_v8 = vmul.f32 %v20476_v55, %v20476_v55  ;;  %13672 = vmatprep.subr.mxu0 %v17442_v49  ;;  %v14803_v41 = vld [vmem:[%s20786_s12 + $0x188] sm:$0xff]  ;;  %v14802_v15 = vld [vmem:[%s20786_s12 + $0x180] sm:$0xff]  ;;  %v14825_v44 = vld [vmem:[%s20786_s12 + $0x238] sm:$0xff] }
0x2ab2   : > { %13354 = vadd.xlane.f32.xlu1 %v13353_v60  ;;  %v13319_v47 = vpop.xlane.xlu1 %13318  ;;  %13673 = vmatpush1.msra.mxu0 %v14809_v26  ;;  %v14823_v60 = vld [vmem:[%s20786_s12 + $0x228] sm:$0xff] }
0x2ab3   : > { %v20487_v32 = vsub.f32 %v20444_v59, %v13324_v34  ;;  %v13327_v27 = vmul.f32 0.020833334, %v13319_v47  ;;  %v13350_v24 = vsel %vm545_vm0, %v13338_v8, 0.0  ;;  %v13341_v20 = vmul.f32 %v20481_v57, %v20481_v57  ;;  %13674 = vmatprep.subr.mxu0 %v17442_v49  ;;  %v14824_v34 = vld [vmem:[%s20786_s12 + $0x230] sm:$0xff]  ;;  %v14822_v8 = vld [vmem:[%s20786_s12 + $0x220] sm:$0xff] }
0x2ab4   : > { %13351 = vadd.xlane.f32.xlu0 %v13350_v24  ;;  %v13316_v28 = vpop.xlane.xlu0 %13315  ;;  %13675 = vmatpush1.msra.mxu0 %v14808_v17 }
0x2ab5   : > { %v20493_v42 = vsub.f32 %v20449_v5, %v13327_v27  ;;  %v13326_v51 = vmul.f32 0.020833334, %v13316_v28  ;;  %v13359_v29 = vsel %vm545_vm0, %v13341_v20, 0.0  ;;  %v13340_v10 = vmul.f32 %v20487_v32, %v20487_v32  ;;  %13676 = vmatprep.subr.mxu0 %v17442_v49 }
0x2ab6   : > { %13360 = vadd.xlane.f32.xlu1 %v13359_v29  ;;  %13677 = vmatpush1.msra.mxu0 %v14807_v50 }
0x2ab7   : > { %v20499_v33 = vsub.f32 %v20454_v11, %v13326_v51  ;;  %v13356_v61 = vsel %vm545_vm0, %v13340_v10, 0.0  ;;  %v13343_v7 = vmul.f32 %v20493_v42, %v20493_v42  ;;  %13678 = vmatprep.subr.mxu0 %v17442_v49 }
0x2ab8   : > { %13357 = vadd.xlane.f32.xlu0 %v13356_v61  ;;  %13679 = vmatpush1.msra.mxu0 %v14806_v23 }
0x2ab9   : > { %v13365_v21 = vsel %vm545_vm0, %v13343_v7, 0.0  ;;  %v13342_v22 = vmul.f32 %v20499_v33, %v20499_v33  ;;  %13680 = vmatprep.subr.mxu0 %v17442_v49 }
0x2aba   : > { %13366 = vadd.xlane.f32.xlu1 %v13365_v21  ;;  %13681 = vmatpush1.msra.mxu0 %v14805_v40 }
0x2abb   : > { %v13362_v56 = vsel %vm545_vm0, %v13342_v22, 0.0  ;;  %13682 = vmatprep.subr.mxu0 %v17442_v49 }
0x2abc   : > { %13363 = vadd.xlane.f32.xlu0 %v13362_v56  ;;  %13683 = vmatpush1.msra.mxu0 %v14804_v18 }
0x2abd   : > { %13684 = vmatprep.subr.mxu0 %v17442_v49 }
0x2abe   : > { %13685 = vmatpush1.msra.mxu0 %v14803_v41 }
0x2abf   : > { %13686 = vmatprep.subr.mxu0 %v17442_v49 }
0x2ac0   : > { %13687 = vmatpush1.msra.mxu0 %v14802_v15 }
0x2ac1   : > { %13704 = vmatprep.subr.mxu0 %v17442_v49 }
0x2ac2   : > { %13705 = vmatpush2.msra.mxu0 %v14825_v44 }
0x2ac3   : > { %13706 = vmatprep.subr.mxu0 %v17442_v49 }
0x2ac4   : > { %13707 = vmatpush2.msra.mxu0 %v14824_v34 }
0x2ac5   : > { %13708 = vmatprep.subr.mxu0 %v17442_v49 }
0x2ac6   : > { %13709 = vmatpush2.msra.mxu0 %v14823_v60 }
0x2ac7   : > { %13710 = vmatprep.subr.mxu0 %v17442_v49 }
0x2ac8   : > { %13711 = vmatpush2.msra.mxu0 %v14822_v8 }
0x2ac9   : > { %13712 = vmatprep.subr.mxu0 %v17442_v49 }
0x2b33   : > { %v13349_v47 = vpop.xlane.xlu1 %13348 }
0x2b34   : > { %v13369_v27 = vmul.f32 0.020833334, %v13349_v47 }
0x2b35   : > { %v13346_v24 = vpop.xlane.xlu0 %13345 }
0x2b36   : > { %v13377_v20 = vadd.f32 1e-05, %v13369_v27  ;;  %v13368_v28 = vmul.f32 0.020833334, %v13346_v24 }
0x2b38   : > { %17355 = vrsqrt.f32 %v13377_v20  ;;  %v13376_v51 = vadd.f32 1e-05, %v13368_v28 }
0x2b3a   : > { %17357 = vrsqrt.f32 %v13376_v51 }
0x2b3b   : > { %v13355_v29 = vpop.xlane.xlu1 %13354 }
0x2b3c   : > { %v13371_v10 = vmul.f32 0.020833334, %v13355_v29  ;;  %v14821_v29 = vld [vmem:[%s20786_s12 + $0x218] sm:$0xff] }
0x2b3d   : > { %v13352_v61 = vpop.xlane.xlu0 %13351  ;;  %13713 = vmatpush2.msra.mxu0 %v14821_v29 }
0x2b3e   : > { %v13379_v7 = vadd.f32 1e-05, %v13371_v10  ;;  %v13370_v21 = vmul.f32 0.020833334, %v13352_v61  ;;  %13714 = vmatprep.subr.mxu0 %v17442_v49  ;;  %v14819_v10 = vld [vmem:[%s20786_s12 + $0x208] sm:$0xff]  ;;  %v14818_v61 = vld [vmem:[%s20786_s12 + $0x200] sm:$0xff] }
0x2b3f   : > { %v13361_v22 = vpop.xlane.xlu1 %13360 }
0x2b40   : > { %17359 = vrsqrt.f32 %v13379_v7  ;;  %v13378_v56 = vadd.f32 1e-05, %v13370_v21  ;;  %v13373_v63 = vmul.f32 0.020833334, %v13361_v22  ;;  %v13790_v7 = vld [vmem:[%s20788_s14 + $0x28] sm:$0xff]  ;;  %v13789_v21 = vld [vmem:[%s20788_s14 + $0x20] sm:$0xff] }
0x2b41   : > { %v13358_v9 = vpop.xlane.xlu0 %13357  ;;  %16920 = vmatprep.subr.mxu1 %v13790_v7 }
0x2b42   : > { %17361 = vrsqrt.f32 %v13378_v56  ;;  %v13372_v36 = vmul.f32 0.020833334, %v13358_v9  ;;  %v13381_v48 = vadd.f32 1e-05, %v13373_v63 }
0x2b43   : > { %v13367_v31 = vpop.xlane.xlu1 %13366 }
0x2b44   : > { %v13380_v30 = vadd.f32 1e-05, %v13372_v36  ;;  %v13375_v62 = vmul.f32 0.020833334, %v13367_v31 }
0x2b45   : > { %v17356_v58 = vpop.eup %17355  ;;  %v13364_v39 = vpop.xlane.xlu0 %13363 }
0x2b46   : > { %17363 = vrsqrt.f32 %v13380_v30  ;;  %v13374_v13 = vmul.f32 0.020833334, %v13364_v39  ;;  %v13393_v14 = vmul.f32 %v17356_v58, %v20461_v43  ;;  %v13383_v53 = vadd.f32 1e-05, %v13375_v62 }
0x2b47   : > { %v17358_v0 = vpop.eup %17357  ;;  %17365 = vrsqrt.f32 %v13381_v48 }
0x2b48   : > { %v13392_v3 = vmul.f32 %v17358_v0, %v20464_v6  ;;  %v13382_v45 = vadd.f32 1e-05, %v13374_v13  ;;  %v13407_v1 = vmul.f32 %v14779_v25, %v13393_v14 }
0x2b4a   : > { %v13406_v2 = vmul.f32 %v14779_v25, %v13392_v3  ;;  %17367 = vrsqrt.f32 %v13382_v45  ;;  %v13421_v50 = vadd.f32 %v14780_v35, %v13407_v1 }
0x2b4b   : > { %17369 = vrsqrt.f32 %v13383_v53 }
0x2b4c   : > { %v13420_v46 = vadd.f32 %v14780_v35, %v13406_v2 }
0x2b4d   : > { %v17360_v26 = vpop.eup %17359 }
0x2b4e   : > { %14794 = vmatmul.mubr.msk.f32.vlgmr.msra.gmra.mxu1 %vm545_vm0, %v13420_v46  ;;  %v13395_v6 = vmul.f32 %v17360_v26, %v20473_v38 }
0x2b4f   : > { %v17362_v43 = vpop.eup %17361  ;;  %13548 = vmatprep.mubr.f32.mxu1 %v17442_v49  ;;  %16921 = vmatpush3.msra.mxu1 %v13790_v7  ;;  %v13785_v7 = vld [vmem:[%s20788_s14] sm:$0xff] }
0x2b50   : > { %v13394_v17 = vmul.f32 %v17362_v43, %v20476_v55  ;;  %v13409_v44 = vmul.f32 %v14779_v25, %v13395_v6  ;;  %16922 = vmatprep.subr.mxu1 %v13789_v21 }
0x2b51   : > { %16923 = vmatpush3.msra.mxu1 %v13789_v21 }
0x2b52   : > { %14795 = vmatmul.mubr.msk.f32.gmra.mxu1 %vm545_vm0, %v13421_v50  ;;  %v13408_v23 = vmul.f32 %v14779_v25, %v13394_v17  ;;  %v13423_v55 = vadd.f32 %v14780_v35, %v13409_v44 }
0x2b53   : > { %v17364_v40 = vpop.eup %17363  ;;  %13554 = vmatprep.mubr.f32.mxu1 %v17442_v49 }
0x2b54   : > { %v17366_v18 = vpop.eup %17365  ;;  %v13396_v41 = vmul.f32 %v17364_v40, %v20487_v32  ;;  %v13422_v15 = vadd.f32 %v14780_v35, %v13408_v23 }
0x2b55   : > { %v13397_v38 = vmul.f32 %v17366_v18, %v20481_v57 }
0x2b56   : > { %14796 = vmatmul.mubr.msk.f32.gmra.mxu1 %vm545_vm0, %v13422_v15  ;;  %v13410_v34 = vmul.f32 %v14779_v25, %v13396_v41 }
0x2b57   : > { %13560 = vmatprep.mubr.f32.mxu1 %v17442_v49  ;;  %v17368_v60 = vpop.eup %17367  ;;  %v13411_v27 = vmul.f32 %v14779_v25, %v13397_v38 }
0x2b58   : > { %v13398_v8 = vmul.f32 %v17368_v60, %v20499_v33  ;;  %v13424_v47 = vadd.f32 %v14780_v35, %v13410_v34  ;;  %v17370_v32 = vpop.eup %17369 }
0x2b59   : > { %v13399_v24 = vmul.f32 %v17370_v32, %v20493_v42  ;;  %v13425_v20 = vadd.f32 %v14780_v35, %v13411_v27  ;;  %v14820_v42 = vld [vmem:[%s20786_s12 + $0x210] sm:$0xff] }
0x2b5a   : > { %14797 = vmatmul.mubr.msk.f32.gmra.mxu1 %vm545_vm0, %v13423_v55  ;;  %v13412_v57 = vmul.f32 %v14779_v25, %v13398_v8  ;;  %13715 = vmatpush2.msra.mxu0 %v14820_v42  ;;  %v13788_v42 = vld [vmem:[%s20788_s14 + $0x18] sm:$0xff] }
0x2b5b   : > { %13566 = vmatprep.mubr.f32.mxu1 %v17442_v49  ;;  %v13413_v51 = vmul.f32 %v14779_v25, %v13399_v24  ;;  %13716 = vmatprep.subr.mxu0 %v17442_v49 }
0x2b5c   : > { %v13426_v28 = vadd.f32 %v14780_v35, %v13412_v57  ;;  %13717 = vmatpush2.msra.mxu0 %v14819_v10  ;;  %16924 = vmatprep.subr.mxu1 %v13788_v42  ;;  %v13787_v10 = vld [vmem:[%s20788_s14 + $0x10] sm:$0xff] }
0x2b5d   : > { %v13427_v33 = vadd.f32 %v14780_v35, %v13413_v51  ;;  %13718 = vmatprep.subr.mxu0 %v17442_v49  ;;  %16925 = vmatpush3.msra.mxu1 %v13788_v42 }
0x2b5e   : > { %14798 = vmatmul.mubr.msk.f32.gmra.mxu1 %vm545_vm0, %v13424_v47  ;;  %13719 = vmatpush2.msra.mxu0 %v14818_v61  ;;  %v13786_v61 = vld [vmem:[%s20788_s14 + $0x8] sm:$0xff] }
0x2b5f   : > { %13572 = vmatprep.mubr.f32.mxu1 %v17442_v49  ;;  %16926 = vmatprep.subr.mxu1 %v13787_v10 }
0x2b60   : > { %16927 = vmatpush3.msra.mxu1 %v13787_v10 }
0x2b61   : > { %16928 = vmatprep.subr.mxu1 %v13786_v61 }
0x2b62   : > { %14799 = vmatmul.mubr.msk.f32.gmra.mxu1 %vm545_vm0, %v13425_v20 }
0x2b63   : > { %13578 = vmatprep.mubr.f32.mxu1 %v17442_v49  ;;  %16929 = vmatpush3.msra.mxu1 %v13786_v61 }
0x2b64   : > { %16930 = vmatprep.subr.mxu1 %v13785_v7 }
0x2b65   : > { %16931 = vmatpush3.msra.mxu1 %v13785_v7 }
0x2b66   : > { %14800 = vmatmul.mubr.msk.f32.gmra.mxu1 %vm545_vm0, %v13426_v28 }
0x2b67   : > { %13584 = vmatprep.mubr.f32.mxu1 %v17442_v49  ;;  %v14793_v49 = vld [vmem:[%s20785_s11 + $0x4] sm:$0x3] }
0x2b68   : > { %v13447_v22 = vrot.slane %v14793_v49, %v18577_v37  ;;  %v13451_v56 = vrot.slane %v14793_v49, %v18583_v16  ;;  %v14835_v49 = vld [vmem:[%s20787_s13 + $0x2] ss:$0 sm:$0xff] }
0x2b6a   : > { %14801 = vmatmul.mubr.msk.f32.gmra.mxu1 %vm545_vm0, %v13427_v33 }
0x2c0e   : > { %v13544_v63 = vpop.f32.mrf.mxu1 }
0x2c0f   : > { %v13545_v9 = vadd.f32 %v13544_v63, %v13447_v22 }
0x2c10   : > { %v13546_v36 = vpop.f32.mrf.mxu1 }
0x2c11   : > { %v13547_v48 = vadd.f32 %v13546_v36, %v13451_v56  ;;  %v13591_v31 = vmax.f32 %v13545_v9, 0.0 }
0x2c12   : > { %v13550_v30 = vpop.f32.mrf.mxu1 }
0x2c13   : > { %v13592_v58 = vmax.f32 %v13547_v48, 0.0  ;;  %v13551_v39 = vadd.f32 %v13550_v30, %v13447_v22 }
0x2c14   : > { %v13552_v13 = vpop.f32.mrf.mxu1 }
0x2c15   : > { %v13553_v0 = vadd.f32 %v13552_v13, %v13451_v56  ;;  %14826 = vmatprep.mubr.msk.f32.mxu0 %vm4798_vm4, %v13592_v58  ;;  %v13593_v62 = vmax.f32 %v13551_v39, 0.0 }
0x2c16   : > { %v13556_v14 = vpop.f32.mrf.mxu1  ;;  %13721 = vmatmul.mubr.f32.vlgmr.msra.gmra.mxu0 %v13591_v31 }
0x2c17   : > { %v13594_v3 = vmax.f32 %v13553_v0, 0.0  ;;  %v13557_v45 = vadd.f32 %v13556_v14, %v13447_v22 }
0x2c18   : > { %v13558_v37 = vpop.f32.mrf.mxu1 }
0x2c19   : > { %v13559_v25 = vadd.f32 %v13558_v37, %v13451_v56  ;;  %14827 = vmatprep.mubr.msk.f32.mxu0 %vm4798_vm4, %v13594_v3  ;;  %v13595_v35 = vmax.f32 %v13557_v45, 0.0 }
0x2c1a   : > { %v13562_v16 = vpop.f32.mrf.mxu1  ;;  %13726 = vmatmul.mubr.f32.gmra.mxu0 %v13593_v62 }
0x2c1b   : > { %v13596_v2 = vmax.f32 %v13559_v25, 0.0  ;;  %v13563_v53 = vadd.f32 %v13562_v16, %v13447_v22 }
0x2c1c   : > { %v13564_v46 = vpop.f32.mrf.mxu1 }
0x2c1d   : > { %v13565_v1 = vadd.f32 %v13564_v46, %v13451_v56  ;;  %14828 = vmatprep.mubr.msk.f32.mxu0 %vm4798_vm4, %v13596_v2  ;;  %v13597_v6 = vmax.f32 %v13563_v53, 0.0 }
0x2c1e   : > { %v13568_v26 = vpop.f32.mrf.mxu1  ;;  %13731 = vmatmul.mubr.f32.gmra.mxu0 %v13595_v35 }
0x2c1f   : > { %v13598_v43 = vmax.f32 %v13565_v1, 0.0  ;;  %v13569_v17 = vadd.f32 %v13568_v26, %v13447_v22 }
0x2c20   : > { %v13570_v50 = vpop.f32.mrf.mxu1 }
0x2c21   : > { %v13571_v23 = vadd.f32 %v13570_v50, %v13451_v56  ;;  %14829 = vmatprep.mubr.msk.f32.mxu0 %vm4798_vm4, %v13598_v43  ;;  %v13599_v41 = vmax.f32 %v13569_v17, 0.0 }
0x2c22   : > { %v13574_v40 = vpop.f32.mrf.mxu1  ;;  %13736 = vmatmul.mubr.f32.gmra.mxu0 %v13597_v6 }
0x2c23   : > { %v13600_v18 = vmax.f32 %v13571_v23, 0.0  ;;  %v13575_v15 = vadd.f32 %v13574_v40, %v13447_v22 }
0x2c24   : > { %v13576_v44 = vpop.f32.mrf.mxu1 }
0x2c25   : > { %v13577_v38 = vadd.f32 %v13576_v44, %v13451_v56  ;;  %14830 = vmatprep.mubr.msk.f32.mxu0 %vm4798_vm4, %v13600_v18  ;;  %v13601_v60 = vmax.f32 %v13575_v15, 0.0 }
0x2c26   : > { %v13580_v55 = vpop.f32.mrf.mxu1  ;;  %13741 = vmatmul.mubr.f32.gmra.mxu0 %v13599_v41 }
0x2c27   : > { %v13602_v34 = vmax.f32 %v13577_v38, 0.0  ;;  %v13581_v8 = vadd.f32 %v13580_v55, %v13447_v22 }
0x2c28   : > { %v13582_v47 = vpop.f32.mrf.mxu1 }
0x2c29   : > { %v13583_v27 = vadd.f32 %v13582_v47, %v13451_v56  ;;  %14831 = vmatprep.mubr.msk.f32.mxu0 %vm4798_vm4, %v13602_v34  ;;  %v13603_v20 = vmax.f32 %v13581_v8, 0.0 }
0x2c2a   : > { %v13586_v32 = vpop.f32.mrf.mxu1  ;;  %13746 = vmatmul.mubr.f32.gmra.mxu0 %v13601_v60 }
0x2c2b   : > { %v13604_v24 = vmax.f32 %v13583_v27, 0.0  ;;  %v13587_v57 = vadd.f32 %v13586_v32, %v13447_v22 }
0x2c2c   : > { %v13588_v28 = vpop.f32.mrf.mxu1 }
0x2c2d   : > { %v13589_v51 = vadd.f32 %v13588_v28, %v13451_v56  ;;  %14832 = vmatprep.mubr.msk.f32.mxu0 %vm4798_vm4, %v13604_v24  ;;  %v13605_v29 = vmax.f32 %v13587_v57, 0.0 }
0x2c2e   : > { %13751 = vmatmul.mubr.f32.gmra.mxu0 %v13603_v20 }
0x2c2f   : > { %v13606_v33 = vmax.f32 %v13589_v51, 0.0 }
0x2c31   : > { %14833 = vmatprep.mubr.msk.f32.mxu0 %vm4798_vm4, %v13606_v33 }
0x2c32   : > { %13756 = vmatmul.mubr.f32.gmra.mxu0 %v13605_v29 }
0x2cd6   : > { %v13722_v21 = vpop.f32.mrf.mxu0 }
0x2cd7   : > { %v13761_v22 = vadd.f32 %v13722_v21, %v20414_v4 }
0x2cd8   : > { %v13724_v56 = vpop.f32.mrf.mxu0 }
0x2cd9   : > { %v13777_v63 = vadd.f32 %v14835_v49, %v13761_v22 }
0x2cda   : > { %v13727_v9 = vpop.f32.mrf.mxu0 }
0x2cdb   : > { %v13762_v36 = vadd.f32 %v13727_v9, %v20409_v54  ;;  %16932 = vmatprep.mubr.msk.f32.mxu1 %vm545_vm0, %v13777_v63 }
0x2cdc   : > { %v13729_v48 = vpop.f32.mrf.mxu0 }
0x2cdd   : > { %v13778_v30 = vadd.f32 %v14835_v49, %v13762_v36 }
0x2cde   : > { %v13732_v58 = vpop.f32.mrf.mxu0 }
0x2cdf   : > { %v13763_v31 = vadd.f32 %v13732_v58, %v20432_v12  ;;  %16933 = vmatmul.mubr.msk.f32.vlgmr.msra.gmra.mxu1 %vm545_vm0, %v13778_v30 }
0x2ce0   : > { %v13734_v39 = vpop.f32.mrf.mxu0 }
0x2ce1   : > { %v13779_v13 = vadd.f32 %v14835_v49, %v13763_v31 }
0x2ce2   : > { %v13737_v0 = vpop.f32.mrf.mxu0 }
0x2ce3   : > { %v13764_v14 = vadd.f32 %v13737_v0, %v20427_v52  ;;  %16935 = vmatprep.mubr.msk.f32.mxu1 %vm545_vm0, %v13779_v13 }
0x2ce4   : > { %v13739_v4 = vpop.f32.mrf.mxu0 }
0x2ce5   : > { %v13780_v3 = vadd.f32 %v14835_v49, %v13764_v14 }
0x2ce6   : > { %v13742_v62 = vpop.f32.mrf.mxu0 }
0x2ce7   : > { %v13765_v54 = vadd.f32 %v13742_v62, %v20444_v59  ;;  %16936 = vmatmul.mubr.msk.f32.gmra.mxu1 %vm545_vm0, %v13780_v3 }
0x2ce8   : > { %v13744_v45 = vpop.f32.mrf.mxu0 }
0x2ce9   : > { %v13781_v37 = vadd.f32 %v14835_v49, %v13765_v54 }
0x2cea   : > { %v13747_v25 = vpop.f32.mrf.mxu0 }
0x2ceb   : > { %v13766_v12 = vadd.f32 %v13747_v25, %v20439_v19  ;;  %16938 = vmatprep.mubr.msk.f32.mxu1 %vm545_vm0, %v13781_v37  ;;  %v14836_v19 = vld [vmem:[%s20789_s15] ss:$0 sm:$0xff] }
0x2cec   : > { %v13749_v16 = vpop.f32.mrf.mxu0 }
0x2ced   : > { %v13782_v52 = vadd.f32 %v14835_v49, %v13766_v12 }
0x2cee   : > { %v13752_v2 = vpop.f32.mrf.mxu0 }
0x2cef   : > { %v13767_v35 = vadd.f32 %v13752_v2, %v20454_v11  ;;  %16939 = vmatmul.mubr.msk.f32.gmra.mxu1 %vm545_vm0, %v13782_v52 }
0x2cf0   : > { %v13754_v53 = vpop.f32.mrf.mxu0 }
0x2cf1   : > { %v13783_v59 = vadd.f32 %v14835_v49, %v13767_v35 }
0x2cf2   : > { %v13757_v46 = vpop.f32.mrf.mxu0 }
0x2cf3   : > { %v13768_v1 = vadd.f32 %v13757_v46, %v20449_v5  ;;  %16941 = vmatprep.mubr.msk.f32.mxu1 %vm545_vm0, %v13783_v59 }
0x2cf4   : > { %v13759_v26 = vpop.f32.mrf.mxu0 }
0x2cf5   : > { %v13784_v43 = vadd.f32 %v14835_v49, %v13768_v1 }
0x2cf7   : > { %16942 = vmatmul.mubr.msk.f32.gmra.mxu1 %vm545_vm0, %v13784_v43 }
0x2d9f   : > { %v16934_v11 = vpop.f32.mrf.mxu1 }
0x2da0   : > { %v13894_v6 = vadd.f32 %v16934_v11, %v14836_v19 }
0x2da1   : > { %v13888_v17 = vpop.f32.mrf.mxu1 }
0x2da2   : > { %13928 = vst [vmem:[%s517_s17 + $0x8] sm:$0xff] %v13894_v6  ;;  %v13889_v5 = vadd.f32 %v14836_v19, %v13888_v17 }
0x2da4   : > { %13927 = vst [vmem:[%s517_s17] sm:$0xff] %v13889_v5 }
0x2da7   : > { %v16937_v50 = vpop.f32.mrf.mxu1 }
0x2da8   : > { %v13904_v23 = vadd.f32 %v16937_v50, %v14836_v19 }
0x2da9   : > { %v13898_v40 = vpop.f32.mrf.mxu1 }
0x2daa   : > { %13930 = vst [vmem:[%s517_s17 + $0x18] sm:$0xff] %v13904_v23  ;;  %v13899_v18 = vadd.f32 %v14836_v19, %v13898_v40 }
0x2dac   : > { %13929 = vst [vmem:[%s517_s17 + $0x10] sm:$0xff] %v13899_v18 }
0x2daf   : > { %v16940_v41 = vpop.f32.mrf.mxu1 }
0x2db0   : > { %v13914_v15 = vadd.f32 %v16940_v41, %v14836_v19 }
0x2db1   : > { %v13908_v44 = vpop.f32.mrf.mxu1 }
0x2db2   : > { %13932 = vst [vmem:[%s517_s17 + $0x28] sm:$0xff] %v13914_v15  ;;  %v13909_v38 = vadd.f32 %v14836_v19, %v13908_v44 }
0x2db4   : > { %13931 = vst [vmem:[%s517_s17 + $0x20] sm:$0xff] %v13909_v38 }
0x2db7   : > { %v16943_v55 = vpop.f32.mrf.mxu1 }
0x2db8   : > { %v13924_v34 = vadd.f32 %v16943_v55, %v14836_v19 }
0x2db9   : > { %v13918_v60 = vpop.f32.mrf.mxu1 }
0x2dba   : > { %13934 = vst [vmem:[%s517_s17 + $0x38] sm:$0xff] %v13924_v34  ;;  %v13919_v8 = vadd.f32 %v14836_v19, %v13918_v60 }
0x2dbc   : > { %13933 = vst [vmem:[%s517_s17 + $0x30] sm:$0xff] %v13919_v8 }
0x2dbd   : > { %17392 = shalt.err (!%p17389_p3)
}
0x2dbe   : > { %s17393_s19 = scalar_lea.hbm %s20728_s18, 1024  ;;  %s17397_s27 = scalar_lea.hbm %s20790_s16, 2048 }
0x2dbf   : > { %p17394_p4 = scmp.ne.s32.totalorder %s20728_s18, %s17393_s19  ;;  %p17398_p9 = scmp.lt.s32.totalorder %s20728_s18, %s20790_s16 }
0x2dc0   : > { %p17399_p10 = scmp.lt.s32.totalorder %s17397_s27, %s17393_s19 }
0x2dc1   : > { %p17395_p7 = pnand %p17394_p4, %p17569_p5 }
0x2dc2   : > { %p17400_p11 = por %p17399_p10, %p17398_p9 }
0x2dc3   : > { %p17396_p8 = pneg %p17395_p7 }
0x2dc5   : > { %p17401_p12 = pnand %p17400_p11, %p17396_p8 }
0x2dc7   : > { %17404 = shalt.err (!%p17401_p12)
}
0x2dc8   : > { %s17444_s25 = smov 128   ;;  %s17445_s30 = smov 8  }
0x2dc9   : > { %16944 = dma.vmem_to_hbm [thread:$0]  (%p17569_p5), %s20730_s29, 1024, %s20728_s18, %s20734_s20, %s17444_s25, %s17444_s25, %s17445_s30  }
0x2dca PF: > { %p16950_p13 = scmp.ge.s32.totalorder %s17439_s24, 2  ;;  %s13965_s17 = sand.u32 1, %s17427_s21  }
0x2dcb   : > { %s13966_s1 = scalar_lea.sflag [#allocation3], %s13965_s17 }
0x2dcc   : > { %p16947_p0 = pnand %p16950_p13, %p17573_p6 }
0x2dce   : > { %p16948_p1 = pneg %p16947_p0 }
0x2dd0   : > { %17422 = dma.done.wait (%p16948_p1), %s13966_s1, 1024  }
0x2dd1   : > { %17424 = vsyncadd (%p16948_p1), %s13966_s1, 4294966272  ;;  %s20806_s24 = sld [smem:[#allocation6_spill]]  ;;  %s20809_s21 = smov %s17431_s22 }
0x2dd2   : > { %s20807_s19 = sld [smem:[#allocation5_spill]] }
0x2dd3   : > { %s20808_s23 = sld [smem:[#allocation7_spill]] }
0x2dd7   : > { %p26_p2 = scmp.ge.s32.totalorder %s20806_s24, 4  }
0x2dd8   : > { %s20810_s22 = smov %s20807_s19 }
0x2dd9   :  { %28 = sbr.rel (!%p26_p2) target bundleno = 6 (0x6), region = 169 }
0x2dde   :  { %13971 = vsyncpa [#allocation3], 1 }
0x2ddf   :  { %13973 = vsyncpa [#allocation3 + $0x1], 1 }

</bundles_post_ra>
